<compile_context>
chip_gen: v7x
topology: tpu7x:2x2x1
jax: 0.10.0
libtpu: 0.0.40
codegen_flags: <defaults>
</compile_context>

<pallas_src>
import jax
import jax.numpy as jnp
from jax.experimental import pallas as pl
from jax.experimental.pallas import tpu as pltpu

# ----------------------------- model config ---------------------------------
D_MODEL = 32
NHEAD = 4
HEAD_DIM = D_MODEL // NHEAD
N_LAYERS = 2            # N-1 = 1 standard FF layer, then 1 MoE layer
DIM_FF = 1024           # hardcoded in CustomTransformerEncoderMixedLastMoE call
NUM_EXPERTS = 4
FEAT_SIZE = 200         # mat2vec feature width
FEAT_PAD = 256          # MXU-tile-aligned K for fc_mat2vec
RESOLUTION = 5000
LN_EPS = 1e-5
NEG_INF = -1e30

# ----------------------- packed "smalls" row layout --------------------------
R_BM2V = 0
R_LAYER0 = 1                               # 6 rows per layer: bqkv, bo, ln1g, ln1b, ln2g, ln2b
R_GATE_B = R_LAYER0 + 6 * N_LAYERS         # MoE gate bias
R_FF_B2 = R_GATE_B + 1                     # one row per standard FF layer (second bias)
R_MOE_B2 = R_FF_B2 + (N_LAYERS - 1)        # NUM_EXPERTS rows (expert second biases)
SM_ROWS = R_MOE_B2 + NUM_EXPERTS
SM_ROWS_PAD = ((SM_ROWS + 7) // 8) * 8

# TODO(synk): mat2vec.csv element-property table cannot be read here; the
# embedding table is synthesized deterministically with the same shape.


# ------------------------------ fused kernel --------------------------------


def _add_layernorm(s, g, b):
    mu = jnp.mean(s, axis=-1, keepdims=True)
    var = jnp.mean((s - mu) ** 2, axis=-1, keepdims=True)
    return (s - mu) * jax.lax.rsqrt(var + LN_EPS) * g + b


def _fused_encoder_kernel(xf_ref, pos_ref, padrow_ref, padcol_ref, bdm_ref, hm_ref,
                          wm2v_ref, smalls_ref, wqkv_ref, wo_ref,
                          w1_ref, b1_ref, w2_ref,
                          gatew_ref, w1cat_ref, b1cat_ref, w2cat_ref,
                          out_ref):
    """One grid step = BB batch elements (BB*T rows) through the whole stack."""
    rows = xf_ref.shape[0]                      # BB * T  (static)
    bf16 = jnp.bfloat16
    f32 = jnp.float32

    smalls = smalls_ref[...]                    # (SM_ROWS_PAD, 128) f32
    head_mask = hm_ref[...]                     # (NHEAD*rows, D)   0/1 lane mask
    bd_mask = bdm_ref[...]                      # (NHEAD*rows, rows) 0/-inf batch block mask
    key_bias = jnp.where(padcol_ref[0] > 0.5, NEG_INF, 0.0)        # (1, rows)

    # --- Embedder: fc_mat2vec (emb_scaler folded) + positional add ---
    h = jnp.dot(xf_ref[...], wm2v_ref[...], preferred_element_type=f32)
    h = h + smalls[R_BM2V:R_BM2V + 1, 0:D_MODEL] + pos_ref[...]     # (rows, D) f32

    for li in range(N_LAYERS):
        base = R_LAYER0 + 6 * li
        bqkv = smalls[base + 0:base + 1, 0:3 * D_MODEL]
        bo   = smalls[base + 1:base + 2, 0:D_MODEL]
        ln1g = smalls[base + 2:base + 3, 0:D_MODEL]
        ln1b = smalls[base + 3:base + 4, 0:D_MODEL]
        ln2g = smalls[base + 4:base + 5, 0:D_MODEL]
        ln2b = smalls[base + 5:base + 6, 0:D_MODEL]

        # ------- multi-head self-attention (block-diag over batch x head) -------
        qkv = jnp.dot(h.astype(bf16), wqkv_ref[li], preferred_element_type=f32) + bqkv
        q = qkv[:, 0:D_MODEL]                    # 1/sqrt(hd) folded into Wq/bq
        k = qkv[:, D_MODEL:2 * D_MODEL]
        v = qkv[:, 2 * D_MODEL:3 * D_MODEL]

        # replicate Q per head along sublanes, keep only that head's lanes
        q_bd = jnp.concatenate([q] * NHEAD, axis=0) * head_mask      # (H*rows, D)
        # one score matmul for all batch elements and heads: Q_bd @ K^T
        s = jax.lax.dot_general(q_bd.astype(bf16), k.astype(bf16),
                                (((1,), (1,)), ((), ())),
                                preferred_element_type=f32)           # (H*rows, rows)
        s = s + key_bias + bd_mask
        m = jnp.max(s, axis=-1, keepdims=True)
        e = jnp.exp(s - m)
        p = e / jnp.sum(e, axis=-1, keepdims=True)
        o_big = jnp.dot(p.astype(bf16), v.astype(bf16),
                        preferred_element_type=f32) * head_mask       # (H*rows, D)
        # reassemble heads: each (rows, D) block contributes only its own lanes
        o = o_big[0:rows]
        for hh in range(1, NHEAD):
            o = o + o_big[hh * rows:(hh + 1) * rows]
        attn = jnp.dot(o.astype(bf16), wo_ref[li], preferred_element_type=f32) + bo

        h = _add_layernorm(h + attn, ln1g, ln1b)

        if li < N_LAYERS - 1:
            # ------------------- standard feed-forward -------------------
            hid = jnp.dot(h.astype(bf16), w1_ref[li], preferred_element_type=f32)
            hid = jnp.maximum(hid + b1_ref[li], 0.0).astype(bf16)     # (rows, FF)
            ff = jnp.dot(hid, w2_ref[li], preferred_element_type=f32)
            ff = ff + smalls[R_FF_B2 + li:R_FF_B2 + li + 1, 0:D_MODEL]
        else:
            # --------------- MoE feed-forward, top-2 gating ---------------
            logits = jnp.dot(h, gatew_ref[...], preferred_element_type=f32)
            logits = logits + smalls[R_GATE_B:R_GATE_B + 1, 0:NUM_EXPERTS]
            lm = jnp.max(logits, axis=-1, keepdims=True)
            ex = jnp.exp(logits - lm)
            scores = ex / jnp.sum(ex, axis=-1, keepdims=True)          # (rows, E)
            gcols = [scores[:, ei:ei + 1] for ei in range(NUM_EXPERTS)]
            gsel = []
            for ei in range(NUM_EXPERTS):
                cnt = None
                for ej in range(NUM_EXPERTS):
                    if ej == ei:
                        continue
                    # tie-break toward lower expert index (torch.topk behaviour)
                    beats = (gcols[ej] >= gcols[ei]) if ej < ei else (gcols[ej] > gcols[ei])
                    beats = beats.astype(f32)
                    cnt = beats if cnt is None else cnt + beats
                # raw top-2 score, no renormalization (matches the reference)
                gsel.append(jnp.where(cnt < 2.0, gcols[ei], 0.0))      # (rows, 1)

            # all 4 experts fused into two wide matmuls
            hid = jnp.dot(h.astype(bf16), w1cat_ref[...], preferred_element_type=f32)
            hid = jnp.maximum(hid + b1cat_ref[...], 0.0)               # (rows, E*FF)
            hid_g = jnp.concatenate(
                [hid[:, ei * DIM_FF:(ei + 1) * DIM_FF] * gsel[ei]
                 for ei in range(NUM_EXPERTS)], axis=-1).astype(bf16)
            ff = jnp.dot(hid_g, w2cat_ref[...], preferred_element_type=f32)
            for ei in range(NUM_EXPERTS):
                ff = ff + gsel[ei] * smalls[R_MOE_B2 + ei:R_MOE_B2 + ei + 1, 0:D_MODEL]

        h = _add_layernorm(h + ff, ln2g, ln2b)

    # fractional=False -> no frac scaling; hmask: zero padded positions
    out_ref[...] = jnp.where(padrow_ref[...] > 0.5, 0.0, h)


# ------------------------------ weight packing -------------------------------


def _pack_weights(params):
    """Kernel-ready operands (constant-folded under jit)."""
    f32, bf16 = jnp.float32, jnp.bfloat16
    emb_scale = 2.0 ** params['emb_scaler']
    att_scale = float(HEAD_DIM) ** -0.5

    w_m2v, b_m2v = params['fc_mat2vec']
    wm2v = jnp.zeros((FEAT_PAD, D_MODEL), f32).at[:FEAT_SIZE, :].set(w_m2v)
    wm2v = (wm2v * emb_scale).astype(bf16)

    smalls = jnp.zeros((SM_ROWS_PAD, 128), f32)
    smalls = smalls.at[R_BM2V, :D_MODEL].set(b_m2v * emb_scale)

    wqkv_l, wo_l, w1_l, b1_l, w2_l = [], [], [], [], []
    for li, lp in enumerate(params['layers']):
        wqkv = jnp.concatenate([lp['Wq'] * att_scale, lp['Wk'], lp['Wv']], axis=1)
        bqkv = jnp.concatenate([lp['bq'] * att_scale, lp['bk'], lp['bv']], axis=0)
        wqkv_l.append(wqkv.astype(bf16))
        wo_l.append(lp['Wo'].astype(bf16))
        base = R_LAYER0 + 6 * li
        smalls = smalls.at[base + 0, :3 * D_MODEL].set(bqkv)
        smalls = smalls.at[base + 1, :D_MODEL].set(lp['bo'])
        smalls = smalls.at[base + 2, :D_MODEL].set(lp['ln1_g'])
        smalls = smalls.at[base + 3, :D_MODEL].set(lp['ln1_b'])
        smalls = smalls.at[base + 4, :D_MODEL].set(lp['ln2_g'])
        smalls = smalls.at[base + 5, :D_MODEL].set(lp['ln2_b'])
        if li < N_LAYERS - 1:
            w1_l.append(lp['ff_W1'].astype(bf16))
            b1_l.append(lp['ff_b1'].reshape(1, DIM_FF).astype(f32))
            w2_l.append(lp['ff_W2'].astype(bf16))
            smalls = smalls.at[R_FF_B2 + li, :D_MODEL].set(lp['ff_b2'])

    mp = params['layers'][-1]
    gate_w = mp['gate_W'].astype(f32)                                  # (D, E)
    smalls = smalls.at[R_GATE_B, :NUM_EXPERTS].set(mp['gate_b'])
    w1cat = jnp.concatenate([mp['experts'][e][0][0] for e in range(NUM_EXPERTS)],
                            axis=1).astype(bf16)                       # (D, E*FF)
    b1cat = jnp.concatenate([mp['experts'][e][0][1] for e in range(NUM_EXPERTS)],
                            axis=0).reshape(1, NUM_EXPERTS * DIM_FF).astype(f32)
    w2cat = jnp.concatenate([mp['experts'][e][1][0] for e in range(NUM_EXPERTS)],
                            axis=0).astype(bf16)                       # (E*FF, D)
    for e in range(NUM_EXPERTS):
        smalls = smalls.at[R_MOE_B2 + e, :D_MODEL].set(mp['experts'][e][1][1])

    return (wm2v, smalls,
            jnp.stack(wqkv_l, 0), jnp.stack(wo_l, 0),
            jnp.stack(w1_l, 0), jnp.stack(b1_l, 0), jnp.stack(w2_l, 0),
            gate_w, w1cat, b1cat, w2cat)


# --------------------------- positional encoders -----------------------------


def make_pe_table(d_half, resolution):
    x = jnp.arange(resolution, dtype=jnp.float32).reshape(resolution, 1)
    frac = jnp.tile(jnp.arange(d_half, dtype=jnp.float32).reshape(1, d_half),
                    (resolution, 1))
    pe = jnp.zeros((resolution, d_half), jnp.float32)
    pe = pe.at[:, 0::2].set(jnp.sin(x / jnp.power(50.0, 2 * frac[:, 0::2] / d_half)))
    pe = pe.at[:, 1::2].set(jnp.cos(x / jnp.power(50.0, 2 * frac[:, 1::2] / d_half)))
    return pe


def frac_encode(pe_table, frac, resolution, log10=False):
    x = frac
    if log10:
        x = 0.0025 * (jnp.log2(x) ** 2)
        x = jnp.minimum(x, 1.0)
    x = jnp.maximum(x, 1.0 / resolution)
    idx = jnp.round(x * resolution).astype(jnp.int32) - 1
    return pe_table[idx]                                   # (B, T, d_half)


# ------------------------------ forward pass ---------------------------------


def _pick_block_batch(B, T):
    """Largest batch block that keeps rows 8-aligned, <=128, and >=2 grid steps."""
    best = 1
    for cand in range(1, B + 1):
        if B % cand:
            continue
        rows = cand * T
        if rows % 8 or rows > 128:
            continue
        if B // cand < 2 and B > 1:      # keep both v7x TensorCores busy
            continue
        best = cand
    return best


def encoder_forward(params, src, frac, pe_table, ple_table):
    B, T = src.shape
    BB = _pick_block_batch(B, T)
    rows = BB * T
    assert B % BB == 0 and rows % 8 == 0, "batch/seq blocking must be 8-row aligned"
    steps = B // BB

    # ---- XLA glue: data-dependent table gathers only ----
    cbfv_pad = jnp.zeros((params['cbfv'].shape[0], FEAT_PAD), jnp.float32)
    cbfv_pad = cbfv_pad.at[:, :FEAT_SIZE].set(params['cbfv'])
    x_feat = jnp.take(cbfv_pad, src, axis=0).reshape(B * T, FEAT_PAD).astype(jnp.bfloat16)

    pe_scaler = 2.0 ** ((1.0 - params['pos_scaler']) ** 2)
    ple_scaler = 2.0 ** ((1.0 - params['pos_scaler_log']) ** 2)
    pe = frac_encode(pe_table, frac, RESOLUTION, log10=False) * pe_scaler
    ple = frac_encode(ple_table, frac, RESOLUTION, log10=True) * ple_scaler
    pos = jnp.concatenate([pe, ple], axis=-1).astype(jnp.float32).reshape(B * T, D_MODEL)

    pad = (frac == 0.0).astype(jnp.float32)
    padrow = pad.reshape(B * T, 1)
    padcol = pad.reshape(steps, 1, rows)

    # static (batch x head) block-diagonal masks, constant-folded under jit
    r = jnp.arange(NHEAD * rows)
    c = jnp.arange(rows)
    d = jnp.arange(D_MODEL)
    bd_mask = jnp.where(((r[:, None] % rows) // T) == (c[None, :] // T),
                        0.0, NEG_INF).astype(jnp.float32)              # (H*rows, rows)
    head_mask = ((r[:, None] // rows) == (d[None, :] // HEAD_DIM)).astype(jnp.float32)

    (wm2v, smalls, wqkv_all, wo_all, w1_all, b1_all, w2_all,
     gate_w, w1cat, b1cat, w2cat) = _pack_weights(params)

    data_args = [x_feat, pos, padrow, padcol]
    data_specs = [
        pl.BlockSpec((rows, FEAT_PAD), lambda i: (i, 0)),
        pl.BlockSpec((rows, D_MODEL), lambda i: (i, 0)),
        pl.BlockSpec((rows, 1), lambda i: (i, 0)),
        pl.BlockSpec((1, 1, rows), lambda i: (i, 0, 0)),
    ]
    const_args = [bd_mask, head_mask, wm2v, smalls, wqkv_all, wo_all,
                  w1_all, b1_all, w2_all, gate_w, w1cat, b1cat, w2cat]
    # whole array resident, constant block index -> fetched once, stays in VMEM
    const_specs = [pl.BlockSpec(a.shape, (lambda i, nd=a.ndim: (0,) * nd))
                   for a in const_args]

    mm_flops = 2 * rows * (
        FEAT_PAD * D_MODEL
        + N_LAYERS * (3 * D_MODEL * D_MODEL + 2 * NHEAD * D_MODEL * rows + D_MODEL * D_MODEL)
        + (N_LAYERS - 1) * 2 * D_MODEL * DIM_FF
        + D_MODEL * NUM_EXPERTS
        + 2 * D_MODEL * NUM_EXPERTS * DIM_FF)
    transcendentals = rows * (N_LAYERS * NHEAD * rows + NUM_EXPERTS)
    nbytes = sum(int(a.size) * a.dtype.itemsize for a in data_args + const_args)
    nbytes += B * T * D_MODEL * 4
    cost = pl.CostEstimate(flops=int(mm_flops) * steps,
                           transcendentals=int(transcendentals) * steps,
                           bytes_accessed=int(nbytes))

    out = pl.pallas_call(
        _fused_encoder_kernel,
        out_shape=jax.ShapeDtypeStruct((B * T, D_MODEL), jnp.float32),
        grid=(steps,),
        in_specs=data_specs + const_specs,
        out_specs=pl.BlockSpec((rows, D_MODEL), lambda i: (i, 0)),
        compiler_params=pltpu.CompilerParams(
            dimension_semantics=("parallel",)),
        cost_estimate=cost,
    )(*data_args, *const_args)
    return out.reshape(B, T, D_MODEL)


# ------------------------------ parameter init -------------------------------


def init_params(key):
    keys = iter(jax.random.split(key, 256))

    def lin(k_in, k_out, scale=0.02):
        return (jax.random.normal(next(keys), (k_in, k_out), jnp.float32) * scale,
                jnp.zeros((k_out,), jnp.float32))

    params = {}
    cbfv = jax.random.normal(next(keys), (98, FEAT_SIZE), jnp.float32)
    params['cbfv'] = jnp.concatenate(
        [jnp.zeros((1, FEAT_SIZE), jnp.float32), cbfv], axis=0)     # (99, FEAT)
    params['fc_mat2vec'] = lin(FEAT_SIZE, D_MODEL)
    params['emb_scaler'] = jnp.array(1.0, jnp.float32)
    params['pos_scaler'] = jnp.array(1.0, jnp.float32)
    params['pos_scaler_log'] = jnp.array(1.0, jnp.float32)

    layers = []
    for li in range(N_LAYERS):
        lp = {}
        lp['Wq'], lp['bq'] = lin(D_MODEL, D_MODEL)
        lp['Wk'], lp['bk'] = lin(D_MODEL, D_MODEL)
        lp['Wv'], lp['bv'] = lin(D_MODEL, D_MODEL)
        lp['Wo'], lp['bo'] = lin(D_MODEL, D_MODEL)
        lp['ln1_g'] = jnp.ones((D_MODEL,), jnp.float32)
        lp['ln1_b'] = jnp.zeros((D_MODEL,), jnp.float32)
        lp['ln2_g'] = jnp.ones((D_MODEL,), jnp.float32)
        lp['ln2_b'] = jnp.zeros((D_MODEL,), jnp.float32)
        if li < N_LAYERS - 1:
            lp['ff_W1'], lp['ff_b1'] = lin(D_MODEL, DIM_FF)
            lp['ff_W2'], lp['ff_b2'] = lin(DIM_FF, D_MODEL)
        else:
            lp['gate_W'], lp['gate_b'] = lin(D_MODEL, NUM_EXPERTS)
            lp['experts'] = [(lin(D_MODEL, DIM_FF), lin(DIM_FF, D_MODEL))
                             for _ in range(NUM_EXPERTS)]
        layers.append(lp)
    params['layers'] = layers
    return params


# ---------------------------------- main -------------------------------------

if __name__ == "__main__":
    key = jax.random.PRNGKey(0)
    pkey, skey, fkey = jax.random.split(key, 3)

    params = init_params(pkey)
    pe_table = make_pe_table(D_MODEL // 2, RESOLUTION)
    ple_table = make_pe_table(D_MODEL // 2, RESOLUTION)

    B, T = 8, 8
    src = jax.random.randint(skey, (B, T), 1, 99, dtype=jnp.int32)  # element ids
    frac = jax.random.uniform(fkey, (B, T), jnp.float32)
    frac = frac.at[:, -2:].set(0.0)                 # exercise key-padding mask
    src = jnp.where(frac == 0.0, 0, src)
    frac = frac / jnp.maximum(jnp.sum(frac, axis=1, keepdims=True), 1e-9)

    fwd = jax.jit(lambda s, f: encoder_forward(params, s, f, pe_table, ple_table))
    out = fwd(src, frac)
    jax.block_until_ready(out)
    assert out.shape == (B, T, D_MODEL)
    assert bool(jnp.all(jnp.isfinite(out)))
    print("KERNEL_OK")
</pallas_src>

<mosaic_0001>
module attributes {stable_mosaic.version = 11 : i64} {
  func.func @_fused_encoder_kernel(%arg0: i32, %arg1: memref<32x256xbf16, #tpu.memory_space<vmem>>, %arg2: memref<32x32xf32, #tpu.memory_space<vmem>>, %arg3: memref<32x1xf32, #tpu.memory_space<vmem>>, %arg4: memref<1x1x32xf32, #tpu.memory_space<vmem>>, %arg5: memref<128x32xf32, #tpu.memory_space<vmem>>, %arg6: memref<128x32xf32, #tpu.memory_space<vmem>>, %arg7: memref<256x32xbf16, #tpu.memory_space<vmem>>, %arg8: memref<24x128xf32, #tpu.memory_space<vmem>>, %arg9: memref<2x32x96xbf16, #tpu.memory_space<vmem>>, %arg10: memref<2x32x32xbf16, #tpu.memory_space<vmem>>, %arg11: memref<1x32x1024xbf16, #tpu.memory_space<vmem>>, %arg12: memref<1x1x1024xf32, #tpu.memory_space<vmem>>, %arg13: memref<1x1024x32xbf16, #tpu.memory_space<vmem>>, %arg14: memref<32x4xf32, #tpu.memory_space<vmem>>, %arg15: memref<32x4096xbf16, #tpu.memory_space<vmem>>, %arg16: memref<1x4096xf32, #tpu.memory_space<vmem>>, %arg17: memref<4096x32xbf16, #tpu.memory_space<vmem>>, %arg18: memref<32x32xf32, #tpu.memory_space<vmem>>) attributes {dimension_semantics = [#tpu.dimension_semantics<parallel>], iteration_bounds = array<i64: 2>, scalar_prefetch = 0 : i64, scratch_operands = 0 : i64, tpu.core_type = #tpu.core_type<tc>, window_params = [{transform_indices = @transform_0, window_bounds = array<i64: 32, 256>}, {transform_indices = @transform_1, window_bounds = array<i64: 32, 32>}, {transform_indices = @transform_2, window_bounds = array<i64: 32, 1>}, {transform_indices = @transform_3, window_bounds = array<i64: 1, 1, 32>}, {pipeline_mode = #tpu.pipeline_mode<synchronous>, transform_indices = @transform_4, window_bounds = array<i64: 128, 32>}, {pipeline_mode = #tpu.pipeline_mode<synchronous>, transform_indices = @transform_5, window_bounds = array<i64: 128, 32>}, {pipeline_mode = #tpu.pipeline_mode<synchronous>, transform_indices = @transform_6, window_bounds = array<i64: 256, 32>}, {pipeline_mode = #tpu.pipeline_mode<synchronous>, transform_indices = @transform_7, window_bounds = array<i64: 24, 128>}, {pipeline_mode = #tpu.pipeline_mode<synchronous>, transform_indices = @transform_8, window_bounds = array<i64: 2, 32, 96>}, {pipeline_mode = #tpu.pipeline_mode<synchronous>, transform_indices = @transform_9, window_bounds = array<i64: 2, 32, 32>}, {pipeline_mode = #tpu.pipeline_mode<synchronous>, transform_indices = @transform_10, window_bounds = array<i64: 1, 32, 1024>}, {pipeline_mode = #tpu.pipeline_mode<synchronous>, transform_indices = @transform_11, window_bounds = array<i64: 1, 1, 1024>}, {pipeline_mode = #tpu.pipeline_mode<synchronous>, transform_indices = @transform_12, window_bounds = array<i64: 1, 1024, 32>}, {pipeline_mode = #tpu.pipeline_mode<synchronous>, transform_indices = @transform_13, window_bounds = array<i64: 32, 4>}, {pipeline_mode = #tpu.pipeline_mode<synchronous>, transform_indices = @transform_14, window_bounds = array<i64: 32, 4096>}, {pipeline_mode = #tpu.pipeline_mode<synchronous>, transform_indices = @transform_15, window_bounds = array<i64: 1, 4096>}, {pipeline_mode = #tpu.pipeline_mode<synchronous>, transform_indices = @transform_16, window_bounds = array<i64: 4096, 32>}, {transform_indices = @transform_17, window_bounds = array<i64: 32, 32>}]} {
    %c0 = arith.constant 0 : index
    %c0_0 = arith.constant 0 : index
    %0 = vector.load %arg8[%c0, %c0_0] : memref<24x128xf32, #tpu.memory_space<vmem>>, vector<24x128xf32>
    %c0_1 = arith.constant 0 : index
    %c0_2 = arith.constant 0 : index
    %1 = vector.load %arg6[%c0_1, %c0_2] : memref<128x32xf32, #tpu.memory_space<vmem>>, vector<128x32xf32>
    %c0_3 = arith.constant 0 : index
    %c0_4 = arith.constant 0 : index
    %2 = vector.load %arg5[%c0_3, %c0_4] : memref<128x32xf32, #tpu.memory_space<vmem>>, vector<128x32xf32>
    %c0_5 = arith.constant 0 : index
    %c0_6 = arith.constant 0 : index
    %c0_7 = arith.constant 0 : index
    %3 = vector.load %arg4[%c0_5, %c0_6, %c0_7] : memref<1x1x32xf32, #tpu.memory_space<vmem>>, vector<1x1x32xf32>
    %4 = vector.shape_cast %3 : vector<1x1x32xf32> to vector<1x32xf32>
    %cst = arith.constant 5.000000e-01 : f32
    %5 = vector.broadcast %cst : f32 to vector<1x32xf32>
    %6 = arith.cmpf ogt, %4, %5 : vector<1x32xf32>
    %cst_8 = arith.constant -1.000000e+30 : f32
    %cst_9 = arith.constant 0.000000e+00 : f32
    %7 = vector.broadcast %cst_8 : f32 to vector<1x32xf32>
    %8 = vector.broadcast %cst_9 : f32 to vector<1x32xf32>
    %9 = arith.select %6, %7, %8 : vector<1x32xi1>, vector<1x32xf32>
    %c0_10 = arith.constant 0 : index
    %c0_11 = arith.constant 0 : index
    %10 = vector.load %arg1[%c0_10, %c0_11] : memref<32x256xbf16, #tpu.memory_space<vmem>>, vector<32x256xbf16>
    %c0_12 = arith.constant 0 : index
    %c0_13 = arith.constant 0 : index
    %11 = vector.load %arg7[%c0_12, %c0_13] : memref<256x32xbf16, #tpu.memory_space<vmem>>, vector<256x32xbf16>
    %cst_14 = arith.constant dense<0.000000e+00> : vector<32x32xf32>
    %12 = tpu.matmul %10, %11, %cst_14 {dimension_numbers = #tpu.dot_dimension_numbers<[1], [0], [0], [1], [0, 0, 1, 1], [], []>} : vector<32x256xbf16>, vector<256x32xbf16>, vector<32x32xf32> -> vector<32x32xf32>
    %13 = vector.extract_strided_slice %0 {offsets = [0, 0], sizes = [1, 32], strides = [1, 1]} : vector<24x128xf32> to vector<1x32xf32>
    %14 = vector.broadcast %13 : vector<1x32xf32> to vector<32x32xf32>
    %15 = arith.addf %12, %14 : vector<32x32xf32>
    %c0_15 = arith.constant 0 : index
    %c0_16 = arith.constant 0 : index
    %16 = vector.load %arg2[%c0_15, %c0_16] : memref<32x32xf32, #tpu.memory_space<vmem>>, vector<32x32xf32>
    %17 = arith.addf %15, %16 : vector<32x32xf32>
    %18 = vector.extract_strided_slice %0 {offsets = [1, 0], sizes = [1, 96], strides = [1, 1]} : vector<24x128xf32> to vector<1x96xf32>
    %19 = vector.extract_strided_slice %0 {offsets = [2, 0], sizes = [1, 32], strides = [1, 1]} : vector<24x128xf32> to vector<1x32xf32>
    %20 = vector.extract_strided_slice %0 {offsets = [3, 0], sizes = [1, 32], strides = [1, 1]} : vector<24x128xf32> to vector<1x32xf32>
    %21 = vector.extract_strided_slice %0 {offsets = [4, 0], sizes = [1, 32], strides = [1, 1]} : vector<24x128xf32> to vector<1x32xf32>
    %22 = vector.extract_strided_slice %0 {offsets = [5, 0], sizes = [1, 32], strides = [1, 1]} : vector<24x128xf32> to vector<1x32xf32>
    %23 = vector.extract_strided_slice %0 {offsets = [6, 0], sizes = [1, 32], strides = [1, 1]} : vector<24x128xf32> to vector<1x32xf32>
    %24 = arith.truncf %17 : vector<32x32xf32> to vector<32x32xbf16>
    %c0_17 = arith.constant 0 : index
    %c0_18 = arith.constant 0 : index
    %c0_19 = arith.constant 0 : index
    %25 = vector.load %arg9[%c0_17, %c0_18, %c0_19] : memref<2x32x96xbf16, #tpu.memory_space<vmem>>, vector<1x32x96xbf16>
    %26 = vector.shape_cast %25 : vector<1x32x96xbf16> to vector<32x96xbf16>
    %cst_20 = arith.constant dense<0.000000e+00> : vector<32x96xf32>
    %27 = tpu.matmul %24, %26, %cst_20 {dimension_numbers = #tpu.dot_dimension_numbers<[1], [0], [0], [1], [0, 0, 1, 1], [], []>} : vector<32x32xbf16>, vector<32x96xbf16>, vector<32x96xf32> -> vector<32x96xf32>
    %28 = vector.broadcast %18 : vector<1x96xf32> to vector<32x96xf32>
    %29 = arith.addf %27, %28 : vector<32x96xf32>
    %30 = vector.extract_strided_slice %29 {offsets = [0, 0], sizes = [32, 32], strides = [1, 1]} : vector<32x96xf32> to vector<32x32xf32>
    %31 = vector.extract_strided_slice %29 {offsets = [0, 32], sizes = [32, 32], strides = [1, 1]} : vector<32x96xf32> to vector<32x32xf32>
    %32 = vector.extract_strided_slice %29 {offsets = [0, 64], sizes = [32, 32], strides = [1, 1]} : vector<32x96xf32> to vector<32x32xf32>
    %33 = tpu.concatenate %30, %30, %30, %30 in 0 : vector<32x32xf32>, vector<32x32xf32>, vector<32x32xf32>, vector<32x32xf32> -> vector<128x32xf32>
    %34 = arith.mulf %33, %1 : vector<128x32xf32>
    %35 = arith.truncf %34 : vector<128x32xf32> to vector<128x32xbf16>
    %36 = arith.truncf %31 : vector<32x32xf32> to vector<32x32xbf16>
    %cst_21 = arith.constant dense<0.000000e+00> : vector<128x32xf32>
    %37 = tpu.matmul %35, %36, %cst_21 {dimension_numbers = #tpu.dot_dimension_numbers<[1], [1], [0], [0], [0, 0, 1, 0], [], []>} : vector<128x32xbf16>, vector<32x32xbf16>, vector<128x32xf32> -> vector<128x32xf32>
    %38 = vector.broadcast %9 : vector<1x32xf32> to vector<128x32xf32>
    %39 = arith.addf %37, %38 : vector<128x32xf32>
    %40 = arith.addf %39, %2 : vector<128x32xf32>
    %cst_22 = arith.constant dense<0xFF800000> : vector<128xf32>
    %41 = vector.multi_reduction <maximumf>, %40, %cst_22 [1] : vector<128x32xf32> to vector<128xf32>
    %42 = vector.shape_cast %41 : vector<128xf32> to vector<128x1xf32>
    %43 = vector.broadcast %42 : vector<128x1xf32> to vector<128x32xf32>
    %44 = arith.subf %40, %43 : vector<128x32xf32>
    %45 = math.exp %44 : vector<128x32xf32>
    %cst_23 = arith.constant dense<0.000000e+00> : vector<128xf32>
    %46 = vector.multi_reduction <add>, %45, %cst_23 [1] : vector<128x32xf32> to vector<128xf32>
    %47 = vector.shape_cast %46 : vector<128xf32> to vector<128x1xf32>
    %48 = vector.broadcast %47 : vector<128x1xf32> to vector<128x32xf32>
    %49 = arith.divf %45, %48 : vector<128x32xf32>
    %50 = arith.truncf %49 : vector<128x32xf32> to vector<128x32xbf16>
    %51 = arith.truncf %32 : vector<32x32xf32> to vector<32x32xbf16>
    %cst_24 = arith.constant dense<0.000000e+00> : vector<128x32xf32>
    %52 = tpu.matmul %50, %51, %cst_24 {dimension_numbers = #tpu.dot_dimension_numbers<[1], [0], [0], [1], [0, 0, 1, 1], [], []>} : vector<128x32xbf16>, vector<32x32xbf16>, vector<128x32xf32> -> vector<128x32xf32>
    %53 = arith.mulf %52, %1 : vector<128x32xf32>
    %54 = vector.extract_strided_slice %53 {offsets = [0, 0], sizes = [32, 32], strides = [1, 1]} : vector<128x32xf32> to vector<32x32xf32>
    %55 = vector.extract_strided_slice %53 {offsets = [32, 0], sizes = [32, 32], strides = [1, 1]} : vector<128x32xf32> to vector<32x32xf32>
    %56 = arith.addf %54, %55 : vector<32x32xf32>
    %57 = vector.extract_strided_slice %53 {offsets = [64, 0], sizes = [32, 32], strides = [1, 1]} : vector<128x32xf32> to vector<32x32xf32>
    %58 = arith.addf %56, %57 : vector<32x32xf32>
    %59 = vector.extract_strided_slice %53 {offsets = [96, 0], sizes = [32, 32], strides = [1, 1]} : vector<128x32xf32> to vector<32x32xf32>
    %60 = arith.addf %58, %59 : vector<32x32xf32>
    %61 = arith.truncf %60 : vector<32x32xf32> to vector<32x32xbf16>
    %c0_25 = arith.constant 0 : index
    %c0_26 = arith.constant 0 : index
    %c0_27 = arith.constant 0 : index
    %62 = vector.load %arg10[%c0_25, %c0_26, %c0_27] : memref<2x32x32xbf16, #tpu.memory_space<vmem>>, vector<1x32x32xbf16>
    %63 = vector.shape_cast %62 : vector<1x32x32xbf16> to vector<32x32xbf16>
    %cst_28 = arith.constant dense<0.000000e+00> : vector<32x32xf32>
    %64 = tpu.matmul %61, %63, %cst_28 {dimension_numbers = #tpu.dot_dimension_numbers<[1], [0], [0], [1], [0, 0, 1, 1], [], []>} : vector<32x32xbf16>, vector<32x32xbf16>, vector<32x32xf32> -> vector<32x32xf32>
    %65 = vector.broadcast %19 : vector<1x32xf32> to vector<32x32xf32>
    %66 = arith.addf %64, %65 : vector<32x32xf32>
    %67 = arith.addf %17, %66 : vector<32x32xf32>
    %cst_29 = arith.constant dense<0.000000e+00> : vector<32xf32>
    %68 = vector.multi_reduction <add>, %67, %cst_29 [1] : vector<32x32xf32> to vector<32xf32>
    %69 = vector.shape_cast %68 : vector<32xf32> to vector<32x1xf32>
    %cst_30 = arith.constant 3.200000e+01 : f32
    %70 = vector.broadcast %cst_30 : f32 to vector<32x1xf32>
    %71 = arith.divf %69, %70 : vector<32x1xf32>
    %72 = vector.broadcast %71 : vector<32x1xf32> to vector<32x32xf32>
    %73 = arith.subf %67, %72 : vector<32x32xf32>
    %74 = arith.mulf %73, %73 : vector<32x32xf32>
    %cst_31 = arith.constant dense<0.000000e+00> : vector<32xf32>
    %75 = vector.multi_reduction <add>, %74, %cst_31 [1] : vector<32x32xf32> to vector<32xf32>
    %76 = vector.shape_cast %75 : vector<32xf32> to vector<32x1xf32>
    %cst_32 = arith.constant 3.200000e+01 : f32
    %77 = vector.broadcast %cst_32 : f32 to vector<32x1xf32>
    %78 = arith.divf %76, %77 : vector<32x1xf32>
    %79 = vector.broadcast %71 : vector<32x1xf32> to vector<32x32xf32>
    %80 = arith.subf %67, %79 : vector<32x32xf32>
    %cst_33 = arith.constant 9.99999974E-6 : f32
    %81 = vector.broadcast %cst_33 : f32 to vector<32x1xf32>
    %82 = arith.addf %78, %81 : vector<32x1xf32>
    %83 = math.rsqrt %82 : vector<32x1xf32>
    %84 = vector.broadcast %83 : vector<32x1xf32> to vector<32x32xf32>
    %85 = arith.mulf %80, %84 : vector<32x32xf32>
    %86 = vector.broadcast %20 : vector<1x32xf32> to vector<32x32xf32>
    %87 = arith.mulf %85, %86 : vector<32x32xf32>
    %88 = vector.broadcast %21 : vector<1x32xf32> to vector<32x32xf32>
    %89 = arith.addf %87, %88 : vector<32x32xf32>
    %90 = arith.truncf %89 : vector<32x32xf32> to vector<32x32xbf16>
    %c0_34 = arith.constant 0 : index
    %c0_35 = arith.constant 0 : index
    %c0_36 = arith.constant 0 : index
    %91 = vector.load %arg11[%c0_34, %c0_35, %c0_36] : memref<1x32x1024xbf16, #tpu.memory_space<vmem>>, vector<1x32x1024xbf16>
    %92 = vector.shape_cast %91 : vector<1x32x1024xbf16> to vector<32x1024xbf16>
    %cst_37 = arith.constant dense<0.000000e+00> : vector<32x1024xf32>
    %93 = tpu.matmul %90, %92, %cst_37 {dimension_numbers = #tpu.dot_dimension_numbers<[1], [0], [0], [1], [0, 0, 1, 1], [], []>} : vector<32x32xbf16>, vector<32x1024xbf16>, vector<32x1024xf32> -> vector<32x1024xf32>
    %c0_38 = arith.constant 0 : index
    %c0_39 = arith.constant 0 : index
    %c0_40 = arith.constant 0 : index
    %94 = vector.load %arg12[%c0_38, %c0_39, %c0_40] : memref<1x1x1024xf32, #tpu.memory_space<vmem>>, vector<1x1x1024xf32>
    %95 = vector.shape_cast %94 : vector<1x1x1024xf32> to vector<1x1024xf32>
    %96 = vector.broadcast %95 : vector<1x1024xf32> to vector<32x1024xf32>
    %97 = arith.addf %93, %96 : vector<32x1024xf32>
    %cst_41 = arith.constant 0.000000e+00 : f32
    %98 = vector.broadcast %cst_41 : f32 to vector<32x1024xf32>
    %99 = arith.maximumf %97, %98 : vector<32x1024xf32>
    %100 = arith.truncf %99 : vector<32x1024xf32> to vector<32x1024xbf16>
    %c0_42 = arith.constant 0 : index
    %c0_43 = arith.constant 0 : index
    %c0_44 = arith.constant 0 : index
    %101 = vector.load %arg13[%c0_42, %c0_43, %c0_44] : memref<1x1024x32xbf16, #tpu.memory_space<vmem>>, vector<1x1024x32xbf16>
    %102 = vector.shape_cast %101 : vector<1x1024x32xbf16> to vector<1024x32xbf16>
    %cst_45 = arith.constant dense<0.000000e+00> : vector<32x32xf32>
    %103 = tpu.matmul %100, %102, %cst_45 {dimension_numbers = #tpu.dot_dimension_numbers<[1], [0], [0], [1], [0, 0, 1, 1], [], []>} : vector<32x1024xbf16>, vector<1024x32xbf16>, vector<32x32xf32> -> vector<32x32xf32>
    %104 = vector.extract_strided_slice %0 {offsets = [14, 0], sizes = [1, 32], strides = [1, 1]} : vector<24x128xf32> to vector<1x32xf32>
    %105 = vector.broadcast %104 : vector<1x32xf32> to vector<32x32xf32>
    %106 = arith.addf %103, %105 : vector<32x32xf32>
    %107 = arith.addf %89, %106 : vector<32x32xf32>
    %cst_46 = arith.constant dense<0.000000e+00> : vector<32xf32>
    %108 = vector.multi_reduction <add>, %107, %cst_46 [1] : vector<32x32xf32> to vector<32xf32>
    %109 = vector.shape_cast %108 : vector<32xf32> to vector<32x1xf32>
    %cst_47 = arith.constant 3.200000e+01 : f32
    %110 = vector.broadcast %cst_47 : f32 to vector<32x1xf32>
    %111 = arith.divf %109, %110 : vector<32x1xf32>
    %112 = vector.broadcast %111 : vector<32x1xf32> to vector<32x32xf32>
    %113 = arith.subf %107, %112 : vector<32x32xf32>
    %114 = arith.mulf %113, %113 : vector<32x32xf32>
    %cst_48 = arith.constant dense<0.000000e+00> : vector<32xf32>
    %115 = vector.multi_reduction <add>, %114, %cst_48 [1] : vector<32x32xf32> to vector<32xf32>
    %116 = vector.shape_cast %115 : vector<32xf32> to vector<32x1xf32>
    %cst_49 = arith.constant 3.200000e+01 : f32
    %117 = vector.broadcast %cst_49 : f32 to vector<32x1xf32>
    %118 = arith.divf %116, %117 : vector<32x1xf32>
    %119 = vector.broadcast %111 : vector<32x1xf32> to vector<32x32xf32>
    %120 = arith.subf %107, %119 : vector<32x32xf32>
    %cst_50 = arith.constant 9.99999974E-6 : f32
    %121 = vector.broadcast %cst_50 : f32 to vector<32x1xf32>
    %122 = arith.addf %118, %121 : vector<32x1xf32>
    %123 = math.rsqrt %122 : vector<32x1xf32>
    %124 = vector.broadcast %123 : vector<32x1xf32> to vector<32x32xf32>
    %125 = arith.mulf %120, %124 : vector<32x32xf32>
    %126 = vector.broadcast %22 : vector<1x32xf32> to vector<32x32xf32>
    %127 = arith.mulf %125, %126 : vector<32x32xf32>
    %128 = vector.broadcast %23 : vector<1x32xf32> to vector<32x32xf32>
    %129 = arith.addf %127, %128 : vector<32x32xf32>
    %130 = vector.extract_strided_slice %0 {offsets = [7, 0], sizes = [1, 96], strides = [1, 1]} : vector<24x128xf32> to vector<1x96xf32>
    %131 = vector.extract_strided_slice %0 {offsets = [8, 0], sizes = [1, 32], strides = [1, 1]} : vector<24x128xf32> to vector<1x32xf32>
    %132 = vector.extract_strided_slice %0 {offsets = [9, 0], sizes = [1, 32], strides = [1, 1]} : vector<24x128xf32> to vector<1x32xf32>
    %133 = vector.extract_strided_slice %0 {offsets = [10, 0], sizes = [1, 32], strides = [1, 1]} : vector<24x128xf32> to vector<1x32xf32>
    %134 = vector.extract_strided_slice %0 {offsets = [11, 0], sizes = [1, 32], strides = [1, 1]} : vector<24x128xf32> to vector<1x32xf32>
    %135 = vector.extract_strided_slice %0 {offsets = [12, 0], sizes = [1, 32], strides = [1, 1]} : vector<24x128xf32> to vector<1x32xf32>
    %136 = arith.truncf %129 : vector<32x32xf32> to vector<32x32xbf16>
    %c1 = arith.constant 1 : index
    %c0_51 = arith.constant 0 : index
    %c0_52 = arith.constant 0 : index
    %137 = vector.load %arg9[%c1, %c0_51, %c0_52] : memref<2x32x96xbf16, #tpu.memory_space<vmem>>, vector<1x32x96xbf16>
    %138 = vector.shape_cast %137 : vector<1x32x96xbf16> to vector<32x96xbf16>
    %cst_53 = arith.constant dense<0.000000e+00> : vector<32x96xf32>
    %139 = tpu.matmul %136, %138, %cst_53 {dimension_numbers = #tpu.dot_dimension_numbers<[1], [0], [0], [1], [0, 0, 1, 1], [], []>} : vector<32x32xbf16>, vector<32x96xbf16>, vector<32x96xf32> -> vector<32x96xf32>
    %140 = vector.broadcast %130 : vector<1x96xf32> to vector<32x96xf32>
    %141 = arith.addf %139, %140 : vector<32x96xf32>
    %142 = vector.extract_strided_slice %141 {offsets = [0, 0], sizes = [32, 32], strides = [1, 1]} : vector<32x96xf32> to vector<32x32xf32>
    %143 = vector.extract_strided_slice %141 {offsets = [0, 32], sizes = [32, 32], strides = [1, 1]} : vector<32x96xf32> to vector<32x32xf32>
    %144 = vector.extract_strided_slice %141 {offsets = [0, 64], sizes = [32, 32], strides = [1, 1]} : vector<32x96xf32> to vector<32x32xf32>
    %145 = tpu.concatenate %142, %142, %142, %142 in 0 : vector<32x32xf32>, vector<32x32xf32>, vector<32x32xf32>, vector<32x32xf32> -> vector<128x32xf32>
    %146 = arith.mulf %145, %1 : vector<128x32xf32>
    %147 = arith.truncf %146 : vector<128x32xf32> to vector<128x32xbf16>
    %148 = arith.truncf %143 : vector<32x32xf32> to vector<32x32xbf16>
    %cst_54 = arith.constant dense<0.000000e+00> : vector<128x32xf32>
    %149 = tpu.matmul %147, %148, %cst_54 {dimension_numbers = #tpu.dot_dimension_numbers<[1], [1], [0], [0], [0, 0, 1, 0], [], []>} : vector<128x32xbf16>, vector<32x32xbf16>, vector<128x32xf32> -> vector<128x32xf32>
    %150 = vector.broadcast %9 : vector<1x32xf32> to vector<128x32xf32>
    %151 = arith.addf %149, %150 : vector<128x32xf32>
    %152 = arith.addf %151, %2 : vector<128x32xf32>
    %cst_55 = arith.constant dense<0xFF800000> : vector<128xf32>
    %153 = vector.multi_reduction <maximumf>, %152, %cst_55 [1] : vector<128x32xf32> to vector<128xf32>
    %154 = vector.shape_cast %153 : vector<128xf32> to vector<128x1xf32>
    %155 = vector.broadcast %154 : vector<128x1xf32> to vector<128x32xf32>
    %156 = arith.subf %152, %155 : vector<128x32xf32>
    %157 = math.exp %156 : vector<128x32xf32>
    %cst_56 = arith.constant dense<0.000000e+00> : vector<128xf32>
    %158 = vector.multi_reduction <add>, %157, %cst_56 [1] : vector<128x32xf32> to vector<128xf32>
    %159 = vector.shape_cast %158 : vector<128xf32> to vector<128x1xf32>
    %160 = vector.broadcast %159 : vector<128x1xf32> to vector<128x32xf32>
    %161 = arith.divf %157, %160 : vector<128x32xf32>
    %162 = arith.truncf %161 : vector<128x32xf32> to vector<128x32xbf16>
    %163 = arith.truncf %144 : vector<32x32xf32> to vector<32x32xbf16>
    %cst_57 = arith.constant dense<0.000000e+00> : vector<128x32xf32>
    %164 = tpu.matmul %162, %163, %cst_57 {dimension_numbers = #tpu.dot_dimension_numbers<[1], [0], [0], [1], [0, 0, 1, 1], [], []>} : vector<128x32xbf16>, vector<32x32xbf16>, vector<128x32xf32> -> vector<128x32xf32>
    %165 = arith.mulf %164, %1 : vector<128x32xf32>
    %166 = vector.extract_strided_slice %165 {offsets = [0, 0], sizes = [32, 32], strides = [1, 1]} : vector<128x32xf32> to vector<32x32xf32>
    %167 = vector.extract_strided_slice %165 {offsets = [32, 0], sizes = [32, 32], strides = [1, 1]} : vector<128x32xf32> to vector<32x32xf32>
    %168 = arith.addf %166, %167 : vector<32x32xf32>
    %169 = vector.extract_strided_slice %165 {offsets = [64, 0], sizes = [32, 32], strides = [1, 1]} : vector<128x32xf32> to vector<32x32xf32>
    %170 = arith.addf %168, %169 : vector<32x32xf32>
    %171 = vector.extract_strided_slice %165 {offsets = [96, 0], sizes = [32, 32], strides = [1, 1]} : vector<128x32xf32> to vector<32x32xf32>
    %172 = arith.addf %170, %171 : vector<32x32xf32>
    %173 = arith.truncf %172 : vector<32x32xf32> to vector<32x32xbf16>
    %c1_58 = arith.constant 1 : index
    %c0_59 = arith.constant 0 : index
    %c0_60 = arith.constant 0 : index
    %174 = vector.load %arg10[%c1_58, %c0_59, %c0_60] : memref<2x32x32xbf16, #tpu.memory_space<vmem>>, vector<1x32x32xbf16>
    %175 = vector.shape_cast %174 : vector<1x32x32xbf16> to vector<32x32xbf16>
    %cst_61 = arith.constant dense<0.000000e+00> : vector<32x32xf32>
    %176 = tpu.matmul %173, %175, %cst_61 {dimension_numbers = #tpu.dot_dimension_numbers<[1], [0], [0], [1], [0, 0, 1, 1], [], []>} : vector<32x32xbf16>, vector<32x32xbf16>, vector<32x32xf32> -> vector<32x32xf32>
    %177 = vector.broadcast %131 : vector<1x32xf32> to vector<32x32xf32>
    %178 = arith.addf %176, %177 : vector<32x32xf32>
    %179 = arith.addf %129, %178 : vector<32x32xf32>
    %cst_62 = arith.constant dense<0.000000e+00> : vector<32xf32>
    %180 = vector.multi_reduction <add>, %179, %cst_62 [1] : vector<32x32xf32> to vector<32xf32>
    %181 = vector.shape_cast %180 : vector<32xf32> to vector<32x1xf32>
    %cst_63 = arith.constant 3.200000e+01 : f32
    %182 = vector.broadcast %cst_63 : f32 to vector<32x1xf32>
    %183 = arith.divf %181, %182 : vector<32x1xf32>
    %184 = vector.broadcast %183 : vector<32x1xf32> to vector<32x32xf32>
    %185 = arith.subf %179, %184 : vector<32x32xf32>
    %186 = arith.mulf %185, %185 : vector<32x32xf32>
    %cst_64 = arith.constant dense<0.000000e+00> : vector<32xf32>
    %187 = vector.multi_reduction <add>, %186, %cst_64 [1] : vector<32x32xf32> to vector<32xf32>
    %188 = vector.shape_cast %187 : vector<32xf32> to vector<32x1xf32>
    %cst_65 = arith.constant 3.200000e+01 : f32
    %189 = vector.broadcast %cst_65 : f32 to vector<32x1xf32>
    %190 = arith.divf %188, %189 : vector<32x1xf32>
    %191 = vector.broadcast %183 : vector<32x1xf32> to vector<32x32xf32>
    %192 = arith.subf %179, %191 : vector<32x32xf32>
    %cst_66 = arith.constant 9.99999974E-6 : f32
    %193 = vector.broadcast %cst_66 : f32 to vector<32x1xf32>
    %194 = arith.addf %190, %193 : vector<32x1xf32>
    %195 = math.rsqrt %194 : vector<32x1xf32>
    %196 = vector.broadcast %195 : vector<32x1xf32> to vector<32x32xf32>
    %197 = arith.mulf %192, %196 : vector<32x32xf32>
    %198 = vector.broadcast %132 : vector<1x32xf32> to vector<32x32xf32>
    %199 = arith.mulf %197, %198 : vector<32x32xf32>
    %200 = vector.broadcast %133 : vector<1x32xf32> to vector<32x32xf32>
    %201 = arith.addf %199, %200 : vector<32x32xf32>
    %c0_67 = arith.constant 0 : index
    %c0_68 = arith.constant 0 : index
    %202 = vector.load %arg14[%c0_67, %c0_68] : memref<32x4xf32, #tpu.memory_space<vmem>>, vector<32x4xf32>
    %cst_69 = arith.constant dense<0.000000e+00> : vector<32x4xf32>
    %203 = tpu.matmul %201, %202, %cst_69 {dimension_numbers = #tpu.dot_dimension_numbers<[1], [0], [0], [1], [0, 0, 1, 1], [], []>} : vector<32x32xf32>, vector<32x4xf32>, vector<32x4xf32> -> vector<32x4xf32>
    %204 = vector.extract_strided_slice %0 {offsets = [13, 0], sizes = [1, 4], strides = [1, 1]} : vector<24x128xf32> to vector<1x4xf32>
    %205 = vector.broadcast %204 : vector<1x4xf32> to vector<32x4xf32>
    %206 = arith.addf %203, %205 : vector<32x4xf32>
    %cst_70 = arith.constant dense<0xFF800000> : vector<32xf32>
    %207 = vector.multi_reduction <maximumf>, %206, %cst_70 [1] : vector<32x4xf32> to vector<32xf32>
    %208 = vector.shape_cast %207 : vector<32xf32> to vector<32x1xf32>
    %209 = vector.broadcast %208 : vector<32x1xf32> to vector<32x4xf32>
    %210 = arith.subf %206, %209 : vector<32x4xf32>
    %211 = math.exp %210 : vector<32x4xf32>
    %cst_71 = arith.constant dense<0.000000e+00> : vector<32xf32>
    %212 = vector.multi_reduction <add>, %211, %cst_71 [1] : vector<32x4xf32> to vector<32xf32>
    %213 = vector.shape_cast %212 : vector<32xf32> to vector<32x1xf32>
    %214 = vector.broadcast %213 : vector<32x1xf32> to vector<32x4xf32>
    %215 = arith.divf %211, %214 : vector<32x4xf32>
    %216 = vector.extract_strided_slice %215 {offsets = [0, 0], sizes = [32, 1], strides = [1, 1]} : vector<32x4xf32> to vector<32x1xf32>
    %217 = vector.extract_strided_slice %215 {offsets = [0, 1], sizes = [32, 1], strides = [1, 1]} : vector<32x4xf32> to vector<32x1xf32>
    %218 = vector.extract_strided_slice %215 {offsets = [0, 2], sizes = [32, 1], strides = [1, 1]} : vector<32x4xf32> to vector<32x1xf32>
    %219 = vector.extract_strided_slice %215 {offsets = [0, 3], sizes = [32, 1], strides = [1, 1]} : vector<32x4xf32> to vector<32x1xf32>
    %220 = arith.cmpf ogt, %217, %216 : vector<32x1xf32>
    %221 = arith.extui %220 : vector<32x1xi1> to vector<32x1xi32>
    %222 = arith.sitofp %221 : vector<32x1xi32> to vector<32x1xf32>
    %223 = arith.cmpf ogt, %218, %216 : vector<32x1xf32>
    %224 = arith.extui %223 : vector<32x1xi1> to vector<32x1xi32>
    %225 = arith.sitofp %224 : vector<32x1xi32> to vector<32x1xf32>
    %226 = arith.addf %222, %225 : vector<32x1xf32>
    %227 = arith.cmpf ogt, %219, %216 : vector<32x1xf32>
    %228 = arith.extui %227 : vector<32x1xi1> to vector<32x1xi32>
    %229 = arith.sitofp %228 : vector<32x1xi32> to vector<32x1xf32>
    %230 = arith.addf %226, %229 : vector<32x1xf32>
    %cst_72 = arith.constant 2.000000e+00 : f32
    %231 = vector.broadcast %cst_72 : f32 to vector<32x1xf32>
    %232 = arith.cmpf olt, %230, %231 : vector<32x1xf32>
    %cst_73 = arith.constant 0.000000e+00 : f32
    %233 = vector.broadcast %cst_73 : f32 to vector<32x1xf32>
    %234 = arith.select %232, %216, %233 : vector<32x1xi1>, vector<32x1xf32>
    %235 = arith.cmpf oge, %216, %217 : vector<32x1xf32>
    %236 = arith.extui %235 : vector<32x1xi1> to vector<32x1xi32>
    %237 = arith.sitofp %236 : vector<32x1xi32> to vector<32x1xf32>
    %238 = arith.cmpf ogt, %218, %217 : vector<32x1xf32>
    %239 = arith.extui %238 : vector<32x1xi1> to vector<32x1xi32>
    %240 = arith.sitofp %239 : vector<32x1xi32> to vector<32x1xf32>
    %241 = arith.addf %237, %240 : vector<32x1xf32>
    %242 = arith.cmpf ogt, %219, %217 : vector<32x1xf32>
    %243 = arith.extui %242 : vector<32x1xi1> to vector<32x1xi32>
    %244 = arith.sitofp %243 : vector<32x1xi32> to vector<32x1xf32>
    %245 = arith.addf %241, %244 : vector<32x1xf32>
    %cst_74 = arith.constant 2.000000e+00 : f32
    %246 = vector.broadcast %cst_74 : f32 to vector<32x1xf32>
    %247 = arith.cmpf olt, %245, %246 : vector<32x1xf32>
    %cst_75 = arith.constant 0.000000e+00 : f32
    %248 = vector.broadcast %cst_75 : f32 to vector<32x1xf32>
    %249 = arith.select %247, %217, %248 : vector<32x1xi1>, vector<32x1xf32>
    %250 = arith.cmpf oge, %216, %218 : vector<32x1xf32>
    %251 = arith.extui %250 : vector<32x1xi1> to vector<32x1xi32>
    %252 = arith.sitofp %251 : vector<32x1xi32> to vector<32x1xf32>
    %253 = arith.cmpf oge, %217, %218 : vector<32x1xf32>
    %254 = arith.extui %253 : vector<32x1xi1> to vector<32x1xi32>
    %255 = arith.sitofp %254 : vector<32x1xi32> to vector<32x1xf32>
    %256 = arith.addf %252, %255 : vector<32x1xf32>
    %257 = arith.cmpf ogt, %219, %218 : vector<32x1xf32>
    %258 = arith.extui %257 : vector<32x1xi1> to vector<32x1xi32>
    %259 = arith.sitofp %258 : vector<32x1xi32> to vector<32x1xf32>
    %260 = arith.addf %256, %259 : vector<32x1xf32>
    %cst_76 = arith.constant 2.000000e+00 : f32
    %261 = vector.broadcast %cst_76 : f32 to vector<32x1xf32>
    %262 = arith.cmpf olt, %260, %261 : vector<32x1xf32>
    %cst_77 = arith.constant 0.000000e+00 : f32
    %263 = vector.broadcast %cst_77 : f32 to vector<32x1xf32>
    %264 = arith.select %262, %218, %263 : vector<32x1xi1>, vector<32x1xf32>
    %265 = arith.cmpf oge, %216, %219 : vector<32x1xf32>
    %266 = arith.extui %265 : vector<32x1xi1> to vector<32x1xi32>
    %267 = arith.sitofp %266 : vector<32x1xi32> to vector<32x1xf32>
    %268 = arith.cmpf oge, %217, %219 : vector<32x1xf32>
    %269 = arith.extui %268 : vector<32x1xi1> to vector<32x1xi32>
    %270 = arith.sitofp %269 : vector<32x1xi32> to vector<32x1xf32>
    %271 = arith.addf %267, %270 : vector<32x1xf32>
    %272 = arith.cmpf oge, %218, %219 : vector<32x1xf32>
    %273 = arith.extui %272 : vector<32x1xi1> to vector<32x1xi32>
    %274 = arith.sitofp %273 : vector<32x1xi32> to vector<32x1xf32>
    %275 = arith.addf %271, %274 : vector<32x1xf32>
    %cst_78 = arith.constant 2.000000e+00 : f32
    %276 = vector.broadcast %cst_78 : f32 to vector<32x1xf32>
    %277 = arith.cmpf olt, %275, %276 : vector<32x1xf32>
    %cst_79 = arith.constant 0.000000e+00 : f32
    %278 = vector.broadcast %cst_79 : f32 to vector<32x1xf32>
    %279 = arith.select %277, %219, %278 : vector<32x1xi1>, vector<32x1xf32>
    %280 = arith.truncf %201 : vector<32x32xf32> to vector<32x32xbf16>
    %c0_80 = arith.constant 0 : index
    %c0_81 = arith.constant 0 : index
    %281 = vector.load %arg15[%c0_80, %c0_81] : memref<32x4096xbf16, #tpu.memory_space<vmem>>, vector<32x4096xbf16>
    %cst_82 = arith.constant dense<0.000000e+00> : vector<32x4096xf32>
    %282 = tpu.matmul %280, %281, %cst_82 {dimension_numbers = #tpu.dot_dimension_numbers<[1], [0], [0], [1], [0, 0, 1, 1], [], []>} : vector<32x32xbf16>, vector<32x4096xbf16>, vector<32x4096xf32> -> vector<32x4096xf32>
    %c0_83 = arith.constant 0 : index
    %c0_84 = arith.constant 0 : index
    %283 = vector.load %arg16[%c0_83, %c0_84] : memref<1x4096xf32, #tpu.memory_space<vmem>>, vector<1x4096xf32>
    %284 = vector.broadcast %283 : vector<1x4096xf32> to vector<32x4096xf32>
    %285 = arith.addf %282, %284 : vector<32x4096xf32>
    %cst_85 = arith.constant 0.000000e+00 : f32
    %286 = vector.broadcast %cst_85 : f32 to vector<32x4096xf32>
    %287 = arith.maximumf %285, %286 : vector<32x4096xf32>
    %288 = vector.extract_strided_slice %287 {offsets = [0, 0], sizes = [32, 1024], strides = [1, 1]} : vector<32x4096xf32> to vector<32x1024xf32>
    %289 = vector.broadcast %234 : vector<32x1xf32> to vector<32x1024xf32>
    %290 = arith.mulf %288, %289 : vector<32x1024xf32>
    %291 = vector.extract_strided_slice %287 {offsets = [0, 1024], sizes = [32, 1024], strides = [1, 1]} : vector<32x4096xf32> to vector<32x1024xf32>
    %292 = vector.broadcast %249 : vector<32x1xf32> to vector<32x1024xf32>
    %293 = arith.mulf %291, %292 : vector<32x1024xf32>
    %294 = vector.extract_strided_slice %287 {offsets = [0, 2048], sizes = [32, 1024], strides = [1, 1]} : vector<32x4096xf32> to vector<32x1024xf32>
    %295 = vector.broadcast %264 : vector<32x1xf32> to vector<32x1024xf32>
    %296 = arith.mulf %294, %295 : vector<32x1024xf32>
    %297 = vector.extract_strided_slice %287 {offsets = [0, 3072], sizes = [32, 1024], strides = [1, 1]} : vector<32x4096xf32> to vector<32x1024xf32>
    %298 = vector.broadcast %279 : vector<32x1xf32> to vector<32x1024xf32>
    %299 = arith.mulf %297, %298 : vector<32x1024xf32>
    %300 = tpu.concatenate %290, %293, %296, %299 in 1 : vector<32x1024xf32>, vector<32x1024xf32>, vector<32x1024xf32>, vector<32x1024xf32> -> vector<32x4096xf32>
    %301 = arith.truncf %300 : vector<32x4096xf32> to vector<32x4096xbf16>
    %c0_86 = arith.constant 0 : index
    %c0_87 = arith.constant 0 : index
    %302 = vector.load %arg17[%c0_86, %c0_87] : memref<4096x32xbf16, #tpu.memory_space<vmem>>, vector<4096x32xbf16>
    %cst_88 = arith.constant dense<0.000000e+00> : vector<32x32xf32>
    %303 = tpu.matmul %301, %302, %cst_88 {dimension_numbers = #tpu.dot_dimension_numbers<[1], [0], [0], [1], [0, 0, 1, 1], [], []>} : vector<32x4096xbf16>, vector<4096x32xbf16>, vector<32x32xf32> -> vector<32x32xf32>
    %304 = vector.extract_strided_slice %0 {offsets = [15, 0], sizes = [1, 32], strides = [1, 1]} : vector<24x128xf32> to vector<1x32xf32>
    %305 = vector.broadcast %234 : vector<32x1xf32> to vector<32x32xf32>
    %306 = vector.broadcast %304 : vector<1x32xf32> to vector<32x32xf32>
    %307 = arith.mulf %305, %306 : vector<32x32xf32>
    %308 = arith.addf %303, %307 : vector<32x32xf32>
    %309 = vector.extract_strided_slice %0 {offsets = [16, 0], sizes = [1, 32], strides = [1, 1]} : vector<24x128xf32> to vector<1x32xf32>
    %310 = vector.broadcast %249 : vector<32x1xf32> to vector<32x32xf32>
    %311 = vector.broadcast %309 : vector<1x32xf32> to vector<32x32xf32>
    %312 = arith.mulf %310, %311 : vector<32x32xf32>
    %313 = arith.addf %308, %312 : vector<32x32xf32>
    %314 = vector.extract_strided_slice %0 {offsets = [17, 0], sizes = [1, 32], strides = [1, 1]} : vector<24x128xf32> to vector<1x32xf32>
    %315 = vector.broadcast %264 : vector<32x1xf32> to vector<32x32xf32>
    %316 = vector.broadcast %314 : vector<1x32xf32> to vector<32x32xf32>
    %317 = arith.mulf %315, %316 : vector<32x32xf32>
    %318 = arith.addf %313, %317 : vector<32x32xf32>
    %319 = vector.extract_strided_slice %0 {offsets = [18, 0], sizes = [1, 32], strides = [1, 1]} : vector<24x128xf32> to vector<1x32xf32>
    %320 = vector.broadcast %279 : vector<32x1xf32> to vector<32x32xf32>
    %321 = vector.broadcast %319 : vector<1x32xf32> to vector<32x32xf32>
    %322 = arith.mulf %320, %321 : vector<32x32xf32>
    %323 = arith.addf %318, %322 : vector<32x32xf32>
    %324 = arith.addf %201, %323 : vector<32x32xf32>
    %cst_89 = arith.constant dense<0.000000e+00> : vector<32xf32>
    %325 = vector.multi_reduction <add>, %324, %cst_89 [1] : vector<32x32xf32> to vector<32xf32>
    %326 = vector.shape_cast %325 : vector<32xf32> to vector<32x1xf32>
    %cst_90 = arith.constant 3.200000e+01 : f32
    %327 = vector.broadcast %cst_90 : f32 to vector<32x1xf32>
    %328 = arith.divf %326, %327 : vector<32x1xf32>
    %329 = vector.broadcast %328 : vector<32x1xf32> to vector<32x32xf32>
    %330 = arith.subf %324, %329 : vector<32x32xf32>
    %331 = arith.mulf %330, %330 : vector<32x32xf32>
    %cst_91 = arith.constant dense<0.000000e+00> : vector<32xf32>
    %332 = vector.multi_reduction <add>, %331, %cst_91 [1] : vector<32x32xf32> to vector<32xf32>
    %333 = vector.shape_cast %332 : vector<32xf32> to vector<32x1xf32>
    %cst_92 = arith.constant 3.200000e+01 : f32
    %334 = vector.broadcast %cst_92 : f32 to vector<32x1xf32>
    %335 = arith.divf %333, %334 : vector<32x1xf32>
    %336 = vector.broadcast %328 : vector<32x1xf32> to vector<32x32xf32>
    %337 = arith.subf %324, %336 : vector<32x32xf32>
    %cst_93 = arith.constant 9.99999974E-6 : f32
    %338 = vector.broadcast %cst_93 : f32 to vector<32x1xf32>
    %339 = arith.addf %335, %338 : vector<32x1xf32>
    %340 = math.rsqrt %339 : vector<32x1xf32>
    %341 = vector.broadcast %340 : vector<32x1xf32> to vector<32x32xf32>
    %342 = arith.mulf %337, %341 : vector<32x32xf32>
    %343 = vector.broadcast %134 : vector<1x32xf32> to vector<32x32xf32>
    %344 = arith.mulf %342, %343 : vector<32x32xf32>
    %345 = vector.broadcast %135 : vector<1x32xf32> to vector<32x32xf32>
    %346 = arith.addf %344, %345 : vector<32x32xf32>
    %c0_94 = arith.constant 0 : index
    %c0_95 = arith.constant 0 : index
    %347 = vector.load %arg3[%c0_94, %c0_95] : memref<32x1xf32, #tpu.memory_space<vmem>>, vector<32x1xf32>
    %cst_96 = arith.constant 5.000000e-01 : f32
    %348 = vector.broadcast %cst_96 : f32 to vector<32x1xf32>
    %349 = arith.cmpf ogt, %347, %348 : vector<32x1xf32>
    %cst_97 = arith.constant 0.000000e+00 : f32
    %350 = vector.shape_cast %349 : vector<32x1xi1> to vector<32x1xi1>
    %351 = vector.broadcast %350 : vector<32x1xi1> to vector<32x32xi1>
    %352 = vector.broadcast %cst_97 : f32 to vector<32x32xf32>
    %353 = arith.select %351, %352, %346 : vector<32x32xi1>, vector<32x32xf32>
    %c0_98 = arith.constant 0 : index
    %c0_99 = arith.constant 0 : index
    %354 = vector.load %arg18[%c0_98, %c0_99] : memref<32x32xf32, #tpu.memory_space<vmem>>, vector<32x32xf32>
    tpu.vector_store %arg18[%c0_98, %c0_99], %353 {strides = array<i32>} : memref<32x32xf32, #tpu.memory_space<vmem>>, vector<32x32xf32>,
    return
  }
  func.func @transform_0(%arg0: i32) -> (i32, i32) {
    %c0_i32 = arith.constant 0 : i32
    %c0_i32_0 = arith.constant 0 : i32
    return %arg0, %c0_i32 : i32, i32
  }
  func.func @transform_1(%arg0: i32) -> (i32, i32) {
    %c0_i32 = arith.constant 0 : i32
    %c0_i32_0 = arith.constant 0 : i32
    return %arg0, %c0_i32 : i32, i32
  }
  func.func @transform_2(%arg0: i32) -> (i32, i32) {
    %c0_i32 = arith.constant 0 : i32
    %c0_i32_0 = arith.constant 0 : i32
    return %arg0, %c0_i32 : i32, i32
  }
  func.func @transform_3(%arg0: i32) -> (i32, i32, i32) {
    %c0_i32 = arith.constant 0 : i32
    %c0_i32_0 = arith.constant 0 : i32
    %c0_i32_1 = arith.constant 0 : i32
    return %arg0, %c0_i32, %c0_i32_0 : i32, i32, i32
  }
  func.func @transform_4(%arg0: i32) -> (i32, i32) {
    %c0_i32 = arith.constant 0 : i32
    %c0_i32_0 = arith.constant 0 : i32
    %c0_i32_1 = arith.constant 0 : i32
    return %c0_i32, %c0_i32_0 : i32, i32
  }
  func.func @transform_5(%arg0: i32) -> (i32, i32) {
    %c0_i32 = arith.constant 0 : i32
    %c0_i32_0 = arith.constant 0 : i32
    %c0_i32_1 = arith.constant 0 : i32
    return %c0_i32, %c0_i32_0 : i32, i32
  }
  func.func @transform_6(%arg0: i32) -> (i32, i32) {
    %c0_i32 = arith.constant 0 : i32
    %c0_i32_0 = arith.constant 0 : i32
    %c0_i32_1 = arith.constant 0 : i32
    return %c0_i32, %c0_i32_0 : i32, i32
  }
  func.func @transform_7(%arg0: i32) -> (i32, i32) {
    %c0_i32 = arith.constant 0 : i32
    %c0_i32_0 = arith.constant 0 : i32
    %c0_i32_1 = arith.constant 0 : i32
    return %c0_i32, %c0_i32_0 : i32, i32
  }
  func.func @transform_8(%arg0: i32) -> (i32, i32, i32) {
    %c0_i32 = arith.constant 0 : i32
    %c0_i32_0 = arith.constant 0 : i32
    %c0_i32_1 = arith.constant 0 : i32
    %c0_i32_2 = arith.constant 0 : i32
    return %c0_i32, %c0_i32_0, %c0_i32_1 : i32, i32, i32
  }
  func.func @transform_9(%arg0: i32) -> (i32, i32, i32) {
    %c0_i32 = arith.constant 0 : i32
    %c0_i32_0 = arith.constant 0 : i32
    %c0_i32_1 = arith.constant 0 : i32
    %c0_i32_2 = arith.constant 0 : i32
    return %c0_i32, %c0_i32_0, %c0_i32_1 : i32, i32, i32
  }
  func.func @transform_10(%arg0: i32) -> (i32, i32, i32) {
    %c0_i32 = arith.constant 0 : i32
    %c0_i32_0 = arith.constant 0 : i32
    %c0_i32_1 = arith.constant 0 : i32
    %c0_i32_2 = arith.constant 0 : i32
    return %c0_i32, %c0_i32_0, %c0_i32_1 : i32, i32, i32
  }
  func.func @transform_11(%arg0: i32) -> (i32, i32, i32) {
    %c0_i32 = arith.constant 0 : i32
    %c0_i32_0 = arith.constant 0 : i32
    %c0_i32_1 = arith.constant 0 : i32
    %c0_i32_2 = arith.constant 0 : i32
    return %c0_i32, %c0_i32_0, %c0_i32_1 : i32, i32, i32
  }
  func.func @transform_12(%arg0: i32) -> (i32, i32, i32) {
    %c0_i32 = arith.constant 0 : i32
    %c0_i32_0 = arith.constant 0 : i32
    %c0_i32_1 = arith.constant 0 : i32
    %c0_i32_2 = arith.constant 0 : i32
    return %c0_i32, %c0_i32_0, %c0_i32_1 : i32, i32, i32
  }
  func.func @transform_13(%arg0: i32) -> (i32, i32) {
    %c0_i32 = arith.constant 0 : i32
    %c0_i32_0 = arith.constant 0 : i32
    %c0_i32_1 = arith.constant 0 : i32
    return %c0_i32, %c0_i32_0 : i32, i32
  }
  func.func @transform_14(%arg0: i32) -> (i32, i32) {
    %c0_i32 = arith.constant 0 : i32
    %c0_i32_0 = arith.constant 0 : i32
    %c0_i32_1 = arith.constant 0 : i32
    return %c0_i32, %c0_i32_0 : i32, i32
  }
  func.func @transform_15(%arg0: i32) -> (i32, i32) {
    %c0_i32 = arith.constant 0 : i32
    %c0_i32_0 = arith.constant 0 : i32
    %c0_i32_1 = arith.constant 0 : i32
    return %c0_i32, %c0_i32_0 : i32, i32
  }
  func.func @transform_16(%arg0: i32) -> (i32, i32) {
    %c0_i32 = arith.constant 0 : i32
    %c0_i32_0 = arith.constant 0 : i32
    %c0_i32_1 = arith.constant 0 : i32
    return %c0_i32, %c0_i32_0 : i32, i32
  }
  func.func @transform_17(%arg0: i32) -> (i32, i32) {
    %c0_i32 = arith.constant 0 : i32
    %c0_i32_0 = arith.constant 0 : i32
    return %arg0, %c0_i32 : i32, i32
  }
}

</mosaic_0001>

<bundles_post_ra>
// kernel: _lambda_.1
= control target key start
LH: loop header
LB: loop body
LE: loop exit
PB: predicated region body
PF: predicated region fallthrough
CT: control target
= control target key end

     0   :  { %s15374_s0 = inlined_call_operand.vmem [shape: bf16[64,256], index: 0, kind: input, shape index: {}]   ;;  %s15375_s1 = inlined_call_operand.vmem [shape: f32[64,32], index: 1, kind: input, shape index: {}]   ;;  %s15376_s2 = inlined_call_operand.vmem [shape: f32[64,1], index: 2, kind: input, shape index: {}]   ;;  %s15377_s3 = inlined_call_operand.vmem [shape: f32[2,1,32], index: 3, kind: input, shape index: {}]   ;;  %s15378_s4 = inlined_call_operand.vmem [shape: f32[128,32], index: 4, kind: input, shape index: {}]   ;;  %s15379_s5 = inlined_call_operand.vmem [shape: f32[128,32], index: 5, kind: input, shape index: {}]   ;;  %s15380_s6 = inlined_call_operand.hbm [shape: bf16[256,32], index: 6, kind: input, shape index: {}]   ;;  %s15381_s7 = inlined_call_operand.vmem [shape: f32[24,128], index: 7, kind: input, shape index: {}]   ;;  %s15382_s8 = inlined_call_operand.hbm [shape: bf16[2,32,96], index: 8, kind: input, shape index: {}]   ;;  %s15383_s9 = inlined_call_operand.hbm [shape: bf16[2,32,32], index: 9, kind: input, shape index: {}]   ;;  %s15384_s10 = inlined_call_operand.vmem [shape: bf16[1,32,1024], index: 10, kind: input, shape index: {}]   ;;  %s15385_s11 = inlined_call_operand.vmem [shape: f32[1,1,1024], index: 11, kind: input, shape index: {}]   ;;  %s15386_s12 = inlined_call_operand.hbm [shape: bf16[1,1024,32], index: 12, kind: input, shape index: {}]   ;;  %s15387_s13 = inlined_call_operand.hbm [shape: f32[32,4], index: 13, kind: input, shape index: {}]   ;;  %s15388_s14 = inlined_call_operand.vmem [shape: bf16[32,4096], index: 14, kind: input, shape index: {}]   ;;  %s15389_s15 = inlined_call_operand.vmem [shape: f32[1,4096], index: 15, kind: input, shape index: {}]   ;;  %s15390_s16 = inlined_call_operand.vmem [shape: bf16[4096,32], index: 16, kind: input, shape index: {}]   ;;  %s15391_s17 = inlined_call_operand.hbm [shape: f32[64,32], index: 17, kind: output, shape index: {}]  }
   0x1   :  { %15428 = sst [smem:[#allocation131_spill]] %s15374_s0 }
   0x2   :  { %15429 = sst [smem:[#allocation132_spill]] %s15375_s1 }
   0x3   :  { %15430 = sst [smem:[#allocation133_spill]] %s15376_s2 }
   0x4   :  { %15431 = sst [smem:[#allocation134_spill]] %s15382_s8 }
   0x5   :  { %15432 = sst [smem:[#allocation135_spill]] %s15389_s15 }
   0x6   :  { %15433 = sst [smem:[#allocation136_spill]] %s15391_s17 }
   0x7   :  { %22 = vsyncpa [#allocation3], 0 }
   0x8   :  { %23 = vsyncpa [#allocation6], 0 }
   0x9   :  { %24 = vsyncpa [#allocation9], 0 }
   0xa   :  { %25 = vsyncpa [#allocation4], 0 }
   0xb   :  { %27 = vsyncpa [#allocation4 + $0x1], 0  ;;  %s11514_s24 = smov 0   ;;  %s11516_s25 = smov 0  }
   0xc   :  { %s11518_s26 = smov 0   ;;  %s11520_s27 = smov 0  }
   0xd LB: > { %15434 = sst [smem:[#allocation16_spill]] %s11387_s24  ;;  %s11535_s28 = sadd.s32 4294967295, %s11399_s27   ;;  %s11399_s27 = sphi %s11520_s27, %s15705_s27   ;;  %s11395_s26 = sphi %s11518_s26, %s15708_s26   ;;  %s11391_s25 = sphi %s11516_s25, %s15707_s25   ;;  %s11387_s24 = sphi %s11514_s24, %s15706_s24  }
   0xe   : > { %15435 = sst [smem:[#allocation17_spill]] %s11391_s25  ;;  %s9045_s29 = sadd.s32 4294967294, %s11399_s27  }
   0xf   : > { %15436 = sst [smem:[#allocation18_spill]] %s11395_s26  ;;  %s11539_s0 = sadd.s32 1, %s11399_s27  }
  0x10   : > { %15437 = sst [smem:[#allocation19_spill]] %s11399_s27  ;;  %s417_s30 = sadd.s32 1, %s11395_s26 }
  0x11   : > { %15438 = sst [smem:[#allocation20_spill]] %s11539_s0  ;;  %s414_s18 = ssub.s32 %s11399_s27, %s11539_s0 }
  0x12   : > { %p427_p0 = scmp.ne.s32.totalorder %s11395_s26, %s11391_s25  ;;  %p415_p1 = scmp.eq.s32.totalorder %s414_s18, 0 }
  0x13   : > { %p428_p2 = scmp.eq.s32.totalorder %s11535_s28, 1  ;;  %p433_p3 = scmp.ne.s32.totalorder %s11391_s25, %s11387_s24 }
  0x14   : > { %p434_p4 = scmp.eq.s32.totalorder %s9045_s29, 1  ;;  %p9046_p7 = scmp.ge.s32.totalorder %s11399_s27, 1 }
  0x15   : > { %s11550_s19 = scalar_select %p415_p1, %s11395_s26, %s417_s30  }
  0x16   : > { %p11552_p5 = por %p428_p2, %p427_p0  ;;  %p11556_p6 = por %p434_p4, %p433_p3 }
  0x17   : > { %15439 = sst [smem:[#allocation21_spill]] %s11550_s19  ;;  %p441_p8 = scmp.lt.s32.totalorder %s11399_s27, 3 }
  0x18   : > { %s15440_s1 = scalar_select %p11552_p5, 1, 0 }
  0x19   : > { %s15442_s20 = scalar_select %p11556_p6, 1, 0 }
  0x1a   : > { %15441 = sst [smem:[#allocation22_spill]] %s15440_s1  ;;  %p15399_p9 = scmp.eq.s32.totalorder %s11535_s28, 0 }
  0x1b   : > { %15443 = sst [smem:[#allocation23_spill]] %s15442_s20  ;;  %p11563_p10 = pnand %p9046_p7, %p441_p8 }
  0x1c   : > { %s11401_s22 = smov [#allocation5]   ;;  %s11402_s30 = smov [#allocation8]  }
  0x1d   : > { %s15444_s21 = scalar_select %p11563_p10, 1, 0 }
  0x1e   : > { %p10422_p11 = pneg %p11563_p10  ;;  %s475_s23 = sshll.u32 %s11401_s22, 4  ;;  %s11569_s23 = int_to_ptr.vmem [resolvable:$true] %s475_s23 }
  0x1f   : > { %s507_s18 = sshll.u32 %s11402_s30, 4  ;;  %s11403_s19 = smov [#allocation2]   ;;  %s11577_s18 = int_to_ptr.vmem [resolvable:$true] %s507_s18 }
  0x20   : > { %p11573_p12 = pnand %p15399_p9, %p10422_p11  ;;  %s11579_s26 = sshll.u32 %s11403_s19, 4  ;;  %s460_s26 = int_to_ptr.vmem [resolvable:$true] %s11579_s26 }
  0x21   : > { %s15446_s8 = sld [smem:[#allocation134_spill]] }
  0x22   : > { %p11589_p0 = pneg %p11573_p12 }
  0x27   : > { %s11185_s24 = scalar_lea.hbm %s15446_s8, 512 }
  0x28   : > { %p11186_p13 = scmp.ne.s32.totalorder %s15446_s8, %s11185_s24  ;;  %p11192_p3 = scmp.lt.u32.totalorder %s11185_s24, %s15446_s8 }
  0x2a   : > { %p11188_p1 = pnand %p11589_p0, %p11186_p13 }
  0x2c   : > { %p11189_p2 = pneg %p11188_p1 }
  0x2e   : > { %p11194_p4 = pnand %p11192_p3, %p11189_p2 }
  0x30   : > { %11197 = shalt.err (!%p11194_p4)
}
  0x31   : > { %s11198_s27 = scalar_lea.vmem %s11569_s23, 512  ;;  %p11206_p9 = scmp.lt.s32.totalorder %s11569_s23, %s11569_s23 }
  0x32   : > { %p11199_p7 = scmp.ne.s32.totalorder %s11569_s23, %s11198_s27  ;;  %p11207_p6 = scmp.lt.s32.totalorder %s11198_s27, %s11198_s27 }
  0x34   : > { %p11201_p8 = pnand %p11199_p7, %p11589_p0  ;;  %p11208_p13 = por %p11207_p6, %p11206_p9 }
  0x36   : > { %p11202_p11 = pneg %p11201_p8 }
  0x38   : > { %p11209_p1 = pnand %p11208_p13, %p11202_p11 }
  0x3a   : > { %11212 = shalt.err (!%p11209_p1)
}
  0x3b   : > { %s11404_s0 = smov 64   ;;  %s11405_s24 = smov 4  }
  0x3c   : > { %10428 = dma.hbm_to_vmem [thread:$0]  (!%p11573_p12), %s15446_s8, 512, %s11569_s23, [#allocation6], %s11404_s0, %s11404_s0, %s11405_s24  }
  0x3d   : > { %s11213_s27 = scalar_lea.hbm %s15386_s12, 8192 }
  0x3e   : > { %p11214_p6 = scmp.ne.s32.totalorder %s15386_s12, %s11213_s27  ;;  %p11220_p3 = scmp.lt.u32.totalorder %s11213_s27, %s15386_s12 }
  0x40   : > { %p11216_p9 = pnand %p11214_p6, %p11589_p0 }
  0x42   : > { %p11217_p2 = pneg %p11216_p9 }
  0x44   : > { %p11222_p4 = pnand %p11220_p3, %p11217_p2 }
  0x46   : > { %11225 = shalt.err (!%p11222_p4)
}
  0x47   : > { %s11226_s23 = scalar_lea.vmem %s11577_s18, 8192  ;;  %p11234_p13 = scmp.lt.s32.totalorder %s11577_s18, %s11577_s18 }
  0x48   : > { %p11227_p7 = scmp.ne.s32.totalorder %s11577_s18, %s11226_s23  ;;  %p11235_p1 = scmp.lt.s32.totalorder %s11226_s23, %s11226_s23 }
  0x4a   : > { %p11229_p8 = pnand %p11227_p7, %p11589_p0  ;;  %p11236_p6 = por %p11235_p1, %p11234_p13 }
  0x4c   : > { %p11230_p11 = pneg %p11229_p8 }
  0x4e   : > { %p11237_p9 = pnand %p11236_p6, %p11230_p11 }
  0x50   : > { %11240 = shalt.err (!%p11237_p9)
}
  0x51   : > { %10434 = dma.hbm_to_vmem [thread:$0]  (!%p11573_p12), %s15386_s12, 8192, %s11577_s18, [#allocation9], %s11404_s0, %s11404_s0, %s11405_s24  }
  0x52   : > { %s11241_s20 = scalar_lea.hbm %s15380_s6, 2048 }
  0x53   : > { %p11242_p2 = scmp.ne.s32.totalorder %s15380_s6, %s11241_s20  ;;  %p11248_p7 = scmp.lt.u32.totalorder %s11241_s20, %s15380_s6 }
  0x55   : > { %p11244_p3 = pnand %p11242_p2, %p11589_p0 }
  0x57   : > { %p11245_p4 = pneg %p11244_p3 }
  0x59   : > { %p11250_p8 = pnand %p11248_p7, %p11245_p4 }
  0x5b   : > { %11253 = shalt.err (!%p11250_p8)
}
  0x5c   : > { %s11254_s23 = scalar_lea.vmem %s460_s26, 2048  ;;  %p11262_p6 = scmp.lt.s32.totalorder %s460_s26, %s460_s26 }
  0x5d   : > { %p11255_p11 = scmp.ne.s32.totalorder %s460_s26, %s11254_s23  ;;  %p11263_p9 = scmp.lt.s32.totalorder %s11254_s23, %s11254_s23 }
  0x5f   : > { %p11257_p13 = pnand %p11255_p11, %p11589_p0  ;;  %p11264_p5 = por %p11263_p9, %p11262_p6 }
  0x61   : > { %p11258_p1 = pneg %p11257_p13 }
  0x63   : > { %p11265_p10 = pnand %p11264_p5, %p11258_p1 }
  0x65   : > { %11268 = shalt.err (!%p11265_p10)
}
  0x66   : > { %10425 = dma.hbm_to_vmem [thread:$0]  (!%p11573_p12), %s15380_s6, 2048, %s460_s26, [#allocation3], %s11404_s0, %s11404_s0, %s11405_s24  }
  0x67   : > { %s11406_s15 = smov [#allocation7]   ;;  %s11407_s1 = smov [#allocation10]  }
  0x68   : > { %s488_s25 = sshll.u32 %s11406_s15, 4  ;;  %s520_s20 = sshll.u32 %s11407_s1, 4  ;;  %s489_s25 = int_to_ptr.vmem [resolvable:$true] %s488_s25  ;;  %s521_s20 = int_to_ptr.vmem [resolvable:$true] %s520_s20 }
  0x69   : > { %s11269_s19 = scalar_lea.hbm %s15383_s9, 512 }
  0x6a   : > { %p11270_p5 = scmp.ne.s32.totalorder %s15383_s9, %s11269_s19  ;;  %p11276_p3 = scmp.lt.u32.totalorder %s11269_s19, %s15383_s9 }
  0x6c   : > { %p11272_p10 = pnand %p11270_p5, %p11589_p0 }
  0x6e   : > { %p11273_p2 = pneg %p11272_p10 }
  0x70   : > { %p11278_p4 = pnand %p11276_p3, %p11273_p2 }
  0x72   : > { %11281 = shalt.err (!%p11278_p4)
}
  0x73   : > { %s11282_s26 = scalar_lea.vmem %s489_s25, 512  ;;  %p11290_p13 = scmp.lt.s32.totalorder %s489_s25, %s489_s25 }
  0x74   : > { %p11283_p7 = scmp.ne.s32.totalorder %s489_s25, %s11282_s26  ;;  %p11291_p1 = scmp.lt.s32.totalorder %s11282_s26, %s11282_s26 }
  0x76   : > { %p11285_p8 = pnand %p11283_p7, %p11589_p0  ;;  %p11292_p6 = por %p11291_p1, %p11290_p13 }
  0x78   : > { %p11286_p11 = pneg %p11285_p8 }
  0x7a   : > { %p11293_p9 = pnand %p11292_p6, %p11286_p11 }
  0x7c   : > { %11296 = shalt.err (!%p11293_p9)
}
  0x7d   : > { %10431 = dma.hbm_to_vmem [thread:$0]  (!%p11573_p12), %s15383_s9, 512, %s489_s25, [#allocation6], %s11404_s0, %s11404_s0, %s11405_s24  }
  0x7e   : > { %s11297_s22 = scalar_lea.hbm %s15387_s13, 512 }
  0x7f   : > { %p11298_p5 = scmp.ne.s32.totalorder %s15387_s13, %s11297_s22  ;;  %p11304_p3 = scmp.lt.u32.totalorder %s11297_s22, %s15387_s13 }
  0x81   : > { %p11300_p10 = pnand %p11298_p5, %p11589_p0 }
  0x83   : > { %p11301_p2 = pneg %p11300_p10 }
  0x85   : > { %p11306_p4 = pnand %p11304_p3, %p11301_p2 }
  0x87   : > { %11309 = shalt.err (!%p11306_p4)
}
  0x88   : > { %s11310_s18 = scalar_lea.vmem %s521_s20, 512  ;;  %p11318_p13 = scmp.lt.s32.totalorder %s521_s20, %s521_s20 }
  0x89   : > { %p11311_p7 = scmp.ne.s32.totalorder %s521_s20, %s11310_s18  ;;  %p11319_p1 = scmp.lt.s32.totalorder %s11310_s18, %s11310_s18 }
  0x8b   : > { %p11313_p8 = pnand %p11311_p7, %p11589_p0  ;;  %p11320_p6 = por %p11319_p1, %p11318_p13 }
  0x8d   : > { %p11314_p11 = pneg %p11313_p8 }
  0x8f   : > { %p11321_p9 = pnand %p11320_p6, %p11314_p11 }
  0x91   : > { %11324 = shalt.err (!%p11321_p9)
}
  0x92   : > { %s11408_s0 = smov 128   ;;  %s11409_s24 = smov 8  }
  0x93   : > { %10437 = dma.hbm_to_vmem [thread:$0]  (!%p11573_p12), %s15387_s13, 512, %s521_s20, [#allocation9], %s11408_s0, %s11408_s0, %s11409_s24  }
  0x94   : > { %p15448_p5 = scmp.ne.s32.totalorder %s15444_s21, 0 }
  0x96   : > { %579 = sbr.rel (%p15448_p5) target bundleno = 6540 (0x198c), region = 88 }
  0x9d   : > { %p15449_p10 = scmp.eq.s32.totalorder %s11535_s28, 0 }
  0x9f   : > { %11370 = dma.done.wait (%p15449_p10), [#allocation3], 2048   ;;  %p15450_p0 = pmov %p15449_p10 }
  0xa1   : > { %11372 = vsyncadd (%p15450_p0), [#allocation3], 4294965248  ;;  %p15451_p2 = pmov %p15450_p0 }
  0xa2   : > { %p15452_p3 = pmov %p15450_p0 }
  0xa3   : > { %11374 = dma.done.wait (%p15451_p2), [#allocation6], 1024  }
  0xa4   : > { %11376 = vsyncadd (%p15452_p3), [#allocation6], 4294966272  ;;  %p15453_p4 = pmov %p15450_p0 }
  0xa5   : > { %p15454_p12 = pmov %p15450_p0 }
  0xa6   : > { %11378 = dma.done.wait (%p15453_p4), [#allocation9], 8704  }
  0xa7   : > { %11380 = vsyncadd (%p15454_p12), [#allocation9], 4294958592  ;;  %v10591_v0 = vld [vmem:[#allocation2 + $0x40] sm:$0xff]   ;;  %s9060_s17 = sshll.u32 %s11535_s28, 2  ;;  %v10593_v2 = vld [vmem:[#allocation2 + $0x48] sm:$0xff]   ;;  %s15455_s8 = sld [smem:[#allocation131_spill]]  ;;  %v759_v22 = vlaneseq }
  0xa8   : > { %v10592_v1 = vld [vmem:[#allocation2] sm:$0xff]   ;;  %9610 = vmatprep.subr.bf16.mxu0 %v10591_v0  ;;  %v10594_v3 = vld [vmem:[#allocation2 + $0x8] sm:$0xff]   ;;  %p662_p7 = scmp.lt.s32.totalorder %s9060_s17, 7  ;;  %v10595_v4 = vld [vmem:[#allocation2 + $0x50] sm:$0xff]   ;;  %s15456_s19 = sld [smem:[#allocation132_spill]]  ;;  %vm958_vm0 = vcmask 261120  }
  0xa9   : > { %9611 = vmatpush3.bf16.msra.mxu0 %v10592_v1  ;;  %v10596_v5 = vld [vmem:[#allocation2 + $0x10] sm:$0xff]   ;;  %v10597_v6 = vld [vmem:[#allocation2 + $0x58] sm:$0xff]   ;;  %v10599_v8 = vld [vmem:[#allocation2 + $0x60] sm:$0xff]   ;;  %v11721_v23 = vshrl.u32 %v759_v22, 7  ;;  %p680_p8 = scmp.lt.s32.totalorder %s11535_s28, 1  ;;  %s11412_s24 = smov 64  }
  0xaa   : > { %9612 = vmatprep.subr.bf16.mxu0 %v10593_v2  ;;  %s15710_s17 = smov (!%p662_p7, %s9060_s17), 7  ;;  %v10598_v7 = vld [vmem:[#allocation2 + $0x18] sm:$0xff]   ;;  %v10600_v9 = vld [vmem:[#allocation2 + $0x20] sm:$0xff]   ;;  %v10601_v10 = vld [vmem:[#allocation2 + $0x68] sm:$0xff]   ;;  %vm3721_vm2 = vcmask 31744   ;;  %s11414_s20 = smov 2  }
  0xab   : > { %s11715_s21 = sshll.u32 %s15710_s17, 3  ;;  %v10602_v12 = vld [vmem:[#allocation2 + $0x28] sm:$0xff]   ;;  %v10603_v13 = vld [vmem:[#allocation2 + $0x70] sm:$0xff]   ;;  %v10605_v15 = vld [vmem:[#allocation2 + $0x78] sm:$0xff]   ;;  %v11724_v24 = vsub.s32 0, %v11721_v23  ;;  %v11752_v53 = vsub.s32 1, %v11721_v23 }
  0xac   : > { %v10604_v14 = vld [vmem:[#allocation2 + $0x30] sm:$0xff]   ;;  %v10606_v16 = vld [vmem:[#allocation2 + $0x38] sm:$0xff]   ;;  %v10613_v20 = vld [vmem:[#allocation5] sm:$0xff]   ;;  %s11418_s15 = smov 127   ;;  %s11419_s1 = smov 126  }
  0xad   : > { %9613 = vmatpush3.bf16.msra.mxu0 %v10594_v3  ;;  %s666_s2 = scalar_lea.vmem %s15455_s8, %s11715_s21  ;;  %10262 = vmatprep.subr.bf16.mxu1 %v10613_v20  ;;  %v10614_v21 = vld [vmem:[#allocation5 + $0x8] sm:$0xff]   ;;  %v11729_v25 = vld [vmem:[%s15381_s7] sm:$0xff]  ;;  %v11759_v55 = vld [vmem:[%s15379_s5 + $0x10] sm:$0xff]  ;;  %s11415_s8 = smov 3  }
  0xae   : > { %9614 = vmatprep.subr.bf16.mxu0 %v10595_v4  ;;  %v10609_v11 = vld [vmem:[%s666_s2 + $0x4] ss:$8 sps:$4 sm:$0xff]   ;;  %v10607_v17 = vld [vmem:[%s666_s2] ss:$8 sps:$4 sm:$0xff]   ;;  %v10610_v18 = vld [vmem:[%s666_s2 + $0x14] ss:$8 sps:$4 sm:$0xff]   ;;  %10263 = vmatpush3.bf16.msra.mxu1 %v10613_v20  ;;  %v762_v27 = vrot.slane %v11729_v25, %v11724_v24  ;;  %s672_s27 = scalar_lea.vmem %s15456_s19, %s11715_s21  ;;  %v945_v54 = vrot.slane %v11729_v25, %v11752_v53 }
  0xaf   : > { %911 = vmatprep.mubr.bf16.mxu0 %v10609_v11  ;;  %v10612_v19 = vld [vmem:[%s666_s2 + $0x10] ss:$8 sps:$4 sm:$0xff]   ;;  %10264 = vmatprep.subr.bf16.mxu1 %v10614_v21  ;;  %v928_v34 = vld [vmem:[%s672_s27] sm:$0xff]  ;;  %v929_v35 = vld [vmem:[%s672_s27 + $0x8] sm:$0xff]  ;;  %s11410_s19 = smov 96   ;;  %s11416_s2 = smov 1  }
  0xb0   : > { %v930_v47 = vld [vmem:[%s672_s27 + $0x10] sm:$0xff]  ;;  %v931_v48 = vld [vmem:[%s672_s27 + $0x18] sm:$0xff]  ;;  %v11774_v61 = vld [vmem:[%s15379_s5] sm:$0xff]  ;;  %s681_s27 = scalar_select %p680_p8, %s11535_s28, 1 }
  0xb1   : > { %9615 = vmatpush3.bf16.msra.mxu0 %v10596_v5  ;;  %v11764_v57 = vld [vmem:[%s15379_s5 + $0x30] sm:$0xff]  ;;  %v11779_v62 = vld [vmem:[%s15379_s5 + $0x20] sm:$0xff]  ;;  %v11789_v1 = vld [vmem:[%s15379_s5 + $0x18] sm:$0xff]  ;;  %s15566_s29 = sld [smem:[#allocation135_spill]]  ;;  %s15695_s26 = sld [smem:[#allocation133_spill]] }
  0xb2   : > { %9616 = vmatprep.subr.bf16.mxu0 %v10597_v6  ;;  %10265 = vmatpush3.bf16.msra.mxu1 %v10614_v21  ;;  %v11769_v58 = vld [vmem:[%s15379_s5 + $0x50] sm:$0xff]  ;;  %v11784_v63 = vld [vmem:[%s15379_s5 + $0x40] sm:$0xff]  ;;  %v11794_v3 = vld [vmem:[%s15379_s5 + $0x38] sm:$0xff]  ;;  %s682_s0 = scalar_lea.vmem %s15377_s3, %s681_s27  ;;  %s11420_s27 = smov 125  }
  0xb3   : > { %v11799_v4 = vld [vmem:[%s15379_s5 + $0x58] sm:$0xff]  ;;  %v11816_v11 = vld [vmem:[%s15379_s5 + $0x48] sm:$0xff]  ;;  %s15698_s30 = sld [smem:[#allocation22_spill]]  ;;  %s9609_s23 = sshll.u32 %s11535_s28, 9 }
  0xb4   : > { %v11835_v22 = vld [vmem:[%s15379_s5 + $0x68] sm:$0xff]  ;;  %s11421_s25 = smov [#allocation11]  }
  0xb5   : > { %9617 = vmatpush3.bf16.msra.mxu0 %v10598_v7 }
  0xb6   : > { %9618 = vmatprep.subr.bf16.mxu0 %v10599_v8  ;;  %v11805_v8 = vld [vmem:[%s15379_s5 + $0x8] sm:$0xff] }
  0xb7   : > { %s15297_s17 = scalar_lea.vmem %s15695_s26, %s11715_s21  ;;  %s15697_s21 = sld [smem:[#allocation17_spill]] }
  0xb8   : > { %s11329_s26 = sshll.u32 %s11421_s25, 4  ;;  %s11330_s26 = int_to_ptr.vmem [resolvable:$false] %s11329_s26 }
  0xb9   : > { %9619 = vmatpush3.bf16.msra.mxu0 %v10600_v9  ;;  %v11810_v9 = vld [vmem:[%s15379_s5 + $0x28] sm:$0xff]  ;;  %p15700_p13 = scmp.ne.s32.totalorder %s15698_s30, 0 }
  0xba   : > { %9620 = vmatprep.subr.bf16.mxu0 %v10601_v10 }
  0xbd   : > { %9621 = vmatpush3.bf16.msra.mxu0 %v10602_v12 }
  0xbe   : > { %9622 = vmatprep.subr.bf16.mxu0 %v10603_v13 }
  0xc1   : > { %9623 = vmatpush3.bf16.msra.mxu0 %v10604_v14 }
  0xc2   : > { %9624 = vmatprep.subr.bf16.mxu0 %v10605_v15 }
  0xc5   : > { %9625 = vmatpush3.bf16.msra.mxu0 %v10606_v16 }
  0xc8   : > { %912 = vmatmul.mubr.bf16.vlgmr.msra.gmra.mrb[0].mxu0 %v10607_v17  ;;  %v11825_v17 = vld [vmem:[%s15379_s5 + $0x60] sm:$0xff] }
  0xc9   : > { %919 = vmatprep.mubr.bf16.mxu0 %v10610_v18 }
  0xd0   : > { %920 = vmatmul.mubr.bf16.gmra.mrb[4].mxu0 %v10612_v19 }
 0x19b   : > { %v9626_v26 = vpop.f32.mrb[0].mxu0 }
 0x19c   : > { %v9627_v28 = vpop.f32.mrb[1].mxu0 }
 0x19d   : > { %v9628_v29 = vadd.f32 %v9627_v28, %v9626_v26  ;;  %v9629_v30 = vpop.f32.mrb[2].mxu0 }
 0x19e   : > { %v9630_v31 = vpop.f32.mrb[3].mxu0 }
 0x19f   : > { %v914_v32 = vadd.f32 %v9628_v29, %v762_v27  ;;  %v9631_v33 = vadd.f32 %v9630_v31, %v9629_v30  ;;  %v11845_v30 = vld [vmem:[%s15379_s5 + $0x70] sm:$0xff]  ;;  %v11850_v31 = vld [vmem:[%s15379_s5 + $0x78] sm:$0xff] }
 0x1a1   : > { %v917_v36 = vadd.f32 %v9631_v33, %v762_v27  ;;  %v11737_v38 = vadd.f32 %v928_v34, %v914_v32 }
 0x1a3   : > { %v9632_v37 = vpop.f32.mrb[4].mxu0  ;;  %v11739_v39 = vadd.f32 %v929_v35, %v917_v36 }
 0x1a4   : > { %v9633_v40 = vpop.f32.mrb[5].mxu0 }
 0x1a5   : > { %v9634_v41 = vadd.f32 %v9633_v40, %v9632_v37  ;;  %v9635_v42 = vpop.f32.mrb[6].mxu0  ;;  %v936_v43 = vpack.c.bf16 %v11739_v39, %v11737_v38 }
 0x1a6   : > { %v9636_v44 = vpop.f32.mrb[7].mxu0 }
 0x1a7   : > { %v922_v45 = vadd.f32 %v9634_v41, %v762_v27  ;;  %v9637_v46 = vadd.f32 %v9636_v44, %v9635_v42  ;;  %10266 = vmatprep.mubr.msk.bf16.mxu1 %vm958_vm0, %v936_v43 }
 0x1a9   : > { %v925_v49 = vadd.f32 %v9637_v46, %v762_v27  ;;  %v11744_v50 = vadd.f32 %v930_v47, %v922_v45 }
 0x1ab   : > { %v11746_v51 = vadd.f32 %v931_v48, %v925_v49 }
 0x1ad   : > { %v937_v52 = vpack.c.bf16 %v11746_v51, %v11744_v50 }
 0x1af   : > { %10267 = vmatmul.mubr.msk.bf16.vlgmr.msra.gmra.mrb[0].mxu1 %vm958_vm0, %v937_v52  ;;  %v720_v52 = vld [vmem:[%s682_s0] sm:$0x1]  ;;  %s15699_s0 = sld [smem:[#allocation136_spill]] }
 0x1b0   : > { %vm721_vm1 = vcmp.gt.f32.partialorder %v720_v52, 0.5 }
 0x282   : > { %v10268_v56 = vpop.f32.mrb[0].mxu1 }
 0x283   : > { %v1008_v59 = vadd.f32 %v10268_v56, %v945_v54  ;;  %v999_v60 = vpop.f32.mrb[1].mxu1 }
 0x284   : > { %v1000_v0 = vadd.f32 %v999_v60, %v945_v54  ;;  %v10269_v2 = vpop.f32.mrb[2].mxu1 }
 0x285   : > { %v1016_v5 = vmul.f32 %v1008_v59, %v11759_v55  ;;  %v1011_v6 = vadd.f32 %v10269_v2, %v945_v54  ;;  %v1002_v7 = vpop.f32.mrb[3].mxu1  ;;  %v1020_v10 = vmul.f32 %v1008_v59, %v11764_v57  ;;  %v1024_v12 = vmul.f32 %v1008_v59, %v11769_v58 }
 0x286   : > { %v1003_v13 = vadd.f32 %v1002_v7, %v945_v54  ;;  %v1014_v14 = vmul.f32 %v1000_v0, %v11774_v61  ;;  %v1018_v15 = vmul.f32 %v1000_v0, %v11779_v62  ;;  %v1022_v16 = vmul.f32 %v1000_v0, %v11784_v63 }
 0x287   : > { %v1017_v18 = vmul.f32 %v1011_v6, %v11789_v1  ;;  %v11828_v19 = vpack.c.bf16 %v1011_v6, %v1008_v59  ;;  %v1021_v20 = vmul.f32 %v1011_v6, %v11794_v3  ;;  %v1025_v21 = vmul.f32 %v1011_v6, %v11799_v4 }
 0x288   : > { %v11837_v26 = vpack.c.bf16 %v1003_v13, %v1000_v0  ;;  %v1015_v27 = vmul.f32 %v1003_v13, %v11805_v8  ;;  %v1019_v28 = vmul.f32 %v1003_v13, %v11810_v9  ;;  %v1023_v29 = vmul.f32 %v1003_v13, %v11816_v11 }
 0x289   : > { %v1031_v32 = vpack.c.bf16 %v1017_v18, %v1016_v5  ;;  %v1033_v33 = vpack.c.bf16 %v1021_v20, %v1020_v10  ;;  %v1035_v34 = vpack.c.bf16 %v1025_v21, %v1024_v12  ;;  %v1026_v35 = vmul.f32 %v1000_v0, %v11825_v17  ;;  %v706_v0 = vld [vmem:[%s15378_s4 + $0x10] sm:$0xff] }
 0x28a   : > { %1048 = vrot.lane.b32.xlu0 %v11837_v26, %s11410_s19  ;;  %v1030_v36 = vpack.c.bf16 %v1015_v27, %v1014_v14  ;;  %v1032_v37 = vpack.c.bf16 %v1019_v28, %v1018_v15  ;;  %v1034_v40 = vpack.c.bf16 %v1023_v29, %v1022_v16  ;;  %v1027_v41 = vmul.f32 %v1003_v13, %v11835_v22  ;;  %v707_v15 = vld [vmem:[%s15378_s4 + $0x18] sm:$0xff]  ;;  %v705_v28 = vld [vmem:[%s15378_s4 + $0x8] sm:$0xff] }
 0x28b   : > { %v1028_v42 = vmul.f32 %v1008_v59, %v11845_v30  ;;  %v1029_v43 = vmul.f32 %v1011_v6, %v11850_v31  ;;  %v15407_v54 = vmov 0.0   ;;  %v704_v6 = vld [vmem:[%s15378_s4] sm:$0xff] }
 0x28c   : > { %10274 = vmatprep.mubr.msk.bf16.mxu1 %vm958_vm0, %v1030_v36  ;;  %v1036_v44 = vpack.c.bf16 %v1027_v41, %v1026_v35  ;;  %v722_v56 = vsel %vm721_vm1, -1e+30, %v15407_v54 }
 0x28d   : > { %v1037_v45 = vpack.c.bf16 %v1029_v43, %v1028_v42  ;;  %v11879_v59 = vrot.slane %v722_v56, %v11724_v24  ;;  %v715_v56 = vld [vmem:[%s15378_s4 + $0x58] sm:$0xff] }
 0x28e   : > { %1050 = vrot.lane.b32.xlu0 %v11828_v19, %s11410_s19 }
 0x2fc   : > { %v1049_v46 = vpop.permute.xlu0 %1048 }
 0x2fd   : > { %10396 = vmatprep.subr.msk.bf16.mxu1 %vm958_vm0, %v1049_v46  ;;  %v1077_v47 = vsel %vm958_vm0, %v1049_v46, 0 }
 0x2fe   : > { %10271 = vmatpush3.bf16.xpose.msra.mxu1 %v1077_v47 }
 0x300   : > { %v1051_v48 = vpop.permute.xlu0 %1050 }
 0x301   : > { %10397 = vmatprep.subr.msk.bf16.mxu1 %vm958_vm0, %v1051_v48  ;;  %v1080_v49 = vsel %vm958_vm0, %v1051_v48, 0 }
 0x306   : > { %10273 = vmatpush3.bf16.xpose.msra.mxu1 %v1080_v49 }
 0x30d   : > { %10275 = vmatmul.mubr.msk.bf16.vlgmr.msra.gmra.mrb[4].mxu1 %vm958_vm0, %v1031_v32 }
 0x30e   : > { %10278 = vmatprep.mubr.msk.bf16.mxu1 %vm958_vm0, %v1032_v37 }
 0x315   : > { %10279 = vmatmul.mubr.msk.bf16.gmra.mrb[8].mxu1 %vm958_vm0, %v1033_v33 }
 0x316   : > { %10282 = vmatprep.mubr.msk.bf16.mxu1 %vm958_vm0, %v1034_v40  ;;  %v710_v40 = vld [vmem:[%s15378_s4 + $0x30] sm:$0xff] }
 0x31d   : > { %10283 = vmatmul.mubr.msk.bf16.gmra.mrb[12].mxu1 %vm958_vm0, %v1035_v34 }
 0x31e   : > { %10286 = vmatprep.mubr.msk.bf16.mxu1 %vm958_vm0, %v1036_v44  ;;  %v708_v44 = vld [vmem:[%s15378_s4 + $0x20] sm:$0xff] }
 0x325   : > { %10287 = vmatmul.mubr.msk.bf16.gmra.mrb[16].mxu1 %vm958_vm0, %v1037_v45 }
 0x3e0   : > { %v10276_v60 = vpop.f32.mrb[4].mxu1 }
 0x3e1   : > { %v1125_v2 = vadd.f32 %v10276_v60, %v11879_v59  ;;  %v1116_v5 = vpop.f32.mrb[5].mxu1 }
 0x3e2   : > { %v1117_v7 = vadd.f32 %v1116_v5, %v11879_v59  ;;  %v10277_v10 = vpop.f32.mrb[6].mxu1 }
 0x3e3   : > { %v1128_v12 = vadd.f32 %v10277_v10, %v11879_v59  ;;  %v1119_v13 = vpop.f32.mrb[7].mxu1  ;;  %v11890_v14 = vadd.f32 %v1125_v2, %v706_v0  ;;  %v711_v2 = vld [vmem:[%s15378_s4 + $0x38] sm:$0xff] }
 0x3e4   : > { %v11895_v16 = vadd.f32 %v1117_v7, %v704_v6  ;;  %v1120_v20 = vadd.f32 %v1119_v13, %v11879_v59  ;;  %v709_v13 = vld [vmem:[%s15378_s4 + $0x28] sm:$0xff] }
 0x3e5   : > { %v1201_v18 = vsel %vm958_vm0, %v11890_v14, -inf  ;;  %v11902_v27 = vadd.f32 %v1128_v12, %v707_v15 }
 0x3e6   : > { %1202 = vmax.xlane.f32.xlu0 %v1201_v18  ;;  %v1195_v21 = vsel %vm958_vm0, %v11895_v16, -inf  ;;  %v11910_v36 = vadd.f32 %v1120_v20, %v705_v28 }
 0x3e7   : > { %1196 = vmax.xlane.f32.xlu1 %v1195_v21  ;;  %v1204_v35 = vsel %vm958_vm0, %v11902_v27, -inf }
 0x3e8   : > { %v10280_v29 = vpop.f32.mrb[8].mxu1  ;;  %v1198_v42 = vsel %vm958_vm0, %v11910_v36, -inf }
 0x3e9   : > { %v1132_v32 = vpop.f32.mrb[9].mxu1  ;;  %v1141_v33 = vadd.f32 %v10280_v29, %v11879_v59 }
 0x3ea   : > { %v10281_v34 = vpop.f32.mrb[10].mxu1  ;;  %v1133_v41 = vadd.f32 %v1132_v32, %v11879_v59 }
 0x3eb   : > { %v1135_v37 = vpop.f32.mrb[11].mxu1  ;;  %1205 = vmax.xlane.f32.xlu1 %v1204_v35  ;;  %v11918_v43 = vadd.f32 %v1141_v33, %v710_v40  ;;  %v1144_v47 = vadd.f32 %v10281_v34, %v11879_v59  ;;  %v717_v33 = vld [vmem:[%s15378_s4 + $0x68] sm:$0xff]  ;;  %v714_v34 = vld [vmem:[%s15378_s4 + $0x50] sm:$0xff]  ;;  %v719_v40 = vld [vmem:[%s15378_s4 + $0x78] sm:$0xff] }
 0x3ec   : > { %v11926_v52 = vadd.f32 %v1133_v41, %v708_v44  ;;  %v1136_v6 = vadd.f32 %v1135_v37, %v11879_v59 }
 0x3ed   : > { %v1213_v49 = vsel %vm958_vm0, %v11918_v43, -inf  ;;  %v11940_v10 = vadd.f32 %v1144_v47, %v711_v2  ;;  %v712_v47 = vld [vmem:[%s15378_s4 + $0x40] sm:$0xff]  ;;  %v713_v2 = vld [vmem:[%s15378_s4 + $0x48] sm:$0xff] }
 0x3ee   : > { %v1207_v7 = vsel %vm958_vm0, %v11926_v52, -inf  ;;  %v11950_v29 = vadd.f32 %v1136_v6, %v709_v13  ;;  %v718_v13 = vld [vmem:[%s15378_s4 + $0x70] sm:$0xff] }
 0x3ef   : > { %1199 = vmax.xlane.f32.xlu1 %v1198_v42  ;;  %v1216_v28 = vsel %vm958_vm0, %v11940_v10, -inf }
 0x3f0   : > { %v10284_v45 = vpop.f32.mrb[12].mxu1  ;;  %v1210_v42 = vsel %vm958_vm0, %v11950_v29, -inf }
 0x3f1   : > { %v1148_v46 = vpop.f32.mrb[13].mxu1  ;;  %v1157_v20 = vadd.f32 %v10284_v45, %v11879_v59 }
 0x3f2   : > { %v10285_v48 = vpop.f32.mrb[14].mxu1  ;;  %v1149_v41 = vadd.f32 %v1148_v46, %v11879_v59 }
 0x3f3   : > { %v1160_v60 = vadd.f32 %v10285_v48, %v11879_v59  ;;  %v1151_v0 = vpop.f32.mrb[15].mxu1  ;;  %1214 = vmax.xlane.f32.xlu1 %v1213_v49  ;;  %v11968_v45 = vadd.f32 %v1157_v20, %v714_v34 }
 0x3f4   : > { %v1152_v46 = vadd.f32 %v1151_v0, %v11879_v59 }
 0x3f5   : > { %v11935_v5 = vadd.f32 %v1160_v60, %v715_v56  ;;  %v1225_v56 = vsel %vm958_vm0, %v11968_v45, -inf  ;;  %v11980_v60 = vadd.f32 %v1149_v41, %v712_v47 }
 0x3f6   : > { %v11990_v0 = vadd.f32 %v1152_v46, %v713_v2 }
 0x3f7   : > { %1208 = vmax.xlane.f32.xlu1 %v1207_v7  ;;  %v1228_v12 = vsel %vm958_vm0, %v11935_v5, -inf }
 0x3f8   : > { %1229 = vmax.xlane.f32.xlu0 %v1228_v12  ;;  %v10288_v15 = vpop.f32.mrb[16].mxu1  ;;  %v1219_v12 = vsel %vm958_vm0, %v11980_v60, -inf }
 0x3f9   : > { %v1164_v18 = vpop.f32.mrb[17].mxu1  ;;  %v1173_v7 = vadd.f32 %v10288_v15, %v11879_v59  ;;  %v716_v15 = vld [vmem:[%s15378_s4 + $0x60] sm:$0xff] }
 0x3fa   : > { %v10289_v21 = vpop.f32.mrb[18].mxu1  ;;  %v1165_v20 = vadd.f32 %v1164_v18, %v11879_v59 }
 0x3fb   : > { %v1167_v32 = vpop.f32.mrb[19].mxu1  ;;  %1217 = vmax.xlane.f32.xlu1 %v1216_v28  ;;  %v1176_v35 = vadd.f32 %v10289_v21, %v11879_v59  ;;  %v1222_v21 = vsel %vm958_vm0, %v11990_v0, -inf  ;;  %v11998_v28 = vadd.f32 %v1173_v7, %v718_v13 }
 0x3fc   : > { %v1168_v37 = vadd.f32 %v1167_v32, %v11879_v59 }
 0x3fd   : > { %v11975_v49 = vadd.f32 %v1176_v35, %v719_v40  ;;  %v1237_v32 = vsel %vm958_vm0, %v11998_v28, -inf }
 0x3fe   : > { %v11966_v44 = vadd.f32 %v1168_v37, %v717_v33  ;;  %v12005_v33 = vadd.f32 %v1165_v20, %v716_v15 }
 0x3ff   : > { %1211 = vmax.xlane.f32.xlu1 %v1210_v42  ;;  %v1240_v6 = vsel %vm958_vm0, %v11975_v49, -inf }
 0x400   : > { %v1234_v48 = vsel %vm958_vm0, %v11966_v44, -inf  ;;  %v1231_v34 = vsel %vm958_vm0, %v12005_v33, -inf }
 0x401   : > { %1235 = vmax.xlane.f32.xlu0 %v1234_v48 }
 0x403   : > { %1226 = vmax.xlane.f32.xlu1 %v1225_v56 }
 0x405   : > { %1241 = vmax.xlane.f32.xlu0 %v1240_v6 }
 0x407   : > { %1220 = vmax.xlane.f32.xlu1 %v1219_v12 }
 0x40b   : > { %1223 = vmax.xlane.f32.xlu1 %v1222_v21 }
 0x40f   : > { %1238 = vmax.xlane.f32.xlu1 %v1237_v32 }
 0x413   : > { %1232 = vmax.xlane.f32.xlu1 %v1231_v34 }
 0x424   : > { %1379 = vrot.lane.b32.xlu1 %v11837_v26, %s11412_s24 }
 0x473   : > { %v1203_v18 = vpop.xlane.xlu0 %1202 }
 0x474   : > { %v1245_v35 = vsub.f32 %v11890_v14, %v1203_v18  ;;  %v1197_v37 = vpop.xlane.xlu1 %1196 }
 0x475   : > { %v1243_v40 = vsub.f32 %v11895_v16, %v1197_v37 }
 0x476   : > { %v1263_v41 = vmul.f32 1.442695, %v1245_v35 }
 0x477   : > { %v1259_v42 = vmul.f32 1.442695, %v1243_v40 }
 0x478   : > { %10941 = vpow2.f32 %v1263_v41  ;;  %v1206_v47 = vpop.xlane.xlu1 %1205 }
 0x479   : > { %v1246_v48 = vsub.f32 %v11902_v27, %v1206_v47  ;;  %10943 = vpow2.f32 %v1259_v42 }
 0x47b   : > { %v1265_v46 = vmul.f32 1.442695, %v1246_v48 }
 0x47c   : > { %v1200_v56 = vpop.xlane.xlu1 %1199 }
 0x47d   : > { %10945 = vpow2.f32 %v1265_v46  ;;  %v1244_v2 = vsub.f32 %v11910_v36, %v1200_v56 }
 0x47f   : > { %v1261_v6 = vmul.f32 1.442695, %v1244_v2 }
 0x480   : > { %v1215_v26 = vpop.xlane.xlu1 %1214 }
 0x481   : > { %10947 = vpow2.f32 %v1261_v6  ;;  %v1249_v14 = vsub.f32 %v11918_v43, %v1215_v26 }
 0x482   : > { %v12016_v7 = vpop.eup %10941 }
 0x483   : > { %v1271_v16 = vmul.f32 1.442695, %v1249_v14  ;;  %v1297_v12 = vsel %vm958_vm0, %v12016_v7, 0.0  ;;  %v12020_v13 = vpop.eup %10943 }
 0x484   : > { %1298 = vadd.xlane.f32.xlu1 %v1297_v12  ;;  %v1209_v27 = vpop.xlane.xlu1 %1208  ;;  %v1291_v15 = vsel %vm958_vm0, %v12020_v13, 0.0 }
 0x485   : > { %10949 = vpow2.f32 %v1271_v16  ;;  %v1247_v20 = vsub.f32 %v11926_v52, %v1209_v27  ;;  %v1230_v43 = vpop.xlane.xlu0 %1229 }
 0x486   : > { %v1254_v52 = vsub.f32 %v11935_v5, %v1230_v43 }
 0x487   : > { %v12023_v21 = vpop.eup %10945  ;;  %v1267_v36 = vmul.f32 1.442695, %v1247_v20 }
 0x488   : > { %1292 = vadd.xlane.f32.xlu1 %v1291_v15  ;;  %v1218_v32 = vpop.xlane.xlu1 %1217  ;;  %v1300_v34 = vsel %vm958_vm0, %v12023_v21, 0.0  ;;  %v1281_v48 = vmul.f32 1.442695, %v1254_v52 }
 0x489   : > { %10951 = vpow2.f32 %v1267_v36  ;;  %v1250_v18 = vsub.f32 %v11940_v10, %v1218_v32  ;;  %1301 = vadd.xlane.f32.xlu0 %v1300_v34 }
 0x48b   : > { %v12030_v35 = vpop.eup %10947  ;;  %v1273_v37 = vmul.f32 1.442695, %v1250_v18 }
 0x48c   : > { %v1212_v40 = vpop.xlane.xlu1 %1211  ;;  %v1294_v41 = vsel %vm958_vm0, %v12030_v35, 0.0 }
 0x48d   : > { %10953 = vpow2.f32 %v1273_v37  ;;  %v1248_v42 = vsub.f32 %v11950_v29, %v1212_v40  ;;  %1295 = vadd.xlane.f32.xlu0 %v1294_v41 }
 0x48e   : > { %v1236_v36 = vpop.xlane.xlu0 %1235 }
 0x48f   : > { %v12036_v47 = vpop.eup %10949  ;;  %v1269_v46 = vmul.f32 1.442695, %v1248_v42  ;;  %v1256_v37 = vsub.f32 %v11966_v44, %v1236_v36 }
 0x490   : > { %v1227_v56 = vpop.xlane.xlu1 %1226  ;;  %v1309_v10 = vsel %vm958_vm0, %v12036_v47, 0.0 }
 0x491   : > { %10955 = vpow2.f32 %v1269_v46  ;;  %v1253_v5 = vsub.f32 %v11968_v45, %v1227_v56  ;;  %1310 = vadd.xlane.f32.xlu1 %v1309_v10  ;;  %v1285_v56 = vmul.f32 1.442695, %v1256_v37 }
 0x492   : > { %10957 = vpow2.f32 %v1281_v48  ;;  %v1242_v40 = vpop.xlane.xlu0 %1241 }
 0x493   : > { %v12041_v2 = vpop.eup %10951  ;;  %v1279_v6 = vmul.f32 1.442695, %v1253_v5  ;;  %v1258_v10 = vsub.f32 %v11975_v49, %v1242_v40 }
 0x494   : > { %v1221_v26 = vpop.xlane.xlu1 %1220  ;;  %v1303_v29 = vsel %vm958_vm0, %v12041_v2, 0.0 }
 0x495   : > { %10959 = vpow2.f32 %v1279_v6  ;;  %v1251_v14 = vsub.f32 %v11980_v60, %v1221_v26  ;;  %1304 = vadd.xlane.f32.xlu1 %v1303_v29 }
 0x497   : > { %v12046_v16 = vpop.eup %10953  ;;  %v1275_v12 = vmul.f32 1.442695, %v1251_v14 }
 0x498   : > { %v1224_v27 = vpop.xlane.xlu1 %1223  ;;  %v1312_v45 = vsel %vm958_vm0, %v12046_v16, 0.0 }
 0x499   : > { %10961 = vpow2.f32 %v1275_v12  ;;  %v1252_v20 = vsub.f32 %v11990_v0, %v1224_v27  ;;  %1313 = vadd.xlane.f32.xlu0 %v1312_v45 }
 0x49b   : > { %v12051_v15 = vpop.eup %10955  ;;  %v1277_v43 = vmul.f32 1.442695, %v1252_v20 }
 0x49c   : > { %v1239_v32 = vpop.xlane.xlu1 %1238  ;;  %v1306_v60 = vsel %vm958_vm0, %v12051_v15, 0.0  ;;  %v12055_v34 = vpop.eup %10957 }
 0x49d   : > { %10963 = vpow2.f32 %v1277_v43  ;;  %v1257_v18 = vsub.f32 %v11998_v28, %v1239_v32  ;;  %1307 = vadd.xlane.f32.xlu0 %v1306_v60  ;;  %v1324_v42 = vsel %vm958_vm0, %v12055_v34, 0.0 }
 0x49f   : > { %v12058_v52 = vpop.eup %10959  ;;  %v1287_v0 = vmul.f32 1.442695, %v1257_v18 }
 0x4a0   : > { %v1233_v41 = vpop.xlane.xlu1 %1232  ;;  %v1321_v48 = vsel %vm958_vm0, %v12058_v52, 0.0 }
 0x4a1   : > { %10965 = vpow2.f32 %v1287_v0  ;;  %v1255_v46 = vsub.f32 %v12005_v33, %v1233_v41  ;;  %1325 = vadd.xlane.f32.xlu0 %v1324_v42  ;;  %1322 = vadd.xlane.f32.xlu1 %v1321_v48  ;;  %v1289_v33 = vmul.f32 1.442695, %v1258_v10 }
 0x4a3   : > { %v12066_v28 = vpop.eup %10961  ;;  %v1283_v44 = vmul.f32 1.442695, %v1255_v46 }
 0x4a4   : > { %v1380_v5 = vpop.permute.xlu1 %1379  ;;  %v1315_v6 = vsel %vm958_vm0, %v12066_v28, 0.0 }
 0x4a5   : > { %10967 = vpow2.f32 %v1283_v44  ;;  %1316 = vadd.xlane.f32.xlu1 %v1315_v6  ;;  %10290 = vmatprep.subr.bf16.mxu0 %v1380_v5 }
 0x4a6   : > { %10291 = vmatpush3.bf16.msra.mxu0 %v1380_v5  ;;  %10969 = vpow2.f32 %v1285_v56 }
 0x4a7   : > { %v12071_v26 = vpop.eup %10963  ;;  %10971 = vpow2.f32 %v1289_v33 }
 0x4a8   : > { %v1318_v29 = vsel %vm958_vm0, %v12071_v26, 0.0 }
 0x4a9   : > { %1319 = vadd.xlane.f32.xlu0 %v1318_v29 }
 0x4ab   : > { %v12075_v14 = vpop.eup %10965 }
 0x4ac   : > { %v1333_v49 = vsel %vm958_vm0, %v12075_v14, 0.0 }
 0x4ad   : > { %1334 = vadd.xlane.f32.xlu0 %v1333_v49 }
 0x4af   : > { %v12079_v12 = vpop.eup %10967 }
 0x4b0   : > { %v1327_v27 = vsel %vm958_vm0, %v12079_v12, 0.0  ;;  %v12083_v45 = vpop.eup %10969 }
 0x4b1   : > { %1328 = vadd.xlane.f32.xlu0 %v1327_v27  ;;  %v1330_v20 = vsel %vm958_vm0, %v12083_v45, 0.0  ;;  %v12087_v36 = vpop.eup %10971 }
 0x4b2   : > { %v1336_v43 = vsel %vm958_vm0, %v12087_v36, 0.0 }
 0x4b5   : > { %1331 = vadd.xlane.f32.xlu0 %v1330_v20 }
 0x4b6   : > { %1381 = vrot.lane.b32.xlu1 %v11828_v19, %s11412_s24 }
 0x4b9   : > { %1337 = vadd.xlane.f32.xlu0 %v1336_v43 }
 0x511   : > { %v1299_v32 = vpop.xlane.xlu1 %1298 }
 0x515   : > { %v1293_v60 = vpop.xlane.xlu1 %1292 }
 0x516   : > { %v1302_v18 = vpop.xlane.xlu0 %1301  ;;  %10973 = vrcp.f32 %v1293_v60 }
 0x51a   : > { %v1296_v37 = vpop.xlane.xlu0 %1295 }
 0x51b   : > { %10975 = vrcp.f32 %v1296_v37 }
 0x51c   : > { %10977 = vrcp.f32 %v1302_v18 }
 0x51d   : > { %10979 = vrcp.f32 %v1299_v32 }
 0x51e   : > { %v1311_v0 = vpop.xlane.xlu1 %1310 }
 0x520   : > { %v10974_v40 = vpop.eup %10973 }
 0x521   : > { %v1340_v48 = vmul.f32 %v10974_v40, %v12020_v13 }
 0x522   : > { %v1305_v56 = vpop.xlane.xlu1 %1304 }
 0x523   : > { %10981 = vrcp.f32 %v1305_v56 }
 0x525   : > { %v10976_v41 = vpop.eup %10975 }
 0x526   : > { %v1314_v42 = vpop.xlane.xlu0 %1313  ;;  %v1342_v46 = vmul.f32 %v10976_v41, %v12030_v35  ;;  %v10978_v5 = vpop.eup %10977 }
 0x527   : > { %v10980_v29 = vpop.eup %10979  ;;  %v1346_v35 = vmul.f32 %v10978_v5, %v12023_v21 }
 0x528   : > { %v1371_v19 = vpack.c.bf16 %v1342_v46, %v1340_v48  ;;  %v1344_v32 = vmul.f32 %v10980_v29, %v12016_v7 }
 0x52a   : > { %v1308_v10 = vpop.xlane.xlu0 %1307  ;;  %10294 = vmatprep.mubr.msk.bf16.mxu0 %vm958_vm0, %v1371_v19  ;;  %v1372_v18 = vpack.c.bf16 %v1346_v35, %v1344_v32  ;;  %v10616_v32 = vld [vmem:[#allocation7 + $0x8] sm:$0xff]  }
 0x52b   : > { %10983 = vrcp.f32 %v1308_v10 }
 0x52c   : > { %10985 = vrcp.f32 %v1314_v42 }
 0x52d   : > { %10987 = vrcp.f32 %v1311_v0  ;;  %v10982_v49 = vpop.eup %10981 }
 0x52e   : > { %v1323_v44 = vpop.xlane.xlu1 %1322  ;;  %v1326_v6 = vpop.xlane.xlu0 %1325  ;;  %v1348_v60 = vmul.f32 %v10982_v49, %v12041_v2 }
 0x532   : > { %v1317_v33 = vpop.xlane.xlu1 %1316 }
 0x533   : > { %10989 = vrcp.f32 %v1317_v33 }
 0x534   : > { %10991 = vrcp.f32 %v1326_v6 }
 0x535   : > { %v10984_v13 = vpop.eup %10983 }
 0x536   : > { %v1320_v27 = vpop.xlane.xlu0 %1319  ;;  %v1382_v20 = vpop.permute.xlu1 %1381  ;;  %v1350_v43 = vmul.f32 %v10984_v13, %v12051_v15 }
 0x537   : > { %10993 = vrcp.f32 %v1320_v27  ;;  %10292 = vmatprep.subr.bf16.mxu0 %v1382_v20  ;;  %v10986_v37 = vpop.eup %10985 }
 0x538   : > { %10995 = vrcp.f32 %v1323_v44  ;;  %10293 = vmatpush3.bf16.msra.mxu0 %v1382_v20  ;;  %v1373_v40 = vpack.c.bf16 %v1350_v43, %v1348_v60  ;;  %v10988_v21 = vpop.eup %10987  ;;  %v1354_v41 = vmul.f32 %v10986_v37, %v12046_v16  ;;  %v10615_v43 = vld [vmem:[#allocation7] sm:$0xff]  }
 0x539   : > { %v1352_v7 = vmul.f32 %v10988_v21, %v12036_v47  ;;  %10310 = vmatprep.subr.bf16.mxu1 %v10615_v43 }
 0x53a   : > { %v1335_v0 = vpop.xlane.xlu0 %1334  ;;  %10311 = vmatpush3.bf16.msra.mxu1 %v10615_v43 }
 0x53b   : > { %10295 = vmatmul.mubr.msk.bf16.vlgmr.msra.gmra.mrb[8].mxu0 %vm958_vm0, %v1372_v18  ;;  %v1374_v56 = vpack.c.bf16 %v1354_v41, %v1352_v7  ;;  %10312 = vmatprep.subr.bf16.mxu1 %v10616_v32 }
 0x53c   : > { %10298 = vmatprep.mubr.msk.bf16.mxu0 %vm958_vm0, %v1373_v40 }
 0x53d   : > { %v10990_v42 = vpop.eup %10989 }
 0x53e   : > { %v1329_v15 = vpop.xlane.xlu0 %1328  ;;  %v10992_v48 = vpop.eup %10991  ;;  %v1356_v10 = vmul.f32 %v10990_v42, %v12066_v28  ;;  %10313 = vmatpush3.bf16.msra.mxu1 %v10616_v32 }
 0x53f   : > { %10997 = vrcp.f32 %v1329_v15  ;;  %v1362_v6 = vmul.f32 %v10992_v48, %v12055_v34 }
 0x541   : > { %v10994_v46 = vpop.eup %10993 }
 0x542   : > { %v10996_v2 = vpop.eup %10995  ;;  %v1332_v19 = vpop.xlane.xlu0 %1331  ;;  %v1358_v44 = vmul.f32 %v10994_v46, %v12071_v26 }
 0x543   : > { %10999 = vrcp.f32 %v1332_v19  ;;  %10299 = vmatmul.mubr.msk.bf16.gmra.mrb[12].mxu0 %vm958_vm0, %v1374_v56  ;;  %v1360_v16 = vmul.f32 %v10996_v2, %v12058_v52 }
 0x544   : > { %v1375_v5 = vpack.c.bf16 %v1358_v44, %v1356_v10  ;;  %11001 = vrcp.f32 %v1335_v0 }
 0x545   : > { %v1376_v33 = vpack.c.bf16 %v1362_v6, %v1360_v16 }
 0x546   : > { %v1338_v47 = vpop.xlane.xlu0 %1337  ;;  %10302 = vmatprep.mubr.msk.bf16.mxu0 %vm958_vm0, %v1375_v5 }
 0x547   : > { %11003 = vrcp.f32 %v1338_v47 }
 0x549   : > { %v10998_v29 = vpop.eup %10997 }
 0x54a   : > { %v1364_v26 = vmul.f32 %v10998_v29, %v12079_v12 }
 0x54b   : > { %10303 = vmatmul.mubr.msk.bf16.gmra.mrb[16].mxu0 %vm958_vm0, %v1376_v33 }
 0x54d   : > { %v11000_v28 = vpop.eup %10999 }
 0x54e   : > { %v1366_v49 = vmul.f32 %v11000_v28, %v12083_v45  ;;  %v11002_v13 = vpop.eup %11001 }
 0x54f   : > { %v1368_v34 = vmul.f32 %v11002_v13, %v12075_v14 }
 0x550   : > { %v1377_v35 = vpack.c.bf16 %v1366_v49, %v1364_v26 }
 0x551   : > { %v11004_v27 = vpop.eup %11003 }
 0x552   : > { %10306 = vmatprep.mubr.msk.bf16.mxu0 %vm958_vm0, %v1377_v35  ;;  %v1370_v52 = vmul.f32 %v11004_v27, %v12087_v36 }
 0x554   : > { %v1378_v20 = vpack.c.bf16 %v1370_v52, %v1368_v34 }
 0x556   : > { %10307 = vmatmul.mubr.msk.bf16.gmra.mrb[20].mxu0 %vm958_vm0, %v1378_v20 }
 0x60e   : > { %v10296_v12 = vpop.f32.mrb[8].mxu0 }
 0x60f   : > { %v1443_v45 = vpop.f32.mrb[9].mxu0  ;;  %v1508_v0 = vmul.f32 %v10296_v12, %v11759_v55 }
 0x610   : > { %v10297_v60 = vpop.f32.mrb[10].mxu0  ;;  %v1506_v36 = vmul.f32 %v1443_v45, %v11774_v61 }
 0x611   : > { %v1446_v18 = vpop.f32.mrb[11].mxu0  ;;  %v1509_v15 = vmul.f32 %v10297_v60, %v11789_v1 }
 0x612   : > { %v1507_v46 = vmul.f32 %v1446_v18, %v11805_v8 }
 0x616   : > { %v10300_v37 = vpop.f32.mrb[12].mxu0 }
 0x617   : > { %v1512_v14 = vmul.f32 %v10300_v37, %v11764_v57  ;;  %v1459_v40 = vpop.f32.mrb[13].mxu0 }
 0x618   : > { %v1510_v21 = vmul.f32 %v1459_v40, %v11779_v62  ;;  %v10301_v41 = vpop.f32.mrb[14].mxu0 }
 0x619   : > { %v1524_v42 = vadd.f32 %v1512_v14, %v1508_v0  ;;  %v1513_v7 = vmul.f32 %v10301_v41, %v11794_v3  ;;  %v1462_v48 = vpop.f32.mrb[15].mxu0 }
 0x61a   : > { %v1522_v56 = vadd.f32 %v1510_v21, %v1506_v36  ;;  %v1511_v2 = vmul.f32 %v1462_v48, %v11810_v9 }
 0x61b   : > { %v1525_v55 = vadd.f32 %v1513_v7, %v1509_v15 }
 0x61c   : > { %v1523_v19 = vadd.f32 %v1511_v2, %v1507_v46 }
 0x61e   : > { %v10304_v57 = vpop.f32.mrb[16].mxu0 }
 0x61f   : > { %v1516_v10 = vmul.f32 %v10304_v57, %v11769_v58  ;;  %v1475_v61 = vpop.f32.mrb[17].mxu0 }
 0x620   : > { %v1514_v62 = vmul.f32 %v1475_v61, %v11784_v63  ;;  %v10305_v44 = vpop.f32.mrb[18].mxu0 }
 0x621   : > { %v1528_v5 = vadd.f32 %v1524_v42, %v1516_v10  ;;  %v1517_v1 = vmul.f32 %v10305_v44, %v11799_v4  ;;  %v1478_v16 = vpop.f32.mrb[19].mxu0 }
 0x622   : > { %v1526_v3 = vadd.f32 %v1522_v56, %v1514_v62  ;;  %v1515_v6 = vmul.f32 %v1478_v16, %v11816_v11 }
 0x623   : > { %v1529_v8 = vadd.f32 %v1525_v55, %v1517_v1 }
 0x624   : > { %v1527_v47 = vadd.f32 %v1523_v19, %v1515_v6  ;;  %v1695_v6 = vld [vmem:[%s15384_s10 + $0x48] sm:$0xff] }
 0x629   : > { %v10308_v33 = vpop.f32.mrb[20].mxu0 }
 0x62a   : > { %v1520_v9 = vmul.f32 %v10308_v33, %v11845_v30  ;;  %v1491_v29 = vpop.f32.mrb[21].mxu0  ;;  %v12136_v30 = vsub.s32 2, %v11721_v23 }
 0x62b   : > { %v1518_v28 = vmul.f32 %v1491_v29, %v11825_v17  ;;  %v10309_v58 = vpop.f32.mrb[22].mxu0  ;;  %v1690_v29 = vld [vmem:[%s15384_s10 + $0x20] sm:$0xff] }
 0x62c   : > { %v1532_v26 = vadd.f32 %v1528_v5, %v1520_v9  ;;  %v1521_v63 = vmul.f32 %v10309_v58, %v11850_v31  ;;  %v1494_v49 = vpop.f32.mrb[23].mxu0  ;;  %v1543_v17 = vrot.slane %v11729_v25, %v12136_v30  ;;  %v1698_v58 = vld [vmem:[%s15384_s10 + $0x60] sm:$0xff] }
 0x62d   : > { %v1530_v13 = vadd.f32 %v1526_v3, %v1518_v28  ;;  %v1519_v4 = vmul.f32 %v1494_v49, %v11835_v22  ;;  %v1694_v28 = vld [vmem:[%s15384_s10 + $0x40] sm:$0xff] }
 0x62e   : > { %v1533_v35 = vadd.f32 %v1529_v8, %v1521_v63  ;;  %v1699_v8 = vld [vmem:[%s15384_s10 + $0x68] sm:$0xff] }
 0x62f   : > { %v1531_v27 = vadd.f32 %v1527_v47, %v1519_v4  ;;  %v1686_v47 = vld [vmem:[%s15384_s10] sm:$0xff]  ;;  %v9121_v33 = vcombine.low %v1695_v6, %v1699_v8  ;;  %v9122_v9 = vcombine.high %v1695_v6, %v1699_v8  ;;  %v9119_v4 = vcombine.low %v1694_v28, %v1698_v58 }
 0x630   : > { %v1535_v34 = vpack.c.bf16 %v1533_v35, %v1532_v26  ;;  %v15409_v26 = vmov 0   ;;  %v9111_v63 = vcombine.low %v1686_v47, %v1690_v29  ;;  %v9112_v49 = vcombine.high %v1686_v47, %v1690_v29  ;;  %v1688_v35 = vld [vmem:[%s15384_s10 + $0x10] sm:$0xff]  ;;  %v10618_v29 = vld [vmem:[#allocation8 + $0xc0] sm:$0xff]  }
 0x631   : > { %v1534_v11 = vpack.c.bf16 %v1531_v27, %v1530_v13  ;;  %1915 = vmatprep.mubr.bf16.mxu0 %v15409_v26  ;;  %v9120_v13 = vcombine.high %v1694_v28, %v1698_v58  ;;  %v1692_v27 = vld [vmem:[%s15384_s10 + $0x30] sm:$0xff] }
 0x632   : > { %1830 = vmatprep.subr.bf16.mxu1 %v9112_v49  ;;  %v10620_v49 = vld [vmem:[#allocation8 + $0x80] sm:$0xff]  }
 0x633   : > { %10314 = vmatprep.mubr.msk.bf16.mxu1 %vm958_vm0, %v1534_v11  ;;  %v9115_v11 = vcombine.low %v1688_v35, %v1692_v27 }
 0x634   : > { %10315 = vmatmul.mubr.msk.bf16.vlgmr.msra.gmra.mrb[20].mxu1 %vm958_vm0, %v1535_v34  ;;  %v1689_v34 = vld [vmem:[%s15384_s10 + $0x18] sm:$0xff] }
 0x635   : > { %1862 = vmatprep.mubr.bf16.mxu1 %v15409_v26  ;;  %1831 = vmatpush1.bf16.msra.mxu1 %v9111_v63  ;;  %v10619_v63 = vld [vmem:[#allocation8] sm:$0xff]  }
 0x636   : > { %1832 = vmatprep.subr.bf16.mxu1 %v9120_v13  ;;  %v10621_v13 = vld [vmem:[#allocation8 + $0x48] sm:$0xff]  }
 0x639   : > { %1833 = vmatpush1.bf16.msra.mxu1 %v9119_v4  ;;  %v10622_v4 = vld [vmem:[#allocation8 + $0xc8] sm:$0xff]  }
 0x707   : > { %v10316_v52 = vpop.f32.mrb[20].mxu1 }
 0x708   : > { %v1596_v31 = vpop.f32.mrb[21].mxu1  ;;  %v1605_v20 = vadd.f32 %v10316_v52, %v1543_v17  ;;  %v1693_v52 = vld [vmem:[%s15384_s10 + $0x38] sm:$0xff] }
 0x709   : > { %v1597_v43 = vadd.f32 %v1596_v31, %v1543_v17  ;;  %v10317_v32 = vpop.f32.mrb[22].mxu1  ;;  %v9117_v31 = vcombine.low %v1689_v34, %v1693_v52 }
 0x70a   : > { %v1599_v22 = vpop.f32.mrb[23].mxu1  ;;  %v1608_v60 = vadd.f32 %v10317_v32, %v1543_v17  ;;  %v1613_v0 = vadd.f32 %v1605_v20, %v11744_v50  ;;  %v9118_v20 = vcombine.high %v1689_v34, %v1693_v52  ;;  %v10625_v34 = vld [vmem:[#allocation8 + $0x50] sm:$0xff]  }
 0x70b   : > { %v1600_v12 = vadd.f32 %v1599_v22, %v1543_v17  ;;  %v1611_v45 = vadd.f32 %v1597_v43, %v11737_v38  ;;  %v1687_v38 = vld [vmem:[%s15384_s10 + $0x8] sm:$0xff]  ;;  %v9116_v17 = vcombine.high %v1688_v35, %v1692_v27  ;;  %v10628_v52 = vld [vmem:[#allocation8 + $0x90] sm:$0xff]  }
 0x70c   : > { %v1621_v25 = vsel %vm958_vm0, %v1613_v0, 0.0  ;;  %v1614_v40 = vadd.f32 %v1608_v60, %v11746_v51  ;;  %v10623_v35 = vld [vmem:[#allocation8 + $0x8] sm:$0xff]  }
 0x70d   : > { %v1615_v18 = vsel %vm958_vm0, %v1611_v45, 0.0  ;;  %v1612_v37 = vadd.f32 %v1600_v12, %v11739_v39  ;;  %v1691_v39 = vld [vmem:[%s15384_s10 + $0x28] sm:$0xff]  ;;  %1936 = vmatprep.subr.bf16.mxu1 %v9116_v17  ;;  %v10627_v17 = vld [vmem:[#allocation8 + $0x10] sm:$0xff]  }
 0x70e   : > { %1616 = vadd.xlane.f32.xlu0 %v1615_v18  ;;  %v1624_v36 = vsel %vm958_vm0, %v1614_v40, 0.0  ;;  %v9113_v50 = vcombine.low %v1687_v38, %v1691_v39  ;;  %v9114_v21 = vcombine.high %v1687_v38, %v1691_v39  ;;  %v12212_v39 = vld [vmem:[%s15381_s7] sm:$0xff]  ;;  %v10624_v27 = vld [vmem:[#allocation8 + $0x88] sm:$0xff]  }
 0x70f   : > { %v1618_v14 = vsel %vm958_vm0, %v1612_v37, 0.0 }
 0x710   : > { %1619 = vadd.xlane.f32.xlu1 %v1618_v14  ;;  %1883 = vmatprep.subr.bf16.mxu0 %v9114_v21  ;;  %v12207_v14 = vsub.s32 3, %v11721_v23 }
 0x711   : > { %1884 = vmatpush1.bf16.msra.mxu0 %v9113_v50 }
 0x712   : > { %1622 = vadd.xlane.f32.xlu0 %v1621_v25  ;;  %1885 = vmatprep.subr.bf16.mxu0 %v9122_v9  ;;  %v1671_v50 = vrot.slane %v12212_v39, %v12207_v14  ;;  %v10617_v9 = vld [vmem:[#allocation8 + $0x40] sm:$0xff]  }
 0x715   : > { %1886 = vmatpush1.bf16.msra.mxu0 %v9121_v33 }
 0x716   : > { %1625 = vadd.xlane.f32.xlu0 %v1624_v36  ;;  %1989 = vmatprep.subr.bf16.mxu0 %v9118_v20  ;;  %v10630_v20 = vld [vmem:[#allocation8 + $0xd8] sm:$0xff]  }
 0x79b   : > { %v1617_v41 = vpop.xlane.xlu0 %1616 }
 0x79c   : > { %v1628_v15 = vmul.f32 0.03125, %v1617_v41  ;;  %v12218_v41 = vsub.s32 4, %v11721_v23 }
 0x79d   : > { %v1620_v42 = vpop.xlane.xlu1 %1619 }
 0x79e   : > { %v12154_v51 = vsub.f32 %v1611_v45, %v1628_v15  ;;  %v1629_v7 = vmul.f32 0.03125, %v1620_v42  ;;  %15457 = vst [vmem:[#allocation24_spill] sm:$0xff] %v12218_v41 }
 0x79f   : > { %v1623_v48 = vpop.xlane.xlu0 %1622 }
 0x7a0   : > { %v12156_v46 = vsub.f32 %v1612_v37, %v1629_v7  ;;  %v1630_v56 = vmul.f32 0.03125, %v1623_v48  ;;  %v1636_v2 = vmul.f32 %v12154_v51, %v12154_v51  ;;  %v1679_v48 = vrot.slane %v12212_v39, %v12218_v41 }
 0x7a2   : > { %v12160_v55 = vsub.f32 %v1613_v0, %v1630_v56  ;;  %v1640_v19 = vsel %vm958_vm0, %v1636_v2, 0.0  ;;  %v1637_v57 = vmul.f32 %v12156_v46, %v12156_v46 }
 0x7a3   : > { %1641 = vadd.xlane.f32.xlu0 %v1640_v19  ;;  %v1626_v10 = vpop.xlane.xlu0 %1625  ;;  %v1696_v19 = vld [vmem:[%s15384_s10 + $0x50] sm:$0xff] }
 0x7a4   : > { %v1631_v61 = vmul.f32 0.03125, %v1626_v10  ;;  %v1643_v44 = vsel %vm958_vm0, %v1637_v57, 0.0  ;;  %v1638_v5 = vmul.f32 %v12160_v55, %v12160_v55 }
 0x7a6   : > { %v12165_v62 = vsub.f32 %v1614_v40, %v1631_v61  ;;  %v1646_v1 = vsel %vm958_vm0, %v1638_v5, 0.0  ;;  %v1700_v61 = vld [vmem:[%s15384_s10 + $0x70] sm:$0xff] }
 0x7a7   : > { %1644 = vadd.xlane.f32.xlu0 %v1643_v44  ;;  %v1701_v44 = vld [vmem:[%s15384_s10 + $0x78] sm:$0xff]  ;;  %v9123_v47 = vcombine.low %v1696_v19, %v1700_v61 }
 0x7a8   : > { %v1639_v16 = vmul.f32 %v12165_v62, %v12165_v62 }
 0x7aa   : > { %v1649_v3 = vsel %vm958_vm0, %v1639_v16, 0.0  ;;  %v9124_v16 = vcombine.high %v1696_v19, %v1700_v61 }
 0x7ab   : > { %1647 = vadd.xlane.f32.xlu0 %v1646_v1 }
 0x7af   : > { %1650 = vadd.xlane.f32.xlu0 %v1649_v3 }
 0x830   : > { %v1642_v43 = vpop.xlane.xlu0 %1641 }
 0x831   : > { %v1652_v32 = vmul.f32 0.03125, %v1642_v43  ;;  %v10631_v43 = vld [vmem:[#allocation8 + $0x18] sm:$0xff]  }
 0x833   : > { %v1656_v22 = vadd.f32 1e-05, %v1652_v32  ;;  %v10632_v32 = vld [vmem:[#allocation8 + $0x98] sm:$0xff]  }
 0x834   : > { %v1645_v12 = vpop.xlane.xlu0 %1644 }
 0x835   : > { %11005 = vrsqrt.f32 %v1656_v22  ;;  %v1653_v45 = vmul.f32 0.03125, %v1645_v12  ;;  %v10633_v22 = vld [vmem:[#allocation8 + $0x60] sm:$0xff]  }
 0x836   : > { %v10634_v12 = vld [vmem:[#allocation8 + $0xe0] sm:$0xff]  }
 0x837   : > { %v1657_v60 = vadd.f32 1e-05, %v1653_v45  ;;  %v10635_v45 = vld [vmem:[#allocation8 + $0x20] sm:$0xff]  }
 0x838   : > { %v1648_v18 = vpop.xlane.xlu0 %1647 }
 0x839   : > { %11007 = vrsqrt.f32 %v1657_v60  ;;  %v1654_v37 = vmul.f32 0.03125, %v1648_v18  ;;  %v10636_v60 = vld [vmem:[#allocation8 + $0xa0] sm:$0xff]   ;;  %v10637_v18 = vld [vmem:[#allocation8 + $0x68] sm:$0xff]  }
 0x83b   : > { %v1658_v0 = vadd.f32 1e-05, %v1654_v37  ;;  %v10638_v37 = vld [vmem:[#allocation8 + $0xe8] sm:$0xff]  }
 0x83c   : > { %v1651_v25 = vpop.xlane.xlu0 %1650 }
 0x83d   : > { %11009 = vrsqrt.f32 %v1658_v0  ;;  %v1655_v40 = vmul.f32 0.03125, %v1651_v25  ;;  %v10639_v0 = vld [vmem:[#allocation8 + $0x28] sm:$0xff]  }
 0x83e   : > { %v10640_v25 = vld [vmem:[#allocation8 + $0xa8] sm:$0xff]  }
 0x83f   : > { %v11006_v36 = vpop.eup %11005  ;;  %v1659_v38 = vadd.f32 1e-05, %v1655_v40  ;;  %v10641_v40 = vld [vmem:[#allocation8 + $0x70] sm:$0xff]  }
 0x840   : > { %v1664_v21 = vmul.f32 %v11006_v36, %v12154_v51  ;;  %v10642_v36 = vld [vmem:[#allocation8 + $0xf0] sm:$0xff]  }
 0x841   : > { %11011 = vrsqrt.f32 %v1659_v38  ;;  %v10643_v38 = vld [vmem:[#allocation8 + $0x30] sm:$0xff]  }
 0x842   : > { %v1672_v42 = vmul.f32 %v1671_v50, %v1664_v21  ;;  %v10645_v21 = vld [vmem:[#allocation8 + $0x78] sm:$0xff]  }
 0x843   : > { %v11008_v15 = vpop.eup %11007 }
 0x844   : > { %v1665_v7 = vmul.f32 %v11008_v15, %v12156_v46  ;;  %v12226_v57 = vadd.f32 %v1679_v48, %v1672_v42  ;;  %v1697_v46 = vld [vmem:[%s15384_s10 + $0x58] sm:$0xff] }
 0x845   : > { %v9126_v3 = vcombine.high %v1697_v46, %v1701_v44  ;;  %v9125_v33 = vcombine.low %v1697_v46, %v1701_v44  ;;  %v10646_v15 = vld [vmem:[#allocation8 + $0xf8] sm:$0xff]  }
 0x846   : > { %v1673_v56 = vmul.f32 %v1671_v50, %v1665_v7  ;;  %v10647_v42 = vld [vmem:[#allocation8 + $0x38] sm:$0xff]  }
 0x847   : > { %v11010_v2 = vpop.eup %11009  ;;  %v10648_v7 = vld [vmem:[#allocation8 + $0xb8] sm:$0xff]  }
 0x848   : > { %v12228_v51 = vadd.f32 %v1679_v48, %v1673_v56  ;;  %v1666_v10 = vmul.f32 %v11010_v2, %v12160_v55  ;;  %v10650_v56 = vld [vmem:[#allocation8 + $0x1c0] sm:$0xff]  }
 0x849   : > { %v12266_v2 = vld [vmem:[%s15385_s11] sm:$0xff] }
 0x84a   : > { %v1684_v5 = vpack.c.bf16 %v12228_v51, %v12226_v57  ;;  %v1674_v6 = vmul.f32 %v1671_v50, %v1666_v10  ;;  %v1707_v19 = vrot.slane %v12266_v2, %v11724_v24  ;;  %v1715_v10 = vrot.slane %v12266_v2, %v12136_v30 }
 0x84b   : > { %v11012_v1 = vpop.eup %11011  ;;  %v1711_v61 = vrot.slane %v12266_v2, %v11752_v53  ;;  %v1719_v46 = vrot.slane %v12266_v2, %v12207_v14 }
 0x84c   : > { %9127 = vmatmul.mubr.msk.bf16.vlgmr.msra.gmra.mrb[24].mxu1 %vm958_vm0, %v1684_v5  ;;  %9129 = vmatmul.mubr.msk.bf16.vlgmr.msra.gmra.mrb[24].mxu0 %vm958_vm0, %v1684_v5  ;;  %v1667_v55 = vmul.f32 %v11012_v1, %v12165_v62  ;;  %v12247_v28 = vadd.f32 %v1679_v48, %v1674_v6 }
 0x84d   : > { %1872 = vmatprep.mubr.bf16.mxu1 %v15409_v26  ;;  %1925 = vmatprep.mubr.bf16.mxu0 %v15409_v26 }
 0x84e   : > { %v1675_v8 = vmul.f32 %v1671_v50, %v1667_v55  ;;  %1937 = vmatpush1.bf16.msra.mxu1 %v9115_v11  ;;  %1990 = vmatpush1.bf16.msra.mxu0 %v9117_v31  ;;  %v10626_v11 = vld [vmem:[#allocation8 + $0xd0] sm:$0xff]   ;;  %v10629_v31 = vld [vmem:[#allocation8 + $0x58] sm:$0xff]  }
 0x84f   : > { %1938 = vmatprep.subr.bf16.mxu1 %v9124_v16  ;;  %1991 = vmatprep.subr.bf16.mxu0 %v9126_v3  ;;  %v10644_v50 = vld [vmem:[#allocation8 + $0xb0] sm:$0xff]  }
 0x850   : > { %v12249_v58 = vadd.f32 %v1679_v48, %v1675_v8  ;;  %v10649_v48 = vld [vmem:[#allocation8 + $0x140] sm:$0xff]  }
 0x852   : > { %v1685_v62 = vpack.c.bf16 %v12249_v58, %v12247_v28  ;;  %1939 = vmatpush1.bf16.msra.mxu1 %v9123_v47  ;;  %1992 = vmatpush1.bf16.msra.mxu0 %v9125_v33 }
 0x853   : > { %9666 = vmatprep.subr.bf16.mxu1 %v10617_v9  ;;  %9694 = vmatprep.subr.bf16.mxu0 %v10618_v29 }
 0x854   : > { %9128 = vmatmul.mubr.msk.bf16.gmra.mrb[28].mxu1 %vm958_vm0, %v1685_v62  ;;  %9130 = vmatmul.mubr.msk.bf16.gmra.mrb[28].mxu0 %vm958_vm0, %v1685_v62 }
 0x855   : > { %1968 = vmatprep.mubr.bf16.mxu1 %v15409_v26  ;;  %2021 = vmatprep.mubr.bf16.mxu0 %v15409_v26 }
 0x85c   : > { %9131 = vmatmul.mubr.msk.bf16.vlgmr.msra.gmra.mrb[32].mxu1 %vm958_vm0, %v1684_v5  ;;  %9133 = vmatmul.mubr.msk.bf16.vlgmr.msra.gmra.mrb[32].mxu0 %vm958_vm0, %v1684_v5 }
 0x85d   : > { %1978 = vmatprep.mubr.bf16.mxu1 %v15409_v26  ;;  %2031 = vmatprep.mubr.bf16.mxu0 %v15409_v26 }
 0x85e   : > { %9667 = vmatpush3.bf16.msra.mxu1 %v10619_v63  ;;  %9695 = vmatpush3.bf16.msra.mxu0 %v10620_v49 }
 0x85f   : > { %9668 = vmatprep.subr.bf16.mxu1 %v10621_v13  ;;  %9696 = vmatprep.subr.bf16.mxu0 %v10622_v4  ;;  %v12277_v4 = vsub.s32 6, %v11721_v23 }
 0x861   : > { %15458 = vst [vmem:[#allocation25_spill] sm:$0xff] %v12277_v4 }
 0x862   : > { %9669 = vmatpush3.bf16.msra.mxu1 %v10623_v35  ;;  %9697 = vmatpush3.bf16.msra.mxu0 %v10624_v27 }
 0x863   : > { %9670 = vmatprep.subr.bf16.mxu1 %v10625_v34  ;;  %9698 = vmatprep.subr.bf16.mxu0 %v10626_v11 }
 0x864   : > { %9132 = vmatmul.mubr.msk.bf16.gmra.mrb[36].mxu1 %vm958_vm0, %v1685_v62  ;;  %9134 = vmatmul.mubr.msk.bf16.gmra.mrb[36].mxu0 %vm958_vm0, %v1685_v62 }
 0x866   : > { %9671 = vmatpush3.bf16.msra.mxu1 %v10627_v17  ;;  %9699 = vmatpush3.bf16.msra.mxu0 %v10628_v52 }
 0x867   : > { %9672 = vmatprep.subr.bf16.mxu1 %v10629_v31  ;;  %9700 = vmatprep.subr.bf16.mxu0 %v10630_v20 }
 0x86a   : > { %9673 = vmatpush3.bf16.msra.mxu1 %v10631_v43  ;;  %9701 = vmatpush3.bf16.msra.mxu0 %v10632_v32 }
 0x86b   : > { %9674 = vmatprep.subr.bf16.mxu1 %v10633_v22  ;;  %9702 = vmatprep.subr.bf16.mxu0 %v10634_v12  ;;  %v12280_v22 = vsub.s32 5, %v11721_v23 }
 0x86d   : > { %15459 = vst [vmem:[#allocation26_spill] sm:$0xff] %v12280_v22 }
 0x86e   : > { %9675 = vmatpush3.bf16.msra.mxu1 %v10635_v45  ;;  %9703 = vmatpush3.bf16.msra.mxu0 %v10636_v60 }
 0x86f   : > { %9676 = vmatprep.subr.bf16.mxu1 %v10637_v18  ;;  %9704 = vmatprep.subr.bf16.mxu0 %v10638_v37  ;;  %v10651_v37 = vld [vmem:[#allocation8 + $0x100] sm:$0xff]  }
 0x872   : > { %9677 = vmatpush3.bf16.msra.mxu1 %v10639_v0  ;;  %9705 = vmatpush3.bf16.msra.mxu0 %v10640_v25  ;;  %v10652_v0 = vld [vmem:[#allocation8 + $0x180] sm:$0xff]   ;;  %v12283_v25 = vsub.s32 7, %v11721_v23  ;;  %v12291_v23 = vrot.slane %v12266_v2, %v12277_v4 }
 0x873   : > { %9678 = vmatprep.subr.bf16.mxu1 %v10641_v40  ;;  %9706 = vmatprep.subr.bf16.mxu0 %v10642_v36 }
 0x876   : > { %9679 = vmatpush3.bf16.msra.mxu1 %v10643_v38  ;;  %9707 = vmatpush3.bf16.msra.mxu0 %v10644_v50 }
 0x877   : > { %9680 = vmatprep.subr.bf16.mxu1 %v10645_v21  ;;  %9708 = vmatprep.subr.bf16.mxu0 %v10646_v15  ;;  %v10653_v21 = vld [vmem:[#allocation8 + $0x148] sm:$0xff]  }
 0x878   : > { %v10654_v15 = vld [vmem:[#allocation8 + $0x1c8] sm:$0xff]  }
 0x87a   : > { %9681 = vmatpush3.bf16.msra.mxu1 %v10647_v42  ;;  %9709 = vmatpush3.bf16.msra.mxu0 %v10648_v7  ;;  %v12287_v42 = vrot.slane %v12266_v2, %v12218_v41 }
 0x87b   : > { %9722 = vmatprep.subr.bf16.mxu1 %v10649_v48  ;;  %9750 = vmatprep.subr.bf16.mxu0 %v10650_v56 }
 0x91f   : > { %v1864_v44 = vpop.f32.mrb[24].mxu1  ;;  %v1917_v5 = vpop.f32.mrb[24].mxu0 }
 0x920   : > { %v1865_v1 = vadd.f32 %v1864_v44, %v1707_v19  ;;  %v1918_v16 = vadd.f32 %v1917_v5, %v1715_v10  ;;  %v1866_v3 = vpop.f32.mrb[25].mxu1  ;;  %v1919_v55 = vpop.f32.mrb[25].mxu0 }
 0x921   : > { %v1867_v6 = vadd.f32 %v1866_v3, %v1711_v61  ;;  %v1920_v8 = vadd.f32 %v1919_v55, %v1719_v46  ;;  %v1868_v47 = vpop.f32.mrb[26].mxu1  ;;  %v1921_v33 = vpop.f32.mrb[26].mxu0  ;;  %v12295_v55 = vrot.slane %v12266_v2, %v12280_v22 }
 0x922   : > { %v1869_v9 = vadd.f32 %v1868_v47, %v1707_v19  ;;  %v1922_v29 = vadd.f32 %v1921_v33, %v1715_v10  ;;  %v1870_v62 = vpop.f32.mrb[27].mxu1  ;;  %v1923_v63 = vpop.f32.mrb[27].mxu0  ;;  %v2042_v35 = vmax.f32 %v1865_v1, 0.0  ;;  %v2044_v27 = vmax.f32 %v1918_v16, 0.0  ;;  %v10655_v47 = vld [vmem:[#allocation8 + $0x108] sm:$0xff]  }
 0x923   : > { %v1871_v49 = vadd.f32 %v1870_v62, %v1711_v61  ;;  %v1924_v13 = vadd.f32 %v1923_v63, %v1719_v46  ;;  %v2043_v17 = vmax.f32 %v1867_v6, 0.0  ;;  %v2045_v52 = vmax.f32 %v1920_v8, 0.0  ;;  %v10656_v33 = vld [vmem:[#allocation8 + $0x188] sm:$0xff]   ;;  %v10657_v63 = vld [vmem:[#allocation8 + $0x150] sm:$0xff]  }
 0x924   : > { %v2050_v34 = vmax.f32 %v1869_v9, 0.0  ;;  %v2052_v11 = vmax.f32 %v1922_v29, 0.0  ;;  %v12299_v9 = vrot.slane %v12266_v2, %v12283_v25 }
 0x925   : > { %v2051_v31 = vmax.f32 %v1871_v49, 0.0  ;;  %v2053_v20 = vmax.f32 %v1924_v13, 0.0  ;;  %v10658_v49 = vld [vmem:[#allocation8 + $0x1d0] sm:$0xff]  }
 0x926   : > { %v2074_v43 = vpack.c.bf16 %v2050_v34, %v2042_v35  ;;  %v2076_v32 = vpack.c.bf16 %v2052_v11, %v2044_v27 }
 0x927   : > { %v2075_v12 = vpack.c.bf16 %v2051_v31, %v2043_v17  ;;  %v2077_v45 = vpack.c.bf16 %v2053_v20, %v2045_v52  ;;  %v1874_v60 = vpop.f32.mrb[28].mxu1  ;;  %v1927_v18 = vpop.f32.mrb[28].mxu0  ;;  %v10659_v31 = vld [vmem:[#allocation8 + $0x110] sm:$0xff]  }
 0x928   : > { %v1875_v40 = vadd.f32 %v1874_v60, %v1707_v19  ;;  %v1928_v36 = vadd.f32 %v1927_v18, %v1715_v10  ;;  %v1876_v38 = vpop.f32.mrb[29].mxu1  ;;  %v1929_v50 = vpop.f32.mrb[29].mxu0  ;;  %v10660_v20 = vld [vmem:[#allocation8 + $0x190] sm:$0xff]   ;;  %v10661_v60 = vld [vmem:[#allocation8 + $0x158] sm:$0xff]  }
 0x929   : > { %v1877_v7 = vadd.f32 %v1876_v38, %v1711_v61  ;;  %v1930_v48 = vadd.f32 %v1929_v50, %v1719_v46  ;;  %v1878_v56 = vpop.f32.mrb[30].mxu1  ;;  %v1931_v44 = vpop.f32.mrb[30].mxu0  ;;  %2638 = vmatprep.mubr.bf16.mxu1 %v2075_v12  ;;  %2687 = vmatprep.mubr.bf16.mxu0 %v2077_v45  ;;  %v10662_v18 = vld [vmem:[#allocation8 + $0x1d8] sm:$0xff]  }
 0x92a   : > { %v1879_v5 = vadd.f32 %v1878_v56, %v1707_v19  ;;  %v1932_v1 = vadd.f32 %v1931_v44, %v1715_v10  ;;  %v1880_v16 = vpop.f32.mrb[31].mxu1  ;;  %v1933_v3 = vpop.f32.mrb[31].mxu0  ;;  %2639 = vmatmul.mubr.bf16.vlgmr.msra.gmra.mrb[40].mxu1 %v2074_v43  ;;  %2688 = vmatmul.mubr.bf16.vlgmr.msra.gmra.mrb[40].mxu0 %v2076_v32  ;;  %v2058_v19 = vmax.f32 %v1875_v40, 0.0  ;;  %v2060_v10 = vmax.f32 %v1928_v36, 0.0  ;;  %v10663_v56 = vld [vmem:[#allocation8 + $0x118] sm:$0xff]  }
 0x92b   : > { %v1881_v6 = vadd.f32 %v1880_v16, %v1711_v61  ;;  %v1934_v8 = vadd.f32 %v1933_v3, %v1719_v46  ;;  %9723 = vmatpush3.bf16.msra.mxu1 %v10651_v37  ;;  %9751 = vmatpush3.bf16.msra.mxu0 %v10652_v0  ;;  %v2059_v13 = vmax.f32 %v1877_v7, 0.0  ;;  %v2061_v35 = vmax.f32 %v1930_v48, 0.0  ;;  %v10664_v44 = vld [vmem:[#allocation8 + $0x198] sm:$0xff]  }
 0x92c   : > { %v2066_v29 = vmax.f32 %v1879_v5, 0.0  ;;  %v2068_v62 = vmax.f32 %v1932_v1, 0.0  ;;  %9724 = vmatprep.subr.bf16.mxu1 %v10653_v21  ;;  %9752 = vmatprep.subr.bf16.mxu0 %v10654_v15 }
 0x92d   : > { %v2067_v61 = vmax.f32 %v1881_v6, 0.0  ;;  %v2069_v46 = vmax.f32 %v1934_v8, 0.0  ;;  %v10665_v6 = vld [vmem:[#allocation8 + $0x160] sm:$0xff]  }
 0x92e   : > { %v2082_v27 = vpack.c.bf16 %v2066_v29, %v2058_v19  ;;  %v2084_v34 = vpack.c.bf16 %v2068_v62, %v2060_v10  ;;  %v10666_v8 = vld [vmem:[#allocation8 + $0x1e0] sm:$0xff]  }
 0x92f   : > { %v2083_v11 = vpack.c.bf16 %v2067_v61, %v2059_v13  ;;  %v2085_v17 = vpack.c.bf16 %v2069_v46, %v2061_v35  ;;  %9725 = vmatpush3.bf16.msra.mxu1 %v10655_v47  ;;  %9753 = vmatpush3.bf16.msra.mxu0 %v10656_v33  ;;  %v1970_v2 = vpop.f32.mrb[32].mxu1  ;;  %v2023_v52 = vpop.f32.mrb[32].mxu0  ;;  %v10667_v61 = vld [vmem:[#allocation8 + $0x120] sm:$0xff]  }
 0x930   : > { %v1971_v43 = vadd.f32 %v1970_v2, %v12287_v42  ;;  %v2024_v32 = vadd.f32 %v2023_v52, %v12291_v23  ;;  %v1972_v12 = vpop.f32.mrb[33].mxu1  ;;  %v2025_v45 = vpop.f32.mrb[33].mxu0  ;;  %9726 = vmatprep.subr.bf16.mxu1 %v10657_v63  ;;  %9754 = vmatprep.subr.bf16.mxu0 %v10658_v49  ;;  %v10668_v46 = vld [vmem:[#allocation8 + $0x1a0] sm:$0xff]   ;;  %v10669_v2 = vld [vmem:[#allocation8 + $0x168] sm:$0xff]  }
 0x931   : > { %v1973_v37 = vadd.f32 %v1972_v12, %v12295_v55  ;;  %v2026_v0 = vadd.f32 %v2025_v45, %v12299_v9  ;;  %v1974_v40 = vpop.f32.mrb[34].mxu1  ;;  %v2027_v36 = vpop.f32.mrb[34].mxu0  ;;  %2646 = vmatprep.mubr.bf16.mxu1 %v2083_v11  ;;  %2695 = vmatprep.mubr.bf16.mxu0 %v2085_v17  ;;  %v10670_v52 = vld [vmem:[#allocation8 + $0x1e8] sm:$0xff]  }
 0x932   : > { %v1975_v38 = vadd.f32 %v1974_v40, %v12287_v42  ;;  %v2028_v50 = vadd.f32 %v2027_v36, %v12291_v23  ;;  %v1976_v21 = vpop.f32.mrb[35].mxu1  ;;  %v2029_v15 = vpop.f32.mrb[35].mxu0  ;;  %2647 = vmatmul.mubr.bf16.gmra.mrb[44].mxu1 %v2082_v27  ;;  %2696 = vmatmul.mubr.bf16.gmra.mrb[44].mxu0 %v2084_v34  ;;  %v2046_v5 = vmax.f32 %v1971_v43, 0.0  ;;  %v2048_v1 = vmax.f32 %v2024_v32, 0.0  ;;  %v10671_v40 = vld [vmem:[#allocation8 + $0x128] sm:$0xff]  }
 0x933   : > { %v1977_v7 = vadd.f32 %v1976_v21, %v12295_v55  ;;  %v2030_v48 = vadd.f32 %v2029_v15, %v12299_v9  ;;  %9727 = vmatpush3.bf16.msra.mxu1 %v10659_v31  ;;  %9755 = vmatpush3.bf16.msra.mxu0 %v10660_v20  ;;  %v2047_v47 = vmax.f32 %v1973_v37, 0.0  ;;  %v2049_v33 = vmax.f32 %v2026_v0, 0.0  ;;  %v10672_v36 = vld [vmem:[#allocation8 + $0x1a8] sm:$0xff]  }
 0x934   : > { %v2054_v16 = vmax.f32 %v1975_v38, 0.0  ;;  %v2056_v3 = vmax.f32 %v2028_v50, 0.0  ;;  %9728 = vmatprep.subr.bf16.mxu1 %v10661_v60  ;;  %9756 = vmatprep.subr.bf16.mxu0 %v10662_v18 }
 0x935   : > { %v2055_v19 = vmax.f32 %v1977_v7, 0.0  ;;  %v2057_v10 = vmax.f32 %v2030_v48, 0.0  ;;  %v10673_v7 = vld [vmem:[#allocation8 + $0x170] sm:$0xff]  }
 0x936   : > { %v12309_v29 = vpack.c.bf16 %v2054_v16, %v2046_v5  ;;  %v12311_v62 = vpack.c.bf16 %v2056_v3, %v2048_v1  ;;  %v10675_v16 = vld [vmem:[#allocation8 + $0x130] sm:$0xff]  }
 0x937   : > { %v2079_v63 = vpack.c.bf16 %v2055_v19, %v2047_v47  ;;  %v2081_v49 = vpack.c.bf16 %v2057_v10, %v2049_v33  ;;  %9729 = vmatpush3.bf16.msra.mxu1 %v10663_v56  ;;  %9757 = vmatpush3.bf16.msra.mxu0 %v10664_v44  ;;  %v1980_v13 = vpop.f32.mrb[36].mxu1  ;;  %v2033_v35 = vpop.f32.mrb[36].mxu0  ;;  %v10676_v3 = vld [vmem:[#allocation8 + $0x1b0] sm:$0xff]   ;;  %v10679_v47 = vld [vmem:[#allocation8 + $0x138] sm:$0xff]   ;;  %v686_v19 = vld [vmem:[%s15381_s7 + $0x8] sm:$0xff] }
 0x938   : > { %v1981_v27 = vadd.f32 %v1980_v13, %v12287_v42  ;;  %v2034_v34 = vadd.f32 %v2033_v35, %v12291_v23  ;;  %v1982_v11 = vpop.f32.mrb[37].mxu1  ;;  %v2035_v17 = vpop.f32.mrb[37].mxu0  ;;  %9730 = vmatprep.subr.bf16.mxu1 %v10665_v6  ;;  %9758 = vmatprep.subr.bf16.mxu0 %v10666_v8  ;;  %v10677_v6 = vld [vmem:[#allocation8 + $0x178] sm:$0xff]  }
 0x939   : > { %v1983_v31 = vadd.f32 %v1982_v11, %v12295_v55  ;;  %v2036_v20 = vadd.f32 %v2035_v17, %v12299_v9  ;;  %v1984_v43 = vpop.f32.mrb[38].mxu1  ;;  %v2037_v32 = vpop.f32.mrb[38].mxu0  ;;  %2736 = vmatprep.mubr.bf16.mxu1 %v2079_v63  ;;  %2785 = vmatprep.mubr.bf16.mxu0 %v2081_v49  ;;  %v10678_v8 = vld [vmem:[#allocation8 + $0x1f8] sm:$0xff]   ;;  %v2221_v49 = vrot.slane %v686_v19, %v12277_v4 }
 0x93a   : > { %v1985_v12 = vadd.f32 %v1984_v43, %v12287_v42  ;;  %v2038_v45 = vadd.f32 %v2037_v32, %v12291_v23  ;;  %v1986_v60 = vpop.f32.mrb[39].mxu1  ;;  %v2039_v18 = vpop.f32.mrb[39].mxu0  ;;  %v2062_v38 = vmax.f32 %v1981_v27, 0.0  ;;  %v2064_v50 = vmax.f32 %v2034_v34, 0.0  ;;  %v10674_v42 = vld [vmem:[#allocation8 + $0x1f0] sm:$0xff]   ;;  %v10680_v33 = vld [vmem:[#allocation8 + $0x1b8] sm:$0xff]  }
 0x93b   : > { %v1987_v37 = vadd.f32 %v1986_v60, %v12295_v55  ;;  %v2040_v0 = vadd.f32 %v2039_v18, %v12299_v9  ;;  %9731 = vmatpush3.bf16.msra.mxu1 %v10667_v61  ;;  %9759 = vmatpush3.bf16.msra.mxu0 %v10668_v46  ;;  %v2063_v48 = vmax.f32 %v1983_v31, 0.0  ;;  %v2065_v23 = vmax.f32 %v2036_v20, 0.0 }
 0x93c   : > { %v2070_v21 = vmax.f32 %v1985_v12, 0.0  ;;  %v2072_v15 = vmax.f32 %v2038_v45, 0.0  ;;  %9732 = vmatprep.subr.bf16.mxu1 %v10669_v2  ;;  %9760 = vmatprep.subr.bf16.mxu0 %v10670_v52 }
 0x93d   : > { %v2071_v56 = vmax.f32 %v1987_v37, 0.0  ;;  %v2073_v44 = vmax.f32 %v2040_v0, 0.0 }
 0x93e   : > { %v2086_v5 = vpack.c.bf16 %v2070_v21, %v2062_v38  ;;  %v2088_v55 = vpack.c.bf16 %v2072_v15, %v2064_v50 }
 0x93f   : > { %v2087_v1 = vpack.c.bf16 %v2071_v56, %v2063_v48  ;;  %v2089_v9 = vpack.c.bf16 %v2073_v44, %v2065_v23  ;;  %9733 = vmatpush3.bf16.msra.mxu1 %v10671_v40  ;;  %9761 = vmatpush3.bf16.msra.mxu0 %v10672_v36 }
 0x940   : > { %9734 = vmatprep.subr.bf16.mxu1 %v10673_v7  ;;  %9762 = vmatprep.subr.bf16.mxu0 %v10674_v42 }
 0x943   : > { %9735 = vmatpush3.bf16.msra.mxu1 %v10675_v16  ;;  %9763 = vmatpush3.bf16.msra.mxu0 %v10676_v3 }
 0x944   : > { %9736 = vmatprep.subr.bf16.mxu1 %v10677_v6  ;;  %9764 = vmatprep.subr.bf16.mxu0 %v10678_v8 }
 0x947   : > { %9737 = vmatpush3.bf16.msra.mxu1 %v10679_v47  ;;  %9765 = vmatpush3.bf16.msra.mxu0 %v10680_v33 }
 0x94a   : > { %2737 = vmatmul.mubr.bf16.vlgmr.msra.gmra.mrb[48].mxu1 %v12309_v29  ;;  %2786 = vmatmul.mubr.bf16.vlgmr.msra.gmra.mrb[48].mxu0 %v12311_v62 }
 0x94b   : > { %2744 = vmatprep.mubr.bf16.mxu1 %v2087_v1  ;;  %2793 = vmatprep.mubr.bf16.mxu0 %v2089_v9 }
 0x952   : > { %2745 = vmatmul.mubr.bf16.gmra.mrb[52].mxu1 %v2086_v5  ;;  %2794 = vmatmul.mubr.bf16.gmra.mrb[52].mxu0 %v2088_v55 }
 0x9fd   : > { %v9682_v10 = vpop.f32.mrb[40].mxu1  ;;  %v9710_v63 = vpop.f32.mrb[40].mxu0 }
 0x9fe   : > { %v9683_v13 = vpop.f32.mrb[41].mxu1  ;;  %v9711_v35 = vpop.f32.mrb[41].mxu0 }
 0x9ff   : > { %v9684_v61 = vadd.f32 %v9683_v13, %v9682_v10  ;;  %v9712_v46 = vadd.f32 %v9711_v35, %v9710_v63  ;;  %v9685_v27 = vpop.f32.mrb[42].mxu1  ;;  %v9713_v29 = vpop.f32.mrb[42].mxu0 }
 0xa00   : > { %v9686_v34 = vpop.f32.mrb[43].mxu1  ;;  %v9714_v62 = vpop.f32.mrb[43].mxu0 }
 0xa01   : > { %v2641_v11 = vadd.f32 %v9684_v61, %v2221_v49  ;;  %v9687_v17 = vadd.f32 %v9686_v34, %v9685_v27  ;;  %v9715_v2 = vadd.f32 %v9714_v62, %v9713_v29 }
 0xa03   : > { %v2690_v52 = vadd.f32 %v9712_v46, %v2641_v11  ;;  %v2644_v31 = vadd.f32 %v9687_v17, %v2221_v49 }
 0xa05   : > { %v2693_v20 = vadd.f32 %v9715_v2, %v2644_v31  ;;  %v9688_v43 = vpop.f32.mrb[44].mxu1  ;;  %v9716_v32 = vpop.f32.mrb[44].mxu0 }
 0xa06   : > { %v9689_v12 = vpop.f32.mrb[45].mxu1  ;;  %v9717_v45 = vpop.f32.mrb[45].mxu0 }
 0xa07   : > { %v9690_v60 = vadd.f32 %v9689_v12, %v9688_v43  ;;  %v9718_v18 = vadd.f32 %v9717_v45, %v9716_v32  ;;  %v9691_v37 = vpop.f32.mrb[46].mxu1  ;;  %v9719_v0 = vpop.f32.mrb[46].mxu0 }
 0xa08   : > { %v9692_v40 = vpop.f32.mrb[47].mxu1  ;;  %v9720_v36 = vpop.f32.mrb[47].mxu0 }
 0xa09   : > { %v2649_v38 = vadd.f32 %v9690_v60, %v2221_v49  ;;  %v9693_v50 = vadd.f32 %v9692_v40, %v9691_v37  ;;  %v9721_v21 = vadd.f32 %v9720_v36, %v9719_v0 }
 0xa0b   : > { %v2698_v15 = vadd.f32 %v9718_v18, %v2649_v38  ;;  %v2652_v7 = vadd.f32 %v9693_v50, %v2221_v49 }
 0xa0d   : > { %v2701_v42 = vadd.f32 %v9721_v21, %v2652_v7 }
 0xa1d   : > { %v9738_v48 = vpop.f32.mrb[48].mxu1  ;;  %v9766_v23 = vpop.f32.mrb[48].mxu0 }
 0xa1e   : > { %v9739_v56 = vpop.f32.mrb[49].mxu1  ;;  %v9767_v44 = vpop.f32.mrb[49].mxu0 }
 0xa1f   : > { %v9740_v5 = vadd.f32 %v9739_v56, %v9738_v48  ;;  %v9768_v55 = vadd.f32 %v9767_v44, %v9766_v23  ;;  %v9741_v1 = vpop.f32.mrb[50].mxu1  ;;  %v9769_v9 = vpop.f32.mrb[50].mxu0 }
 0xa20   : > { %v9742_v16 = vpop.f32.mrb[51].mxu1  ;;  %v9770_v3 = vpop.f32.mrb[51].mxu0 }
 0xa21   : > { %v2739_v6 = vadd.f32 %v9740_v5, %v2690_v52  ;;  %v9743_v8 = vadd.f32 %v9742_v16, %v9741_v1  ;;  %v9771_v47 = vadd.f32 %v9770_v3, %v9769_v9  ;;  %v10681_v16 = vld [vmem:[#allocation5 + $0x10] sm:$0xff]   ;;  %v10682_v3 = vld [vmem:[#allocation5 + $0x18] sm:$0xff]  }
 0xa22   : > { %10318 = vmatprep.subr.bf16.mxu1 %v10681_v16 }
 0xa23   : > { %v2788_v33 = vadd.f32 %v9768_v55, %v2739_v6  ;;  %v2742_v19 = vadd.f32 %v9743_v8, %v2693_v20  ;;  %10319 = vmatpush3.bf16.msra.mxu1 %v10681_v16  ;;  %v12392_v16 = vld [vmem:[%s15379_s5 + $0x40] sm:$0xff] }
 0xa24   : > { %10320 = vmatprep.subr.bf16.mxu1 %v10682_v3 }
 0xa25   : > { %v2791_v10 = vadd.f32 %v9771_v47, %v2742_v19  ;;  %v9744_v63 = vpop.f32.mrb[52].mxu1  ;;  %v9772_v13 = vpop.f32.mrb[52].mxu0  ;;  %v2802_v49 = vadd.f32 %v2788_v33, %v12226_v57 }
 0xa26   : > { %v9745_v35 = vpop.f32.mrb[53].mxu1  ;;  %v9773_v61 = vpop.f32.mrb[53].mxu0 }
 0xa27   : > { %v9746_v46 = vadd.f32 %v9745_v35, %v9744_v63  ;;  %v9774_v27 = vadd.f32 %v9773_v61, %v9772_v13  ;;  %v9747_v29 = vpop.f32.mrb[54].mxu1  ;;  %v9775_v34 = vpop.f32.mrb[54].mxu0  ;;  %v2806_v62 = vsel %vm958_vm0, %v2802_v49, 0.0  ;;  %v2803_v11 = vadd.f32 %v2791_v10, %v12228_v51  ;;  %10321 = vmatpush3.bf16.msra.mxu1 %v10682_v3 }
 0xa28   : > { %v9748_v17 = vpop.f32.mrb[55].mxu1  ;;  %v9776_v2 = vpop.f32.mrb[55].mxu0  ;;  %2807 = vadd.xlane.f32.xlu0 %v2806_v62 }
 0xa29   : > { %v2747_v52 = vadd.f32 %v9746_v46, %v2698_v15  ;;  %v9749_v31 = vadd.f32 %v9748_v17, %v9747_v29  ;;  %v9777_v20 = vadd.f32 %v9776_v2, %v9775_v34  ;;  %v2809_v57 = vsel %vm958_vm0, %v2803_v11, 0.0 }
 0xa2a   : > { %v2861_v29 = vrot.slane %v12212_v39, %v12280_v22  ;;  %v2869_v2 = vrot.slane %v12212_v39, %v12277_v4 }
 0xa2b   : > { %v2796_v43 = vadd.f32 %v9774_v27, %v2747_v52  ;;  %v2750_v32 = vadd.f32 %v9749_v31, %v2701_v42 }
 0xa2c   : > { %2810 = vadd.xlane.f32.xlu0 %v2809_v57 }
 0xa2d   : > { %v2799_v12 = vadd.f32 %v9777_v20, %v2750_v32  ;;  %v2804_v45 = vadd.f32 %v2796_v43, %v12247_v28 }
 0xa2f   : > { %v2812_v60 = vsel %vm958_vm0, %v2804_v45, 0.0  ;;  %v2805_v18 = vadd.f32 %v2799_v12, %v12249_v58 }
 0xa30   : > { %2813 = vadd.xlane.f32.xlu0 %v2812_v60 }
 0xa31   : > { %v2815_v51 = vsel %vm958_vm0, %v2805_v18, 0.0 }
 0xa32   : > { %2816 = vadd.xlane.f32.xlu1 %v2815_v51 }
 0xab5   : > { %v2808_v37 = vpop.xlane.xlu0 %2807 }
 0xab6   : > { %v2818_v0 = vmul.f32 0.03125, %v2808_v37 }
 0xab8   : > { %v2822_v40 = vsub.f32 %v2802_v49, %v2818_v0 }
 0xab9   : > { %v2811_v36 = vpop.xlane.xlu0 %2810 }
 0xaba   : > { %v2819_v38 = vmul.f32 0.03125, %v2811_v36  ;;  %v2826_v50 = vmul.f32 %v2822_v40, %v2822_v40 }
 0xabc   : > { %v2823_v21 = vsub.f32 %v2803_v11, %v2819_v38  ;;  %v2830_v15 = vsel %vm958_vm0, %v2826_v50, 0.0 }
 0xabd   : > { %2831 = vadd.xlane.f32.xlu0 %v2830_v15  ;;  %v2814_v7 = vpop.xlane.xlu0 %2813 }
 0xabe   : > { %v2820_v28 = vmul.f32 0.03125, %v2814_v7  ;;  %v2827_v42 = vmul.f32 %v2823_v21, %v2823_v21  ;;  %v12362_v7 = vld [vmem:[%s15379_s5 + $0x10] sm:$0xff] }
 0xabf   : > { %v2817_v48 = vpop.xlane.xlu1 %2816 }
 0xac0   : > { %v2824_v23 = vsub.f32 %v2804_v45, %v2820_v28  ;;  %v2821_v58 = vmul.f32 0.03125, %v2817_v48  ;;  %v2833_v56 = vsel %vm958_vm0, %v2827_v42, 0.0 }
 0xac1   : > { %2834 = vadd.xlane.f32.xlu1 %v2833_v56 }
 0xac2   : > { %v2825_v44 = vsub.f32 %v2805_v18, %v2821_v58  ;;  %v2828_v5 = vmul.f32 %v2824_v23, %v2824_v23  ;;  %v12374_v58 = vld [vmem:[%s15379_s5 + $0x50] sm:$0xff] }
 0xac4   : > { %v2836_v55 = vsel %vm958_vm0, %v2828_v5, 0.0  ;;  %v2829_v1 = vmul.f32 %v2825_v44, %v2825_v44  ;;  %v12380_v5 = vld [vmem:[%s15379_s5] sm:$0xff] }
 0xac5   : > { %2837 = vadd.xlane.f32.xlu0 %v2836_v55 }
 0xac6   : > { %v2839_v9 = vsel %vm958_vm0, %v2829_v1, 0.0  ;;  %v12386_v1 = vld [vmem:[%s15379_s5 + $0x20] sm:$0xff] }
 0xac7   : > { %2840 = vadd.xlane.f32.xlu1 %v2839_v9 }
 0xb4a   : > { %v2832_v6 = vpop.xlane.xlu0 %2831 }
 0xb4b   : > { %v2842_v8 = vmul.f32 0.03125, %v2832_v6  ;;  %v12398_v6 = vld [vmem:[%s15379_s5 + $0x18] sm:$0xff] }
 0xb4d   : > { %v2846_v47 = vadd.f32 1e-05, %v2842_v8 }
 0xb4e   : > { %v2835_v33 = vpop.xlane.xlu1 %2834 }
 0xb4f   : > { %11013 = vrsqrt.f32 %v2846_v47  ;;  %v2843_v19 = vmul.f32 0.03125, %v2835_v33  ;;  %v12406_v33 = vld [vmem:[%s15379_s5 + $0x38] sm:$0xff] }
 0xb51   : > { %v2847_v10 = vadd.f32 1e-05, %v2843_v19 }
 0xb52   : > { %v2838_v63 = vpop.xlane.xlu0 %2837 }
 0xb53   : > { %11015 = vrsqrt.f32 %v2847_v10  ;;  %v2844_v13 = vmul.f32 0.03125, %v2838_v63  ;;  %v12412_v10 = vld [vmem:[%s15379_s5 + $0x58] sm:$0xff] }
 0xb54   : > { %v2841_v49 = vpop.xlane.xlu1 %2840 }
 0xb55   : > { %v2848_v35 = vadd.f32 1e-05, %v2844_v13  ;;  %v2845_v61 = vmul.f32 0.03125, %v2841_v49  ;;  %v12420_v49 = vld [vmem:[%s15379_s5 + $0x8] sm:$0xff] }
 0xb57   : > { %11017 = vrsqrt.f32 %v2848_v35  ;;  %v2849_v46 = vadd.f32 1e-05, %v2845_v61  ;;  %v12426_v61 = vld [vmem:[%s15379_s5 + $0x28] sm:$0xff] }
 0xb59   : > { %v11014_v27 = vpop.eup %11013  ;;  %11019 = vrsqrt.f32 %v2849_v46 }
 0xb5a   : > { %v2854_v34 = vmul.f32 %v11014_v27, %v2822_v40  ;;  %v2884_v40 = vrot.slane %v12212_v39, %v12283_v25  ;;  %v12432_v27 = vld [vmem:[%s15379_s5 + $0x48] sm:$0xff] }
 0xb5c   : > { %v2862_v17 = vmul.f32 %v2861_v29, %v2854_v34 }
 0xb5d   : > { %v11016_v62 = vpop.eup %11015 }
 0xb5e   : > { %v2855_v11 = vmul.f32 %v11016_v62, %v2823_v21  ;;  %v12343_v43 = vadd.f32 %v2869_v2, %v2862_v17  ;;  %v12440_v17 = vld [vmem:[%s15379_s5 + $0x60] sm:$0xff] }
 0xb60   : > { %v2863_v52 = vmul.f32 %v2861_v29, %v2855_v11 }
 0xb61   : > { %v11018_v31 = vpop.eup %11017 }
 0xb62   : > { %v2856_v20 = vmul.f32 %v11018_v31, %v2824_v23  ;;  %v12345_v32 = vadd.f32 %v2869_v2, %v2863_v52  ;;  %v12368_v23 = vld [vmem:[%s15379_s5 + $0x30] sm:$0xff] }
 0xb63   : > { %v11020_v57 = vpop.eup %11019 }
 0xb64   : > { %v2864_v12 = vmul.f32 %v2861_v29, %v2856_v20  ;;  %v2857_v45 = vmul.f32 %v11020_v57, %v2825_v44  ;;  %v2874_v60 = vpack.c.bf16 %v12345_v32, %v12343_v43  ;;  %v12448_v57 = vld [vmem:[%s15379_s5 + $0x68] sm:$0xff] }
 0xb66   : > { %v2865_v18 = vmul.f32 %v2861_v29, %v2857_v45  ;;  %10322 = vmatprep.mubr.msk.bf16.mxu1 %vm958_vm0, %v2874_v60  ;;  %v12350_v51 = vadd.f32 %v2869_v2, %v2864_v12  ;;  %v12454_v45 = vld [vmem:[%s15379_s5 + $0x70] sm:$0xff] }
 0xb68   : > { %v12352_v37 = vadd.f32 %v2869_v2, %v2865_v18  ;;  %v12460_v18 = vld [vmem:[%s15379_s5 + $0x78] sm:$0xff] }
 0xb6a   : > { %v2875_v0 = vpack.c.bf16 %v12352_v37, %v12350_v51 }
 0xb6c   : > { %10323 = vmatmul.mubr.msk.bf16.vlgmr.msra.gmra.mrb[56].mxu1 %vm958_vm0, %v2875_v0 }
 0xc3f   : > { %v10324_v36 = vpop.f32.mrb[56].mxu1 }
 0xc40   : > { %v2946_v38 = vadd.f32 %v10324_v36, %v2884_v40  ;;  %v2937_v50 = vpop.f32.mrb[57].mxu1 }
 0xc41   : > { %v2938_v21 = vadd.f32 %v2937_v50, %v2884_v40  ;;  %v10325_v15 = vpop.f32.mrb[58].mxu1 }
 0xc42   : > { %v2954_v28 = vmul.f32 %v12362_v7, %v2946_v38  ;;  %v2949_v42 = vadd.f32 %v10325_v15, %v2884_v40  ;;  %v2940_v48 = vpop.f32.mrb[59].mxu1  ;;  %v2958_v39 = vmul.f32 %v12368_v23, %v2946_v38  ;;  %v2962_v56 = vmul.f32 %v12374_v58, %v2946_v38 }
 0xc43   : > { %v2941_v44 = vadd.f32 %v2940_v48, %v2884_v40  ;;  %v2952_v55 = vmul.f32 %v12380_v5, %v2938_v21  ;;  %v2956_v9 = vmul.f32 %v12386_v1, %v2938_v21  ;;  %v2960_v3 = vmul.f32 %v12392_v16, %v2938_v21 }
 0xc44   : > { %v2955_v8 = vmul.f32 %v12398_v6, %v2949_v42  ;;  %v12401_v47 = vpack.c.bf16 %v2949_v42, %v2946_v38  ;;  %v2959_v19 = vmul.f32 %v12406_v33, %v2949_v42  ;;  %v2963_v63 = vmul.f32 %v12412_v10, %v2949_v42 }
 0xc45   : > { %v12415_v13 = vpack.c.bf16 %v2941_v44, %v2938_v21  ;;  %v2953_v35 = vmul.f32 %v12420_v49, %v2941_v44  ;;  %v2957_v46 = vmul.f32 %v12426_v61, %v2941_v44  ;;  %v2961_v29 = vmul.f32 %v12432_v27, %v2941_v44 }
 0xc46   : > { %v2969_v34 = vpack.c.bf16 %v2955_v8, %v2954_v28  ;;  %2982 = vrot.lane.b32.xlu1 %v12401_v47, %s11410_s19  ;;  %v2971_v62 = vpack.c.bf16 %v2959_v19, %v2958_v39  ;;  %v2973_v11 = vpack.c.bf16 %v2963_v63, %v2962_v56  ;;  %v2964_v2 = vmul.f32 %v12440_v17, %v2938_v21  ;;  %v11135_v63 = vld [vmem:[%s15378_s4 + $0x8] sm:$0xff] }
 0xc47   : > { %2980 = vrot.lane.b32.xlu0 %v12415_v13, %s11410_s19  ;;  %v2968_v52 = vpack.c.bf16 %v2953_v35, %v2952_v55  ;;  %v2970_v31 = vpack.c.bf16 %v2957_v46, %v2956_v9  ;;  %v2972_v20 = vpack.c.bf16 %v2961_v29, %v2960_v3  ;;  %v2965_v12 = vmul.f32 %v12448_v57, %v2941_v44  ;;  %v11134_v3 = vld [vmem:[%s15378_s4] sm:$0xff]  ;;  %v11136_v46 = vld [vmem:[%s15378_s4 + $0x18] sm:$0xff] }
 0xc48   : > { %v2966_v60 = vmul.f32 %v12454_v45, %v2946_v38  ;;  %v2967_v0 = vmul.f32 %v12460_v18, %v2949_v42 }
 0xc49   : > { %10330 = vmatprep.mubr.msk.bf16.mxu0 %vm958_vm0, %v2968_v52  ;;  %v2974_v40 = vpack.c.bf16 %v2965_v12, %v2964_v2 }
 0xc4a   : > { %v2975_v36 = vpack.c.bf16 %v2967_v0, %v2966_v60 }
 0xcb8   : > { %v2983_v15 = vpop.permute.xlu1 %2982 }
 0xcb9   : > { %v2981_v50 = vpop.permute.xlu0 %2980  ;;  %v3012_v38 = vsel %vm958_vm0, %v2983_v15, 0 }
 0xcba   : > { %10398 = vmatprep.subr.msk.bf16.mxu0 %vm958_vm0, %v2981_v50  ;;  %v3009_v21 = vsel %vm958_vm0, %v2981_v50, 0 }
 0xcbb   : > { %10327 = vmatpush3.bf16.xpose.msra.mxu0 %v3009_v21  ;;  %v11138_v21 = vld [vmem:[%s15378_s4 + $0x20] sm:$0xff] }
 0xcbc   : > { %10399 = vmatprep.subr.msk.bf16.mxu0 %vm958_vm0, %v2983_v15 }
 0xcc3   : > { %10329 = vmatpush3.bf16.xpose.msra.mxu0 %v3012_v38  ;;  %v11139_v38 = vld [vmem:[%s15378_s4 + $0x28] sm:$0xff] }
 0xcca   : > { %10331 = vmatmul.mubr.msk.bf16.vlgmr.msra.gmra.mrb[56].mxu0 %vm958_vm0, %v2969_v34  ;;  %v11137_v34 = vld [vmem:[%s15378_s4 + $0x10] sm:$0xff] }
 0xccb   : > { %10334 = vmatprep.mubr.msk.bf16.mxu0 %vm958_vm0, %v2970_v31 }
 0xcd2   : > { %10335 = vmatmul.mubr.msk.bf16.gmra.mrb[60].mxu0 %vm958_vm0, %v2971_v62 }
 0xcd3   : > { %10338 = vmatprep.mubr.msk.bf16.mxu0 %vm958_vm0, %v2972_v20 }
 0xcda   : > { %10339 = vmatmul.mubr.msk.bf16.gmra.mrb[64].mxu0 %vm958_vm0, %v2973_v11 }
 0xcdb   : > { %10342 = vmatprep.mubr.msk.bf16.mxu0 %vm958_vm0, %v2974_v40 }
 0xce2   : > { %10343 = vmatmul.mubr.msk.bf16.gmra.mrb[68].mxu0 %vm958_vm0, %v2975_v36 }
 0xd9d   : > { %v10332_v28 = vpop.f32.mrb[56].mxu0 }
 0xd9e   : > { %v3048_v42 = vpop.f32.mrb[57].mxu0  ;;  %v3057_v56 = vadd.f32 %v10332_v28, %v11879_v59 }
 0xd9f   : > { %v3049_v48 = vadd.f32 %v3048_v42, %v11879_v59  ;;  %v10333_v39 = vpop.f32.mrb[58].mxu0 }
 0xda0   : > { %v3060_v44 = vadd.f32 %v10333_v39, %v11879_v59  ;;  %v3051_v55 = vpop.f32.mrb[59].mxu0  ;;  %v12499_v62 = vadd.f32 %v11137_v34, %v3057_v56  ;;  %v11140_v56 = vld [vmem:[%s15378_s4 + $0x30] sm:$0xff] }
 0xda1   : > { %v3052_v9 = vadd.f32 %v3051_v55, %v11879_v59  ;;  %v12482_v8 = vadd.f32 %v11134_v3, %v3049_v48  ;;  %v11141_v55 = vld [vmem:[%s15378_s4 + $0x38] sm:$0xff] }
 0xda2   : > { %v12494_v29 = vadd.f32 %v11136_v46, %v3060_v44  ;;  %v3133_v0 = vsel %vm958_vm0, %v12499_v62, -inf }
 0xda3   : > { %v3127_v19 = vsel %vm958_vm0, %v12482_v8, -inf  ;;  %v12489_v35 = vadd.f32 %v11135_v63, %v3052_v9 }
 0xda4   : > { %3128 = vmax.xlane.f32.xlu1 %v3127_v19  ;;  %v3136_v12 = vsel %vm958_vm0, %v12494_v29, -inf }
 0xda5   : > { %v10336_v11 = vpop.f32.mrb[60].mxu0  ;;  %v3130_v2 = vsel %vm958_vm0, %v12489_v35, -inf }
 0xda6   : > { %v3064_v52 = vpop.f32.mrb[61].mxu0  ;;  %3131 = vmax.xlane.f32.xlu0 %v3130_v2  ;;  %v3073_v40 = vadd.f32 %v10336_v11, %v11879_v59 }
 0xda7   : > { %v3065_v31 = vadd.f32 %v3064_v52, %v11879_v59  ;;  %v10337_v20 = vpop.f32.mrb[62].mxu0 }
 0xda8   : > { %v3067_v60 = vpop.f32.mrb[63].mxu0  ;;  %3137 = vmax.xlane.f32.xlu1 %v3136_v12  ;;  %v3076_v36 = vadd.f32 %v10337_v20, %v11879_v59  ;;  %v12528_v44 = vadd.f32 %v11140_v56, %v3073_v40  ;;  %v11142_v20 = vld [vmem:[%s15378_s4 + $0x40] sm:$0xff]  ;;  %v11144_v40 = vld [vmem:[%s15378_s4 + $0x50] sm:$0xff] }
 0xda9   : > { %v3068_v50 = vadd.f32 %v3067_v60, %v11879_v59  ;;  %v12514_v15 = vadd.f32 %v11138_v21, %v3065_v31  ;;  %v11143_v60 = vld [vmem:[%s15378_s4 + $0x48] sm:$0xff] }
 0xdaa   : > { %3134 = vmax.xlane.f32.xlu0 %v3133_v0  ;;  %v12533_v9 = vadd.f32 %v11141_v55, %v3076_v36  ;;  %v3145_v52 = vsel %vm958_vm0, %v12528_v44, -inf }
 0xdab   : > { %v12519_v28 = vadd.f32 %v11139_v38, %v3068_v50  ;;  %v3139_v48 = vsel %vm958_vm0, %v12514_v15, -inf  ;;  %v11145_v50 = vld [vmem:[%s15378_s4 + $0x58] sm:$0xff] }
 0xdac   : > { %v3148_v31 = vsel %vm958_vm0, %v12533_v9, -inf }
 0xdad   : > { %v10340_v42 = vpop.f32.mrb[64].mxu0  ;;  %v3142_v39 = vsel %vm958_vm0, %v12519_v28, -inf }
 0xdae   : > { %v3080_v3 = vpop.f32.mrb[65].mxu0  ;;  %3140 = vmax.xlane.f32.xlu0 %v3139_v48  ;;  %3143 = vmax.xlane.f32.xlu1 %v3142_v39  ;;  %v3089_v46 = vadd.f32 %v10340_v42, %v11879_v59 }
 0xdaf   : > { %v3081_v19 = vadd.f32 %v3080_v3, %v11879_v59  ;;  %v10341_v63 = vpop.f32.mrb[66].mxu0 }
 0xdb0   : > { %v3092_v34 = vadd.f32 %v10341_v63, %v11879_v59  ;;  %v3083_v11 = vpop.f32.mrb[67].mxu0  ;;  %v12556_v36 = vadd.f32 %v11144_v40, %v3089_v46  ;;  %v11148_v40 = vld [vmem:[%s15378_s4 + $0x70] sm:$0xff] }
 0xdb1   : > { %v3084_v2 = vadd.f32 %v3083_v11, %v11879_v59  ;;  %v12546_v12 = vadd.f32 %v11142_v20, %v3081_v19 }
 0xdb2   : > { %3146 = vmax.xlane.f32.xlu0 %v3145_v52  ;;  %3149 = vmax.xlane.f32.xlu1 %v3148_v31  ;;  %v12561_v21 = vadd.f32 %v11145_v50, %v3092_v34  ;;  %v3157_v19 = vsel %vm958_vm0, %v12556_v36, -inf  ;;  %v11147_v31 = vld [vmem:[%s15378_s4 + $0x68] sm:$0xff] }
 0xdb3   : > { %v12551_v0 = vadd.f32 %v11143_v60, %v3084_v2  ;;  %v3151_v42 = vsel %vm958_vm0, %v12546_v12, -inf  ;;  %v11146_v2 = vld [vmem:[%s15378_s4 + $0x60] sm:$0xff] }
 0xdb4   : > { %v3160_v63 = vsel %vm958_vm0, %v12561_v21, -inf }
 0xdb5   : > { %v10344_v38 = vpop.f32.mrb[68].mxu0  ;;  %v3154_v48 = vsel %vm958_vm0, %v12551_v0, -inf }
 0xdb6   : > { %v3096_v39 = vpop.f32.mrb[69].mxu0  ;;  %3152 = vmax.xlane.f32.xlu0 %v3151_v42  ;;  %3155 = vmax.xlane.f32.xlu1 %v3154_v48  ;;  %v3105_v46 = vadd.f32 %v10344_v38, %v11879_v59  ;;  %v11149_v38 = vld [vmem:[%s15378_s4 + $0x78] sm:$0xff] }
 0xdb7   : > { %v3097_v56 = vadd.f32 %v3096_v39, %v11879_v59  ;;  %v10345_v55 = vpop.f32.mrb[70].mxu0 }
 0xdb8   : > { %v3099_v3 = vpop.f32.mrb[71].mxu0  ;;  %v3108_v34 = vadd.f32 %v10345_v55, %v11879_v59  ;;  %v12592_v50 = vadd.f32 %v11148_v40, %v3105_v46 }
 0xdb9   : > { %v3100_v11 = vadd.f32 %v3099_v3, %v11879_v59  ;;  %v12578_v52 = vadd.f32 %v11146_v2, %v3097_v56 }
 0xdba   : > { %3158 = vmax.xlane.f32.xlu0 %v3157_v19  ;;  %3161 = vmax.xlane.f32.xlu1 %v3160_v63  ;;  %v12597_v42 = vadd.f32 %v11149_v38, %v3108_v34  ;;  %v3169_v48 = vsel %vm958_vm0, %v12592_v50, -inf }
 0xdbb   : > { %v12583_v20 = vadd.f32 %v11147_v31, %v3100_v11  ;;  %v3163_v60 = vsel %vm958_vm0, %v12578_v52, -inf }
 0xdbc   : > { %v3172_v39 = vsel %vm958_vm0, %v12597_v42, -inf }
 0xdbd   : > { %v3166_v59 = vsel %vm958_vm0, %v12583_v20, -inf }
 0xdbe   : > { %3164 = vmax.xlane.f32.xlu0 %v3163_v60  ;;  %3167 = vmax.xlane.f32.xlu1 %v3166_v59 }
 0xdc2   : > { %3170 = vmax.xlane.f32.xlu0 %v3169_v48  ;;  %3173 = vmax.xlane.f32.xlu1 %v3172_v39 }
 0xe31   : > { %v3129_v56 = vpop.xlane.xlu1 %3128 }
 0xe32   : > { %v3175_v63 = vsub.f32 %v12482_v8, %v3129_v56 }
 0xe33   : > { %v3132_v55 = vpop.xlane.xlu0 %3131 }
 0xe34   : > { %v3176_v3 = vsub.f32 %v12489_v35, %v3132_v55  ;;  %v3191_v60 = vmul.f32 1.442695, %v3175_v63 }
 0xe35   : > { %v3138_v19 = vpop.xlane.xlu1 %3137 }
 0xe36   : > { %v3178_v46 = vsub.f32 %v12494_v29, %v3138_v19  ;;  %v3193_v34 = vmul.f32 1.442695, %v3176_v3 }
 0xe37   : > { %v3135_v11 = vpop.xlane.xlu0 %3134 }
 0xe38   : > { %v3197_v2 = vmul.f32 1.442695, %v3178_v46  ;;  %v3177_v31 = vsub.f32 %v12499_v62, %v3135_v11 }
 0xe3a   : > { %11021 = vpow2.f32 %v3197_v2  ;;  %v3195_v59 = vmul.f32 1.442695, %v3177_v31 }
 0xe3b   : > { %11023 = vpow2.f32 %v3193_v34  ;;  %v3141_v40 = vpop.xlane.xlu0 %3140  ;;  %v3144_v38 = vpop.xlane.xlu1 %3143 }
 0xe3c   : > { %11025 = vpow2.f32 %v3195_v59  ;;  %v3179_v35 = vsub.f32 %v12514_v15, %v3141_v40  ;;  %v3180_v48 = vsub.f32 %v12519_v28, %v3144_v38 }
 0xe3d   : > { %11027 = vpow2.f32 %v3191_v60 }
 0xe3e   : > { %v3199_v55 = vmul.f32 1.442695, %v3179_v35  ;;  %v3201_v19 = vmul.f32 1.442695, %v3180_v48 }
 0xe3f   : > { %v3147_v8 = vpop.xlane.xlu0 %3146  ;;  %v3150_v39 = vpop.xlane.xlu1 %3149 }
 0xe40   : > { %v3181_v29 = vsub.f32 %v12528_v44, %v3147_v8  ;;  %v3182_v56 = vsub.f32 %v12533_v9, %v3150_v39 }
 0xe42   : > { %v3203_v62 = vmul.f32 1.442695, %v3181_v29  ;;  %v3205_v3 = vmul.f32 1.442695, %v3182_v56 }
 0xe43   : > { %v3153_v63 = vpop.xlane.xlu0 %3152  ;;  %v3156_v46 = vpop.xlane.xlu1 %3155 }
 0xe44   : > { %v12611_v34 = vpop.eup %11021  ;;  %11029 = vpow2.f32 %v3203_v62  ;;  %v3183_v44 = vsub.f32 %v12546_v12, %v3153_v63  ;;  %v3184_v9 = vsub.f32 %v12551_v0, %v3156_v46 }
 0xe45   : > { %v12613_v11 = vpop.eup %11023  ;;  %11031 = vpow2.f32 %v3205_v3  ;;  %v3232_v15 = vsel %vm958_vm0, %v12611_v34, 0.0 }
 0xe46   : > { %v12617_v28 = vpop.eup %11025  ;;  %11033 = vpow2.f32 %v3199_v55  ;;  %3233 = vadd.xlane.f32.xlu1 %v3232_v15  ;;  %v3226_v35 = vsel %vm958_vm0, %v12613_v11, 0.0  ;;  %v3207_v12 = vmul.f32 1.442695, %v3183_v44  ;;  %v3209_v0 = vmul.f32 1.442695, %v3184_v9 }
 0xe47   : > { %11035 = vpow2.f32 %v3201_v19  ;;  %v3159_v2 = vpop.xlane.xlu0 %3158  ;;  %v3162_v31 = vpop.xlane.xlu1 %3161  ;;  %v3229_v60 = vsel %vm958_vm0, %v12617_v28, 0.0 }
 0xe48   : > { %v12623_v59 = vpop.eup %11027  ;;  %v3185_v40 = vsub.f32 %v12556_v36, %v3159_v2  ;;  %v3186_v38 = vsub.f32 %v12561_v21, %v3162_v31  ;;  %3230 = vadd.xlane.f32.xlu0 %v3229_v60 }
 0xe49   : > { %v3223_v56 = vsel %vm958_vm0, %v12623_v59, 0.0 }
 0xe4a   : > { %v3211_v48 = vmul.f32 1.442695, %v3185_v40  ;;  %v3213_v8 = vmul.f32 1.442695, %v3186_v38  ;;  %3227 = vadd.xlane.f32.xlu1 %v3226_v35 }
 0xe4b   : > { %v3165_v39 = vpop.xlane.xlu0 %3164  ;;  %v3168_v29 = vpop.xlane.xlu1 %3167 }
 0xe4c   : > { %11037 = vpow2.f32 %v3211_v48  ;;  %3224 = vadd.xlane.f32.xlu0 %v3223_v56  ;;  %v3187_v55 = vsub.f32 %v12578_v52, %v3165_v39  ;;  %v3188_v38 = vsub.f32 %v12583_v20, %v3168_v29 }
 0xe4d   : > { %11039 = vpow2.f32 %v3213_v8 }
 0xe4e   : > { %v12631_v36 = vpop.eup %11029  ;;  %11041 = vpow2.f32 %v3207_v12  ;;  %v3215_v2 = vmul.f32 1.442695, %v3187_v55 }
 0xe4f   : > { %v12633_v21 = vpop.eup %11031  ;;  %11043 = vpow2.f32 %v3209_v0  ;;  %v3171_v62 = vpop.xlane.xlu0 %3170  ;;  %v3241_v3 = vsel %vm958_vm0, %v12631_v36, 0.0  ;;  %v3217_v0 = vmul.f32 1.442695, %v3188_v38 }
 0xe50   : > { %v12638_v19 = vpop.eup %11033  ;;  %v3189_v63 = vsub.f32 %v12592_v50, %v3171_v62  ;;  %v3174_v46 = vpop.xlane.xlu1 %3173  ;;  %3242 = vadd.xlane.f32.xlu0 %v3241_v3  ;;  %v3244_v15 = vsel %vm958_vm0, %v12633_v21, 0.0 }
 0xe51   : > { %v12643_v44 = vpop.eup %11035  ;;  %3245 = vadd.xlane.f32.xlu1 %v3244_v15  ;;  %v3190_v52 = vsub.f32 %v12597_v42, %v3174_v46  ;;  %v3235_v31 = vsel %vm958_vm0, %v12638_v19, 0.0 }
 0xe52   : > { %v3219_v9 = vmul.f32 1.442695, %v3189_v63  ;;  %v3238_v50 = vsel %vm958_vm0, %v12643_v44, 0.0 }
 0xe53   : > { %v3221_v35 = vmul.f32 1.442695, %v3190_v52 }
 0xe54   : > { %11045 = vpow2.f32 %v3219_v9  ;;  %3236 = vadd.xlane.f32.xlu0 %v3235_v31 }
 0xe55   : > { %3239 = vadd.xlane.f32.xlu1 %v3238_v50  ;;  %11047 = vpow2.f32 %v3215_v2 }
 0xe56   : > { %v12650_v60 = vpop.eup %11037  ;;  %11049 = vpow2.f32 %v3221_v35 }
 0xe57   : > { %v12652_v40 = vpop.eup %11039  ;;  %v3253_v42 = vsel %vm958_vm0, %v12650_v60, 0.0  ;;  %11051 = vpow2.f32 %v3217_v0 }
 0xe58   : > { %v12657_v12 = vpop.eup %11041  ;;  %3254 = vadd.xlane.f32.xlu0 %v3253_v42  ;;  %v3256_v48 = vsel %vm958_vm0, %v12652_v40, 0.0 }
 0xe59   : > { %v12661_v8 = vpop.eup %11043  ;;  %3257 = vadd.xlane.f32.xlu1 %v3256_v48  ;;  %v3247_v39 = vsel %vm958_vm0, %v12657_v12, 0.0 }
 0xe5a   : > { %v3250_v20 = vsel %vm958_vm0, %v12661_v8, 0.0 }
 0xe5c   : > { %3248 = vadd.xlane.f32.xlu0 %v3247_v39 }
 0xe5d   : > { %3251 = vadd.xlane.f32.xlu1 %v3250_v20 }
 0xe5e   : > { %v12667_v29 = vpop.eup %11045 }
 0xe5f   : > { %v3265_v56 = vsel %vm958_vm0, %v12667_v29, 0.0  ;;  %v12671_v55 = vpop.eup %11047 }
 0xe60   : > { %v3259_v62 = vsel %vm958_vm0, %v12671_v55, 0.0  ;;  %v12675_v3 = vpop.eup %11049 }
 0xe61   : > { %3266 = vadd.xlane.f32.xlu1 %v3265_v56  ;;  %v3268_v63 = vsel %vm958_vm0, %v12675_v3, 0.0  ;;  %v12679_v46 = vpop.eup %11051 }
 0xe62   : > { %v3262_v15 = vsel %vm958_vm0, %v12679_v46, 0.0 }
 0xe65   : > { %3260 = vadd.xlane.f32.xlu1 %v3259_v62 }
 0xe69   : > { %3269 = vadd.xlane.f32.xlu1 %v3268_v63 }
 0xe6d   : > { %3263 = vadd.xlane.f32.xlu1 %v3262_v15 }
 0xe72   : > { %3311 = vrot.lane.b32.xlu0 %v12415_v13, %s11412_s24 }
 0xe7e   : > { %3313 = vrot.lane.b32.xlu1 %v12401_v47, %s11412_s24 }
 0xed3   : > { %v3234_v9 = vpop.xlane.xlu1 %3233 }
 0xed5   : > { %v3231_v2 = vpop.xlane.xlu0 %3230 }
 0xed7   : > { %v3228_v52 = vpop.xlane.xlu1 %3227 }
 0xed8   : > { %11053 = vrcp.f32 %v3228_v52 }
 0xed9   : > { %v3225_v31 = vpop.xlane.xlu0 %3224 }
 0xeda   : > { %11055 = vrcp.f32 %v3225_v31 }
 0xedb   : > { %11057 = vrcp.f32 %v3231_v2 }
 0xedd   : > { %v3243_v50 = vpop.xlane.xlu0 %3242 }
 0xede   : > { %v3246_v38 = vpop.xlane.xlu1 %3245 }
 0xee1   : > { %v3237_v35 = vpop.xlane.xlu0 %3236 }
 0xee2   : > { %v11054_v42 = vpop.eup %11053  ;;  %v3240_v48 = vpop.xlane.xlu1 %3239  ;;  %11059 = vrcp.f32 %v3237_v35 }
 0xee3   : > { %v3274_v13 = vmul.f32 %v11054_v42, %v12613_v11  ;;  %11061 = vrcp.f32 %v3240_v48 }
 0xee4   : > { %v11056_v0 = vpop.eup %11055  ;;  %11063 = vrcp.f32 %v3234_v9 }
 0xee5   : > { %v3255_v39 = vpop.xlane.xlu0 %3254  ;;  %v3272_v20 = vmul.f32 %v11056_v0, %v12623_v59  ;;  %11065 = vrcp.f32 %v3243_v50  ;;  %v11058_v11 = vpop.eup %11057 }
 0xee6   : > { %v3258_v56 = vpop.xlane.xlu1 %3257  ;;  %11067 = vrcp.f32 %v3246_v38 }
 0xee7   : > { %v3303_v62 = vpack.c.bf16 %v3274_v13, %v3272_v20  ;;  %v3276_v13 = vmul.f32 %v11058_v11, %v12617_v28 }
 0xee9   : > { %v3249_v47 = vpop.xlane.xlu0 %3248  ;;  %10350 = vmatprep.mubr.msk.bf16.mxu1 %vm958_vm0, %v3303_v62 }
 0xeea   : > { %v3252_v63 = vpop.xlane.xlu1 %3251  ;;  %11069 = vrcp.f32 %v3249_v47 }
 0xeeb   : > { %11071 = vrcp.f32 %v3252_v63 }
 0xeec   : > { %v11060_v59 = vpop.eup %11059  ;;  %11073 = vrcp.f32 %v3255_v39 }
 0xeed   : > { %v3312_v15 = vpop.permute.xlu0 %3311  ;;  %v11062_v0 = vpop.eup %11061  ;;  %v3280_v2 = vmul.f32 %v11060_v59, %v12638_v19  ;;  %11075 = vrcp.f32 %v3258_v56 }
 0xeee   : > { %v3267_v52 = vpop.xlane.xlu1 %3266  ;;  %10346 = vmatprep.subr.bf16.mxu1 %v3312_v15  ;;  %v11064_v20 = vpop.eup %11063  ;;  %v3282_v35 = vmul.f32 %v11062_v0, %v12643_v44 }
 0xeef   : > { %10347 = vmatpush3.bf16.msra.mxu1 %v3312_v15  ;;  %v3278_v9 = vmul.f32 %v11064_v20, %v12611_v34  ;;  %v11066_v50 = vpop.eup %11065 }
 0xef0   : > { %v11068_v38 = vpop.eup %11067  ;;  %v3305_v63 = vpack.c.bf16 %v3282_v35, %v3280_v2  ;;  %v3284_v28 = vmul.f32 %v11066_v50, %v12631_v36 }
 0xef1   : > { %v3304_v48 = vpack.c.bf16 %v3278_v9, %v3276_v13  ;;  %v3286_v34 = vmul.f32 %v11068_v38, %v12633_v21 }
 0xef2   : > { %v3261_v31 = vpop.xlane.xlu1 %3260 }
 0xef3   : > { %v3306_v56 = vpack.c.bf16 %v3286_v34, %v3284_v28 }
 0xef4   : > { %v11070_v47 = vpop.eup %11069 }
 0xef5   : > { %v11072_v15 = vpop.eup %11071  ;;  %v3288_v19 = vmul.f32 %v11070_v47, %v12657_v12 }
 0xef6   : > { %v3270_v54 = vpop.xlane.xlu1 %3269  ;;  %v3290_v44 = vmul.f32 %v11072_v15, %v12661_v8  ;;  %v11074_v39 = vpop.eup %11073 }
 0xef7   : > { %v11076_v11 = vpop.eup %11075  ;;  %v3292_v36 = vmul.f32 %v11074_v39, %v12650_v60  ;;  %v10683_v60 = vld [vmem:[#allocation7 + $0x10] sm:$0xff]  }
 0xef8   : > { %v3307_v59 = vpack.c.bf16 %v3290_v44, %v3288_v19  ;;  %v3294_v21 = vmul.f32 %v11076_v11, %v12652_v40  ;;  %v10684_v40 = vld [vmem:[#allocation7 + $0x18] sm:$0xff]  }
 0xefa   : > { %v3264_v42 = vpop.xlane.xlu1 %3263 }
 0xefb   : > { %11077 = vrcp.f32 %v3264_v42 }
 0xefc   : > { %11079 = vrcp.f32 %v3261_v31 }
 0xefd   : > { %11081 = vrcp.f32 %v3270_v54  ;;  %v3308_v54 = vpack.c.bf16 %v3294_v21, %v3292_v36 }
 0xefe   : > { %v3314_v62 = vpop.permute.xlu1 %3313  ;;  %11083 = vrcp.f32 %v3267_v52 }
 0xeff   : > { %10348 = vmatprep.subr.bf16.mxu1 %v3314_v62 }
 0xf00   : > { %10349 = vmatpush3.bf16.msra.mxu1 %v3314_v62 }
 0xf01   : > { %10366 = vmatprep.subr.bf16.mxu1 %v10683_v60 }
 0xf03   : > { %10351 = vmatmul.mubr.msk.bf16.vlgmr.msra.gmra.mrb[60].mxu1 %vm958_vm0, %v3304_v48 }
 0xf04   : > { %10354 = vmatprep.mubr.msk.bf16.mxu1 %vm958_vm0, %v3305_v63  ;;  %10367 = vmatpush3.bf16.msra.mxu1 %v10683_v60 }
 0xf05   : > { %v11078_v42 = vpop.eup %11077  ;;  %10368 = vmatprep.subr.bf16.mxu1 %v10684_v40 }
 0xf06   : > { %v11080_v31 = vpop.eup %11079  ;;  %v3298_v12 = vmul.f32 %v11078_v42, %v12679_v46 }
 0xf07   : > { %v3296_v8 = vmul.f32 %v11080_v31, %v12671_v55  ;;  %v11082_v0 = vpop.eup %11081 }
 0xf08   : > { %v11084_v52 = vpop.eup %11083  ;;  %v3302_v13 = vmul.f32 %v11082_v0, %v12675_v3  ;;  %10369 = vmatpush3.bf16.msra.mxu1 %v10684_v40 }
 0xf09   : > { %v3309_v20 = vpack.c.bf16 %v3298_v12, %v3296_v8  ;;  %v3300_v62 = vmul.f32 %v11084_v52, %v12667_v29 }
 0xf0b   : > { %10355 = vmatmul.mubr.msk.bf16.gmra.mrb[64].mxu1 %vm958_vm0, %v3306_v56  ;;  %v3310_v2 = vpack.c.bf16 %v3302_v13, %v3300_v62 }
 0xf0c   : > { %10358 = vmatprep.mubr.msk.bf16.mxu1 %vm958_vm0, %v3307_v59 }
 0xf13   : > { %10359 = vmatmul.mubr.msk.bf16.gmra.mrb[68].mxu1 %vm958_vm0, %v3308_v54 }
 0xf14   : > { %10362 = vmatprep.mubr.msk.bf16.mxu1 %vm958_vm0, %v3309_v20 }
 0xf1b   : > { %10363 = vmatmul.mubr.msk.bf16.gmra.mrb[72].mxu1 %vm958_vm0, %v3310_v2 }
 0xfd6   : > { %v10352_v55 = vpop.f32.mrb[60].mxu1 }
 0xfd7   : > { %v3375_v46 = vpop.f32.mrb[61].mxu1  ;;  %v3440_v38 = vmul.f32 %v12362_v7, %v10352_v55 }
 0xfd8   : > { %v10353_v35 = vpop.f32.mrb[62].mxu1  ;;  %v3438_v29 = vmul.f32 %v12380_v5, %v3375_v46 }
 0xfd9   : > { %v3378_v9 = vpop.f32.mrb[63].mxu1  ;;  %v3441_v15 = vmul.f32 %v12398_v6, %v10353_v35 }
 0xfda   : > { %v3439_v44 = vmul.f32 %v12420_v49, %v3378_v9 }
 0xfde   : > { %v10356_v50 = vpop.f32.mrb[64].mxu1 }
 0xfdf   : > { %v3444_v3 = vmul.f32 %v12368_v23, %v10356_v50  ;;  %v3391_v48 = vpop.f32.mrb[65].mxu1 }
 0xfe0   : > { %v3442_v47 = vmul.f32 %v12386_v1, %v3391_v48  ;;  %v10357_v63 = vpop.f32.mrb[66].mxu1 }
 0xfe1   : > { %v3456_v28 = vadd.f32 %v3444_v3, %v3440_v38  ;;  %v3445_v34 = vmul.f32 %v12406_v33, %v10357_v63  ;;  %v3394_v19 = vpop.f32.mrb[67].mxu1 }
 0xfe2   : > { %v3454_v39 = vadd.f32 %v3442_v47, %v3438_v29  ;;  %v3443_v56 = vmul.f32 %v12426_v61, %v3394_v19 }
 0xfe3   : > { %v3457_v7 = vadd.f32 %v3445_v34, %v3441_v15  ;;  %v3617_v34 = vld [vmem:[#allocation10 + $0x8] sm:$0xff] }
 0xfe4   : > { %v3455_v11 = vadd.f32 %v3443_v56, %v3439_v44 }
 0xfe6   : > { %v10360_v23 = vpop.f32.mrb[68].mxu1 }
 0xfe7   : > { %v3448_v59 = vmul.f32 %v12374_v58, %v10360_v23  ;;  %v3407_v5 = vpop.f32.mrb[69].mxu1 }
 0xfe8   : > { %v3446_v1 = vmul.f32 %v12392_v16, %v3407_v5  ;;  %v10361_v42 = vpop.f32.mrb[70].mxu1 }
 0xfe9   : > { %v3460_v31 = vadd.f32 %v3456_v28, %v3448_v59  ;;  %v3449_v6 = vmul.f32 %v12412_v10, %v10361_v42  ;;  %v3410_v36 = vpop.f32.mrb[71].mxu1 }
 0xfea   : > { %v3458_v33 = vadd.f32 %v3454_v39, %v3446_v1  ;;  %v3447_v21 = vmul.f32 %v12432_v27, %v3410_v36 }
 0xfeb   : > { %v3461_v49 = vadd.f32 %v3457_v7, %v3449_v6 }
 0xfec   : > { %v3459_v12 = vadd.f32 %v3455_v11, %v3447_v21 }
 0xfee   : > { %v10364_v8 = vpop.f32.mrb[72].mxu1 }
 0xfef   : > { %v3452_v61 = vmul.f32 %v12454_v45, %v10364_v8  ;;  %v3423_v54 = vpop.f32.mrb[73].mxu1  ;;  %v3618_v8 = vld [vmem:[#allocation10 + $0x10] sm:$0xff] }
 0xff0   : > { %v3450_v0 = vmul.f32 %v12440_v17, %v3423_v54  ;;  %v10365_v58 = vpop.f32.mrb[74].mxu1  ;;  %v12733_v17 = vld [vmem:[%s15381_s7 + $0x8] sm:$0xff]  ;;  %v4096_v54 = vld [vmem:[%s15388_s14] sm:$0xff] }
 0xff1   : > { %v3464_v20 = vadd.f32 %v3460_v31, %v3452_v61  ;;  %v3453_v16 = vmul.f32 %v12460_v18, %v10365_v58  ;;  %v3426_v52 = vpop.f32.mrb[75].mxu1  ;;  %v3476_v45 = vrot.slane %v12733_v17, %v11724_v24  ;;  %v3619_v61 = vld [vmem:[#allocation10 + $0x18] sm:$0xff]  ;;  %v4112_v58 = vld [vmem:[%s15388_s14 + $0x80] sm:$0xff] }
 0xff2   : > { %v3462_v13 = vadd.f32 %v3458_v33, %v3450_v0  ;;  %v3451_v10 = vmul.f32 %v12448_v57, %v3426_v52  ;;  %v10392_v0 = vpack.c.bf16 %v3619_v61, %v3618_v8  ;;  %v4128_v52 = vld [vmem:[%s15388_s14 + $0x100] sm:$0xff] }
 0xff3   : > { %v3465_v62 = vadd.f32 %v3461_v49, %v3453_v16  ;;  %v9252_v16 = vcombine.high %v4096_v54, %v4112_v58 }
 0xff4   : > { %v3463_v2 = vadd.f32 %v3459_v12, %v3451_v10  ;;  %v4097_v10 = vld [vmem:[%s15388_s14 + $0x8] sm:$0xff] }
 0xff5   : > { %v3467_v60 = vpack.c.bf16 %v3465_v62, %v3464_v20  ;;  %v9251_v20 = vcombine.low %v4096_v54, %v4112_v58  ;;  %4654 = vmatprep.subr.bf16.mxu1 %v9252_v16  ;;  %v4116_v58 = vld [vmem:[%s15388_s14 + $0xa0] sm:$0xff] }
 0xff6   : > { %v3466_v27 = vpack.c.bf16 %v3463_v2, %v3462_v13  ;;  %v4144_v13 = vld [vmem:[%s15388_s14 + $0x180] sm:$0xff] }
 0xff7   : > { %v9283_v62 = vcombine.low %v4128_v52, %v4144_v13  ;;  %v9284_v2 = vcombine.high %v4128_v52, %v4144_v13 }
 0xff8   : > { %10370 = vmatprep.mubr.msk.bf16.mxu1 %vm958_vm0, %v3466_v27 }
 0xff9   : > { %10371 = vmatmul.mubr.msk.bf16.vlgmr.msra.gmra.mrb[76].mxu1 %vm958_vm0, %v3467_v60  ;;  %v4113_v60 = vld [vmem:[%s15388_s14 + $0x88] sm:$0xff] }
 0xffa   : > { %4686 = vmatprep.mubr.bf16.mxu1 %v15409_v26  ;;  %4655 = vmatpush1.bf16.msra.mxu1 %v9251_v20  ;;  %v9253_v27 = vcombine.low %v4097_v10, %v4113_v60 }
 0xffb   : > { %4656 = vmatprep.subr.bf16.mxu1 %v9284_v2  ;;  %v4147_v2 = vld [vmem:[%s15388_s14 + $0x198] sm:$0xff] }
 0xffe   : > { %4657 = vmatpush1.bf16.msra.mxu1 %v9283_v62  ;;  %v4131_v62 = vld [vmem:[%s15388_s14 + $0x118] sm:$0xff] }
0x10cc   : > { %v10372_v18 = vpop.f32.mrb[76].mxu1 }
0x10cd   : > { %v3529_v57 = vpop.f32.mrb[77].mxu1  ;;  %v3538_v40 = vadd.f32 %v10372_v18, %v3476_v45  ;;  %v4098_v18 = vld [vmem:[%s15388_s14 + $0x10] sm:$0xff] }
0x10ce   : > { %v3530_v55 = vadd.f32 %v3529_v57, %v3476_v45  ;;  %v10373_v46 = vpop.f32.mrb[78].mxu1  ;;  %v4114_v57 = vld [vmem:[%s15388_s14 + $0x90] sm:$0xff] }
0x10cf   : > { %v3532_v35 = vpop.f32.mrb[79].mxu1  ;;  %v3541_v38 = vadd.f32 %v10373_v46, %v3476_v45  ;;  %v3546_v29 = vadd.f32 %v3538_v40, %v12350_v51  ;;  %v9255_v40 = vcombine.low %v4098_v18, %v4114_v57 }
0x10d0   : > { %v3533_v9 = vadd.f32 %v3532_v35, %v3476_v45  ;;  %v3544_v50 = vadd.f32 %v3530_v55, %v12343_v43  ;;  %v3616_v43 = vld [vmem:[#allocation10] sm:$0xff]  ;;  %v9254_v45 = vcombine.high %v4097_v10, %v4113_v60  ;;  %v9256_v55 = vcombine.high %v4098_v18, %v4114_v57  ;;  %v4101_v18 = vld [vmem:[%s15388_s14 + $0x28] sm:$0xff] }
0x10d1   : > { %v3554_v63 = vsel %vm958_vm0, %v3546_v29, 0.0  ;;  %v3547_v15 = vadd.f32 %v3541_v38, %v12352_v37  ;;  %v10388_v19 = vpack.c.bf16 %v3617_v34, %v3616_v43  ;;  %v3603_v43 = vrot.slane %v12733_v17, %v11752_v53  ;;  %v4117_v57 = vld [vmem:[%s15388_s14 + $0xa8] sm:$0xff] }
0x10d2   : > { %v3548_v3 = vsel %vm958_vm0, %v3544_v50, 0.0  ;;  %v3545_v48 = vadd.f32 %v3533_v9, %v12345_v32  ;;  %4760 = vmatprep.subr.bf16.mxu1 %v9256_v55  ;;  %v9262_v55 = vcombine.high %v4101_v18, %v4117_v57 }
0x10d3   : > { %3549 = vadd.xlane.f32.xlu0 %v3548_v3  ;;  %v3557_v28 = vsel %vm958_vm0, %v3547_v15, 0.0  ;;  %10389 = vmatprep.subr.bf16.mxu0 %v10388_v19 }
0x10d4   : > { %v3551_v47 = vsel %vm958_vm0, %v3545_v48, 0.0  ;;  %10391 = vmatpush3.bf16.msra.mxu0 %v10388_v19 }
0x10d5   : > { %3552 = vadd.xlane.f32.xlu1 %v3551_v47  ;;  %10393 = vmatprep.subr.bf16.mxu0 %v10392_v0 }
0x10d7   : > { %3555 = vadd.xlane.f32.xlu0 %v3554_v63 }
0x10d8   : > { %10395 = vmatpush3.bf16.msra.mxu0 %v10392_v0  ;;  %v4100_v0 = vld [vmem:[%s15388_s14 + $0x20] sm:$0xff] }
0x10d9   : > { %4707 = vmatprep.subr.bf16.mxu0 %v9254_v45  ;;  %v9260_v10 = vcombine.high %v4100_v0, %v4116_v58  ;;  %v9290_v45 = vcombine.high %v4131_v62, %v4147_v2 }
0x10db   : > { %3558 = vadd.xlane.f32.xlu0 %v3557_v28 }
0x1160   : > { %v3550_v32 = vpop.xlane.xlu0 %3549 }
0x1161   : > { %v3560_v44 = vmul.f32 0.03125, %v3550_v32  ;;  %v3611_v32 = vrot.slane %v12733_v17, %v12136_v30 }
0x1162   : > { %v3553_v51 = vpop.xlane.xlu1 %3552 }
0x1163   : > { %v12745_v39 = vsub.f32 %v3544_v50, %v3560_v44  ;;  %v3561_v56 = vmul.f32 0.03125, %v3553_v51 }
0x1164   : > { %v3556_v7 = vpop.xlane.xlu0 %3555 }
0x1165   : > { %v12747_v11 = vsub.f32 %v3545_v48, %v3561_v56  ;;  %v3562_v23 = vmul.f32 0.03125, %v3556_v7  ;;  %v3568_v37 = vmul.f32 %v12745_v39, %v12745_v39 }
0x1167   : > { %v12751_v59 = vsub.f32 %v3546_v29, %v3562_v23  ;;  %v3572_v5 = vsel %vm958_vm0, %v3568_v37, 0.0  ;;  %v3569_v1 = vmul.f32 %v12747_v11, %v12747_v11  ;;  %v4129_v23 = vld [vmem:[%s15388_s14 + $0x108] sm:$0xff] }
0x1168   : > { %3573 = vadd.xlane.f32.xlu0 %v3572_v5  ;;  %v3559_v42 = vpop.xlane.xlu0 %3558  ;;  %v4145_v37 = vld [vmem:[%s15388_s14 + $0x188] sm:$0xff] }
0x1169   : > { %v3563_v31 = vmul.f32 0.03125, %v3559_v42  ;;  %v3575_v36 = vsel %vm958_vm0, %v3569_v1, 0.0  ;;  %v3570_v33 = vmul.f32 %v12751_v59, %v12751_v59  ;;  %v4130_v1 = vld [vmem:[%s15388_s14 + $0x110] sm:$0xff] }
0x116b   : > { %v12756_v6 = vsub.f32 %v3547_v15, %v3563_v31  ;;  %v3578_v49 = vsel %vm958_vm0, %v3570_v33, 0.0  ;;  %v9286_v33 = vcombine.high %v4129_v23, %v4145_v37 }
0x116c   : > { %3576 = vadd.xlane.f32.xlu0 %v3575_v36 }
0x116d   : > { %v3571_v21 = vmul.f32 %v12756_v6, %v12756_v6 }
0x116f   : > { %v3581_v12 = vsel %vm958_vm0, %v3571_v21, 0.0 }
0x1170   : > { %3579 = vadd.xlane.f32.xlu0 %v3578_v49  ;;  %3582 = vadd.xlane.f32.xlu1 %v3581_v12  ;;  %v4099_v49 = vld [vmem:[%s15388_s14 + $0x18] sm:$0xff] }
0x1171   : > { %v4115_v12 = vld [vmem:[%s15388_s14 + $0x98] sm:$0xff] }
0x1172   : > { %v9258_v16 = vcombine.high %v4099_v49, %v4115_v12 }
0x11f5   : > { %v3574_v46 = vpop.xlane.xlu0 %3573 }
0x11f6   : > { %v3584_v35 = vmul.f32 0.03125, %v3574_v46  ;;  %v4132_v46 = vld [vmem:[%s15388_s14 + $0x120] sm:$0xff] }
0x11f8   : > { %v3588_v9 = vadd.f32 1e-05, %v3584_v35  ;;  %v4148_v35 = vld [vmem:[%s15388_s14 + $0x1a0] sm:$0xff] }
0x11f9   : > { %v3577_v50 = vpop.xlane.xlu0 %3576 }
0x11fa   : > { %11085 = vrsqrt.f32 %v3588_v9  ;;  %v3585_v38 = vmul.f32 0.03125, %v3577_v50  ;;  %v9259_v9 = vcombine.low %v4100_v0, %v4116_v58  ;;  %v9292_v50 = vcombine.high %v4132_v46, %v4148_v35  ;;  %v4106_v58 = vld [vmem:[%s15388_s14 + $0x50] sm:$0xff] }
0x11fc   : > { %v3589_v3 = vadd.f32 1e-05, %v3585_v38  ;;  %v4102_v38 = vld [vmem:[%s15388_s14 + $0x30] sm:$0xff] }
0x11fd   : > { %v3583_v48 = vpop.xlane.xlu1 %3582  ;;  %v3580_v29 = vpop.xlane.xlu0 %3579 }
0x11fe   : > { %11087 = vrsqrt.f32 %v3589_v3  ;;  %v3587_v47 = vmul.f32 0.03125, %v3583_v48  ;;  %v3586_v63 = vmul.f32 0.03125, %v3580_v29  ;;  %v4118_v3 = vld [vmem:[%s15388_s14 + $0xb0] sm:$0xff]  ;;  %v9291_v48 = vcombine.low %v4132_v46, %v4148_v35 }
0x11ff   : > { %v9264_v29 = vcombine.high %v4102_v38, %v4118_v3  ;;  %v4138_v46 = vld [vmem:[%s15388_s14 + $0x150] sm:$0xff] }
0x1200   : > { %v3591_v15 = vadd.f32 1e-05, %v3587_v47  ;;  %v3590_v28 = vadd.f32 1e-05, %v3586_v63  ;;  %v4133_v47 = vld [vmem:[%s15388_s14 + $0x128] sm:$0xff]  ;;  %v4154_v35 = vld [vmem:[%s15388_s14 + $0x1d0] sm:$0xff] }
0x1201   : > { %v4149_v63 = vld [vmem:[%s15388_s14 + $0x1a8] sm:$0xff] }
0x1202   : > { %11089 = vrsqrt.f32 %v3591_v15  ;;  %v9261_v15 = vcombine.low %v4101_v18, %v4117_v57  ;;  %v4107_v18 = vld [vmem:[%s15388_s14 + $0x58] sm:$0xff] }
0x1203   : > { %11091 = vrsqrt.f32 %v3590_v28  ;;  %v9294_v28 = vcombine.high %v4133_v47, %v4149_v63  ;;  %v4123_v57 = vld [vmem:[%s15388_s14 + $0xd8] sm:$0xff] }
0x1204   : > { %v11086_v34 = vpop.eup %11085 }
0x1205   : > { %v3596_v19 = vmul.f32 %v11086_v34, %v12745_v39  ;;  %v4119_v34 = vld [vmem:[%s15388_s14 + $0xb8] sm:$0xff] }
0x1207   : > { %v3604_v44 = vmul.f32 %v3603_v43, %v3596_v19  ;;  %v9293_v19 = vcombine.low %v4133_v47, %v4149_v63  ;;  %v4139_v47 = vld [vmem:[%s15388_s14 + $0x158] sm:$0xff] }
0x1208   : > { %v11088_v51 = vpop.eup %11087  ;;  %v4155_v63 = vld [vmem:[%s15388_s14 + $0x1d8] sm:$0xff] }
0x1209   : > { %v3597_v56 = vmul.f32 %v11088_v51, %v12747_v11  ;;  %v12795_v7 = vadd.f32 %v3611_v32, %v3604_v44  ;;  %v4146_v11 = vld [vmem:[%s15388_s14 + $0x190] sm:$0xff] }
0x120a   : > { %v9287_v13 = vcombine.low %v4130_v1, %v4146_v11  ;;  %v4134_v44 = vld [vmem:[%s15388_s14 + $0x130] sm:$0xff] }
0x120b   : > { %15460 = vst [vmem:[#allocation27_spill] sm:$0xff] %v12795_v7  ;;  %v3605_v5 = vmul.f32 %v3603_v43, %v3597_v56  ;;  %10382 = vmatprep.mubr.msk.f32.mxu0 %vm958_vm0, %v12795_v7  ;;  %v4150_v51 = vld [vmem:[%s15388_s14 + $0x1b0] sm:$0xff]  ;;  %v9263_v56 = vcombine.low %v4102_v38, %v4118_v3  ;;  %v4108_v38 = vld [vmem:[%s15388_s14 + $0x60] sm:$0xff] }
0x120c   : > { %v11090_v39 = vpop.eup %11089  ;;  %v4124_v3 = vld [vmem:[%s15388_s14 + $0xe0] sm:$0xff] }
0x120d   : > { %v11092_v42 = vpop.eup %11091  ;;  %v12811_v31 = vadd.f32 %v3611_v32, %v3605_v5  ;;  %v3599_v36 = vmul.f32 %v11090_v39, %v12756_v6  ;;  %v9288_v6 = vcombine.high %v4130_v1, %v4146_v11  ;;  %v4120_v5 = vld [vmem:[%s15388_s14 + $0xc0] sm:$0xff]  ;;  %v9295_v39 = vcombine.low %v4134_v44, %v4150_v51  ;;  %v4135_v11 = vld [vmem:[%s15388_s14 + $0x138] sm:$0xff] }
0x120e   : > { %v3598_v21 = vmul.f32 %v11092_v42, %v12751_v59  ;;  %v9285_v59 = vcombine.low %v4129_v23, %v4145_v37  ;;  %v9296_v23 = vcombine.high %v4134_v44, %v4150_v51  ;;  %v4104_v37 = vld [vmem:[%s15388_s14 + $0x40] sm:$0xff]  ;;  %v4151_v42 = vld [vmem:[%s15388_s14 + $0x1b8] sm:$0xff] }
0x120f   : > { %15461 = vst [vmem:[#allocation28_spill] sm:$0xff] %v12811_v31  ;;  %v12823_v8 = vpack.c.bf16 %v12811_v31, %v12795_v7  ;;  %10383 = vmatmul.mubr.msk.f32.vlgmr.msra.gmra.mrb[72].mxu0 %vm958_vm0, %v12811_v31  ;;  %v3607_v61 = vmul.f32 %v3603_v43, %v3599_v36  ;;  %v9268_v1 = vcombine.high %v4104_v37, %v4120_v5  ;;  %v4140_v44 = vld [vmem:[%s15388_s14 + $0x160] sm:$0xff] }
0x1210   : > { %4708 = vmatpush1.bf16.msra.mxu0 %v9253_v27  ;;  %v3606_v54 = vmul.f32 %v3603_v43, %v3598_v21  ;;  %v9257_v27 = vcombine.low %v4099_v49, %v4115_v12  ;;  %v4103_v43 = vld [vmem:[%s15388_s14 + $0x38] sm:$0xff]  ;;  %v4105_v21 = vld [vmem:[%s15388_s14 + $0x48] sm:$0xff]  ;;  %v9297_v12 = vcombine.low %v4135_v11, %v4151_v42  ;;  %v4156_v51 = vld [vmem:[%s15388_s14 + $0x1e0] sm:$0xff] }
0x1211   : > { %9315 = vmatmul.mubr.msk.bf16.vlgmr.msra.gmra.mrb[80].mxu1 %vm958_vm0, %v12823_v8  ;;  %v12835_v20 = vadd.f32 %v3611_v32, %v3607_v61  ;;  %4709 = vmatprep.subr.bf16.mxu0 %v9286_v33  ;;  %v9265_v36 = vcombine.low %v4103_v43, %v4119_v34  ;;  %v9298_v33 = vcombine.high %v4135_v11, %v4151_v42  ;;  %v4121_v49 = vld [vmem:[%s15388_s14 + $0xc8] sm:$0xff] }
0x1212   : > { %v12837_v52 = vadd.f32 %v3611_v32, %v3606_v54  ;;  %4696 = vmatprep.mubr.bf16.mxu1 %v15409_v26  ;;  %4761 = vmatpush1.bf16.msra.mxu1 %v9255_v40  ;;  %v9289_v40 = vcombine.low %v4131_v62, %v4147_v2  ;;  %v9266_v32 = vcombine.high %v4103_v43, %v4119_v34  ;;  %v4152_v54 = vld [vmem:[%s15388_s14 + $0x1c0] sm:$0xff]  ;;  %v4137_v62 = vld [vmem:[%s15388_s14 + $0x148] sm:$0xff] }
0x1213   : > { %15462 = vst [vmem:[#allocation29_spill] sm:$0xff] %v12835_v20  ;;  %4762 = vmatprep.subr.bf16.mxu1 %v9288_v6  ;;  %v9270_v61 = vcombine.high %v4105_v21, %v4121_v49  ;;  %v4136_v6 = vld [vmem:[%s15388_s14 + $0x140] sm:$0xff]  ;;  %v4153_v2 = vld [vmem:[%s15388_s14 + $0x1c8] sm:$0xff] }
0x1214   : > { %15463 = vst [vmem:[#allocation30_spill] sm:$0xff] %v12837_v52  ;;  %10385 = vmatprep.mubr.msk.f32.mxu0 %vm958_vm0, %v12837_v52  ;;  %4710 = vmatpush1.bf16.msra.mxu0 %v9285_v59  ;;  %v12853_v60 = vpack.c.bf16 %v12835_v20, %v12837_v52  ;;  %v9267_v59 = vcombine.low %v4104_v37, %v4120_v5  ;;  %v4109_v43 = vld [vmem:[%s15388_s14 + $0x68] sm:$0xff]  ;;  %v4110_v37 = vld [vmem:[%s15388_s14 + $0x70] sm:$0xff] }
0x1215   : > { %10386 = vmatmul.mubr.msk.f32.gmra.mrb[74].mxu0 %vm958_vm0, %v12835_v20  ;;  %4813 = vmatprep.subr.bf16.mxu0 %v9258_v16  ;;  %v9300_v0 = vcombine.high %v4136_v6, %v4152_v54  ;;  %v4122_v16 = vld [vmem:[%s15388_s14 + $0xd0] sm:$0xff]  ;;  %v4125_v34 = vld [vmem:[%s15388_s14 + $0xe8] sm:$0xff] }
0x1216   : > { %4739 = vmatprep.mubr.bf16.mxu0 %v15409_v26  ;;  %4763 = vmatpush1.bf16.msra.mxu1 %v9287_v13  ;;  %v9299_v13 = vcombine.low %v4136_v6, %v4152_v54  ;;  %v4126_v5 = vld [vmem:[%s15388_s14 + $0xf0] sm:$0xff]  ;;  %v4141_v11 = vld [vmem:[%s15388_s14 + $0x168] sm:$0xff] }
0x1217   : > { %4866 = vmatprep.subr.bf16.mxu1 %v9260_v10  ;;  %v9272_v10 = vcombine.high %v4106_v58, %v4122_v16  ;;  %v4157_v42 = vld [vmem:[%s15388_s14 + $0x1e8] sm:$0xff]  ;;  %v4142_v6 = vld [vmem:[%s15388_s14 + $0x170] sm:$0xff] }
0x1218   : > { %v4158_v54 = vld [vmem:[%s15388_s14 + $0x1f0] sm:$0xff] }
0x1219   : > { %9317 = vmatmul.mubr.msk.bf16.vlgmr.msra.gmra.mrb[76].mxu0 %vm958_vm0, %v12823_v8  ;;  %9316 = vmatmul.mubr.msk.bf16.gmra.mrb[84].mxu1 %vm958_vm0, %v12853_v60 }
0x121a   : > { %4749 = vmatprep.mubr.bf16.mxu0 %v15409_v26  ;;  %4792 = vmatprep.mubr.bf16.mxu1 %v15409_v26 }
0x121b   : > { %4814 = vmatpush1.bf16.msra.mxu0 %v9257_v27  ;;  %v9269_v27 = vcombine.low %v4105_v21, %v4121_v49  ;;  %v4111_v21 = vld [vmem:[%s15388_s14 + $0x78] sm:$0xff] }
0x121c   : > { %4815 = vmatprep.subr.bf16.mxu0 %v9290_v45  ;;  %v9302_v45 = vcombine.high %v4137_v62, %v4153_v2  ;;  %v4127_v49 = vld [vmem:[%s15388_s14 + $0xf8] sm:$0xff] }
0x121f   : > { %4816 = vmatpush1.bf16.msra.mxu0 %v9289_v40  ;;  %v9301_v40 = vcombine.low %v4137_v62, %v4153_v2 }
0x1220   : > { %4919 = vmatprep.subr.bf16.mxu0 %v9262_v55  ;;  %v9274_v55 = vcombine.high %v4107_v18, %v4123_v57 }
0x1221   : > { %9318 = vmatmul.mubr.msk.bf16.gmra.mrb[80].mxu0 %vm958_vm0, %v12853_v60  ;;  %9319 = vmatmul.mubr.msk.bf16.vlgmr.msra.gmra.mrb[88].mxu1 %vm958_vm0, %v12823_v8 }
0x1222   : > { %4845 = vmatprep.mubr.bf16.mxu0 %v15409_v26  ;;  %4802 = vmatprep.mubr.bf16.mxu1 %v15409_v26 }
0x1223   : > { %4867 = vmatpush1.bf16.msra.mxu1 %v9259_v9  ;;  %v9271_v9 = vcombine.low %v4106_v58, %v4122_v16  ;;  %v9311_v58 = vcombine.low %v4142_v6, %v4158_v54  ;;  %v4143_v16 = vld [vmem:[%s15388_s14 + $0x178] sm:$0xff] }
0x1224   : > { %4868 = vmatprep.subr.bf16.mxu1 %v9292_v50  ;;  %v9304_v50 = vcombine.high %v4138_v46, %v4154_v35 }
0x1227   : > { %4869 = vmatpush1.bf16.msra.mxu1 %v9291_v48  ;;  %v9303_v48 = vcombine.low %v4138_v46, %v4154_v35 }
0x1228   : > { %4972 = vmatprep.subr.bf16.mxu1 %v9264_v29  ;;  %v9276_v29 = vcombine.high %v4108_v38, %v4124_v3 }
0x1229   : > { %9321 = vmatmul.mubr.msk.bf16.vlgmr.msra.gmra.mrb[84].mxu0 %vm958_vm0, %v12823_v8  ;;  %9320 = vmatmul.mubr.msk.bf16.gmra.mrb[92].mxu1 %vm958_vm0, %v12853_v60 }
0x122a   : > { %4855 = vmatprep.mubr.bf16.mxu0 %v15409_v26  ;;  %4898 = vmatprep.mubr.bf16.mxu1 %v15409_v26 }
0x122b   : > { %4920 = vmatpush1.bf16.msra.mxu0 %v9261_v15  ;;  %v9273_v15 = vcombine.low %v4107_v18, %v4123_v57 }
0x122c   : > { %4921 = vmatprep.subr.bf16.mxu0 %v9294_v28  ;;  %v9306_v28 = vcombine.high %v4139_v47, %v4155_v63 }
0x122f   : > { %4922 = vmatpush1.bf16.msra.mxu0 %v9293_v19  ;;  %v9305_v19 = vcombine.low %v4139_v47, %v4155_v63 }
0x1230   : > { %5025 = vmatprep.subr.bf16.mxu0 %v9266_v32  ;;  %v9278_v32 = vcombine.high %v4109_v43, %v4125_v34 }
0x1231   : > { %9322 = vmatmul.mubr.msk.bf16.gmra.mrb[88].mxu0 %vm958_vm0, %v12853_v60  ;;  %9323 = vmatmul.mubr.msk.bf16.vlgmr.msra.gmra.mrb[96].mxu1 %vm958_vm0, %v12823_v8 }
0x1232   : > { %4951 = vmatprep.mubr.bf16.mxu0 %v15409_v26  ;;  %4908 = vmatprep.mubr.bf16.mxu1 %v15409_v26 }
0x1233   : > { %4973 = vmatpush1.bf16.msra.mxu1 %v9263_v56  ;;  %v9275_v56 = vcombine.low %v4108_v38, %v4124_v3 }
0x1234   : > { %4974 = vmatprep.subr.bf16.mxu1 %v9296_v23  ;;  %v9308_v23 = vcombine.high %v4140_v44, %v4156_v51 }
0x1237   : > { %4975 = vmatpush1.bf16.msra.mxu1 %v9295_v39  ;;  %v9307_v39 = vcombine.low %v4140_v44, %v4156_v51 }
0x1238   : > { %5078 = vmatprep.subr.bf16.mxu1 %v9268_v1  ;;  %v9280_v1 = vcombine.high %v4110_v37, %v4126_v5 }
0x1239   : > { %9325 = vmatmul.mubr.msk.bf16.vlgmr.msra.gmra.mrb[92].mxu0 %vm958_vm0, %v12823_v8  ;;  %9324 = vmatmul.mubr.msk.bf16.gmra.mrb[100].mxu1 %vm958_vm0, %v12853_v60 }
0x123a   : > { %4961 = vmatprep.mubr.bf16.mxu0 %v15409_v26  ;;  %5004 = vmatprep.mubr.bf16.mxu1 %v15409_v26 }
0x123b   : > { %5026 = vmatpush1.bf16.msra.mxu0 %v9265_v36  ;;  %v9277_v36 = vcombine.low %v4109_v43, %v4125_v34 }
0x123c   : > { %5027 = vmatprep.subr.bf16.mxu0 %v9298_v33  ;;  %v9310_v33 = vcombine.high %v4141_v11, %v4157_v42 }
0x123f   : > { %5028 = vmatpush1.bf16.msra.mxu0 %v9297_v12  ;;  %v9309_v12 = vcombine.low %v4141_v11, %v4157_v42 }
0x1240   : > { %5131 = vmatprep.subr.bf16.mxu0 %v9270_v61  ;;  %v9282_v61 = vcombine.high %v4111_v21, %v4127_v49 }
0x1241   : > { %9326 = vmatmul.mubr.msk.bf16.gmra.mrb[96].mxu0 %vm958_vm0, %v12853_v60  ;;  %9327 = vmatmul.mubr.msk.bf16.vlgmr.msra.gmra.mrb[104].mxu1 %vm958_vm0, %v12823_v8 }
0x1242   : > { %5057 = vmatprep.mubr.bf16.mxu0 %v15409_v26  ;;  %5014 = vmatprep.mubr.bf16.mxu1 %v15409_v26 }
0x1243   : > { %5079 = vmatpush1.bf16.msra.mxu1 %v9267_v59  ;;  %v9279_v59 = vcombine.low %v4110_v37, %v4126_v5 }
0x1244   : > { %5080 = vmatprep.subr.bf16.mxu1 %v9300_v0  ;;  %v9312_v0 = vcombine.high %v4142_v6, %v4158_v54 }
0x1247   : > { %5081 = vmatpush1.bf16.msra.mxu1 %v9299_v13  ;;  %v4159_v13 = vld [vmem:[%s15388_s14 + $0x1f8] sm:$0xff] }
0x1248   : > { %5184 = vmatprep.subr.bf16.mxu1 %v9272_v10  ;;  %v9281_v10 = vcombine.low %v4111_v21, %v4127_v49  ;;  %v9314_v62 = vcombine.high %v4143_v16, %v4159_v13  ;;  %v9313_v2 = vcombine.low %v4143_v16, %v4159_v13 }
0x1249   : > { %9329 = vmatmul.mubr.msk.bf16.vlgmr.msra.gmra.mrb[100].mxu0 %vm958_vm0, %v12823_v8  ;;  %9328 = vmatmul.mubr.msk.bf16.gmra.mrb[108].mxu1 %vm958_vm0, %v12853_v60 }
0x124a   : > { %5067 = vmatprep.mubr.bf16.mxu0 %v15409_v26  ;;  %5110 = vmatprep.mubr.bf16.mxu1 %v15409_v26 }
0x124b   : > { %5132 = vmatpush1.bf16.msra.mxu0 %v9269_v27  ;;  %v3623_v27 = vrot.slane %v12733_v17, %v12280_v22 }
0x124c   : > { %5133 = vmatprep.subr.bf16.mxu0 %v9302_v45 }
0x124f   : > { %5134 = vmatpush1.bf16.msra.mxu0 %v9301_v40 }
0x1250   : > { %5237 = vmatprep.subr.bf16.mxu0 %v9274_v55 }
0x1251   : > { %9330 = vmatmul.mubr.msk.bf16.gmra.mrb[104].mxu0 %vm958_vm0, %v12853_v60  ;;  %9331 = vmatmul.mubr.msk.bf16.vlgmr.msra.gmra.mrb[112].mxu1 %vm958_vm0, %v12823_v8 }
0x1252   : > { %5163 = vmatprep.mubr.bf16.mxu0 %v15409_v26  ;;  %5120 = vmatprep.mubr.bf16.mxu1 %v15409_v26 }
0x1253   : > { %5185 = vmatpush1.bf16.msra.mxu1 %v9271_v9 }
0x1254   : > { %5186 = vmatprep.subr.bf16.mxu1 %v9304_v50 }
0x1257   : > { %5187 = vmatpush1.bf16.msra.mxu1 %v9303_v48 }
0x1258   : > { %5290 = vmatprep.subr.bf16.mxu1 %v9276_v29 }
0x1259   : > { %9333 = vmatmul.mubr.msk.bf16.vlgmr.msra.gmra.mrb[108].mxu0 %vm958_vm0, %v12823_v8  ;;  %9332 = vmatmul.mubr.msk.bf16.gmra.mrb[116].mxu1 %vm958_vm0, %v12853_v60 }
0x125a   : > { %5173 = vmatprep.mubr.bf16.mxu0 %v15409_v26  ;;  %5216 = vmatprep.mubr.bf16.mxu1 %v15409_v26 }
0x125b   : > { %5238 = vmatpush1.bf16.msra.mxu0 %v9273_v15 }
0x125c   : > { %5239 = vmatprep.subr.bf16.mxu0 %v9306_v28 }
0x125f   : > { %5240 = vmatpush1.bf16.msra.mxu0 %v9305_v19 }
0x1260   : > { %5343 = vmatprep.subr.bf16.mxu0 %v9278_v32 }
0x1261   : > { %9334 = vmatmul.mubr.msk.bf16.gmra.mrb[112].mxu0 %vm958_vm0, %v12853_v60  ;;  %9335 = vmatmul.mubr.msk.bf16.vlgmr.msra.gmra.mrb[120].mxu1 %vm958_vm0, %v12823_v8 }
0x1262   : > { %5269 = vmatprep.mubr.bf16.mxu0 %v15409_v26  ;;  %5226 = vmatprep.mubr.bf16.mxu1 %v15409_v26 }
0x1263   : > { %5291 = vmatpush1.bf16.msra.mxu1 %v9275_v56 }
0x1264   : > { %5292 = vmatprep.subr.bf16.mxu1 %v9308_v23 }
0x1267   : > { %5293 = vmatpush1.bf16.msra.mxu1 %v9307_v39 }
0x1268   : > { %5396 = vmatprep.subr.bf16.mxu1 %v9280_v1 }
0x1269   : > { %9337 = vmatmul.mubr.msk.bf16.vlgmr.msra.gmra.mrb[116].mxu0 %vm958_vm0, %v12823_v8  ;;  %9336 = vmatmul.mubr.msk.bf16.gmra.mrb[124].mxu1 %vm958_vm0, %v12853_v60 }
0x126a   : > { %5279 = vmatprep.mubr.bf16.mxu0 %v15409_v26  ;;  %5322 = vmatprep.mubr.bf16.mxu1 %v15409_v26 }
0x126b   : > { %5344 = vmatpush1.bf16.msra.mxu0 %v9277_v36 }
0x126c   : > { %5345 = vmatprep.subr.bf16.mxu0 %v9310_v33 }
0x126f   : > { %5346 = vmatpush1.bf16.msra.mxu0 %v9309_v12 }
0x1270   : > { %5449 = vmatprep.subr.bf16.mxu0 %v9282_v61 }
0x1271   : > { %9338 = vmatmul.mubr.msk.bf16.gmra.mrb[120].mxu0 %vm958_vm0, %v12853_v60  ;;  %9339 = vmatmul.mubr.msk.bf16.vlgmr.msra.gmra.mrb[128].mxu1 %vm958_vm0, %v12823_v8 }
0x1272   : > { %5375 = vmatprep.mubr.bf16.mxu0 %v15409_v26  ;;  %5332 = vmatprep.mubr.bf16.mxu1 %v15409_v26 }
0x1273   : > { %5397 = vmatpush1.bf16.msra.mxu1 %v9279_v59 }
0x1274   : > { %5398 = vmatprep.subr.bf16.mxu1 %v9312_v0 }
0x1277   : > { %5399 = vmatpush1.bf16.msra.mxu1 %v9311_v58 }
0x1279   : > { %9341 = vmatmul.mubr.msk.bf16.vlgmr.msra.gmra.mrb[124].mxu0 %vm958_vm0, %v12823_v8  ;;  %9340 = vmatmul.mubr.msk.bf16.gmra.mrb[132].mxu1 %vm958_vm0, %v12853_v60 }
0x127a   : > { %5385 = vmatprep.mubr.bf16.mxu0 %v15409_v26  ;;  %5428 = vmatprep.mubr.bf16.mxu1 %v15409_v26 }
0x127b   : > { %5450 = vmatpush1.bf16.msra.mxu0 %v9281_v10 }
0x127c   : > { %5451 = vmatprep.subr.bf16.mxu0 %v9314_v62 }
0x127f   : > { %5452 = vmatpush1.bf16.msra.mxu0 %v9313_v2 }
0x1281   : > { %9342 = vmatmul.mubr.msk.bf16.gmra.mrb[128].mxu0 %vm958_vm0, %v12853_v60  ;;  %9343 = vmatmul.mubr.msk.bf16.vlgmr.msra.gmra.mrb[136].mxu1 %vm958_vm0, %v12823_v8 }
0x1282   : > { %5481 = vmatprep.mubr.bf16.mxu0 %v15409_v26  ;;  %5438 = vmatprep.mubr.bf16.mxu1 %v15409_v26 }
0x1289   : > { %9345 = vmatmul.mubr.msk.bf16.vlgmr.msra.gmra.mrb[132].mxu0 %vm958_vm0, %v12823_v8  ;;  %9344 = vmatmul.mubr.msk.bf16.gmra.mrb[140].mxu1 %vm958_vm0, %v12853_v60 }
0x128a   : > { %5491 = vmatprep.mubr.bf16.mxu0 %v15409_v26 }
0x1291   : > { %9346 = vmatmul.mubr.msk.bf16.gmra.mrb[136].mxu0 %vm958_vm0, %v12853_v60 }
0x12e2   : > { %v10384_v45 = vpop.f32.mrb[72].mxu0 }
0x12e3   : > { %v13086_v18 = vadd.f32 %v10384_v45, %v3623_v27  ;;  %v3702_v57 = vpop.f32.mrb[73].mxu0 }
0x12e4   : > { %v13088_v40 = vadd.f32 %v3702_v57, %v3623_v27  ;;  %v13090_v55 = vpop.f32.mrb[80].mxu1 }
0x12e5   : > { %v13092_v8 = vpop.f32.mrb[81].mxu1  ;;  %v3725_v46 = vsel %vm3721_vm2, %v13086_v18, -inf }
0x12e6   : > { %v13096_v35 = vpop.f32.mrb[82].mxu1  ;;  %3726 = vmax.xlane.f32.xlu1 %v3725_v46  ;;  %v3722_v17 = vsel %vm3721_vm2, %v13088_v40, -inf }
0x12e7   : > { %v13100_v60 = vpop.f32.mrb[83].mxu1  ;;  %3723 = vmax.xlane.f32.xlu0 %v3722_v17 }
0x12e8   : > { %v10387_v9 = vpop.f32.mrb[74].mxu0 }
0x12e9   : > { %v13102_v50 = vadd.f32 %v10387_v9, %v3623_v27  ;;  %v3712_v38 = vpop.f32.mrb[75].mxu0 }
0x12ea   : > { %v13104_v3 = vadd.f32 %v3712_v38, %v3623_v27 }
0x12eb   : > { %v3731_v48 = vsel %vm3721_vm2, %v13102_v50, -inf }
0x12ec   : > { %3732 = vmax.xlane.f32.xlu1 %v3731_v48  ;;  %v13108_v29 = vpop.f32.mrb[76].mxu0  ;;  %v13110_v47 = vpop.f32.mrb[84].mxu1  ;;  %v3728_v63 = vsel %vm3721_vm2, %v13104_v3, -inf }
0x12ed   : > { %v13114_v15 = vpop.f32.mrb[77].mxu0  ;;  %3729 = vmax.xlane.f32.xlu0 %v3728_v63  ;;  %v13116_v28 = vpop.f32.mrb[85].mxu1 }
0x12ee   : > { %v13118_v43 = vpop.f32.mrb[78].mxu0  ;;  %v13120_v34 = vpop.f32.mrb[86].mxu1 }
0x12ef   : > { %v13122_v19 = vpop.f32.mrb[79].mxu0  ;;  %v13124_v32 = vpop.f32.mrb[87].mxu1 }
0x12f4   : > { %v13126_v44 = vpop.f32.mrb[80].mxu0  ;;  %v13128_v51 = vpop.f32.mrb[88].mxu1 }
0x12f5   : > { %v13130_v56 = vpop.f32.mrb[81].mxu0  ;;  %v13132_v23 = vpop.f32.mrb[89].mxu1 }
0x12f6   : > { %v13134_v37 = vpop.f32.mrb[82].mxu0  ;;  %v13136_v5 = vpop.f32.mrb[90].mxu1 }
0x12f7   : > { %v13138_v39 = vpop.f32.mrb[83].mxu0  ;;  %v13140_v1 = vpop.f32.mrb[91].mxu1 }
0x12fc   : > { %v13142_v11 = vpop.f32.mrb[84].mxu0  ;;  %v13144_v42 = vpop.f32.mrb[92].mxu1 }
0x12fd   : > { %v13146_v36 = vpop.f32.mrb[85].mxu0  ;;  %v13148_v33 = vpop.f32.mrb[93].mxu1 }
0x12fe   : > { %v13150_v21 = vpop.f32.mrb[86].mxu0  ;;  %v13152_v49 = vpop.f32.mrb[94].mxu1 }
0x12ff   : > { %v13154_v12 = vpop.f32.mrb[87].mxu0  ;;  %v13156_v61 = vpop.f32.mrb[95].mxu1 }
0x1304   : > { %v13158_v6 = vpop.f32.mrb[88].mxu0  ;;  %v13160_v54 = vpop.f32.mrb[96].mxu1 }
0x1305   : > { %15464 = vst [vmem:[#allocation31_spill] sm:$0xff] %v13160_v54  ;;  %v13162_v59 = vpop.f32.mrb[89].mxu0  ;;  %v13164_v0 = vpop.f32.mrb[97].mxu1 }
0x1306   : > { %15465 = vst [vmem:[#allocation32_spill] sm:$0xff] %v13164_v0  ;;  %v13166_v58 = vpop.f32.mrb[90].mxu0  ;;  %v13168_v16 = vpop.f32.mrb[98].mxu1 }
0x1307   : > { %15466 = vst [vmem:[#allocation33_spill] sm:$0xff] %v13168_v16  ;;  %v13170_v13 = vpop.f32.mrb[91].mxu0  ;;  %v13172_v10 = vpop.f32.mrb[99].mxu1 }
0x1308   : > { %15467 = vst [vmem:[#allocation34_spill] sm:$0xff] %v13170_v13  ;;  %15468 = vst [vmem:[#allocation35_spill] sm:$0xff] %v13172_v10  ;;  %v10693_v10 = vld [vmem:[%s15390_s16 + $0x50] sm:$0xff]  }
0x130c   : > { %v13174_v62 = vpop.f32.mrb[92].mxu0  ;;  %v13176_v2 = vpop.f32.mrb[100].mxu1 }
0x130d   : > { %15469 = vst [vmem:[#allocation36_spill] sm:$0xff] %v13174_v62  ;;  %15470 = vst [vmem:[#allocation37_spill] sm:$0xff] %v13176_v2  ;;  %v13178_v27 = vpop.f32.mrb[93].mxu0  ;;  %v13180_v45 = vpop.f32.mrb[101].mxu1  ;;  %v10691_v2 = vld [vmem:[%s15390_s16 + $0x8] sm:$0xff]  }
0x130e   : > { %15471 = vst [vmem:[#allocation38_spill] sm:$0xff] %v13178_v27  ;;  %15472 = vst [vmem:[#allocation39_spill] sm:$0xff] %v13180_v45  ;;  %v13182_v57 = vpop.f32.mrb[94].mxu0  ;;  %v13184_v46 = vpop.f32.mrb[102].mxu1  ;;  %v10692_v62 = vld [vmem:[%s15390_s16 + $0x88] sm:$0xff]  }
0x130f   : > { %15473 = vst [vmem:[#allocation40_spill] sm:$0xff] %v13182_v57  ;;  %15474 = vst [vmem:[#allocation41_spill] sm:$0xff] %v13184_v46  ;;  %v13186_v17 = vpop.f32.mrb[95].mxu0  ;;  %v13188_v9 = vpop.f32.mrb[103].mxu1 }
0x1310   : > { %15475 = vst [vmem:[#allocation42_spill] sm:$0xff] %v13186_v17  ;;  %15476 = vst [vmem:[#allocation43_spill] sm:$0xff] %v13188_v9 }
0x1314   : > { %v13190_v38 = vpop.f32.mrb[96].mxu0  ;;  %v13192_v48 = vpop.f32.mrb[104].mxu1 }
0x1315   : > { %15477 = vst [vmem:[#allocation44_spill] sm:$0xff] %v13190_v38  ;;  %15478 = vst [vmem:[#allocation45_spill] sm:$0xff] %v13192_v48  ;;  %v13194_v63 = vpop.f32.mrb[97].mxu0  ;;  %v13196_v26 = vpop.f32.mrb[105].mxu1 }
0x1316   : > { %15479 = vst [vmem:[#allocation46_spill] sm:$0xff] %v13194_v63  ;;  %15480 = vst [vmem:[#allocation47_spill] sm:$0xff] %v13196_v26  ;;  %v13198_v20 = vpop.f32.mrb[98].mxu0  ;;  %v13200_v52 = vpop.f32.mrb[106].mxu1 }
0x1317   : > { %15481 = vst [vmem:[#allocation48_spill] sm:$0xff] %v13198_v20  ;;  %15482 = vst [vmem:[#allocation49_spill] sm:$0xff] %v13200_v52  ;;  %v13202_v31 = vpop.f32.mrb[99].mxu0  ;;  %v13204_v7 = vpop.f32.mrb[107].mxu1 }
0x1318   : > { %15483 = vst [vmem:[#allocation50_spill] sm:$0xff] %v13202_v31  ;;  %15484 = vst [vmem:[#allocation51_spill] sm:$0xff] %v13204_v7 }
0x131c   : > { %v13206_v46 = vpop.f32.mrb[100].mxu0  ;;  %v13208_v17 = vpop.f32.mrb[108].mxu1 }
0x131d   : > { %15485 = vst [vmem:[#allocation52_spill] sm:$0xff] %v13206_v46  ;;  %15486 = vst [vmem:[#allocation53_spill] sm:$0xff] %v13208_v17  ;;  %v13210_v9 = vpop.f32.mrb[101].mxu0  ;;  %v13212_v38 = vpop.f32.mrb[109].mxu1 }
0x131e   : > { %15487 = vst [vmem:[#allocation54_spill] sm:$0xff] %v13210_v9  ;;  %15488 = vst [vmem:[#allocation55_spill] sm:$0xff] %v13212_v38  ;;  %v13214_v48 = vpop.f32.mrb[102].mxu0  ;;  %v13216_v63 = vpop.f32.mrb[110].mxu1 }
0x131f   : > { %15489 = vst [vmem:[#allocation56_spill] sm:$0xff] %v13214_v48  ;;  %15490 = vst [vmem:[#allocation57_spill] sm:$0xff] %v13216_v63  ;;  %v13218_v26 = vpop.f32.mrb[103].mxu0  ;;  %v13220_v20 = vpop.f32.mrb[111].mxu1 }
0x1320   : > { %15491 = vst [vmem:[#allocation58_spill] sm:$0xff] %v13218_v26  ;;  %15492 = vst [vmem:[#allocation59_spill] sm:$0xff] %v13220_v20 }
0x1324   : > { %v13222_v52 = vpop.f32.mrb[104].mxu0  ;;  %v13224_v31 = vpop.f32.mrb[112].mxu1 }
0x1325   : > { %15493 = vst [vmem:[#allocation60_spill] sm:$0xff] %v13222_v52  ;;  %15494 = vst [vmem:[#allocation61_spill] sm:$0xff] %v13224_v31  ;;  %v13226_v7 = vpop.f32.mrb[105].mxu0  ;;  %v13228_v46 = vpop.f32.mrb[113].mxu1 }
0x1326   : > { %15495 = vst [vmem:[#allocation62_spill] sm:$0xff] %v13226_v7  ;;  %15496 = vst [vmem:[#allocation63_spill] sm:$0xff] %v13228_v46  ;;  %v13230_v17 = vpop.f32.mrb[106].mxu0  ;;  %v13232_v9 = vpop.f32.mrb[114].mxu1 }
0x1327   : > { %15497 = vst [vmem:[#allocation64_spill] sm:$0xff] %v13230_v17  ;;  %15498 = vst [vmem:[#allocation65_spill] sm:$0xff] %v13232_v9  ;;  %v13234_v38 = vpop.f32.mrb[107].mxu0  ;;  %v13236_v48 = vpop.f32.mrb[115].mxu1 }
0x1328   : > { %15499 = vst [vmem:[#allocation66_spill] sm:$0xff] %v13234_v38  ;;  %15500 = vst [vmem:[#allocation67_spill] sm:$0xff] %v13236_v48 }
0x132c   : > { %v13238_v63 = vpop.f32.mrb[108].mxu0  ;;  %v13240_v26 = vpop.f32.mrb[116].mxu1 }
0x132d   : > { %15501 = vst [vmem:[#allocation68_spill] sm:$0xff] %v13238_v63  ;;  %15502 = vst [vmem:[#allocation69_spill] sm:$0xff] %v13240_v26  ;;  %v13242_v20 = vpop.f32.mrb[109].mxu0  ;;  %v13244_v52 = vpop.f32.mrb[117].mxu1 }
0x132e   : > { %15503 = vst [vmem:[#allocation70_spill] sm:$0xff] %v13242_v20  ;;  %15504 = vst [vmem:[#allocation71_spill] sm:$0xff] %v13244_v52  ;;  %v13246_v31 = vpop.f32.mrb[110].mxu0  ;;  %v13248_v7 = vpop.f32.mrb[118].mxu1 }
0x132f   : > { %15505 = vst [vmem:[#allocation72_spill] sm:$0xff] %v13246_v31  ;;  %15506 = vst [vmem:[#allocation73_spill] sm:$0xff] %v13248_v7  ;;  %v13250_v46 = vpop.f32.mrb[111].mxu0  ;;  %v13252_v17 = vpop.f32.mrb[119].mxu1 }
0x1330   : > { %15507 = vst [vmem:[#allocation74_spill] sm:$0xff] %v13250_v46  ;;  %15508 = vst [vmem:[#allocation75_spill] sm:$0xff] %v13252_v17 }
0x1334   : > { %v13254_v9 = vpop.f32.mrb[112].mxu0  ;;  %v13256_v38 = vpop.f32.mrb[120].mxu1 }
0x1335   : > { %15509 = vst [vmem:[#allocation76_spill] sm:$0xff] %v13254_v9  ;;  %15510 = vst [vmem:[#allocation77_spill] sm:$0xff] %v13256_v38  ;;  %v13258_v48 = vpop.f32.mrb[113].mxu0  ;;  %v13260_v63 = vpop.f32.mrb[121].mxu1 }
0x1336   : > { %15511 = vst [vmem:[#allocation78_spill] sm:$0xff] %v13258_v48  ;;  %15512 = vst [vmem:[#allocation79_spill] sm:$0xff] %v13260_v63  ;;  %v13262_v26 = vpop.f32.mrb[114].mxu0  ;;  %v13264_v20 = vpop.f32.mrb[122].mxu1 }
0x1337   : > { %15513 = vst [vmem:[#allocation80_spill] sm:$0xff] %v13262_v26  ;;  %15514 = vst [vmem:[#allocation81_spill] sm:$0xff] %v13264_v20  ;;  %v13266_v52 = vpop.f32.mrb[115].mxu0  ;;  %v13268_v31 = vpop.f32.mrb[123].mxu1 }
0x1338   : > { %15515 = vst [vmem:[#allocation82_spill] sm:$0xff] %v13266_v52  ;;  %15516 = vst [vmem:[#allocation83_spill] sm:$0xff] %v13268_v31 }
0x133c   : > { %v13270_v7 = vpop.f32.mrb[116].mxu0  ;;  %v13272_v46 = vpop.f32.mrb[124].mxu1 }
0x133d   : > { %15517 = vst [vmem:[#allocation84_spill] sm:$0xff] %v13270_v7  ;;  %15518 = vst [vmem:[#allocation85_spill] sm:$0xff] %v13272_v46  ;;  %v13274_v17 = vpop.f32.mrb[117].mxu0  ;;  %v13276_v9 = vpop.f32.mrb[125].mxu1 }
0x133e   : > { %15519 = vst [vmem:[#allocation86_spill] sm:$0xff] %v13274_v17  ;;  %15520 = vst [vmem:[#allocation87_spill] sm:$0xff] %v13276_v9  ;;  %v13278_v38 = vpop.f32.mrb[118].mxu0  ;;  %v13280_v48 = vpop.f32.mrb[126].mxu1 }
0x133f   : > { %15521 = vst [vmem:[#allocation88_spill] sm:$0xff] %v13278_v38  ;;  %15522 = vst [vmem:[#allocation89_spill] sm:$0xff] %v13280_v48  ;;  %v13282_v63 = vpop.f32.mrb[119].mxu0  ;;  %v13284_v26 = vpop.f32.mrb[127].mxu1 }
0x1340   : > { %15523 = vst [vmem:[#allocation90_spill] sm:$0xff] %v13282_v63  ;;  %15524 = vst [vmem:[#allocation91_spill] sm:$0xff] %v13284_v26 }
0x1344   : > { %v13286_v20 = vpop.f32.mrb[120].mxu0  ;;  %v13288_v52 = vpop.f32.mrb[128].mxu1 }
0x1345   : > { %15525 = vst [vmem:[#allocation92_spill] sm:$0xff] %v13286_v20  ;;  %15526 = vst [vmem:[#allocation93_spill] sm:$0xff] %v13288_v52  ;;  %v13290_v31 = vpop.f32.mrb[121].mxu0  ;;  %v13292_v7 = vpop.f32.mrb[129].mxu1 }
0x1346   : > { %15527 = vst [vmem:[#allocation94_spill] sm:$0xff] %v13290_v31  ;;  %15528 = vst [vmem:[#allocation95_spill] sm:$0xff] %v13292_v7  ;;  %v13294_v46 = vpop.f32.mrb[122].mxu0  ;;  %v13296_v17 = vpop.f32.mrb[130].mxu1 }
0x1347   : > { %15529 = vst [vmem:[#allocation96_spill] sm:$0xff] %v13294_v46  ;;  %15530 = vst [vmem:[#allocation97_spill] sm:$0xff] %v13296_v17  ;;  %v13298_v9 = vpop.f32.mrb[123].mxu0  ;;  %v13300_v38 = vpop.f32.mrb[131].mxu1 }
0x1348   : > { %15531 = vst [vmem:[#allocation98_spill] sm:$0xff] %v13298_v9  ;;  %15532 = vst [vmem:[#allocation99_spill] sm:$0xff] %v13300_v38 }
0x134c   : > { %v13302_v48 = vpop.f32.mrb[124].mxu0  ;;  %v13304_v63 = vpop.f32.mrb[132].mxu1 }
0x134d   : > { %15533 = vst [vmem:[#allocation100_spill] sm:$0xff] %v13302_v48  ;;  %15534 = vst [vmem:[#allocation101_spill] sm:$0xff] %v13304_v63  ;;  %v13306_v26 = vpop.f32.mrb[125].mxu0  ;;  %v13308_v20 = vpop.f32.mrb[133].mxu1 }
0x134e   : > { %15535 = vst [vmem:[#allocation102_spill] sm:$0xff] %v13306_v26  ;;  %15536 = vst [vmem:[#allocation103_spill] sm:$0xff] %v13308_v20  ;;  %v13310_v52 = vpop.f32.mrb[126].mxu0  ;;  %v13312_v31 = vpop.f32.mrb[134].mxu1 }
0x134f   : > { %15537 = vst [vmem:[#allocation104_spill] sm:$0xff] %v13310_v52  ;;  %15538 = vst [vmem:[#allocation105_spill] sm:$0xff] %v13312_v31  ;;  %v13314_v7 = vpop.f32.mrb[127].mxu0  ;;  %v13316_v46 = vpop.f32.mrb[135].mxu1 }
0x1350   : > { %15539 = vst [vmem:[#allocation106_spill] sm:$0xff] %v13314_v7  ;;  %15540 = vst [vmem:[#allocation107_spill] sm:$0xff] %v13316_v46 }
0x1354   : > { %v13318_v17 = vpop.f32.mrb[128].mxu0  ;;  %v13320_v9 = vpop.f32.mrb[136].mxu1 }
0x1355   : > { %15541 = vst [vmem:[#allocation108_spill] sm:$0xff] %v13318_v17  ;;  %15542 = vst [vmem:[#allocation109_spill] sm:$0xff] %v13320_v9  ;;  %v13322_v38 = vpop.f32.mrb[129].mxu0  ;;  %v13324_v48 = vpop.f32.mrb[137].mxu1 }
0x1356   : > { %15543 = vst [vmem:[#allocation110_spill] sm:$0xff] %v13322_v38  ;;  %15544 = vst [vmem:[#allocation111_spill] sm:$0xff] %v13324_v48  ;;  %v13326_v63 = vpop.f32.mrb[130].mxu0  ;;  %v13328_v26 = vpop.f32.mrb[138].mxu1 }
0x1357   : > { %15545 = vst [vmem:[#allocation112_spill] sm:$0xff] %v13326_v63  ;;  %15546 = vst [vmem:[#allocation113_spill] sm:$0xff] %v13328_v26  ;;  %v13330_v20 = vpop.f32.mrb[131].mxu0  ;;  %v13332_v52 = vpop.f32.mrb[139].mxu1 }
0x1358   : > { %15547 = vst [vmem:[#allocation114_spill] sm:$0xff] %v13330_v20  ;;  %15548 = vst [vmem:[#allocation115_spill] sm:$0xff] %v13332_v52 }
0x135c   : > { %v13334_v31 = vpop.f32.mrb[132].mxu0  ;;  %v13336_v7 = vpop.f32.mrb[140].mxu1 }
0x135d   : > { %15549 = vst [vmem:[#allocation116_spill] sm:$0xff] %v13334_v31  ;;  %15550 = vst [vmem:[#allocation117_spill] sm:$0xff] %v13336_v7  ;;  %v13338_v46 = vpop.f32.mrb[133].mxu0  ;;  %v13340_v17 = vpop.f32.mrb[141].mxu1 }
0x135e   : > { %15551 = vst [vmem:[#allocation118_spill] sm:$0xff] %v13338_v46  ;;  %15552 = vst [vmem:[#allocation119_spill] sm:$0xff] %v13340_v17  ;;  %v13342_v9 = vpop.f32.mrb[134].mxu0  ;;  %v13344_v38 = vpop.f32.mrb[142].mxu1 }
0x135f   : > { %15553 = vst [vmem:[#allocation120_spill] sm:$0xff] %v13342_v9  ;;  %15554 = vst [vmem:[#allocation121_spill] sm:$0xff] %v13344_v38  ;;  %v13346_v48 = vpop.f32.mrb[135].mxu0  ;;  %v13348_v63 = vpop.f32.mrb[143].mxu1 }
0x1360   : > { %15555 = vst [vmem:[#allocation122_spill] sm:$0xff] %v13346_v48  ;;  %15556 = vst [vmem:[#allocation123_spill] sm:$0xff] %v13348_v63 }
0x1364   : > { %v13350_v26 = vpop.f32.mrb[136].mxu0 }
0x1365   : > { %15557 = vst [vmem:[#allocation124_spill] sm:$0xff] %v13350_v26  ;;  %v13352_v20 = vpop.f32.mrb[137].mxu0 }
0x1366   : > { %15558 = vst [vmem:[#allocation125_spill] sm:$0xff] %v13352_v20  ;;  %v13354_v52 = vpop.f32.mrb[138].mxu0 }
0x1367   : > { %15559 = vst [vmem:[#allocation126_spill] sm:$0xff] %v13354_v52  ;;  %v13356_v31 = vpop.f32.mrb[139].mxu0 }
0x1368   : > { %15560 = vst [vmem:[#allocation127_spill] sm:$0xff] %v13356_v31 }
0x1373   : > { %v3727_v7 = vpop.xlane.xlu1 %3726 }
0x1374   : > { %v3735_v46 = vsub.f32 %v13086_v18, %v3727_v7  ;;  %v3724_v17 = vpop.xlane.xlu0 %3723 }
0x1375   : > { %v3734_v9 = vsub.f32 %v13088_v40, %v3724_v17 }
0x1376   : > { %v3740_v57 = vmul.f32 1.442695, %v3735_v46 }
0x1377   : > { %v3738_v38 = vmul.f32 1.442695, %v3734_v9 }
0x1378   : > { %11093 = vpow2.f32 %v3740_v57 }
0x1379   : > { %11095 = vpow2.f32 %v3738_v38  ;;  %v3733_v48 = vpop.xlane.xlu1 %3732 }
0x137a   : > { %v3737_v63 = vsub.f32 %v13102_v50, %v3733_v48  ;;  %v3730_v26 = vpop.xlane.xlu0 %3729 }
0x137b   : > { %v3736_v20 = vsub.f32 %v13104_v3, %v3730_v26 }
0x137c   : > { %v3744_v45 = vmul.f32 1.442695, %v3737_v63 }
0x137d   : > { %v3742_v52 = vmul.f32 1.442695, %v3736_v20 }
0x137e   : > { %11097 = vpow2.f32 %v3744_v45 }
0x137f   : > { %11099 = vpow2.f32 %v3742_v52 }
0x1382   : > { %v11094_v31 = vpop.eup %11093 }
0x1383   : > { %v11096_v27 = vpop.eup %11095  ;;  %v3749_v7 = vsel %vm3721_vm2, %v11094_v31, 0.0 }
0x1384   : > { %3750 = vadd.xlane.f32.xlu1 %v3749_v7  ;;  %v3746_v18 = vsel %vm3721_vm2, %v11096_v27, 0.0 }
0x1385   : > { %3747 = vadd.xlane.f32.xlu0 %v3746_v18 }
0x1388   : > { %v11098_v40 = vpop.eup %11097 }
0x1389   : > { %v11100_v57 = vpop.eup %11099  ;;  %v3755_v46 = vsel %vm3721_vm2, %v11098_v40, 0.0 }
0x138a   : > { %3756 = vadd.xlane.f32.xlu1 %v3755_v46  ;;  %v3752_v50 = vsel %vm3721_vm2, %v11100_v57, 0.0 }
0x138b   : > { %3753 = vadd.xlane.f32.xlu0 %v3752_v50 }
0x1411   : > { %v3751_v26 = vpop.xlane.xlu1 %3750 }
0x1412   : > { %11101 = vrcp.f32 %v3751_v26  ;;  %v3748_v20 = vpop.xlane.xlu0 %3747 }
0x1413   : > { %11103 = vrcp.f32 %v3748_v20 }
0x1417   : > { %v3757_v52 = vpop.xlane.xlu1 %3756 }
0x1418   : > { %11105 = vrcp.f32 %v3757_v52  ;;  %v3754_v3 = vpop.xlane.xlu0 %3753  ;;  %v11417_v52 = vmov 1  }
0x1419   : > { %11107 = vrcp.f32 %v3754_v3  ;;  %10533 = vset.pattern.permute.xlu1 %v11417_v52  ;;  %10532 = vset.pattern.permute.xlu0 %v11417_v52 }
0x141c   : > { %v11102_v45 = vpop.eup %11101 }
0x141d   : > { %v11104_v17 = vpop.eup %11103  ;;  %v13366_v9 = vmul.f32 %v11102_v45, %v11094_v31 }
0x141e   : > { %v13368_v38 = vmul.f32 %v11104_v17, %v11096_v27 }
0x141f   : > { %15561 = vst [vmem:[#allocation128_spill] sm:$0xff] %v13366_v9  ;;  %3796 = vrot.lane.b32.xlu1 %v13366_v9, %s11414_s20 }
0x1420   : > { %3794 = vrot.lane.b32.xlu0 %v13368_v38, %s11414_s20 }
0x1422   : > { %v11106_v48 = vpop.eup %11105 }
0x1423   : > { %v11108_v63 = vpop.eup %11107  ;;  %3838 = vrot.lane.b32.xlu1 %v13368_v38, %s11415_s8  ;;  %v13376_v18 = vmul.f32 %v11106_v48, %v11098_v40  ;;  %v15562_v40 = vmov 0.0  }
0x1424   : > { %3840 = vrot.lane.b32.xlu0 %v13366_v9, %s11415_s8  ;;  %v13374_v7 = vmul.f32 %v11108_v63, %v11100_v57 }
0x1427   : > { %3798 = vrot.lane.b32.xlu1 %v13374_v7, %s11414_s20 }
0x1428   : > { %3800 = vrot.lane.b32.xlu0 %v13376_v18, %s11414_s20  ;;  %s658_s20 = sand.u32 1, %s15697_s21  }
0x1429   : > { %s9059_s22 = sshll.u32 %s658_s20, 5  ;;  %s15333_s28 = scalar_lea.sflag [#allocation4], %s658_s20 }
0x142a   : > { %s660_s24 = scalar_lea.vmem [#allocation11], %s9059_s22 }
0x142b   : > { %3842 = vrot.lane.b32.xlu1 %v13374_v7, %s11415_s8  ;;  %s8900_s19 = sshll.u32 %s660_s24, 4  ;;  %s15322_s19 = int_to_ptr.vmem [resolvable:$true] %s8900_s19 }
0x142c   : > { %3844 = vrot.lane.b32.xlu0 %v13376_v18, %s11415_s8  ;;  %p11332_p9 = scmp.lt.s32.totalorder %s15322_s19, %s11330_s26 }
0x142f   : > { %3770 = vrot.lane.b32.xlu1 %v13368_v38, %s11416_s2 }
0x1430   : > { %3772 = vrot.lane.b32.xlu0 %v13366_v9, %s11416_s2 }
0x1491   : > { %v3797_v31 = vpop.permute.xlu1 %3796 }
0x1492   : > { %vm3807_vm3 = vcmp.gt.f32.partialorder %v13366_v9, %v3797_v31  ;;  %v3795_v27 = vpop.permute.xlu0 %3794 }
0x1493   : > { %v9232_v57 = vsel %vm3807_vm3, 1.0, %v15562_v40  ;;  %vm3806_vm4 = vcmp.gt.f32.partialorder %v13368_v38, %v3795_v27 }
0x1494   : > { %v9231_v46 = vsel %vm3806_vm4, 1.0, %v15562_v40 }
0x1495   : > { %v13390_v50 = vpack.i.bf16 %v9232_v57, %v9231_v46  ;;  %v3839_v26 = vpop.permute.xlu1 %3838 }
0x1496   : > { %vm3850_vm5 = vcmp.gt.f32.partialorder %v13368_v38, %v3839_v26  ;;  %v3841_v20 = vpop.permute.xlu0 %3840 }
0x1497   : > { %v9235_v3 = vsel %vm3850_vm5, 1.0, %v15562_v40  ;;  %vm3851_vm6 = vcmp.gt.f32.partialorder %v13366_v9, %v3841_v20  ;;  %10508 = vrot.lane.b32.xlu1 %v13390_v50, %s11418_s15 }
0x1498   : > { %v9236_v45 = vsel %vm3851_vm6, 1.0, %v15562_v40 }
0x1499   : > { %v10512_v17 = vpack.i.bf16 %v9236_v45, %v9235_v3  ;;  %v3799_v48 = vpop.permute.xlu1 %3798 }
0x149a   : > { %vm3808_vm7 = vcmp.gt.f32.partialorder %v13374_v7, %v3799_v48  ;;  %v3801_v63 = vpop.permute.xlu0 %3800 }
0x149b   : > { %v9233_v31 = vsel %vm3808_vm7, 1.0, %v15562_v40  ;;  %vm3809_vm8 = vcmp.gt.f32.partialorder %v13376_v18, %v3801_v63  ;;  %3774 = vrot.lane.b32.xlu1 %v13374_v7, %s11416_s2  ;;  %10513 = vrot.lane.b32.xlu0 %v10512_v17, %s11419_s1 }
0x149c   : > { %v9234_v27 = vsel %vm3809_vm8, 1.0, %v15562_v40 }
0x149d   : > { %v13405_v57 = vpack.i.bf16 %v9234_v27, %v9233_v31  ;;  %v3843_v46 = vpop.permute.xlu1 %3842  ;;  %v10685_v27 = vld [vmem:[%s15390_s16 + $0x40] sm:$0xff]  }
0x149e   : > { %vm3852_vm9 = vcmp.gt.f32.partialorder %v13374_v7, %v3843_v46  ;;  %v3845_v26 = vpop.permute.xlu0 %3844  ;;  %v10686_v46 = vld [vmem:[%s15390_s16 + $0xc0] sm:$0xff]   ;;  %9814 = vmatprep.subr.bf16.mxu1 %v10685_v27  ;;  %v10694_v27 = vld [vmem:[%s15390_s16 + $0xd0] sm:$0xff]  }
0x149f   : > { %v9237_v20 = vsel %vm3852_vm9, 1.0, %v15562_v40  ;;  %vm3853_vm10 = vcmp.gt.f32.partialorder %v13376_v18, %v3845_v26  ;;  %3776 = vrot.lane.b32.xlu0 %v13376_v18, %s11416_s2  ;;  %10518 = vrot.lane.b32.xlu1 %v13405_v57, %s11418_s15  ;;  %v10687_v26 = vld [vmem:[%s15390_s16] sm:$0xff]  }
0x14a0   : > { %v9238_v52 = vsel %vm3853_vm10, 1.0, %v15562_v40  ;;  %9842 = vmatprep.subr.bf16.mxu0 %v10686_v46  ;;  %9815 = vmatpush3.bf16.msra.mxu1 %v10687_v26  ;;  %v10695_v46 = vld [vmem:[%s15390_s16 + $0x10] sm:$0xff]  }
0x14a1   : > { %v10522_v3 = vpack.i.bf16 %v9238_v52, %v9237_v20  ;;  %v13415_v45 = vpop.permute.xlu1 %3770  ;;  %v10688_v20 = vld [vmem:[%s15390_s16 + $0x80] sm:$0xff]   ;;  %v10689_v52 = vld [vmem:[%s15390_s16 + $0x48] sm:$0xff]   ;;  %v10696_v26 = vld [vmem:[%s15390_s16 + $0x90] sm:$0xff]  }
0x14a2   : > { %vm3782_vm11 = vcmp.gt.f32.partialorder %v13368_v38, %v13415_v45  ;;  %v13419_v17 = vpop.permute.xlu0 %3772  ;;  %9843 = vmatpush3.bf16.msra.mxu0 %v10688_v20  ;;  %9816 = vmatprep.subr.bf16.mxu1 %v10689_v52  ;;  %v10697_v20 = vld [vmem:[%s15390_s16 + $0x58] sm:$0xff]  }
0x14a3   : > { %v13422_v48 = vsel %vm3782_vm11, 1.0, %v15562_v40  ;;  %vm3783_vm12 = vcmp.gt.f32.partialorder %v13366_v9, %v13419_v17  ;;  %3890 = vrot.lane.b32.xlu1 %v13368_v38, %s11418_s15  ;;  %10523 = vrot.lane.b32.xlu0 %v10522_v3, %s11419_s1  ;;  %v10690_v3 = vld [vmem:[%s15390_s16 + $0xc8] sm:$0xff]   ;;  %v10698_v52 = vld [vmem:[%s15390_s16 + $0xd8] sm:$0xff]  }
0x14a4   : > { %v13430_v63 = vsel %vm3783_vm12, 1.0, %v15562_v40  ;;  %9844 = vmatprep.subr.bf16.mxu0 %v10690_v3  ;;  %9817 = vmatpush3.bf16.msra.mxu1 %v10691_v2  ;;  %v10700_v2 = vld [vmem:[%s15390_s16 + $0x98] sm:$0xff]   ;;  %v10702_v3 = vld [vmem:[%s15390_s16 + $0xe0] sm:$0xff]  }
0x14a5   : > { %v13434_v31 = vpack.i.bf16 %v13430_v63, %v13422_v48  ;;  %9818 = vmatprep.subr.bf16.mxu1 %v10693_v10  ;;  %v10701_v10 = vld [vmem:[%s15390_s16 + $0x60] sm:$0xff]  }
0x14a6   : > { %9845 = vmatpush3.bf16.msra.mxu0 %v10692_v62  ;;  %v10699_v62 = vld [vmem:[%s15390_s16 + $0x18] sm:$0xff]  }
0x14a7   : > { %15563 = vst [vmem:[#allocation129_spill] sm:$0xff] %v13434_v31  ;;  %3892 = vrot.lane.b32.xlu0 %v13366_v9, %s11418_s15  ;;  %10528 = vrot.lane.b32.xlu1 %v13434_v31, %s11419_s1 }
0x14a8   : > { %9846 = vmatprep.subr.bf16.mxu0 %v10694_v27  ;;  %9819 = vmatpush3.bf16.msra.mxu1 %v10695_v46  ;;  %v10703_v27 = vld [vmem:[%s15390_s16 + $0x20] sm:$0xff]  }
0x14a9   : > { %9820 = vmatprep.subr.bf16.mxu1 %v10697_v20  ;;  %v10704_v46 = vld [vmem:[%s15390_s16 + $0xa0] sm:$0xff]   ;;  %v10706_v20 = vld [vmem:[%s15390_s16 + $0xe8] sm:$0xff]  }
0x14aa   : > { %9847 = vmatpush3.bf16.msra.mxu0 %v10696_v26  ;;  %v10705_v26 = vld [vmem:[%s15390_s16 + $0x68] sm:$0xff]  }
0x14ab   : > { %9848 = vmatprep.subr.bf16.mxu0 %v10698_v52  ;;  %v10707_v52 = vld [vmem:[%s15390_s16 + $0x28] sm:$0xff]  }
0x14ac   : > { %9821 = vmatpush3.bf16.msra.mxu1 %v10699_v62  ;;  %v10708_v62 = vld [vmem:[%s15390_s16 + $0xa8] sm:$0xff]  }
0x14ad   : > { %9822 = vmatprep.subr.bf16.mxu1 %v10701_v10  ;;  %v10710_v10 = vld [vmem:[%s15390_s16 + $0xf0] sm:$0xff]  }
0x14ae   : > { %9849 = vmatpush3.bf16.msra.mxu0 %v10700_v2  ;;  %v10709_v2 = vld [vmem:[%s15390_s16 + $0x70] sm:$0xff]  }
0x14af   : > { %9850 = vmatprep.subr.bf16.mxu0 %v10702_v3  ;;  %v10711_v3 = vld [vmem:[%s15390_s16 + $0x30] sm:$0xff]  }
0x14b0   : > { %9823 = vmatpush3.bf16.msra.mxu1 %v10703_v27  ;;  %v10712_v27 = vld [vmem:[%s15390_s16 + $0xb0] sm:$0xff]  }
0x14b1   : > { %9824 = vmatprep.subr.bf16.mxu1 %v10705_v26 }
0x14b2   : > { %9851 = vmatpush3.bf16.msra.mxu0 %v10704_v46 }
0x14b3   : > { %9852 = vmatprep.subr.bf16.mxu0 %v10706_v20 }
0x14b4   : > { %9825 = vmatpush3.bf16.msra.mxu1 %v10707_v52 }
0x14b5   : > { %9826 = vmatprep.subr.bf16.mxu1 %v10709_v2 }
0x14b6   : > { %9853 = vmatpush3.bf16.msra.mxu0 %v10708_v62 }
0x14b7   : > { %9854 = vmatprep.subr.bf16.mxu0 %v10710_v10 }
0x14b8   : > { %9827 = vmatpush3.bf16.msra.mxu1 %v10711_v3 }
0x14ba   : > { %9855 = vmatpush3.bf16.msra.mxu0 %v10712_v27 }
0x1509   : > { %v10509_v46 = vpop.permute.xlu1 %10508 }
0x150a   : > { %v11153_v16 = vadd.low.f32.bf16 %v13422_v48, %v10509_v46  ;;  %v11154_v52 = vadd.high.f32.bf16 %v13430_v63, %v10509_v46  ;;  %v10713_v48 = vld [vmem:[%s15390_s16 + $0x78] sm:$0xff]  }
0x150b   : > { %v10715_v63 = vld [vmem:[%s15390_s16 + $0x38] sm:$0xff]   ;;  %9828 = vmatprep.subr.bf16.mxu1 %v10713_v48 }
0x150c   : > { %9829 = vmatpush3.bf16.msra.mxu1 %v10715_v63 }
0x150d   : > { %v3775_v26 = vpop.permute.xlu1 %3774  ;;  %v10514_v20 = vpop.permute.xlu0 %10513 }
0x150e   : > { %v11155_v62 = vadd.high.f32.bf16 %v11154_v52, %v10514_v20  ;;  %v11156_v0 = vadd.low.f32.bf16 %v11153_v16, %v10514_v20  ;;  %vm3784_vm13 = vcmp.gt.f32.partialorder %v13374_v7, %v3775_v26  ;;  %v10714_v16 = vld [vmem:[%s15390_s16 + $0xf8] sm:$0xff]  }
0x150f   : > { %9856 = vmatprep.subr.bf16.mxu0 %v10714_v16 }
0x1510   : > { %vm3883_vm14 = vcmp.lt.f32.partialorder %v11155_v62, 2.0  ;;  %vm3882_vm15 = vcmp.lt.f32.partialorder %v11156_v0, 2.0  ;;  %v9229_v0 = vsel %vm3784_vm13, 1.0, %v15562_v40 }
0x1511   : > { %v10519_v54 = vpop.permute.xlu1 %10518  ;;  %v3777_v31 = vpop.permute.xlu0 %3776  ;;  %v3887_v2 = vsel %vm3883_vm14, %v13419_v17, 0.0  ;;  %v3886_v10 = vsel %vm3882_vm15, %v13415_v45, 0.0  ;;  %v10716_v45 = vld [vmem:[%s15390_s16 + $0xb8] sm:$0xff]  }
0x1512   : > { %vm3785_vm1 = vcmp.gt.f32.partialorder %v13376_v18, %v3777_v31  ;;  %5637 = vperm.xlu1 %10533, %v3887_v2   ;;  %5632 = vperm.xlu0 %10532, %v3886_v10   ;;  %v11157_v46 = vadd.low.f32.bf16 %v9229_v0, %v10519_v54  ;;  %v10718_v10 = vld [vmem:[%s15390_s16 + $0x1c0] sm:$0xff]  }
0x1513   : > { %v9230_v3 = vsel %vm3785_vm1, 1.0, %v15562_v40  ;;  %9857 = vmatpush3.bf16.msra.mxu0 %v10716_v45 }
0x1514   : > { %v13544_v17 = vpack.i.bf16 %v9230_v3, %v9229_v0  ;;  %v11158_v20 = vadd.high.f32.bf16 %v9230_v3, %v10519_v54  ;;  %v10717_v54 = vld [vmem:[%s15390_s16 + $0x140] sm:$0xff]   ;;  %9898 = vmatprep.subr.bf16.mxu0 %v10718_v10 }
0x1515   : > { %v10524_v27 = vpop.permute.xlu0 %10523  ;;  %v13546_v52 = vpop.permute.xlu1 %3890  ;;  %9870 = vmatprep.subr.bf16.mxu1 %v10717_v54 }
0x1516   : > { %v11159_v62 = vadd.high.f32.bf16 %v11158_v20, %v10524_v27  ;;  %v11160_v13 = vadd.low.f32.bf16 %v11157_v46, %v10524_v27  ;;  %10535 = vrot.lane.b32.xlu1 %v13390_v50, %s11420_s27  ;;  %3894 = vrot.lane.b32.xlu0 %v13374_v7, %s11418_s15  ;;  %vm3902_vm2 = vcmp.ge.f32.partialorder %v13368_v38, %v13546_v52 }
0x1517   : > { %v13565_v50 = vsel %vm3902_vm2, 1.0, %v15562_v40 }
0x1518   : > { %vm3885_vm4 = vcmp.lt.f32.partialorder %v11159_v62, 2.0  ;;  %vm3884_vm5 = vcmp.lt.f32.partialorder %v11160_v13, 2.0  ;;  %v15565_v13 = vmov 0  }
0x1519   : > { %v13554_v2 = vpop.permute.xlu0 %3892  ;;  %v3888_v63 = vsel %vm3884_vm5, %v3775_v26, 0.0  ;;  %v3889_v0 = vsel %vm3885_vm4, %v3777_v31, 0.0  ;;  %v4160_v31 = vld [vmem:[%s15566_s29] sm:$0xff] }
0x151a   : > { %vm3903_vm3 = vcmp.ge.f32.partialorder %v13366_v9, %v13554_v2  ;;  %3896 = vrot.lane.b32.xlu1 %v13376_v18, %s11418_s15  ;;  %10540 = vrot.lane.b32.xlu0 %v13544_v17, %s11419_s1  ;;  %v4171_v26 = vrot.slane %v4160_v31, %v11724_v24  ;;  %v4179_v3 = vrot.slane %v4160_v31, %v12136_v30 }
0x151b   : > { %v13568_v48 = vsel %vm3903_vm3, 1.0, %v15562_v40  ;;  %v4183_v45 = vrot.slane %v4160_v31, %v12207_v14  ;;  %v4187_v10 = vrot.slane %v4160_v31, %v12218_v41 }
0x151c   : > { %v13576_v16 = vpack.i.bf16 %v13568_v48, %v13565_v50  ;;  %v13596_v27 = vadd.f32 %v13090_v55, %v4171_v26  ;;  %v13600_v20 = vadd.f32 %v13096_v35, %v4171_v26  ;;  %v4742_v54 = vadd.f32 %v13108_v29, %v4179_v3 }
0x151d   : > { %v13611_v55 = vrot.slane %v4160_v31, %v12277_v4  ;;  %v4746_v41 = vadd.f32 %v13118_v43, %v4179_v3  ;;  %v4748_v4 = vadd.f32 %v13122_v19, %v4183_v45  ;;  %v13637_v43 = vadd.f32 %v13128_v51, %v4187_v10 }
0x151e   : > { %15564 = vst [vmem:[#allocation130_spill] sm:$0xff] %v13576_v16  ;;  %5642 = vperm.xlu1 %10533, %v3888_v63   ;;  %5647 = vperm.xlu0 %10532, %v3889_v0   ;;  %v13606_v63 = vadd.f32 %v13110_v47, %v4171_v26  ;;  %v4744_v0 = vadd.f32 %v13114_v15, %v4183_v45  ;;  %v5534_v29 = vmax.f32 %v13600_v20, 0.0 }
0x151f   : > { %v13623_v15 = vadd.f32 %v13120_v34, %v4171_v26  ;;  %v13634_v20 = vadd.f32 %v13130_v56, %v4183_v45  ;;  %v13641_v26 = vadd.f32 %v13134_v37, %v4179_v3  ;;  %v13651_v51 = vadd.f32 %v13142_v11, %v13611_v55 }
0x1520   : > { %v13663_v11 = vadd.f32 %v13138_v39, %v4183_v45 }
0x1521   : > { %v5508_v37 = vmax.f32 %v13651_v51, 0.0 }
0x1522   : > { %10545 = vrot.lane.b32.xlu1 %v13405_v57, %s11420_s27  ;;  %3958 = vrot.lane.b32.xlu0 %v13368_v38, %s11419_s1  ;;  %v4175_v57 = vrot.slane %v4160_v31, %v11752_v53 }
0x1523   : > { %10554 = vset.pattern.permute.xlu1 %v15565_v13  ;;  %10555 = vset.pattern.permute.xlu0 %v15565_v13  ;;  %v4191_v13 = vrot.slane %v4160_v31, %v12280_v22  ;;  %v5504_v22 = vmax.f32 %v4742_v54, 0.0  ;;  %v5537_v54 = vmax.f32 %v4748_v4, 0.0 }
0x1524   : > { %v4691_v46 = vadd.f32 %v13092_v8, %v4175_v57  ;;  %v4695_v62 = vadd.f32 %v13100_v60, %v4175_v57  ;;  %v5502_v8 = vmax.f32 %v13596_v27, 0.0  ;;  %v13618_v60 = vrot.slane %v4160_v31, %v12283_v25 }
0x1525   : > { %v13627_v27 = vadd.f32 %v13124_v32, %v4175_v57  ;;  %v4797_v19 = vadd.f32 %v13132_v23, %v4191_v13  ;;  %v4799_v32 = vadd.f32 %v13136_v5, %v4187_v10  ;;  %v4801_v56 = vadd.f32 %v13140_v1, %v4191_v13 }
0x1526   : > { %3960 = vrot.lane.b32.xlu1 %v13366_v9, %s11419_s1  ;;  %10550 = vrot.lane.b32.xlu0 %v13576_v16, %s11418_s15  ;;  %v5503_v35 = vmax.f32 %v4691_v46, 0.0  ;;  %v13615_v16 = vadd.f32 %v13116_v28, %v4175_v57  ;;  %v5535_v47 = vmax.f32 %v4695_v62, 0.0  ;;  %v13630_v28 = vadd.f32 %v13126_v44, %v4179_v3  ;;  %v13645_v44 = vpop.permute.xlu1 %10528 }
0x1527   : > { %v5505_v46 = vmax.f32 %v4744_v0, 0.0  ;;  %v5536_v57 = vmax.f32 %v4746_v41, 0.0  ;;  %v4850_v23 = vadd.f32 %v13146_v36, %v13618_v60  ;;  %v5569_v5 = vmax.f32 %v13634_v20, 0.0 }
0x1528   : > { %v5567_v34 = vmax.f32 %v13615_v16, 0.0  ;;  %v5506_v41 = vmax.f32 %v13637_v43, 0.0  ;;  %v4854_v3 = vadd.f32 %v13154_v12, %v13618_v60  ;;  %v5507_v62 = vmax.f32 %v4797_v19, 0.0  ;;  %v10730_v16 = vld [vmem:[%s15390_s16 + $0x1d8] sm:$0xff]  }
0x1529   : > { %v5538_v4 = vmax.f32 %v4799_v32, 0.0  ;;  %v5539_v31 = vmax.f32 %v4801_v56, 0.0  ;;  %v13667_v0 = vadd.f32 %v13144_v42, %v4187_v10  ;;  %v13670_v36 = vadd.f32 %v13148_v33, %v4191_v13 }
0x152a   : > { %v5509_v43 = vmax.f32 %v4850_v23, 0.0  ;;  %v4852_v12 = vadd.f32 %v13150_v21, %v13611_v55  ;;  %v13675_v1 = vadd.f32 %v13152_v49, %v4187_v10  ;;  %v13678_v39 = vadd.f32 %v13156_v61, %v4191_v13 }
0x152b   : > { %v5541_v45 = vmax.f32 %v4854_v3, 0.0  ;;  %v13682_v19 = vadd.f32 %v13162_v59, %v13618_v60  ;;  %v11161_v42 = vadd.low.f32.bf16 %v13565_v50, %v13645_v44  ;;  %v10721_v3 = vld [vmem:[%s15390_s16 + $0x148] sm:$0xff]  }
0x1591   : > { %v13686_v33 = vpop.permute.xlu1 %5637  ;;  %v13688_v32 = vpop.permute.xlu0 %5632 }
0x1592   : > { %v5651_v21 = vmul.f32 %v13688_v32, %v5503_v35  ;;  %v5659_v49 = vmul.f32 %v13686_v33, %v5535_v47  ;;  %v5653_v10 = vmul.f32 %v13688_v32, %v5505_v46  ;;  %v5661_v61 = vmul.f32 %v13686_v33, %v5537_v54  ;;  %v10719_v35 = vld [vmem:[%s15390_s16 + $0x100] sm:$0xff]  }
0x1593   : > { %v5650_v13 = vmul.f32 %v13688_v32, %v5502_v8  ;;  %v5658_v59 = vmul.f32 %v13686_v33, %v5534_v29  ;;  %v5652_v56 = vmul.f32 %v13688_v32, %v5504_v22  ;;  %v5660_v50 = vmul.f32 %v13686_v33, %v5536_v57  ;;  %v10720_v47 = vld [vmem:[%s15390_s16 + $0x180] sm:$0xff]  }
0x1594   : > { %v5839_v51 = vpack.c.bf16 %v5659_v49, %v5651_v21  ;;  %v5841_v23 = vpack.c.bf16 %v5661_v61, %v5653_v10  ;;  %v13705_v46 = vmul.f32 %v13688_v32, %v5507_v62  ;;  %v13708_v8 = vmul.f32 %v13686_v33, %v5539_v31  ;;  %v10722_v21 = vld [vmem:[%s15390_s16 + $0x1c8] sm:$0xff]  }
0x1595   : > { %v10536_v29 = vpop.permute.xlu1 %10535  ;;  %v13710_v22 = vpop.permute.xlu0 %3894  ;;  %v5838_v57 = vpack.c.bf16 %v5658_v59, %v5650_v13  ;;  %v5840_v54 = vpack.c.bf16 %v5660_v50, %v5652_v56  ;;  %v13719_v49 = vmul.f32 %v13688_v32, %v5509_v43  ;;  %v13722_v62 = vmul.f32 %v13686_v33, %v5541_v45 }
0x1596   : > { %v11162_v31 = vadd.high.f32.bf16 %v13568_v48, %v13645_v44  ;;  %7990 = vmatprep.mubr.bf16.mxu1 %v5839_v51  ;;  %8039 = vmatprep.mubr.bf16.mxu0 %v5841_v23  ;;  %v5843_v10 = vpack.c.bf16 %v13708_v8, %v13705_v46  ;;  %v5540_v61 = vmax.f32 %v4852_v12, 0.0  ;;  %v13731_v43 = vmul.f32 %v13688_v32, %v5506_v41  ;;  %v10723_v12 = vld [vmem:[%s15390_s16 + $0x108] sm:$0xff]  }
0x1597   : > { %7991 = vmatmul.mubr.bf16.vlgmr.msra.gmra.mrb[144].mxu1 %v5838_v57  ;;  %8040 = vmatmul.mubr.bf16.vlgmr.msra.gmra.mrb[140].mxu0 %v5840_v54  ;;  %v5845_v13 = vpack.c.bf16 %v13722_v62, %v13719_v49  ;;  %v13734_v45 = vmul.f32 %v13686_v33, %v5538_v4  ;;  %v5601_v59 = vmax.f32 %v13663_v11, 0.0  ;;  %v11164_v44 = vadd.low.f32.bf16 %v11161_v42, %v10536_v29  ;;  %v10724_v41 = vld [vmem:[%s15390_s16 + $0x188] sm:$0xff]  }
0x1598   : > { %v11163_v48 = vadd.high.f32.bf16 %v11162_v31, %v10536_v29  ;;  %vm3904_vm6 = vcmp.ge.f32.partialorder %v13374_v7, %v13710_v22  ;;  %9871 = vmatpush3.bf16.msra.mxu1 %v10719_v35  ;;  %9899 = vmatpush3.bf16.msra.mxu0 %v10720_v47  ;;  %v5570_v4 = vmax.f32 %v13667_v0, 0.0  ;;  %v13753_v50 = vmul.f32 %v13688_v32, %v5508_v37  ;;  %v10725_v35 = vld [vmem:[%s15390_s16 + $0x150] sm:$0xff]   ;;  %v10739_v49 = vld [vmem:[%s15390_s16 + $0x128] sm:$0xff]  }
0x1599   : > { %v13746_v56 = vpop.permute.xlu1 %3896  ;;  %v13748_v11 = vpop.permute.xlu0 %10540  ;;  %9872 = vmatprep.subr.bf16.mxu1 %v10721_v3  ;;  %9900 = vmatprep.subr.bf16.mxu0 %v10722_v21  ;;  %v5842_v42 = vpack.c.bf16 %v13734_v45, %v13731_v43  ;;  %v13756_v51 = vmul.f32 %v13686_v33, %v5540_v61  ;;  %v5571_v23 = vmax.f32 %v13670_v36, 0.0  ;;  %vm3950_vm8 = vcmp.lt.f32.partialorder %v11164_v44, 2.0  ;;  %v10726_v47 = vld [vmem:[%s15390_s16 + $0x1d0] sm:$0xff]   ;;  %v10756_v43 = vld [vmem:[%s15390_s16 + $0x288] sm:$0xff]  }
0x159a   : > { %vm3951_vm7 = vcmp.lt.f32.partialorder %v11163_v48, 2.0  ;;  %vm3905_vm9 = vcmp.ge.f32.partialorder %v13376_v18, %v13746_v56  ;;  %v9241_v37 = vsel %vm3904_vm6, 1.0, %v15562_v40  ;;  %v3954_v29 = vsel %vm3950_vm8, %v13546_v52, 0.0  ;;  %v10727_v52 = vld [vmem:[%s15390_s16 + $0x110] sm:$0xff]  }
0x159b   : > { %v13772_v36 = vsel %vm3905_vm9, 1.0, %v15562_v40  ;;  %v3955_v57 = vsel %vm3951_vm7, %v13554_v2, 0.0  ;;  %v5603_v54 = vmax.f32 %v13678_v39, 0.0  ;;  %v13779_v3 = vadd.f32 %v13158_v6, %v13611_v55  ;;  %v10728_v2 = vld [vmem:[%s15390_s16 + $0x190] sm:$0xff]   ;;  %5684 = vperm.xlu1 %10554, %v3954_v29  }
0x159c   : > { %v13783_v21 = vadd.f32 %v13166_v58, %v13611_v55  ;;  %v13786_v31 = vpack.i.bf16 %v13772_v36, %v9241_v37  ;;  %9873 = vmatpush3.bf16.msra.mxu1 %v10723_v12  ;;  %9901 = vmatpush3.bf16.msra.mxu0 %v10724_v41  ;;  %v5573_v6 = vmax.f32 %v13682_v19, 0.0  ;;  %v15567_v39 = vld [vmem:[#allocation34_spill] sm:$0xff]  ;;  %v5844_v48 = vpack.c.bf16 %v13756_v51, %v13753_v50  ;;  %v10729_v41 = vld [vmem:[%s15390_s16 + $0x158] sm:$0xff]  }
0x159d   : > { %v4864_v61 = vadd.f32 %v15567_v39, %v13618_v60  ;;  %5689 = vperm.xlu0 %10555, %v3955_v57   ;;  %v13797_v58 = vpop.permute.xlu1 %5642  ;;  %v13799_v55 = vpop.permute.xlu0 %5647  ;;  %9874 = vmatprep.subr.bf16.mxu1 %v10725_v35  ;;  %v15568_v19 = vmax.f32 %v13627_v27, 0.0  ;;  %v15570_v35 = vmax.f32 %v13623_v15, 0.0  ;;  %v10757_v45 = vld [vmem:[%s15390_s16 + $0x250] sm:$0xff]  }
0x159e   : > { %9902 = vmatprep.subr.bf16.mxu0 %v10726_v47  ;;  %v5667_v44 = vmul.f32 %v13797_v58, %v5567_v34  ;;  %v5669_v60 = vmul.f32 %v13797_v58, %v5569_v5  ;;  %v5677_v29 = vmul.f32 %v13799_v55, %v5601_v59  ;;  %v15569_v34 = vmax.f32 %v13606_v63, 0.0  ;;  %v10759_v50 = vld [vmem:[%s15390_s16 + $0x210] sm:$0xff]  }
0x159f   : > { %v5675_v12 = vmul.f32 %v13799_v55, %v15568_v19  ;;  %v5674_v20 = vmul.f32 %v13799_v55, %v15570_v35  ;;  %v15571_v5 = vmax.f32 %v13630_v28, 0.0  ;;  %v15572_v59 = vmax.f32 %v13641_v26, 0.0  ;;  %v10732_v26 = vld [vmem:[%s15390_s16 + $0x198] sm:$0xff]   ;;  %v10760_v51 = vld [vmem:[%s15390_s16 + $0x290] sm:$0xff]  }
0x15a0   : > { %v5666_v27 = vmul.f32 %v13797_v58, %v15569_v34  ;;  %9875 = vmatpush3.bf16.msra.mxu1 %v10727_v52  ;;  %9903 = vmatpush3.bf16.msra.mxu0 %v10728_v2  ;;  %v13832_v19 = vmul.f32 %v13797_v58, %v5571_v23  ;;  %v5605_v63 = vmax.f32 %v4864_v61, 0.0  ;;  %v15573_v34 = vld [vmem:[#allocation129_spill] sm:$0xff]  ;;  %v5873_v28 = vpack.c.bf16 %v5677_v29, %v5669_v60  ;;  %v10731_v52 = vld [vmem:[%s15390_s16 + $0x118] sm:$0xff]  }
0x15a1   : > { %v5668_v47 = vmul.f32 %v13797_v58, %v15571_v5  ;;  %v5871_v57 = vpack.c.bf16 %v5675_v12, %v5667_v44  ;;  %v5676_v39 = vmul.f32 %v13799_v55, %v15572_v59  ;;  %10557 = vrot.lane.b32.xlu1 %v15573_v34, %s11420_s27  ;;  %3964 = vrot.lane.b32.xlu0 %v13376_v18, %s11419_s1  ;;  %v10546_v15 = vpop.permute.xlu1 %10545  ;;  %v5602_v44 = vmax.f32 %v13675_v1, 0.0  ;;  %v10733_v12 = vld [vmem:[%s15390_s16 + $0x160] sm:$0xff]   ;;  %v13926_v59 = vpop.permute.xlu0 %3958  ;;  %v10744_v34 = vld [vmem:[%s15390_s16 + $0x1b0] sm:$0xff]  }
0x15a2   : > { %v5870_v35 = vpack.c.bf16 %v5674_v20, %v5666_v27  ;;  %v13845_v23 = vmul.f32 %v13799_v55, %v5603_v54  ;;  %v11165_v2 = vadd.low.f32.bf16 %v9241_v37, %v13748_v11  ;;  %9876 = vmatprep.subr.bf16.mxu1 %v10729_v41  ;;  %8047 = vmatprep.mubr.bf16.mxu0 %v5873_v28  ;;  %v10734_v1 = vld [vmem:[%s15390_s16 + $0x1e0] sm:$0xff]   ;;  %v5604_v20 = vmax.f32 %v13783_v21, 0.0  ;;  %v10742_v21 = vld [vmem:[%s15390_s16 + $0x1f0] sm:$0xff]   ;;  %v10747_v28 = vld [vmem:[%s15390_s16 + $0x138] sm:$0xff]  }
0x15a3   : > { %7998 = vmatprep.mubr.bf16.mxu1 %v5871_v57  ;;  %v5872_v61 = vpack.c.bf16 %v5676_v39, %v5668_v47  ;;  %9904 = vmatprep.subr.bf16.mxu0 %v10730_v16  ;;  %v13855_v29 = vmul.f32 %v13797_v58, %v5573_v6  ;;  %v13858_v54 = vmul.f32 %v13799_v55, %v5605_v63  ;;  %v5572_v6 = vmax.f32 %v13779_v3, 0.0  ;;  %v10737_v3 = vld [vmem:[%s15390_s16 + $0x168] sm:$0xff]   ;;  %v10743_v63 = vld [vmem:[%s15390_s16 + $0x130] sm:$0xff]  }
0x15a4   : > { %v5875_v60 = vpack.c.bf16 %v13845_v23, %v13832_v19  ;;  %v11166_v37 = vadd.high.f32.bf16 %v13772_v36, %v13748_v11  ;;  %v11167_v41 = vadd.low.f32.bf16 %v11165_v2, %v10546_v15  ;;  %7999 = vmatmul.mubr.bf16.gmra.mrb[148].mxu1 %v5870_v35  ;;  %v13868_v16 = vmul.f32 %v13797_v58, %v5570_v4  ;;  %v10735_v11 = vld [vmem:[%s15390_s16 + $0x120] sm:$0xff]   ;;  %v10738_v47 = vld [vmem:[%s15390_s16 + $0x1e8] sm:$0xff]   ;;  %v10748_v35 = vld [vmem:[%s15390_s16 + $0x1b8] sm:$0xff]  }
0x15a5   : > { %8048 = vmatmul.mubr.bf16.gmra.mrb[144].mxu0 %v5872_v61  ;;  %9877 = vmatpush3.bf16.msra.mxu1 %v10731_v52  ;;  %v10736_v36 = vld [vmem:[%s15390_s16 + $0x1a0] sm:$0xff]   ;;  %v5877_v27 = vpack.c.bf16 %v13858_v54, %v13855_v29  ;;  %v13880_v0 = vmul.f32 %v13799_v55, %v5602_v44  ;;  %v13899_v46 = vmul.f32 %v13797_v58, %v5572_v6  ;;  %v10762_v19 = vld [vmem:[%s15390_s16 + $0x2d8] sm:$0xff]  }
0x15a6   : > { %9905 = vmatpush3.bf16.msra.mxu0 %v10732_v26  ;;  %v11168_v4 = vadd.high.f32.bf16 %v11166_v37, %v10546_v15  ;;  %vm3952_vm10 = vcmp.lt.f32.partialorder %v11167_v41, 2.0  ;;  %3962 = vrot.lane.b32.xlu1 %v13374_v7, %s11419_s1  ;;  %v13910_v62 = vmul.f32 %v13799_v55, %v5604_v20  ;;  %vm3970_vm13 = vcmp.ge.f32.partialorder %v13368_v38, %v13926_v59  ;;  %v10749_v52 = vld [vmem:[%s15390_s16 + $0x240] sm:$0xff]   ;;  %v10753_v37 = vld [vmem:[%s15390_s16 + $0x248] sm:$0xff]   ;;  %v10763_v23 = vld [vmem:[%s15390_s16 + $0x218] sm:$0xff]  }
0x15a7   : > { %8088 = vmatprep.mubr.bf16.mxu1 %v5843_v10  ;;  %8137 = vmatprep.mubr.bf16.mxu0 %v5845_v13  ;;  %v3956_v5 = vsel %vm3952_vm10, %v13710_v22, 0.0  ;;  %v5874_v8 = vpack.c.bf16 %v13880_v0, %v13868_v16  ;;  %v10740_v22 = vld [vmem:[%s15390_s16 + $0x1a8] sm:$0xff]   ;;  %v10741_v10 = vld [vmem:[%s15390_s16 + $0x170] sm:$0xff]   ;;  %v13917_v13 = vpop.permute.xlu1 %3960  ;;  %v13962_v26 = vsel %vm3970_vm13, 1.0, %v15562_v40  ;;  %v10750_v2 = vld [vmem:[%s15390_s16 + $0x2c0] sm:$0xff]  }
0x15a8   : > { %9878 = vmatprep.subr.bf16.mxu1 %v10733_v12  ;;  %9906 = vmatprep.subr.bf16.mxu0 %v10734_v1  ;;  %vm3953_vm11 = vcmp.lt.f32.partialorder %v11168_v4, 2.0  ;;  %v5876_v57 = vpack.c.bf16 %v13910_v62, %v13899_v46  ;;  %vm3971_vm12 = vcmp.ge.f32.partialorder %v13366_v9, %v13917_v13  ;;  %v10751_v44 = vld [vmem:[%s15390_s16 + $0x200] sm:$0xff]   ;;  %v10754_v41 = vld [vmem:[%s15390_s16 + $0x2c8] sm:$0xff]   ;;  %v10773_v4 = vld [vmem:[%s15390_s16 + $0x270] sm:$0xff]  }
0x15a9   : > { %5694 = vperm.xlu0 %10555, %v3956_v5   ;;  %9879 = vmatpush3.bf16.msra.mxu1 %v10735_v11  ;;  %v3957_v39 = vsel %vm3953_vm11, %v13746_v56, 0.0  ;;  %v10746_v56 = vld [vmem:[%s15390_s16 + $0x1f8] sm:$0xff]   ;;  %v13948_v15 = vsel %vm3971_vm12, 1.0, %v15562_v40  ;;  %v10752_v12 = vld [vmem:[%s15390_s16 + $0x280] sm:$0xff]   ;;  %v10755_v1 = vld [vmem:[%s15390_s16 + $0x208] sm:$0xff]  }
0x15aa   : > { %9907 = vmatpush3.bf16.msra.mxu0 %v10736_v36  ;;  %10562 = vrot.lane.b32.xlu1 %v13786_v31, %s11418_s15  ;;  %v10571_v61 = vpack.i.bf16 %v13948_v15, %v13962_v26  ;;  %v10765_v29 = vld [vmem:[%s15390_s16 + $0x260] sm:$0xff]   ;;  %v10769_v11 = vld [vmem:[%s15390_s16 + $0x268] sm:$0xff]   ;;  %v10775_v20 = vld [vmem:[%s15390_s16 + $0x230] sm:$0xff]  }
0x15ab   : > { %9880 = vmatprep.subr.bf16.mxu1 %v10737_v3  ;;  %9908 = vmatprep.subr.bf16.mxu0 %v10738_v47  ;;  %v10766_v54 = vld [vmem:[%s15390_s16 + $0x2e0] sm:$0xff]   ;;  %v10770_v36 = vld [vmem:[%s15390_s16 + $0x2e8] sm:$0xff]   ;;  %v10774_v3 = vld [vmem:[%s15390_s16 + $0x2f0] sm:$0xff]  }
0x15ac   : > { %v10767_v16 = vld [vmem:[%s15390_s16 + $0x220] sm:$0xff]   ;;  %v10772_v0 = vld [vmem:[%s15390_s16 + $0x2a8] sm:$0xff]   ;;  %v10776_v5 = vld [vmem:[%s15390_s16 + $0x2b0] sm:$0xff]  }
0x15ad   : > { %10567 = vrot.lane.b32.xlu0 %v13544_v17, %s11420_s27  ;;  %9881 = vmatpush3.bf16.msra.mxu1 %v10739_v49  ;;  %v10745_v17 = vld [vmem:[%s15390_s16 + $0x178] sm:$0xff]   ;;  %v10768_v6 = vld [vmem:[%s15390_s16 + $0x2a0] sm:$0xff]  }
0x15ae   : > { %9909 = vmatpush3.bf16.msra.mxu0 %v10740_v22  ;;  %5699 = vperm.xlu1 %10554, %v3957_v39   ;;  %v10777_v47 = vld [vmem:[%s15390_s16 + $0x278] sm:$0xff]   ;;  %v10781_v22 = vld [vmem:[%s15390_s16 + $0x340] sm:$0xff]  }
0x15af   : > { %9882 = vmatprep.subr.bf16.mxu1 %v10741_v10  ;;  %9910 = vmatprep.subr.bf16.mxu0 %v10742_v21  ;;  %v10778_v46 = vld [vmem:[%s15390_s16 + $0x2f8] sm:$0xff]   ;;  %v10782_v62 = vld [vmem:[%s15390_s16 + $0x3c0] sm:$0xff]   ;;  %v4161_v10 = vld [vmem:[%s15566_s29 + $0x8] sm:$0xff] }
0x15b0   : > { %v10780_v49 = vld [vmem:[%s15390_s16 + $0x2b8] sm:$0xff]   ;;  %v4203_v21 = vrot.slane %v4161_v10, %v11724_v24  ;;  %v4211_v39 = vrot.slane %v4161_v10, %v12136_v30 }
0x15b1   : > { %4028 = vrot.lane.b32.xlu0 %v13366_v9, %s11420_s27  ;;  %9883 = vmatpush3.bf16.msra.mxu1 %v10743_v63  ;;  %v4215_v63 = vrot.slane %v4161_v10, %v12207_v14 }
0x15b2   : > { %9911 = vmatpush3.bf16.msra.mxu0 %v10744_v34  ;;  %4026 = vrot.lane.b32.xlu1 %v13368_v38, %s11420_s27  ;;  %v15574_v34 = vld [vmem:[#allocation31_spill] sm:$0xff] }
0x15b3   : > { %9884 = vmatprep.subr.bf16.mxu1 %v10745_v17  ;;  %9912 = vmatprep.subr.bf16.mxu0 %v10746_v56  ;;  %v4901_v17 = vadd.f32 %v15574_v34, %v4203_v21  ;;  %v15575_v56 = vld [vmem:[#allocation32_spill] sm:$0xff]  ;;  %v15590_v34 = vld [vmem:[#allocation49_spill] sm:$0xff] }
0x15b5   : > { %9885 = vmatpush3.bf16.msra.mxu1 %v10747_v28 }
0x15b6   : > { %9913 = vmatpush3.bf16.msra.mxu0 %v10748_v35  ;;  %10572 = vrot.lane.b32.xlu1 %v10571_v61, %s11418_s15  ;;  %v15576_v35 = vld [vmem:[#allocation33_spill] sm:$0xff] }
0x15b7   : > { %9926 = vmatprep.subr.bf16.mxu1 %v10749_v52  ;;  %9954 = vmatprep.subr.bf16.mxu0 %v10750_v2  ;;  %v4905_v52 = vadd.f32 %v15576_v35, %v4203_v21  ;;  %v15577_v2 = vld [vmem:[#allocation35_spill] sm:$0xff] }
0x15b8   : > { %8089 = vmatmul.mubr.bf16.vlgmr.msra.gmra.mrb[152].mxu1 %v5842_v42  ;;  %v10758_v42 = vld [vmem:[%s15390_s16 + $0x2d0] sm:$0xff]  }
0x15b9   : > { %8138 = vmatmul.mubr.bf16.vlgmr.msra.gmra.mrb[148].mxu0 %v5844_v48  ;;  %8096 = vmatprep.mubr.bf16.mxu1 %v5875_v60  ;;  %v10761_v48 = vld [vmem:[%s15390_s16 + $0x258] sm:$0xff]  }
0x15ba   : > { %8145 = vmatprep.mubr.bf16.mxu0 %v5877_v27  ;;  %9927 = vmatpush3.bf16.msra.mxu1 %v10751_v44  ;;  %v10764_v60 = vld [vmem:[%s15390_s16 + $0x298] sm:$0xff]   ;;  %v10771_v27 = vld [vmem:[%s15390_s16 + $0x228] sm:$0xff]   ;;  %v15578_v44 = vld [vmem:[#allocation36_spill] sm:$0xff] }
0x15bb   : > { %9955 = vmatpush3.bf16.msra.mxu0 %v10752_v12  ;;  %9928 = vmatprep.subr.bf16.mxu1 %v10753_v37  ;;  %v4954_v12 = vadd.f32 %v15578_v44, %v4211_v39  ;;  %v15579_v37 = vld [vmem:[#allocation37_spill] sm:$0xff] }
0x15bc   : > { %9956 = vmatprep.subr.bf16.mxu0 %v10754_v41  ;;  %v14094_v41 = vadd.f32 %v15579_v37, %v4203_v21 }
0x15be   : > { %9929 = vmatpush3.bf16.msra.mxu1 %v10755_v1  ;;  %v15580_v1 = vld [vmem:[#allocation24_spill] sm:$0xff] }
0x15bf   : > { %9957 = vmatpush3.bf16.msra.mxu0 %v10756_v43  ;;  %9930 = vmatprep.subr.bf16.mxu1 %v10757_v45  ;;  %v14097_v43 = vrot.slane %v4161_v10, %v15580_v1  ;;  %v15581_v45 = vld [vmem:[#allocation38_spill] sm:$0xff] }
0x15c0   : > { %9958 = vmatprep.subr.bf16.mxu0 %v10758_v42  ;;  %8097 = vmatmul.mubr.bf16.gmra.mrb[156].mxu1 %v5874_v8  ;;  %v10779_v8 = vld [vmem:[%s15390_s16 + $0x238] sm:$0xff]   ;;  %v4956_v42 = vadd.f32 %v15581_v45, %v4215_v63  ;;  %v15595_v45 = vld [vmem:[#allocation58_spill] sm:$0xff] }
0x15c1   : > { %8146 = vmatmul.mubr.bf16.gmra.mrb[152].mxu0 %v5876_v57  ;;  %v4207_v57 = vrot.slane %v4161_v10, %v11752_v53 }
0x15c2   : > { %9931 = vmatpush3.bf16.msra.mxu1 %v10759_v50  ;;  %v15582_v50 = vld [vmem:[#allocation26_spill] sm:$0xff] }
0x15c3   : > { %9959 = vmatpush3.bf16.msra.mxu0 %v10760_v51  ;;  %9932 = vmatprep.subr.bf16.mxu1 %v10761_v48  ;;  %v4903_v28 = vadd.f32 %v15575_v56, %v4207_v57  ;;  %v4907_v61 = vadd.f32 %v15577_v2, %v4207_v57  ;;  %v14101_v51 = vrot.slane %v4161_v10, %v15582_v50  ;;  %v5510_v48 = vmax.f32 %v4901_v17, 0.0 }
0x15c4   : > { %9960 = vmatprep.subr.bf16.mxu0 %v10762_v19  ;;  %v15583_v19 = vld [vmem:[#allocation39_spill] sm:$0xff]  ;;  %v5011_v17 = vadd.f32 %v15590_v34, %v14097_v43 }
0x15c6   : > { %9933 = vmatpush3.bf16.msra.mxu1 %v10763_v23  ;;  %v14104_v23 = vadd.f32 %v15583_v19, %v4207_v57 }
0x15c7   : > { %9961 = vmatpush3.bf16.msra.mxu0 %v10764_v60  ;;  %9934 = vmatprep.subr.bf16.mxu1 %v10765_v29  ;;  %v15584_v60 = vld [vmem:[#allocation25_spill] sm:$0xff] }
0x15c8   : > { %9962 = vmatprep.subr.bf16.mxu0 %v10766_v54  ;;  %v14107_v29 = vrot.slane %v4161_v10, %v15584_v60  ;;  %v14110_v54 = vrot.slane %v4161_v10, %v12283_v25 }
0x15ca   : > { %9935 = vmatpush3.bf16.msra.mxu1 %v10767_v16  ;;  %v5511_v16 = vmax.f32 %v4903_v28, 0.0  ;;  %v15591_v28 = vld [vmem:[#allocation43_spill] sm:$0xff] }
0x15cb   : > { %9963 = vmatpush3.bf16.msra.mxu0 %v10768_v6  ;;  %9936 = vmatprep.subr.bf16.mxu1 %v10769_v11  ;;  %v5542_v6 = vmax.f32 %v4905_v52, 0.0  ;;  %v5543_v11 = vmax.f32 %v4907_v61, 0.0  ;;  %v14128_v35 = vadd.f32 %v15591_v28, %v4207_v57  ;;  %v15592_v52 = vld [vmem:[#allocation51_spill] sm:$0xff]  ;;  %v15593_v61 = vld [vmem:[#allocation52_spill] sm:$0xff] }
0x15cc   : > { %9964 = vmatprep.subr.bf16.mxu0 %v10770_v36  ;;  %v15585_v36 = vld [vmem:[#allocation40_spill] sm:$0xff]  ;;  %v5013_v2 = vadd.f32 %v15592_v52, %v14101_v51  ;;  %v5060_v44 = vadd.f32 %v15593_v61, %v14107_v29  ;;  %v15599_v52 = vld [vmem:[#allocation50_spill] sm:$0xff]  ;;  %v5546_v61 = vmax.f32 %v5011_v17, 0.0 }
0x15ce   : > { %9937 = vmatpush3.bf16.msra.mxu1 %v10771_v27  ;;  %v4958_v27 = vadd.f32 %v15585_v36, %v4211_v39  ;;  %v15596_v36 = vld [vmem:[#allocation44_spill] sm:$0xff] }
0x15cf   : > { %9965 = vmatpush3.bf16.msra.mxu0 %v10772_v0  ;;  %9938 = vmatprep.subr.bf16.mxu1 %v10773_v4  ;;  %v5512_v0 = vmax.f32 %v4954_v12, 0.0  ;;  %v5516_v4 = vmax.f32 %v5060_v44, 0.0 }
0x15d0   : > { %9966 = vmatprep.subr.bf16.mxu0 %v10774_v3  ;;  %v15586_v3 = vld [vmem:[#allocation42_spill] sm:$0xff]  ;;  %v5544_v12 = vmax.f32 %v4958_v27, 0.0  ;;  %v14148_v27 = vadd.f32 %v15599_v52, %v4215_v63 }
0x15d2   : > { %9939 = vmatpush3.bf16.msra.mxu1 %v10775_v20  ;;  %v4960_v20 = vadd.f32 %v15586_v3, %v4215_v63  ;;  %v14139_v3 = vadd.f32 %v15596_v36, %v4211_v39  ;;  %v15601_v36 = vld [vmem:[#allocation56_spill] sm:$0xff] }
0x15d3   : > { %9967 = vmatpush3.bf16.msra.mxu0 %v10776_v5  ;;  %9940 = vmatprep.subr.bf16.mxu1 %v10777_v47  ;;  %v15587_v5 = vld [vmem:[#allocation45_spill] sm:$0xff]  ;;  %v5064_v56 = vadd.f32 %v15601_v36, %v14107_v29 }
0x15d4   : > { %9968 = vmatprep.subr.bf16.mxu0 %v10778_v46  ;;  %v5007_v47 = vadd.f32 %v15587_v5, %v14097_v43  ;;  %v14117_v46 = vpop.permute.xlu0 %10550  ;;  %v5545_v19 = vmax.f32 %v4960_v20, 0.0  ;;  %v15597_v5 = vld [vmem:[#allocation46_spill] sm:$0xff]  ;;  %v10786_v36 = vld [vmem:[%s15390_s16 + $0x3c8] sm:$0xff]  }
0x15d5   : > { %v14142_v57 = vadd.f32 %v15597_v5, %v4215_v63 }
0x15d6   : > { %9941 = vmatpush3.bf16.msra.mxu1 %v10779_v8  ;;  %v5513_v8 = vmax.f32 %v4956_v42, 0.0  ;;  %v5066_v42 = vadd.f32 %v15595_v45, %v14110_v54  ;;  %v15600_v45 = vld [vmem:[#allocation53_spill] sm:$0xff] }
0x15d7   : > { %9969 = vmatpush3.bf16.msra.mxu0 %v10780_v49  ;;  %9982 = vmatprep.subr.bf16.mxu1 %v10781_v22  ;;  %v15588_v49 = vld [vmem:[#allocation41_spill] sm:$0xff]  ;;  %v14152_v20 = vadd.f32 %v15600_v45, %v14097_v43 }
0x15d8   : > { %10010 = vmatprep.subr.bf16.mxu0 %v10782_v62  ;;  %v14120_v22 = vadd.f32 %v15588_v49, %v4203_v21  ;;  %v15589_v62 = vld [vmem:[#allocation47_spill] sm:$0xff]  ;;  %v15594_v21 = vld [vmem:[#allocation54_spill] sm:$0xff]  ;;  %v5514_v49 = vmax.f32 %v5007_v47, 0.0  ;;  %v5549_v9 = vmax.f32 %v5066_v42, 0.0 }
0x15d9   : > { %v5009_v10 = vadd.f32 %v15589_v62, %v14101_v51  ;;  %v5062_v37 = vadd.f32 %v15594_v21, %v14110_v54  ;;  %v15598_v62 = vld [vmem:[#allocation48_spill] sm:$0xff]  ;;  %v5547_v21 = vmax.f32 %v5013_v2, 0.0 }
0x15da   : > { %v14145_v34 = vadd.f32 %v15598_v62, %v4211_v39  ;;  %v11169_v39 = vadd.high.f32.bf16 %v13948_v15, %v14117_v46 }
0x15db   : > { %v5515_v28 = vmax.f32 %v5009_v10, 0.0  ;;  %v5517_v5 = vmax.f32 %v5062_v37, 0.0 }
0x161a   : > { %v14158_v47 = vpop.permute.xlu1 %5684 }
0x161b   : > { %15602 = vst [vmem:[#allocation34_spill] sm:$0xff] %v14158_v47  ;;  %v5703_v63 = vmul.f32 %v14158_v47, %v5511_v16  ;;  %v5705_v2 = vmul.f32 %v14158_v47, %v5513_v8  ;;  %v5702_v62 = vmul.f32 %v14158_v47, %v5510_v48  ;;  %v5704_v42 = vmul.f32 %v14158_v47, %v5512_v0  ;;  %v10783_v16 = vld [vmem:[%s15390_s16 + $0x300] sm:$0xff]  }
0x161c   : > { %v14160_v10 = vpop.permute.xlu0 %5689  ;;  %v14177_v8 = vmul.f32 %v14158_v47, %v5515_v28 }
0x161d   : > { %15603 = vst [vmem:[#allocation129_spill] sm:$0xff] %v14160_v10  ;;  %v5711_v17 = vmul.f32 %v14160_v10, %v5543_v11  ;;  %v5713_v44 = vmul.f32 %v14160_v10, %v5545_v19  ;;  %v5710_v37 = vmul.f32 %v14160_v10, %v5542_v6  ;;  %v5712_v15 = vmul.f32 %v14160_v10, %v5544_v12  ;;  %v10784_v11 = vld [vmem:[%s15390_s16 + $0x380] sm:$0xff]   ;;  %v10785_v12 = vld [vmem:[%s15390_s16 + $0x348] sm:$0xff]  }
0x161e   : > { %v14180_v48 = vmul.f32 %v14160_v10, %v5547_v21  ;;  %v10558_v6 = vpop.permute.xlu1 %10557  ;;  %v14192_v28 = vmul.f32 %v14160_v10, %v5549_v9  ;;  %v11170_v21 = vadd.low.f32.bf16 %v13962_v26, %v14117_v46  ;;  %v14204_v9 = vmul.f32 %v14160_v10, %v5546_v61 }
0x161f   : > { %v5847_v52 = vpack.c.bf16 %v5711_v17, %v5703_v63  ;;  %v5849_v45 = vpack.c.bf16 %v5713_v44, %v5705_v2  ;;  %v5846_v0 = vpack.c.bf16 %v5710_v37, %v5702_v62  ;;  %v5848_v19 = vpack.c.bf16 %v5712_v15, %v5704_v42  ;;  %v15604_v15 = vld [vmem:[#allocation55_spill] sm:$0xff] }
0x1620   : > { %v14189_v63 = vmul.f32 %v14158_v47, %v5517_v5  ;;  %v5548_v2 = vmax.f32 %v5064_v56, 0.0  ;;  %v14201_v5 = vmul.f32 %v14158_v47, %v5514_v49  ;;  %v11171_v26 = vadd.low.f32.bf16 %v11170_v21, %v10558_v6  ;;  %v14207_v37 = vpop.permute.xlu0 %3964  ;;  %v10787_v56 = vld [vmem:[%s15390_s16 + $0x308] sm:$0xff]  }
0x1621   : > { %8186 = vmatprep.mubr.bf16.mxu1 %v5847_v52  ;;  %8235 = vmatprep.mubr.bf16.mxu0 %v5849_v45  ;;  %v11172_v46 = vadd.high.f32.bf16 %v11169_v39, %v10558_v6  ;;  %v10788_v49 = vld [vmem:[%s15390_s16 + $0x388] sm:$0xff]   ;;  %v14216_v42 = vmul.f32 %v14158_v47, %v5516_v4  ;;  %v5607_v61 = vmax.f32 %v14128_v35, 0.0  ;;  %v14221_v39 = vadd.f32 %v15604_v15, %v14101_v51  ;;  %v10789_v6 = vld [vmem:[%s15390_s16 + $0x350] sm:$0xff]  }
0x1622   : > { %8187 = vmatmul.mubr.bf16.vlgmr.msra.gmra.mrb[160].mxu1 %v5846_v0  ;;  %8236 = vmatmul.mubr.bf16.vlgmr.msra.gmra.mrb[156].mxu0 %v5848_v19  ;;  %v14223_v52 = vpop.permute.xlu1 %3962  ;;  %vm4018_vm14 = vcmp.lt.f32.partialorder %v11171_v26, 2.0  ;;  %v10790_v0 = vld [vmem:[%s15390_s16 + $0x3d0] sm:$0xff]   ;;  %v15606_v19 = vld [vmem:[#allocation59_spill] sm:$0xff]  ;;  %v5577_v26 = vmax.f32 %v14142_v57, 0.0  ;;  %vm3973_vm2 = vcmp.ge.f32.partialorder %v13376_v18, %v14207_v37  ;;  %v5609_v57 = vmax.f32 %v14148_v27, 0.0 }
0x1623   : > { %9983 = vmatpush3.bf16.msra.mxu1 %v10783_v16  ;;  %10011 = vmatpush3.bf16.msra.mxu0 %v10784_v11  ;;  %v14228_v16 = vmul.f32 %v14160_v10, %v5548_v2  ;;  %v15605_v11 = vld [vmem:[#allocation57_spill] sm:$0xff]  ;;  %vm4019_vm15 = vcmp.lt.f32.partialorder %v11172_v46, 2.0  ;;  %vm3972_vm1 = vcmp.ge.f32.partialorder %v13374_v7, %v14223_v52  ;;  %v5576_v2 = vmax.f32 %v14139_v3, 0.0  ;;  %v15607_v46 = vld [vmem:[#allocation60_spill] sm:$0xff]  ;;  %v10794_v27 = vld [vmem:[%s15390_s16 + $0x3d8] sm:$0xff]  }
0x1624   : > { %9984 = vmatprep.subr.bf16.mxu1 %v10785_v12  ;;  %10012 = vmatprep.subr.bf16.mxu0 %v10786_v36  ;;  %v14232_v4 = vadd.f32 %v15605_v11, %v14097_v43  ;;  %v5023_v12 = vadd.f32 %v15606_v19, %v14101_v51  ;;  %v4023_v36 = vsel %vm4019_vm15, %v13917_v13, 0.0  ;;  %v4022_v43 = vsel %vm4018_vm14, %v13926_v59, 0.0  ;;  %v10791_v13 = vld [vmem:[%s15390_s16 + $0x310] sm:$0xff]  }
0x1625   : > { %v14252_v15 = vadd.f32 %v15607_v46, %v14107_v29  ;;  %v10792_v59 = vld [vmem:[%s15390_s16 + $0x390] sm:$0xff]   ;;  %v5608_v3 = vmax.f32 %v14145_v34, 0.0  ;;  %5741 = vperm.xlu1 %10554, %v4023_v36   ;;  %5736 = vperm.xlu0 %10555, %v4022_v43   ;;  %v5579_v19 = vmax.f32 %v14221_v39, 0.0  ;;  %v10793_v34 = vld [vmem:[%s15390_s16 + $0x358] sm:$0xff]   ;;  %v15609_v43 = vld [vmem:[#allocation64_spill] sm:$0xff]  ;;  %v9246_v39 = vsel %vm3973_vm2, 1.0, %v15562_v40 }
0x1626   : > { %v15608_v46 = vld [vmem:[#allocation62_spill] sm:$0xff]  ;;  %v5610_v45 = vmax.f32 %v14232_v4, 0.0  ;;  %v5611_v36 = vmax.f32 %v5023_v12, 0.0  ;;  %v5074_v44 = vadd.f32 %v15609_v43, %v14107_v29  ;;  %v10795_v4 = vld [vmem:[%s15390_s16 + $0x318] sm:$0xff]   ;;  %v15611_v12 = vmax.f32 %v14104_v23, 0.0  ;;  %v10797_v23 = vld [vmem:[%s15390_s16 + $0x360] sm:$0xff]  }
0x1627   : > { %9985 = vmatpush3.bf16.msra.mxu1 %v10787_v56  ;;  %10013 = vmatpush3.bf16.msra.mxu0 %v10788_v49  ;;  %v9245_v56 = vsel %vm3972_vm1, 1.0, %v15562_v40  ;;  %v10563_v49 = vpop.permute.xlu1 %10562  ;;  %v5072_v21 = vadd.f32 %v15608_v46, %v14110_v54  ;;  %v10796_v29 = vld [vmem:[%s15390_s16 + $0x398] sm:$0xff]   ;;  %v15615_v10 = vmax.f32 %v14120_v22, 0.0 }
0x1628   : > { %v14256_v51 = vpop.permute.xlu0 %5694  ;;  %9986 = vmatprep.subr.bf16.mxu1 %v10789_v6  ;;  %10014 = vmatprep.subr.bf16.mxu0 %v10790_v0  ;;  %v5580_v6 = vmax.f32 %v14252_v15, 0.0  ;;  %v15610_v0 = vld [vmem:[#allocation66_spill] sm:$0xff]  ;;  %v10581_v17 = vpack.i.bf16 %v9246_v39, %v9245_v56  ;;  %v11173_v15 = vadd.low.f32.bf16 %v9245_v56, %v10563_v49  ;;  %v11174_v62 = vadd.high.f32.bf16 %v9246_v39, %v10563_v49  ;;  %v10798_v56 = vld [vmem:[%s15390_s16 + $0x3e0] sm:$0xff]  }
0x1629   : > { %v5076_v46 = vadd.f32 %v15610_v0, %v14110_v54  ;;  %v5719_v43 = vmul.f32 %v14256_v51, %v15611_v12  ;;  %4030 = vrot.lane.b32.xlu1 %v13374_v7, %s11420_s27  ;;  %v15612_v54 = vld [vmem:[#allocation130_spill] sm:$0xff]  ;;  %v5721_v0 = vmul.f32 %v14256_v51, %v5577_v26  ;;  %v15614_v49 = vmax.f32 %v14094_v41, 0.0 }
0x162a   : > { %10577 = vrot.lane.b32.xlu0 %v15612_v54, %s11419_s1  ;;  %v14334_v22 = vmul.f32 %v14256_v51, %v5579_v19 }
0x162b   : > { %9987 = vmatpush3.bf16.msra.mxu1 %v10791_v13  ;;  %10015 = vmatpush3.bf16.msra.mxu0 %v10792_v59  ;;  %v5581_v13 = vmax.f32 %v5072_v21, 0.0  ;;  %v5718_v39 = vmul.f32 %v14256_v51, %v15614_v49  ;;  %v5720_v21 = vmul.f32 %v14256_v51, %v5576_v2 }
0x162c   : > { %v10568_v11 = vpop.permute.xlu0 %10567  ;;  %9988 = vmatprep.subr.bf16.mxu1 %v10793_v34  ;;  %10016 = vmatprep.subr.bf16.mxu0 %v10794_v27  ;;  %v5612_v27 = vmax.f32 %v5074_v44, 0.0  ;;  %v10799_v44 = vld [vmem:[%s15390_s16 + $0x320] sm:$0xff]  }
0x162d   : > { %v14303_v59 = vpop.permute.xlu1 %5699  ;;  %v11175_v12 = vadd.high.f32.bf16 %v11174_v62, %v10568_v11  ;;  %v11176_v54 = vadd.low.f32.bf16 %v11173_v15, %v10568_v11  ;;  %v5613_v62 = vmax.f32 %v5076_v46, 0.0  ;;  %10582 = vrot.lane.b32.xlu1 %v10581_v17, %s11418_s15  ;;  %v10800_v17 = vld [vmem:[%s15390_s16 + $0x3a0] sm:$0xff]   ;;  %v15616_v11 = vmax.f32 %v14152_v20, 0.0  ;;  %v10801_v46 = vld [vmem:[%s15390_s16 + $0x368] sm:$0xff]   ;;  %s15328_s15 = scalar_lea.hbm %s15699_s0, %s9609_s23 }
0x162e   : > { %15613 = vst [vmem:[#allocation31_spill] sm:$0xff] %v14303_v59  ;;  %v5727_v26 = vmul.f32 %v14303_v59, %v5607_v61  ;;  %v5729_v34 = vmul.f32 %v14303_v59, %v5609_v57  ;;  %v5726_v47 = vmul.f32 %v14303_v59, %v15615_v10  ;;  %v5728_v41 = vmul.f32 %v14303_v59, %v5608_v3  ;;  %v10804_v15 = vld [vmem:[%s15390_s16 + $0x3a8] sm:$0xff]  }
0x162f   : > { %9989 = vmatpush3.bf16.msra.mxu1 %v10795_v4  ;;  %10017 = vmatpush3.bf16.msra.mxu0 %v10796_v29  ;;  %v14325_v49 = vmul.f32 %v14303_v59, %v5611_v36  ;;  %vm4021_vm3 = vcmp.lt.f32.partialorder %v11175_v12, 2.0  ;;  %vm4020_vm4 = vcmp.lt.f32.partialorder %v11176_v54, 2.0  ;;  %v5725_v57 = vmul.f32 %v14256_v51, %v5581_v13  ;;  %v10812_v12 = vld [vmem:[%s15390_s16 + $0x3b8] sm:$0xff]   ;;  %v10813_v54 = vld [vmem:[%s15390_s16 + $0x440] sm:$0xff]  }
0x1630   : > { %4032 = vrot.lane.b32.xlu0 %v13376_v18, %s11420_s27  ;;  %v5879_v35 = vpack.c.bf16 %v5727_v26, %v5719_v43  ;;  %v5881_v10 = vpack.c.bf16 %v5729_v34, %v5721_v0  ;;  %9990 = vmatprep.subr.bf16.mxu1 %v10797_v23  ;;  %v5878_v61 = vpack.c.bf16 %v5726_v47, %v5718_v39  ;;  %v4025_v47 = vsel %vm4021_vm3, %v14207_v37, 0.0  ;;  %v10802_v37 = vld [vmem:[%s15390_s16 + $0x3e8] sm:$0xff]   ;;  %v10810_v39 = vld [vmem:[%s15390_s16 + $0x3f8] sm:$0xff]   ;;  %v10815_v26 = vld [vmem:[%s15390_s16 + $0x400] sm:$0xff]   ;;  %s11325_s27 = scalar_lea.vmem %s15322_s19, 512 }
0x1631   : > { %10018 = vmatprep.subr.bf16.mxu0 %v10798_v56  ;;  %v5880_v2 = vpack.c.bf16 %v5728_v41, %v5720_v21  ;;  %v5883_v3 = vpack.c.bf16 %v14325_v49, %v14334_v22  ;;  %v14345_v19 = vmul.f32 %v14256_v51, %v15616_v11  ;;  %v14348_v36 = vmul.f32 %v14256_v51, %v5580_v6  ;;  %v10803_v43 = vld [vmem:[%s15390_s16 + $0x328] sm:$0xff]   ;;  %v10811_v21 = vld [vmem:[%s15390_s16 + $0x338] sm:$0xff]   ;;  %v10816_v34 = vld [vmem:[%s15390_s16 + $0x480] sm:$0xff]   ;;  %p11326_p11 = scmp.ne.s32.totalorder %s15322_s19, %s11325_s27 }
0x1632   : > { %8194 = vmatprep.mubr.bf16.mxu1 %v5879_v35  ;;  %8243 = vmatprep.mubr.bf16.mxu0 %v5881_v10  ;;  %v5733_v4 = vmul.f32 %v14303_v59, %v5613_v62  ;;  %v14357_v29 = vmul.f32 %v14303_v59, %v5610_v45  ;;  %v14360_v20 = vmul.f32 %v14303_v59, %v5612_v27  ;;  %v4024_v6 = vsel %vm4020_vm4, %v14223_v52, 0.0  ;;  %v10805_v52 = vld [vmem:[%s15390_s16 + $0x370] sm:$0xff]   ;;  %v10817_v27 = vld [vmem:[%s15390_s16 + $0x448] sm:$0xff]   ;;  %v10825_v22 = vld [vmem:[%s15390_s16 + $0x458] sm:$0xff]  }
0x1633   : > { %8195 = vmatmul.mubr.bf16.gmra.mrb[164].mxu1 %v5878_v61  ;;  %8244 = vmatmul.mubr.bf16.gmra.mrb[160].mxu0 %v5880_v2  ;;  %v15617_v45 = vpack.c.bf16 %v14180_v48, %v14177_v8  ;;  %v15618_v56 = vpack.c.bf16 %v14192_v28, %v14189_v63  ;;  %v10806_v8 = vld [vmem:[%s15390_s16 + $0x3f0] sm:$0xff]   ;;  %v10809_v28 = vld [vmem:[%s15390_s16 + $0x378] sm:$0xff]   ;;  %v15619_v41 = vpack.c.bf16 %v14204_v9, %v14201_v5  ;;  %v10818_v49 = vld [vmem:[%s15390_s16 + $0x4c8] sm:$0xff]   ;;  %p11327_p1 = pnand %p11326_p11, %p15700_p13 }
0x1634   : > { %9991 = vmatpush3.bf16.msra.mxu1 %v10799_v44  ;;  %10019 = vmatpush3.bf16.msra.mxu0 %v10800_v17  ;;  %v5885_v13 = vpack.c.bf16 %v5733_v4, %v5725_v57  ;;  %v5882_v0 = vpack.c.bf16 %v14357_v29, %v14345_v19  ;;  %v5884_v23 = vpack.c.bf16 %v14360_v20, %v14348_v36  ;;  %v10807_v48 = vld [vmem:[%s15390_s16 + $0x330] sm:$0xff]   ;;  %v10819_v35 = vld [vmem:[%s15390_s16 + $0x408] sm:$0xff]   ;;  %v10826_v10 = vld [vmem:[%s15390_s16 + $0x4d8] sm:$0xff]  }
0x1635   : > { %8284 = vmatprep.mubr.bf16.mxu1 %v15617_v45  ;;  %8333 = vmatprep.mubr.bf16.mxu0 %v15618_v56  ;;  %v10808_v63 = vld [vmem:[%s15390_s16 + $0x3b0] sm:$0xff]   ;;  %v15620_v62 = vpack.c.bf16 %v14228_v16, %v14216_v42  ;;  %v10820_v5 = vld [vmem:[%s15390_s16 + $0x488] sm:$0xff]   ;;  %v10827_v61 = vld [vmem:[%s15390_s16 + $0x418] sm:$0xff]   ;;  %p11328_p6 = pneg %p11327_p1 }
0x1636   : > { %5751 = vperm.xlu1 %10554, %v4025_v47   ;;  %5746 = vperm.xlu0 %10555, %v4024_v6   ;;  %v10821_v9 = vld [vmem:[%s15390_s16 + $0x450] sm:$0xff]   ;;  %v10828_v2 = vld [vmem:[%s15390_s16 + $0x498] sm:$0xff]   ;;  %v10829_v17 = vld [vmem:[%s15390_s16 + $0x460] sm:$0xff]  }
0x1637   : > { %9992 = vmatprep.subr.bf16.mxu1 %v10801_v46  ;;  %10020 = vmatprep.subr.bf16.mxu0 %v10802_v37  ;;  %v10822_v42 = vld [vmem:[%s15390_s16 + $0x4d0] sm:$0xff]   ;;  %v10831_v57 = vld [vmem:[%s15390_s16 + $0x420] sm:$0xff]   ;;  %v10833_v19 = vld [vmem:[%s15390_s16 + $0x468] sm:$0xff]  }
0x1638   : > { %9993 = vmatpush3.bf16.msra.mxu1 %v10803_v43  ;;  %10021 = vmatpush3.bf16.msra.mxu0 %v10804_v15  ;;  %v10823_v16 = vld [vmem:[%s15390_s16 + $0x410] sm:$0xff]   ;;  %v10832_v11 = vld [vmem:[%s15390_s16 + $0x4a0] sm:$0xff]   ;;  %v10834_v36 = vld [vmem:[%s15390_s16 + $0x4e8] sm:$0xff]  }
0x1639   : > { %9994 = vmatprep.subr.bf16.mxu1 %v10805_v52  ;;  %10022 = vmatprep.subr.bf16.mxu0 %v10806_v8  ;;  %v10824_v44 = vld [vmem:[%s15390_s16 + $0x490] sm:$0xff]   ;;  %v10835_v47 = vld [vmem:[%s15390_s16 + $0x428] sm:$0xff]   ;;  %v10841_v37 = vld [vmem:[%s15390_s16 + $0x478] sm:$0xff]  }
0x163a   : > { %10587 = vrot.lane.b32.xlu0 %v13786_v31, %s11419_s1  ;;  %v10814_v31 = vld [vmem:[%s15390_s16 + $0x4c0] sm:$0xff]   ;;  %v10836_v46 = vld [vmem:[%s15390_s16 + $0x4a8] sm:$0xff]   ;;  %v10837_v4 = vld [vmem:[%s15390_s16 + $0x470] sm:$0xff]  }
0x163b   : > { %v10838_v29 = vld [vmem:[%s15390_s16 + $0x4f0] sm:$0xff]   ;;  %v10842_v43 = vld [vmem:[%s15390_s16 + $0x4f8] sm:$0xff]   ;;  %v10845_v52 = vld [vmem:[%s15390_s16 + $0x540] sm:$0xff]  }
0x163c   : > { %9995 = vmatpush3.bf16.msra.mxu1 %v10807_v48  ;;  %10023 = vmatpush3.bf16.msra.mxu0 %v10808_v63  ;;  %v10839_v20 = vld [vmem:[%s15390_s16 + $0x430] sm:$0xff]   ;;  %v10843_v45 = vld [vmem:[%s15390_s16 + $0x438] sm:$0xff]  }
0x163d   : > { %9996 = vmatprep.subr.bf16.mxu1 %v10809_v28  ;;  %10024 = vmatprep.subr.bf16.mxu0 %v10810_v39  ;;  %v10840_v6 = vld [vmem:[%s15390_s16 + $0x4b0] sm:$0xff]   ;;  %v10844_v15 = vld [vmem:[%s15390_s16 + $0x4b8] sm:$0xff]  }
0x1640   : > { %9997 = vmatpush3.bf16.msra.mxu1 %v10811_v21  ;;  %10025 = vmatpush3.bf16.msra.mxu0 %v10812_v12 }
0x1641   : > { %10038 = vmatprep.subr.bf16.mxu1 %v10813_v54  ;;  %10066 = vmatprep.subr.bf16.mxu0 %v10814_v31 }
0x1643   : > { %8285 = vmatmul.mubr.bf16.vlgmr.msra.gmra.mrb[168].mxu1 %v15619_v41  ;;  %8334 = vmatmul.mubr.bf16.vlgmr.msra.gmra.mrb[164].mxu0 %v15620_v62 }
0x1644   : > { %8292 = vmatprep.mubr.bf16.mxu1 %v5883_v3  ;;  %8341 = vmatprep.mubr.bf16.mxu0 %v5885_v13  ;;  %v10830_v3 = vld [vmem:[%s15390_s16 + $0x4e0] sm:$0xff]  }
0x1645   : > { %10039 = vmatpush3.bf16.msra.mxu1 %v10815_v26  ;;  %10067 = vmatpush3.bf16.msra.mxu0 %v10816_v34  ;;  %v10846_v13 = vld [vmem:[%s15390_s16 + $0x5c0] sm:$0xff]  }
0x1646   : > { %10040 = vmatprep.subr.bf16.mxu1 %v10817_v27  ;;  %10068 = vmatprep.subr.bf16.mxu0 %v10818_v49 }
0x1649   : > { %10041 = vmatpush3.bf16.msra.mxu1 %v10819_v35  ;;  %10069 = vmatpush3.bf16.msra.mxu0 %v10820_v5 }
0x164a   : > { %10042 = vmatprep.subr.bf16.mxu1 %v10821_v9  ;;  %10070 = vmatprep.subr.bf16.mxu0 %v10822_v42 }
0x164b   : > { %8293 = vmatmul.mubr.bf16.gmra.mrb[172].mxu1 %v5882_v0  ;;  %8342 = vmatmul.mubr.bf16.gmra.mrb[168].mxu0 %v5884_v23  ;;  %v11151_v0 = vld [vmem:[%s15381_s7 + $0x8] sm:$0xff] }
0x164c   : > { %v6417_v23 = vrot.slane %v11151_v0, %v12283_v25 }
0x164d   : > { %10043 = vmatpush3.bf16.msra.mxu1 %v10823_v16  ;;  %10071 = vmatpush3.bf16.msra.mxu0 %v10824_v44 }
0x164e   : > { %10044 = vmatprep.subr.bf16.mxu1 %v10825_v22  ;;  %10072 = vmatprep.subr.bf16.mxu0 %v10826_v10  ;;  %v6418_v28 = vmul.f32 %v6417_v23, %v13688_v32  ;;  %v6419_v27 = vmul.f32 %v6417_v23, %v13686_v33  ;;  %v6420_v32 = vmul.f32 %v6417_v23, %v13797_v58 }
0x164f   : > { %v6421_v33 = vmul.f32 %v6417_v23, %v13799_v55  ;;  %v4162_v55 = vld [vmem:[%s15566_s29 + $0x10] sm:$0xff] }
0x1651   : > { %10045 = vmatpush3.bf16.msra.mxu1 %v10827_v61  ;;  %10073 = vmatpush3.bf16.msra.mxu0 %v10828_v2 }
0x1652   : > { %10046 = vmatprep.subr.bf16.mxu1 %v10829_v17  ;;  %10074 = vmatprep.subr.bf16.mxu0 %v10830_v3 }
0x1655   : > { %10047 = vmatpush3.bf16.msra.mxu1 %v10831_v57  ;;  %10075 = vmatpush3.bf16.msra.mxu0 %v10832_v11 }
0x1656   : > { %10048 = vmatprep.subr.bf16.mxu1 %v10833_v19  ;;  %10076 = vmatprep.subr.bf16.mxu0 %v10834_v36 }
0x1659   : > { %10049 = vmatpush3.bf16.msra.mxu1 %v10835_v47  ;;  %10077 = vmatpush3.bf16.msra.mxu0 %v10836_v46 }
0x165a   : > { %10050 = vmatprep.subr.bf16.mxu1 %v10837_v4  ;;  %10078 = vmatprep.subr.bf16.mxu0 %v10838_v29 }
0x165d   : > { %10051 = vmatpush3.bf16.msra.mxu1 %v10839_v20  ;;  %10079 = vmatpush3.bf16.msra.mxu0 %v10840_v6 }
0x165e   : > { %10052 = vmatprep.subr.bf16.mxu1 %v10841_v37  ;;  %10080 = vmatprep.subr.bf16.mxu0 %v10842_v43 }
0x1661   : > { %10053 = vmatpush3.bf16.msra.mxu1 %v10843_v45  ;;  %10081 = vmatpush3.bf16.msra.mxu0 %v10844_v15 }
0x1662   : > { %10094 = vmatprep.subr.bf16.mxu1 %v10845_v52  ;;  %10122 = vmatprep.subr.bf16.mxu0 %v10846_v13 }
0x166a   : > { %v9830_v56 = vpop.f32.mrb[144].mxu1  ;;  %v9858_v8 = vpop.f32.mrb[140].mxu0 }
0x166b   : > { %v9831_v48 = vpop.f32.mrb[145].mxu1  ;;  %v9859_v63 = vpop.f32.mrb[141].mxu0 }
0x166c   : > { %v9832_v39 = vadd.f32 %v9831_v48, %v9830_v56  ;;  %v9860_v21 = vadd.f32 %v9859_v63, %v9858_v8  ;;  %v9833_v12 = vpop.f32.mrb[146].mxu1  ;;  %v9861_v54 = vpop.f32.mrb[142].mxu0 }
0x166d   : > { %v9834_v31 = vpop.f32.mrb[147].mxu1  ;;  %v9862_v26 = vpop.f32.mrb[143].mxu0 }
0x166e   : > { %v7993_v34 = vadd.f32 %v9832_v39, %v6418_v28  ;;  %v9835_v41 = vadd.f32 %v9834_v31, %v9833_v12  ;;  %v9863_v49 = vadd.f32 %v9862_v26, %v9861_v54  ;;  %v4235_v39 = vrot.slane %v4162_v55, %v11724_v24 }
0x166f   : > { %v4239_v54 = vrot.slane %v4162_v55, %v11752_v53 }
0x1670   : > { %v8042_v62 = vadd.f32 %v9860_v21, %v7993_v34  ;;  %v7996_v35 = vadd.f32 %v9835_v41, %v6419_v27  ;;  %v4243_v41 = vrot.slane %v4162_v55, %v12136_v30 }
0x1672   : > { %v8045_v5 = vadd.f32 %v9863_v49, %v7996_v35  ;;  %v4247_v35 = vrot.slane %v4162_v55, %v12207_v14 }
0x1677   : > { %v9836_v9 = vpop.f32.mrb[148].mxu1 }
0x1678   : > { %v9864_v42 = vpop.f32.mrb[144].mxu0  ;;  %v9837_v16 = vpop.f32.mrb[149].mxu1 }
0x1679   : > { %v9865_v44 = vpop.f32.mrb[145].mxu0  ;;  %v9838_v22 = vadd.f32 %v9837_v16, %v9836_v9  ;;  %v9839_v61 = vpop.f32.mrb[150].mxu1  ;;  %v15621_v16 = vld [vmem:[#allocation61_spill] sm:$0xff] }
0x167a   : > { %v9866_v10 = vadd.f32 %v9865_v44, %v9864_v42  ;;  %v9867_v2 = vpop.f32.mrb[146].mxu0  ;;  %v9840_v17 = vpop.f32.mrb[151].mxu1  ;;  %v14537_v44 = vadd.f32 %v15621_v16, %v4235_v39 }
0x167b   : > { %v9868_v3 = vpop.f32.mrb[147].mxu0  ;;  %v8001_v57 = vadd.f32 %v9838_v22, %v6420_v32  ;;  %v9841_v11 = vadd.f32 %v9840_v17, %v9839_v61  ;;  %v15622_v32 = vld [vmem:[#allocation63_spill] sm:$0xff] }
0x167c   : > { %v9869_v19 = vadd.f32 %v9868_v3, %v9867_v2  ;;  %v14540_v22 = vadd.f32 %v15622_v32, %v4239_v54  ;;  %v15624_v3 = vld [vmem:[#allocation67_spill] sm:$0xff] }
0x167d   : > { %v8050_v36 = vadd.f32 %v9866_v10, %v8001_v57  ;;  %v8004_v47 = vadd.f32 %v9841_v11, %v6421_v33  ;;  %v15623_v10 = vld [vmem:[#allocation65_spill] sm:$0xff]  ;;  %v5119_v57 = vadd.f32 %v15624_v3, %v4239_v54  ;;  %v15625_v33 = vld [vmem:[#allocation68_spill] sm:$0xff] }
0x167e   : > { %v14543_v61 = vadd.f32 %v15623_v10, %v4235_v39  ;;  %v14549_v11 = vadd.f32 %v15625_v33, %v4243_v41  ;;  %v15637_v3 = vld [vmem:[#allocation76_spill] sm:$0xff]  ;;  %v15638_v33 = vld [vmem:[#allocation78_spill] sm:$0xff] }
0x167f   : > { %v8053_v46 = vadd.f32 %v9869_v19, %v8004_v47  ;;  %v15626_v19 = vld [vmem:[#allocation69_spill] sm:$0xff]  ;;  %v4251_v47 = vrot.slane %v4162_v55, %v15580_v1 }
0x168b   : > { %v9886_v4 = vpop.f32.mrb[152].mxu1 }
0x168c   : > { %v9914_v29 = vpop.f32.mrb[148].mxu0  ;;  %v9887_v20 = vpop.f32.mrb[153].mxu1 }
0x168d   : > { %v9915_v6 = vpop.f32.mrb[149].mxu0  ;;  %v9888_v37 = vadd.f32 %v9887_v20, %v9886_v4  ;;  %v9889_v43 = vpop.f32.mrb[154].mxu1 }
0x168e   : > { %v9916_v58 = vadd.f32 %v9915_v6, %v9914_v29  ;;  %v9917_v45 = vpop.f32.mrb[150].mxu0  ;;  %v9890_v15 = vpop.f32.mrb[155].mxu1  ;;  %v15627_v29 = vld [vmem:[#allocation70_spill] sm:$0xff]  ;;  %v15628_v6 = vld [vmem:[#allocation71_spill] sm:$0xff] }
0x168f   : > { %v9918_v52 = vpop.f32.mrb[151].mxu0  ;;  %v8091_v13 = vadd.f32 %v9888_v37, %v8042_v62  ;;  %v9891_v0 = vadd.f32 %v9890_v15, %v9889_v43  ;;  %v14555_v4 = vpop.permute.xlu1 %4026  ;;  %v5168_v20 = vadd.f32 %v15627_v29, %v4247_v35  ;;  %v14559_v37 = vadd.f32 %v15628_v6, %v4239_v54  ;;  %v15629_v43 = vld [vmem:[#allocation72_spill] sm:$0xff] }
0x1690   : > { %v9919_v56 = vadd.f32 %v9918_v52, %v9917_v45  ;;  %v5170_v45 = vadd.f32 %v15629_v43, %v4243_v41  ;;  %v14566_v15 = vrot.slane %v4162_v55, %v15584_v60  ;;  %v14569_v52 = vrot.slane %v4162_v55, %v12283_v25  ;;  %v15641_v43 = vld [vmem:[#allocation86_spill] sm:$0xff] }
0x1691   : > { %v14528_v23 = vadd.f32 %v9916_v58, %v8091_v13  ;;  %v8094_v8 = vadd.f32 %v9891_v0, %v8045_v5  ;;  %v4255_v58 = vrot.slane %v4162_v55, %v15582_v50  ;;  %v5518_v13 = vmax.f32 %v14537_v44, 0.0  ;;  %v15635_v44 = vld [vmem:[#allocation81_spill] sm:$0xff] }
0x1692   : > { %v5519_v0 = vmax.f32 %v14540_v22, 0.0  ;;  %v14589_v32 = vadd.f32 %v15635_v44, %v4251_v47  ;;  %v15636_v22 = vld [vmem:[#allocation83_spill] sm:$0xff]  ;;  %vm4038_vm5 = vcmp.ge.f32.partialorder %v13368_v38, %v14555_v4 }
0x1693   : > { %v14530_v48 = vadd.f32 %v9919_v56, %v8094_v8  ;;  %v9892_v63 = vpop.f32.mrb[156].mxu1  ;;  %v5550_v56 = vmax.f32 %v14543_v61, 0.0  ;;  %v15630_v8 = vld [vmem:[#allocation74_spill] sm:$0xff]  ;;  %v5225_v10 = vadd.f32 %v15636_v22, %v4255_v58  ;;  %v14592_v61 = vpop.permute.xlu1 %10572 }
0x1694   : > { %v9920_v28 = vpop.f32.mrb[152].mxu0  ;;  %v9893_v21 = vpop.f32.mrb[157].mxu1 }
0x1695   : > { %v9921_v12 = vpop.f32.mrb[153].mxu0  ;;  %v9894_v31 = vadd.f32 %v9893_v21, %v9892_v63  ;;  %v9895_v34 = vpop.f32.mrb[158].mxu1  ;;  %v5172_v63 = vadd.f32 %v15630_v8, %v4247_v35  ;;  %v5520_v21 = vmax.f32 %v14549_v11, 0.0  ;;  %v15639_v11 = vld [vmem:[#allocation84_spill] sm:$0xff]  ;;  %v15642_v8 = vld [vmem:[#allocation90_spill] sm:$0xff]  ;;  %v5555_v44 = vmax.f32 %v5225_v10, 0.0 }
0x1696   : > { %v9922_v26 = vadd.f32 %v9921_v12, %v9920_v28  ;;  %v9923_v27 = vpop.f32.mrb[154].mxu0  ;;  %v9896_v49 = vpop.f32.mrb[159].mxu1  ;;  %v5551_v28 = vmax.f32 %v5119_v57, 0.0  ;;  %v14595_v57 = vadd.f32 %v15637_v3, %v4243_v41  ;;  %v15649_v10 = vld [vmem:[#allocation91_spill] sm:$0xff] }
0x1697   : > { %v9924_v62 = vpop.f32.mrb[155].mxu0  ;;  %v8099_v5 = vadd.f32 %v9894_v31, %v8050_v36  ;;  %v9897_v9 = vadd.f32 %v9896_v49, %v9895_v34  ;;  %v14552_v36 = vadd.f32 %v15626_v19, %v4235_v39  ;;  %v15631_v31 = vld [vmem:[#allocation77_spill] sm:$0xff]  ;;  %v5521_v34 = vmax.f32 %v5168_v20, 0.0  ;;  %v15640_v20 = vld [vmem:[#allocation80_spill] sm:$0xff] }
0x1698   : > { %v9925_v42 = vadd.f32 %v9924_v62, %v9923_v27  ;;  %v15632_v27 = vld [vmem:[#allocation73_spill] sm:$0xff]  ;;  %v15633_v62 = vld [vmem:[#allocation79_spill] sm:$0xff]  ;;  %v14602_v19 = vadd.f32 %v15639_v11, %v14566_v15  ;;  %v14608_v6 = vadd.f32 %v15640_v20, %v4243_v41  ;;  %v15645_v41 = vld [vmem:[#allocation128_spill] sm:$0xff] }
0x1699   : > { %v14545_v2 = vadd.f32 %v9922_v26, %v8099_v5  ;;  %v8102_v17 = vadd.f32 %v9897_v9, %v8053_v46  ;;  %v14578_v26 = vadd.f32 %v15631_v31, %v4251_v47  ;;  %v14582_v49 = vadd.f32 %v15632_v27, %v4235_v39  ;;  %v15643_v27 = vld [vmem:[#allocation82_spill] sm:$0xff]  ;;  %v15648_v20 = vld [vmem:[#allocation89_spill] sm:$0xff] }
0x169a   : > { %v5221_v5 = vadd.f32 %v15633_v62, %v4255_v58  ;;  %v5552_v9 = vmax.f32 %v5170_v45, 0.0  ;;  %v14598_v39 = vadd.f32 %v15638_v33, %v4247_v35  ;;  %v5274_v45 = vadd.f32 %v15641_v43, %v14569_v52  ;;  %v15646_v33 = vld [vmem:[#allocation87_spill] sm:$0xff] }
0x169b   : > { %v14562_v46 = vadd.f32 %v9925_v42, %v8102_v17  ;;  %v15634_v42 = vld [vmem:[#allocation75_spill] sm:$0xff]  ;;  %v5553_v17 = vmax.f32 %v5172_v63, 0.0  ;;  %v5522_v29 = vmax.f32 %v14578_v26, 0.0  ;;  %v5278_v63 = vadd.f32 %v15642_v8, %v14569_v52  ;;  %v15644_v26 = vld [vmem:[#allocation85_spill] sm:$0xff] }
0x169c   : > { %v14586_v16 = vadd.f32 %v15634_v42, %v4239_v54  ;;  %v14604_v54 = vpop.permute.xlu0 %4028  ;;  %v5523_v31 = vmax.f32 %v5221_v5, 0.0  ;;  %v14615_v62 = vadd.f32 %v15643_v27, %v4247_v35  ;;  %v5554_v42 = vmax.f32 %v14589_v32, 0.0  ;;  %v15647_v35 = vld [vmem:[#allocation88_spill] sm:$0xff] }
0x169d   : > { %v14621_v22 = vadd.f32 %v15644_v26, %v4251_v47  ;;  %vm4039_vm6 = vcmp.ge.f32.partialorder %v15645_v41, %v14604_v54  ;;  %v5524_v3 = vmax.f32 %v14602_v19, 0.0  ;;  %v14627_v11 = vadd.f32 %v15646_v33, %v4255_v58  ;;  %v15650_v26 = vld [vmem:[#allocation92_spill] sm:$0xff] }
0x169e   : > { %v5276_v5 = vadd.f32 %v15647_v35, %v14566_v15  ;;  %v14632_v43 = vadd.f32 %v15648_v20, %v4251_v47  ;;  %v5525_v38 = vmax.f32 %v5274_v45, 0.0  ;;  %v5557_v32 = vmax.f32 %v5278_v63, 0.0 }
0x169f   : > { %v14635_v8 = vadd.f32 %v15649_v10, %v4255_v58  ;;  %v9247_v27 = vsel %vm4038_vm5, 1.0, %v15562_v40  ;;  %v14640_v41 = vadd.f32 %v15650_v26, %v14566_v15  ;;  %v9248_v19 = vsel %vm4039_vm6, 1.0, %v15562_v40 }
0x16a0   : > { %v11177_v33 = vadd.low.f32.bf16 %v9247_v27, %v14592_v61 }
0x16a4   : > { %v14644_v12 = vpop.permute.xlu1 %5741  ;;  %v14646_v35 = vpop.permute.xlu0 %5736 }
0x16a5   : > { %v5755_v47 = vmul.f32 %v14646_v35, %v5519_v0  ;;  %v5763_v45 = vmul.f32 %v14644_v12, %v5551_v28  ;;  %v5757_v58 = vmul.f32 %v14646_v35, %v5521_v34  ;;  %v5765_v63 = vmul.f32 %v14644_v12, %v5553_v17  ;;  %v10847_v0 = vld [vmem:[%s15390_s16 + $0x500] sm:$0xff]  }
0x16a6   : > { %v5754_v20 = vmul.f32 %v14646_v35, %v5518_v13  ;;  %v5762_v10 = vmul.f32 %v14644_v12, %v5550_v56  ;;  %v5756_v26 = vmul.f32 %v14646_v35, %v5520_v21  ;;  %v5764_v27 = vmul.f32 %v14644_v12, %v5552_v9  ;;  %v10848_v28 = vld [vmem:[%s15390_s16 + $0x580] sm:$0xff]  }
0x16a7   : > { %v5855_v55 = vpack.c.bf16 %v5763_v45, %v5755_v47  ;;  %v5857_v59 = vpack.c.bf16 %v5765_v63, %v5757_v58  ;;  %v14663_v34 = vmul.f32 %v14646_v35, %v5523_v31  ;;  %v14666_v13 = vmul.f32 %v14644_v12, %v5555_v44  ;;  %v10849_v47 = vld [vmem:[%s15390_s16 + $0x548] sm:$0xff]  }
0x16a8   : > { %v14668_v56 = vpop.permute.xlu1 %4030  ;;  %v10578_v21 = vpop.permute.xlu0 %10577  ;;  %v5854_v9 = vpack.c.bf16 %v5762_v10, %v5754_v20  ;;  %v5856_v17 = vpack.c.bf16 %v5764_v27, %v5756_v26  ;;  %v10850_v45 = vld [vmem:[%s15390_s16 + $0x5c8] sm:$0xff]   ;;  %v14677_v58 = vmul.f32 %v14646_v35, %v5525_v38  ;;  %v14680_v31 = vmul.f32 %v14644_v12, %v5557_v32 }
0x16a9   : > { %v11178_v44 = vadd.high.f32.bf16 %v9248_v19, %v14592_v61  ;;  %8382 = vmatprep.mubr.bf16.mxu1 %v5855_v55  ;;  %8431 = vmatprep.mubr.bf16.mxu0 %v5857_v59  ;;  %v5859_v63 = vpack.c.bf16 %v14666_v13, %v14663_v34  ;;  %v5556_v20 = vmax.f32 %v5276_v5, 0.0  ;;  %v14688_v26 = vmul.f32 %v14646_v35, %v5522_v29  ;;  %v10851_v59 = vld [vmem:[%s15390_s16 + $0x508] sm:$0xff]  }
0x16aa   : > { %8383 = vmatmul.mubr.bf16.vlgmr.msra.gmra.mrb[176].mxu1 %v5854_v9  ;;  %8432 = vmatmul.mubr.bf16.vlgmr.msra.gmra.mrb[172].mxu0 %v5856_v17  ;;  %v5861_v10 = vpack.c.bf16 %v14680_v31, %v14677_v58  ;;  %v14691_v38 = vmul.f32 %v14644_v12, %v5554_v42  ;;  %v5614_v32 = vmax.f32 %v14582_v49, 0.0  ;;  %v11180_v55 = vadd.low.f32.bf16 %v11177_v33, %v10578_v21  ;;  %v10852_v5 = vld [vmem:[%s15390_s16 + $0x588] sm:$0xff]  }
0x16ab   : > { %v11179_v61 = vadd.high.f32.bf16 %v11178_v44, %v10578_v21  ;;  %10095 = vmatpush3.bf16.msra.mxu1 %v10847_v0  ;;  %10123 = vmatpush3.bf16.msra.mxu0 %v10848_v28  ;;  %v14701_v29 = vmul.f32 %v14646_v35, %v5524_v3  ;;  %v5615_v42 = vmax.f32 %v14586_v16, 0.0  ;;  %vm4040_vm7 = vcmp.ge.f32.partialorder %v13374_v7, %v14668_v56  ;;  %v10853_v16 = vld [vmem:[%s15390_s16 + $0x550] sm:$0xff]   ;;  %v10867_v34 = vld [vmem:[%s15390_s16 + $0x528] sm:$0xff]  }
0x16ac   : > { %v14706_v49 = vpop.permute.xlu1 %10582  ;;  %v14708_v19 = vpop.permute.xlu0 %4032  ;;  %10096 = vmatprep.subr.bf16.mxu1 %v10849_v47  ;;  %10124 = vmatprep.subr.bf16.mxu0 %v10850_v45  ;;  %v5858_v33 = vpack.c.bf16 %v14691_v38, %v14688_v26  ;;  %v14713_v27 = vmul.f32 %v14644_v12, %v5556_v20  ;;  %vm4086_vm9 = vcmp.lt.f32.partialorder %v11180_v55, 2.0  ;;  %v10854_v3 = vld [vmem:[%s15390_s16 + $0x5d0] sm:$0xff]   ;;  %v5584_v9 = vmax.f32 %v14595_v57, 0.0  ;;  %v10857_v55 = vld [vmem:[%s15390_s16 + $0x558] sm:$0xff]   ;;  %v10868_v13 = vld [vmem:[%s15390_s16 + $0x5a8] sm:$0xff]  }
0x16ad   : > { %vm4087_vm8 = vcmp.lt.f32.partialorder %v11179_v61, 2.0  ;;  %vm4041_vm10 = vcmp.ge.f32.partialorder %v13376_v18, %v14708_v19  ;;  %v4090_v0 = vsel %vm4086_vm9, %v14555_v4, 0.0  ;;  %v5585_v17 = vmax.f32 %v14598_v39, 0.0  ;;  %v15651_v47 = vld [vmem:[#allocation94_spill] sm:$0xff] }
0x16ae   : > { %v4091_v28 = vsel %vm4087_vm8, %v14604_v54, 0.0  ;;  %v5860_v21 = vpack.c.bf16 %v14713_v27, %v14701_v29  ;;  %v5284_v45 = vadd.f32 %v15651_v47, %v14569_v52  ;;  %v14732_v44 = vsel %vm4041_vm10, 1.0, %v15562_v40  ;;  %v10855_v18 = vld [vmem:[%s15390_s16 + $0x510] sm:$0xff]   ;;  %5788 = vperm.xlu1 %10554, %v4090_v0   ;;  %v15653_v0 = vld [vmem:[#allocation96_spill] sm:$0xff]  ;;  %v10889_v27 = vld [vmem:[%s15390_s16 + $0x658] sm:$0xff]  }
0x16af   : > { %10097 = vmatpush3.bf16.msra.mxu1 %v10851_v59  ;;  %10125 = vmatpush3.bf16.msra.mxu0 %v10852_v5  ;;  %v10856_v4 = vld [vmem:[%s15390_s16 + $0x590] sm:$0xff]   ;;  %v5616_v57 = vmax.f32 %v14608_v6, 0.0  ;;  %v5617_v39 = vmax.f32 %v14615_v62, 0.0  ;;  %v5586_v54 = vmax.f32 %v14621_v22, 0.0  ;;  %v10858_v59 = vld [vmem:[%s15390_s16 + $0x5d8] sm:$0xff]   ;;  %v5587_v5 = vmax.f32 %v14627_v11, 0.0 }
0x16b0   : > { %v15652_v20 = vld [vmem:[#allocation98_spill] sm:$0xff]  ;;  %5793 = vperm.xlu0 %10555, %v4091_v28   ;;  %v5618_v6 = vmax.f32 %v14632_v43, 0.0  ;;  %v5619_v62 = vmax.f32 %v14635_v8, 0.0  ;;  %10098 = vmatprep.subr.bf16.mxu1 %v10853_v16  ;;  %v5588_v22 = vmax.f32 %v14640_v41, 0.0  ;;  %v5286_v28 = vadd.f32 %v15653_v0, %v14566_v15  ;;  %v10859_v15 = vld [vmem:[%s15390_s16 + $0x518] sm:$0xff]  }
0x16b1   : > { %v5288_v61 = vadd.f32 %v15652_v20, %v14569_v52  ;;  %v9249_v52 = vsel %vm4040_vm7, 1.0, %v15562_v40  ;;  %10126 = vmatprep.subr.bf16.mxu0 %v10854_v3  ;;  %v11182_v11 = vadd.high.f32.bf16 %v14732_v44, %v14706_v49  ;;  %v5589_v8 = vmax.f32 %v5284_v45, 0.0  ;;  %v10885_v26 = vld [vmem:[%s15390_s16 + $0x650] sm:$0xff]  }
0x16b2   : > { %v11181_v47 = vadd.low.f32.bf16 %v9249_v52, %v14706_v49  ;;  %v10860_v49 = vld [vmem:[%s15390_s16 + $0x598] sm:$0xff]   ;;  %v15654_v3 = vmax.f32 %v14559_v37, 0.0  ;;  %v10886_v38 = vld [vmem:[%s15390_s16 + $0x6d0] sm:$0xff]  }
0x16b3   : > { %10099 = vmatpush3.bf16.msra.mxu1 %v10855_v18  ;;  %10127 = vmatpush3.bf16.msra.mxu0 %v10856_v4  ;;  %v5621_v16 = vmax.f32 %v5288_v61, 0.0  ;;  %v10887_v29 = vld [vmem:[%s15390_s16 + $0x610] sm:$0xff]  }
0x16b4   : > { %10100 = vmatprep.subr.bf16.mxu1 %v10857_v55  ;;  %10128 = vmatprep.subr.bf16.mxu0 %v10858_v59  ;;  %v5620_v55 = vmax.f32 %v5286_v28, 0.0  ;;  %v10863_v28 = vld [vmem:[%s15390_s16 + $0x520] sm:$0xff]  }
0x16b5   : > { %v14764_v43 = vpop.permute.xlu1 %5751  ;;  %v14766_v20 = vpop.permute.xlu0 %5746 }
0x16b6   : > { %v5779_v7 = vmul.f32 %v14764_v43, %v5615_v42  ;;  %v5781_v40 = vmul.f32 %v14764_v43, %v5617_v39  ;;  %v5778_v41 = vmul.f32 %v14764_v43, %v5614_v32  ;;  %v5771_v45 = vmul.f32 %v14766_v20, %v15654_v3 }
0x16b7   : > { %v5773_v44 = vmul.f32 %v14766_v20, %v5585_v17  ;;  %v15655_v42 = vmax.f32 %v14552_v36, 0.0  ;;  %v5772_v18 = vmul.f32 %v14766_v20, %v5584_v9  ;;  %v5780_v4 = vmul.f32 %v14764_v43, %v5616_v57  ;;  %10101 = vmatpush3.bf16.msra.mxu1 %v10859_v15  ;;  %10129 = vmatpush3.bf16.msra.mxu0 %v10860_v49  ;;  %v10861_v9 = vld [vmem:[%s15390_s16 + $0x560] sm:$0xff]   ;;  %v10866_v15 = vld [vmem:[%s15390_s16 + $0x5e8] sm:$0xff]  }
0x16b8   : > { %v14787_v39 = vmul.f32 %v14766_v20, %v5587_v5  ;;  %v14790_v61 = vmul.f32 %v14764_v43, %v5619_v62  ;;  %v5887_v37 = vpack.c.bf16 %v5779_v7, %v5771_v45  ;;  %v14793_v17 = vmul.f32 %v14766_v20, %v5589_v8  ;;  %v10862_v57 = vld [vmem:[%s15390_s16 + $0x5e0] sm:$0xff]   ;;  %10102 = vmatprep.subr.bf16.mxu1 %v10861_v9 }
0x16b9   : > { %v5770_v32 = vmul.f32 %v14766_v20, %v15655_v42  ;;  %v5889_v52 = vpack.c.bf16 %v5781_v40, %v5773_v44  ;;  %v10588_v36 = vpop.permute.xlu0 %10587  ;;  %v5888_v59 = vpack.c.bf16 %v5780_v4, %v5772_v18  ;;  %v14804_v62 = vmul.f32 %v14764_v43, %v5621_v16  ;;  %v10864_v8 = vld [vmem:[%s15390_s16 + $0x5a0] sm:$0xff]   ;;  %10130 = vmatprep.subr.bf16.mxu0 %v10862_v57  ;;  %v10875_v44 = vld [vmem:[%s15390_s16 + $0x538] sm:$0xff]  }
0x16ba   : > { %v5891_v5 = vpack.c.bf16 %v14790_v61, %v14787_v39  ;;  %8390 = vmatprep.mubr.bf16.mxu1 %v5887_v37  ;;  %v14813_v7 = vmul.f32 %v14766_v20, %v5586_v54  ;;  %v14816_v40 = vmul.f32 %v14764_v43, %v5618_v6  ;;  %v14827_v16 = vmul.f32 %v14766_v20, %v5588_v22  ;;  %v10876_v42 = vld [vmem:[%s15390_s16 + $0x5b8] sm:$0xff]   ;;  %v10878_v18 = vld [vmem:[%s15390_s16 + $0x6c0] sm:$0xff]   ;;  %v10881_v61 = vld [vmem:[%s15390_s16 + $0x648] sm:$0xff]  }
0x16bb   : > { %v5886_v0 = vpack.c.bf16 %v5778_v41, %v5770_v32  ;;  %8439 = vmatprep.mubr.bf16.mxu0 %v5889_v52  ;;  %v10865_v41 = vld [vmem:[%s15390_s16 + $0x568] sm:$0xff]   ;;  %v5893_v49 = vpack.c.bf16 %v14804_v62, %v14793_v17  ;;  %v14830_v54 = vmul.f32 %v14764_v43, %v5620_v55  ;;  %v11183_v6 = vadd.high.f32.bf16 %v11182_v11, %v10588_v36  ;;  %v10874_v11 = vld [vmem:[%s15390_s16 + $0x5f8] sm:$0xff]   ;;  %v10877_v32 = vld [vmem:[%s15390_s16 + $0x640] sm:$0xff]  }
0x16bc   : > { %8440 = vmatmul.mubr.bf16.gmra.mrb[176].mxu0 %v5888_v59  ;;  %v11184_v3 = vadd.low.f32.bf16 %v11181_v47, %v10588_v36  ;;  %v5890_v45 = vpack.c.bf16 %v14816_v40, %v14813_v7  ;;  %10103 = vmatpush3.bf16.msra.mxu1 %v10863_v28  ;;  %v10873_v47 = vld [vmem:[%s15390_s16 + $0x578] sm:$0xff]   ;;  %v10879_v4 = vld [vmem:[%s15390_s16 + $0x600] sm:$0xff]   ;;  %v10882_v37 = vld [vmem:[%s15390_s16 + $0x6c8] sm:$0xff]  }
0x16bd   : > { %8391 = vmatmul.mubr.bf16.gmra.mrb[180].mxu1 %v5886_v0  ;;  %8529 = vmatprep.mubr.bf16.mxu0 %v5861_v10  ;;  %v5892_v22 = vpack.c.bf16 %v14830_v54, %v14827_v16  ;;  %vm4089_vm11 = vcmp.lt.f32.partialorder %v11183_v6, 2.0  ;;  %v10870_v10 = vld [vmem:[%s15390_s16 + $0x5f0] sm:$0xff]   ;;  %v10880_v39 = vld [vmem:[%s15390_s16 + $0x680] sm:$0xff]   ;;  %v10883_v52 = vld [vmem:[%s15390_s16 + $0x608] sm:$0xff]  }
0x16be   : > { %8480 = vmatprep.mubr.bf16.mxu1 %v5859_v63  ;;  %vm4088_vm12 = vcmp.lt.f32.partialorder %v11184_v3, 2.0  ;;  %10131 = vmatpush3.bf16.msra.mxu0 %v10864_v8  ;;  %v4093_v58 = vsel %vm4089_vm11, %v14708_v19, 0.0  ;;  %v10869_v63 = vld [vmem:[%s15390_s16 + $0x570] sm:$0xff]   ;;  %v10884_v0 = vld [vmem:[%s15390_s16 + $0x688] sm:$0xff]   ;;  %v10891_v17 = vld [vmem:[%s15390_s16 + $0x618] sm:$0xff]  }
0x16bf   : > { %v4092_v31 = vsel %vm4088_vm12, %v14668_v56, 0.0  ;;  %10104 = vmatprep.subr.bf16.mxu1 %v10865_v41  ;;  %10132 = vmatprep.subr.bf16.mxu0 %v10866_v15  ;;  %v10871_v19 = vld [vmem:[%s15390_s16 + $0x530] sm:$0xff]   ;;  %v10892_v55 = vld [vmem:[%s15390_s16 + $0x698] sm:$0xff]   ;;  %v10893_v36 = vld [vmem:[%s15390_s16 + $0x660] sm:$0xff]  }
0x16c0   : > { %5803 = vperm.xlu0 %10555, %v4093_v58   ;;  %5798 = vperm.xlu1 %10554, %v4092_v31   ;;  %v10872_v56 = vld [vmem:[%s15390_s16 + $0x5b0] sm:$0xff]   ;;  %v10894_v59 = vld [vmem:[%s15390_s16 + $0x6e0] sm:$0xff]   ;;  %v10898_v62 = vld [vmem:[%s15390_s16 + $0x6e8] sm:$0xff]  }
0x16c1   : > { %10105 = vmatpush3.bf16.msra.mxu1 %v10867_v34  ;;  %v10895_v9 = vld [vmem:[%s15390_s16 + $0x620] sm:$0xff]   ;;  %v10899_v28 = vld [vmem:[%s15390_s16 + $0x628] sm:$0xff]   ;;  %v10901_v7 = vld [vmem:[%s15390_s16 + $0x670] sm:$0xff]  }
0x16c2   : > { %10133 = vmatpush3.bf16.msra.mxu0 %v10868_v13  ;;  %10106 = vmatprep.subr.bf16.mxu1 %v10869_v63  ;;  %v10896_v57 = vld [vmem:[%s15390_s16 + $0x6a0] sm:$0xff]   ;;  %v10900_v8 = vld [vmem:[%s15390_s16 + $0x6a8] sm:$0xff]   ;;  %v10902_v40 = vld [vmem:[%s15390_s16 + $0x6f0] sm:$0xff]  }
0x16c3   : > { %10134 = vmatprep.subr.bf16.mxu0 %v10870_v10  ;;  %v10903_v41 = vld [vmem:[%s15390_s16 + $0x630] sm:$0xff]   ;;  %v10906_v16 = vld [vmem:[%s15390_s16 + $0x6f8] sm:$0xff]   ;;  %v10909_v3 = vld [vmem:[%s15390_s16 + $0x740] sm:$0xff]  }
0x16c4   : > { %v10904_v15 = vld [vmem:[%s15390_s16 + $0x6b0] sm:$0xff]   ;;  %v10907_v54 = vld [vmem:[%s15390_s16 + $0x638] sm:$0xff]  }
0x16c5   : > { %10107 = vmatpush3.bf16.msra.mxu1 %v10871_v19  ;;  %v10908_v6 = vld [vmem:[%s15390_s16 + $0x6b8] sm:$0xff]  }
0x16c6   : > { %10135 = vmatpush3.bf16.msra.mxu0 %v10872_v56  ;;  %10108 = vmatprep.subr.bf16.mxu1 %v10873_v47 }
0x16c7   : > { %10136 = vmatprep.subr.bf16.mxu0 %v10874_v11 }
0x16c9   : > { %10109 = vmatpush3.bf16.msra.mxu1 %v10875_v44 }
0x16ca   : > { %10137 = vmatpush3.bf16.msra.mxu0 %v10876_v42  ;;  %10150 = vmatprep.subr.bf16.mxu1 %v10877_v32 }
0x16cb   : > { %10178 = vmatprep.subr.bf16.mxu0 %v10878_v18 }
0x16cc   : > { %8481 = vmatmul.mubr.bf16.vlgmr.msra.gmra.mrb[184].mxu1 %v5858_v33  ;;  %v10888_v33 = vld [vmem:[%s15390_s16 + $0x690] sm:$0xff]  }
0x16cd   : > { %8530 = vmatmul.mubr.bf16.vlgmr.msra.gmra.mrb[180].mxu0 %v5860_v21  ;;  %8488 = vmatprep.mubr.bf16.mxu1 %v5891_v5  ;;  %v10890_v21 = vld [vmem:[%s15390_s16 + $0x6d8] sm:$0xff]   ;;  %v10897_v5 = vld [vmem:[%s15390_s16 + $0x668] sm:$0xff]  }
0x16ce   : > { %8537 = vmatprep.mubr.bf16.mxu0 %v5893_v49  ;;  %10151 = vmatpush3.bf16.msra.mxu1 %v10879_v4  ;;  %v10905_v49 = vld [vmem:[%s15390_s16 + $0x678] sm:$0xff]  }
0x16cf   : > { %10179 = vmatpush3.bf16.msra.mxu0 %v10880_v39  ;;  %10152 = vmatprep.subr.bf16.mxu1 %v10881_v61 }
0x16d0   : > { %10180 = vmatprep.subr.bf16.mxu0 %v10882_v37 }
0x16d2   : > { %10153 = vmatpush3.bf16.msra.mxu1 %v10883_v52 }
0x16d3   : > { %10181 = vmatpush3.bf16.msra.mxu0 %v10884_v0  ;;  %10154 = vmatprep.subr.bf16.mxu1 %v10885_v26 }
0x16d4   : > { %10182 = vmatprep.subr.bf16.mxu0 %v10886_v38  ;;  %8489 = vmatmul.mubr.bf16.gmra.mrb[188].mxu1 %v5890_v45  ;;  %v10910_v45 = vld [vmem:[%s15390_s16 + $0x7c0] sm:$0xff]  }
0x16d5   : > { %8538 = vmatmul.mubr.bf16.gmra.mrb[184].mxu0 %v5892_v22 }
0x16d6   : > { %10155 = vmatpush3.bf16.msra.mxu1 %v10887_v29 }
0x16d7   : > { %10183 = vmatpush3.bf16.msra.mxu0 %v10888_v33  ;;  %10156 = vmatprep.subr.bf16.mxu1 %v10889_v27 }
0x16d8   : > { %10184 = vmatprep.subr.bf16.mxu0 %v10890_v21 }
0x16da   : > { %10157 = vmatpush3.bf16.msra.mxu1 %v10891_v17 }
0x16db   : > { %10185 = vmatpush3.bf16.msra.mxu0 %v10892_v55  ;;  %10158 = vmatprep.subr.bf16.mxu1 %v10893_v36 }
0x16dc   : > { %10186 = vmatprep.subr.bf16.mxu0 %v10894_v59 }
0x16de   : > { %10159 = vmatpush3.bf16.msra.mxu1 %v10895_v9 }
0x16df   : > { %10187 = vmatpush3.bf16.msra.mxu0 %v10896_v57  ;;  %10160 = vmatprep.subr.bf16.mxu1 %v10897_v5 }
0x16e0   : > { %10188 = vmatprep.subr.bf16.mxu0 %v10898_v62 }
0x16e2   : > { %10161 = vmatpush3.bf16.msra.mxu1 %v10899_v28 }
0x16e3   : > { %10189 = vmatpush3.bf16.msra.mxu0 %v10900_v8  ;;  %10162 = vmatprep.subr.bf16.mxu1 %v10901_v7 }
0x16e4   : > { %10190 = vmatprep.subr.bf16.mxu0 %v10902_v40 }
0x16e6   : > { %10163 = vmatpush3.bf16.msra.mxu1 %v10903_v41 }
0x16e7   : > { %10191 = vmatpush3.bf16.msra.mxu0 %v10904_v15  ;;  %10164 = vmatprep.subr.bf16.mxu1 %v10905_v49 }
0x16e8   : > { %10192 = vmatprep.subr.bf16.mxu0 %v10906_v16 }
0x16ea   : > { %10165 = vmatpush3.bf16.msra.mxu1 %v10907_v54 }
0x16eb   : > { %10193 = vmatpush3.bf16.msra.mxu0 %v10908_v6  ;;  %10206 = vmatprep.subr.bf16.mxu1 %v10909_v3 }
0x16ec   : > { %10234 = vmatprep.subr.bf16.mxu0 %v10910_v45 }
0x16f5   : > { %v9942_v22 = vpop.f32.mrb[160].mxu1  ;;  %v9970_v34 = vpop.f32.mrb[156].mxu0 }
0x16f6   : > { %v9943_v13 = vpop.f32.mrb[161].mxu1  ;;  %v9971_v58 = vpop.f32.mrb[157].mxu0 }
0x16f7   : > { %v9944_v31 = vadd.f32 %v9943_v13, %v9942_v22  ;;  %v9972_v63 = vadd.f32 %v9971_v58, %v9970_v34  ;;  %v9945_v10 = vpop.f32.mrb[162].mxu1  ;;  %v9973_v19 = vpop.f32.mrb[158].mxu0  ;;  %v4163_v22 = vld [vmem:[%s15566_s29 + $0x18] sm:$0xff] }
0x16f8   : > { %v9946_v56 = vpop.f32.mrb[163].mxu1  ;;  %v9974_v47 = vpop.f32.mrb[159].mxu0 }
0x16f9   : > { %v8189_v11 = vadd.f32 %v9944_v31, %v14528_v23  ;;  %v9947_v44 = vadd.f32 %v9946_v56, %v9945_v10  ;;  %v9975_v42 = vadd.f32 %v9974_v47, %v9973_v19 }
0x16fb   : > { %v8238_v32 = vadd.f32 %v9972_v63, %v8189_v11  ;;  %v8192_v18 = vadd.f32 %v9947_v44, %v14530_v48  ;;  %v14994_v11 = vrot.slane %v4163_v22, %v11724_v24  ;;  %v14997_v44 = vrot.slane %v4163_v22, %v11752_v53 }
0x16fd   : > { %v8241_v4 = vadd.f32 %v9975_v42, %v8192_v18 }
0x1706   : > { %v9948_v39 = vpop.f32.mrb[164].mxu1  ;;  %v9976_v61 = vpop.f32.mrb[160].mxu0 }
0x1707   : > { %v9949_v37 = vpop.f32.mrb[165].mxu1  ;;  %v9977_v0 = vpop.f32.mrb[161].mxu0 }
0x1708   : > { %v9950_v52 = vadd.f32 %v9949_v37, %v9948_v39  ;;  %v9951_v26 = vpop.f32.mrb[166].mxu1  ;;  %v9978_v38 = vadd.f32 %v9977_v0, %v9976_v61  ;;  %v9979_v29 = vpop.f32.mrb[162].mxu0  ;;  %v15656_v39 = vld [vmem:[#allocation93_spill] sm:$0xff]  ;;  %v15657_v37 = vld [vmem:[#allocation95_spill] sm:$0xff]  ;;  %v15008_v0 = vrot.slane %v4163_v22, %v12136_v30 }
0x1709   : > { %v9952_v33 = vpop.f32.mrb[167].mxu1  ;;  %v9980_v17 = vpop.f32.mrb[163].mxu0  ;;  %v5325_v61 = vadd.f32 %v15656_v39, %v14994_v11 }
0x170a   : > { %v8197_v27 = vadd.f32 %v9950_v52, %v14545_v2  ;;  %v9953_v21 = vadd.f32 %v9952_v33, %v9951_v26  ;;  %v9981_v23 = vadd.f32 %v9980_v17, %v9979_v29  ;;  %v5327_v52 = vadd.f32 %v15657_v37, %v14997_v44 }
0x170b   : > { %v15011_v26 = vrot.slane %v4163_v22, %v12207_v14  ;;  %v15017_v29 = vrot.slane %v4163_v22, %v15582_v50  ;;  %v15020_v33 = vrot.slane %v4163_v22, %v15584_v60  ;;  %v15661_v50 = vld [vmem:[#allocation102_spill] sm:$0xff]  ;;  %v15662_v60 = vld [vmem:[#allocation104_spill] sm:$0xff] }
0x170c   : > { %v8246_v55 = vadd.f32 %v9978_v38, %v8197_v27  ;;  %v8200_v36 = vadd.f32 %v9953_v21, %v14562_v46  ;;  %v15014_v38 = vrot.slane %v4163_v22, %v15580_v1  ;;  %v15023_v27 = vrot.slane %v4163_v22, %v12283_v25  ;;  %v15663_v25 = vld [vmem:[#allocation106_spill] sm:$0xff]  ;;  %v15670_v22 = vld [vmem:[#allocation120_spill] sm:$0xff] }
0x170d   : > { %v5526_v21 = vmax.f32 %v5325_v61, 0.0  ;;  %v5527_v17 = vmax.f32 %v5327_v52, 0.0 }
0x170e   : > { %v8249_v59 = vadd.f32 %v9981_v23, %v8200_v36  ;;  %v15658_v23 = vld [vmem:[#allocation97_spill] sm:$0xff]  ;;  %v15659_v36 = vld [vmem:[#allocation99_spill] sm:$0xff] }
0x1716   : > { %v9998_v48 = vpop.f32.mrb[168].mxu1  ;;  %v10026_v9 = vpop.f32.mrb[164].mxu0 }
0x1717   : > { %v9999_v57 = vpop.f32.mrb[169].mxu1  ;;  %v10027_v62 = vpop.f32.mrb[165].mxu0 }
0x1718   : > { %v10000_v5 = vadd.f32 %v9999_v57, %v9998_v48  ;;  %v10001_v28 = vpop.f32.mrb[170].mxu1  ;;  %v10028_v8 = vadd.f32 %v10027_v62, %v10026_v9  ;;  %v10029_v7 = vpop.f32.mrb[166].mxu0  ;;  %v15660_v48 = vld [vmem:[#allocation100_spill] sm:$0xff]  ;;  %v5380_v57 = vadd.f32 %v15661_v50, %v15011_v26  ;;  %v5384_v62 = vadd.f32 %v15663_v25, %v15011_v26 }
0x1719   : > { %v10002_v40 = vpop.f32.mrb[171].mxu1  ;;  %v10030_v49 = vpop.f32.mrb[167].mxu0  ;;  %v5378_v9 = vadd.f32 %v15660_v48, %v15008_v0 }
0x171a   : > { %v8287_v41 = vadd.f32 %v10000_v5, %v8238_v32  ;;  %v10003_v15 = vadd.f32 %v10002_v40, %v10001_v28  ;;  %v10031_v2 = vadd.f32 %v10030_v49, %v10029_v7  ;;  %v5382_v5 = vadd.f32 %v15662_v60, %v15008_v0  ;;  %v15664_v28 = vld [vmem:[#allocation109_spill] sm:$0xff]  ;;  %v15665_v7 = vld [vmem:[#allocation111_spill] sm:$0xff] }
0x171b   : > { %v5433_v40 = vadd.f32 %v15665_v7, %v15017_v29  ;;  %v15667_v49 = vld [vmem:[#allocation115_spill] sm:$0xff]  ;;  %v5561_v61 = vmax.f32 %v5384_v62, 0.0 }
0x171c   : > { %v14986_v16 = vadd.f32 %v10028_v8, %v8287_v41  ;;  %v8290_v54 = vadd.f32 %v10003_v15, %v8241_v4  ;;  %v5431_v8 = vadd.f32 %v15664_v28, %v15014_v38  ;;  %v15666_v41 = vld [vmem:[#allocation113_spill] sm:$0xff]  ;;  %v5560_v39 = vmax.f32 %v5382_v5, 0.0 }
0x171d   : > { %v5435_v15 = vadd.f32 %v15666_v41, %v15014_v38  ;;  %v5531_v52 = vmax.f32 %v5433_v40, 0.0 }
0x171e   : > { %v14988_v6 = vadd.f32 %v10031_v2, %v8290_v54  ;;  %v10004_v46 = vpop.f32.mrb[172].mxu1  ;;  %v10032_v3 = vpop.f32.mrb[168].mxu0  ;;  %v5437_v2 = vadd.f32 %v15667_v49, %v15017_v29  ;;  %v15668_v54 = vld [vmem:[#allocation116_spill] sm:$0xff]  ;;  %v5530_v37 = vmax.f32 %v5431_v8, 0.0 }
0x171f   : > { %v10005_v45 = vpop.f32.mrb[173].mxu1  ;;  %v10033_v13 = vpop.f32.mrb[169].mxu0  ;;  %v10912_v49 = vld [vmem:[%s15390_s16 + $0x780] sm:$0xff]  }
0x1720   : > { %v10006_v34 = vadd.f32 %v10005_v45, %v10004_v46  ;;  %v10007_v58 = vpop.f32.mrb[174].mxu1  ;;  %v10034_v31 = vadd.f32 %v10033_v13, %v10032_v3  ;;  %v10035_v63 = vpop.f32.mrb[170].mxu0  ;;  %v5484_v46 = vadd.f32 %v15668_v54, %v15020_v33  ;;  %v15669_v3 = vld [vmem:[#allocation118_spill] sm:$0xff] }
0x1721   : > { %v10008_v10 = vpop.f32.mrb[175].mxu1  ;;  %v10036_v47 = vpop.f32.mrb[171].mxu0  ;;  %v5486_v45 = vadd.f32 %v15669_v3, %v15023_v27  ;;  %v15671_v13 = vld [vmem:[#allocation122_spill] sm:$0xff]  ;;  %v10913_v3 = vld [vmem:[%s15390_s16 + $0x748] sm:$0xff]  }
0x1722   : > { %v8295_v19 = vadd.f32 %v10006_v34, %v8246_v55  ;;  %v10009_v56 = vadd.f32 %v10008_v10, %v10007_v58  ;;  %v10037_v42 = vadd.f32 %v10036_v47, %v10035_v63  ;;  %v5329_v55 = vadd.f32 %v15658_v23, %v14994_v11  ;;  %v15672_v10 = vld [vmem:[#allocation101_spill] sm:$0xff] }
0x1723   : > { %v5488_v34 = vadd.f32 %v15670_v22, %v15020_v33  ;;  %v5490_v58 = vadd.f32 %v15671_v13, %v15023_v27  ;;  %v5562_v23 = vmax.f32 %v5435_v15, 0.0  ;;  %v5532_v48 = vmax.f32 %v5484_v46, 0.0 }
0x1724   : > { %v14999_v32 = vadd.f32 %v10034_v31, %v8295_v19  ;;  %v8298_v18 = vadd.f32 %v10009_v56, %v8249_v59  ;;  %v5331_v59 = vadd.f32 %v15659_v36, %v14997_v44  ;;  %v5558_v31 = vmax.f32 %v5329_v55, 0.0  ;;  %v15673_v56 = vld [vmem:[#allocation103_spill] sm:$0xff] }
0x1725   : > { %v15055_v19 = vadd.f32 %v15672_v10, %v14994_v11  ;;  %v15059_v47 = vadd.f32 %v15673_v56, %v14997_v44  ;;  %v5563_v36 = vmax.f32 %v5437_v2, 0.0  ;;  %v5533_v50 = vmax.f32 %v5486_v45, 0.0  ;;  %v10914_v45 = vld [vmem:[%s15390_s16 + $0x7c8] sm:$0xff]  }
0x1726   : > { %v15001_v4 = vadd.f32 %v10037_v42, %v8298_v18  ;;  %v5559_v63 = vmax.f32 %v5331_v59, 0.0  ;;  %v5528_v42 = vmax.f32 %v5378_v9, 0.0  ;;  %v5529_v18 = vmax.f32 %v5380_v57, 0.0 }
0x1727   : > { %v5564_v55 = vmax.f32 %v5488_v34, 0.0  ;;  %v5565_v59 = vmax.f32 %v5490_v58, 0.0 }
0x172d   : > { %v15061_v60 = vpop.permute.xlu1 %5788 }
0x172e   : > { %v5807_v28 = vmul.f32 %v15061_v60, %v5527_v17  ;;  %v5809_v9 = vmul.f32 %v15061_v60, %v5529_v18  ;;  %v5806_v5 = vmul.f32 %v15061_v60, %v5526_v21  ;;  %v5808_v8 = vmul.f32 %v15061_v60, %v5528_v42  ;;  %v10911_v17 = vld [vmem:[%s15390_s16 + $0x700] sm:$0xff]   ;;  %v15674_v42 = vld [vmem:[#allocation105_spill] sm:$0xff] }
0x172f   : > { %v15063_v25 = vpop.permute.xlu0 %5793  ;;  %v15080_v2 = vmul.f32 %v15061_v60, %v5531_v52  ;;  %v15092_v22 = vmul.f32 %v15061_v60, %v5533_v50  ;;  %v15100_v58 = vmul.f32 %v15061_v60, %v5530_v37  ;;  %v15108_v10 = vmul.f32 %v15061_v60, %v5532_v48  ;;  %v10915_v37 = vld [vmem:[%s15390_s16 + $0x708] sm:$0xff]  }
0x1730   : > { %v5815_v7 = vmul.f32 %v15063_v25, %v5559_v63  ;;  %v5817_v57 = vmul.f32 %v15063_v25, %v5561_v61  ;;  %v5814_v62 = vmul.f32 %v15063_v25, %v5558_v31  ;;  %v5816_v40 = vmul.f32 %v15063_v25, %v5560_v39  ;;  %v15675_v39 = vld [vmem:[#allocation107_spill] sm:$0xff]  ;;  %v10916_v52 = vld [vmem:[%s15390_s16 + $0x788] sm:$0xff]  }
0x1731   : > { %v15083_v21 = vmul.f32 %v15063_v25, %v5563_v36  ;;  %v15095_v34 = vmul.f32 %v15063_v25, %v5565_v59  ;;  %v15103_v31 = vmul.f32 %v15063_v25, %v5562_v23  ;;  %v15111_v56 = vmul.f32 %v15063_v25, %v5564_v55  ;;  %v15676_v36 = vld [vmem:[#allocation108_spill] sm:$0xff]  ;;  %v10918_v55 = vld [vmem:[%s15390_s16 + $0x7d0] sm:$0xff]  }
0x1732   : > { %v5863_v41 = vpack.c.bf16 %v5815_v7, %v5807_v28  ;;  %v5865_v15 = vpack.c.bf16 %v5817_v57, %v5809_v9  ;;  %v5862_v54 = vpack.c.bf16 %v5814_v62, %v5806_v5  ;;  %v5864_v46 = vpack.c.bf16 %v5816_v40, %v5808_v8  ;;  %v15678_v28 = vld [vmem:[#allocation112_spill] sm:$0xff]  ;;  %v15679_v9 = vld [vmem:[#allocation114_spill] sm:$0xff]  ;;  %v15680_v5 = vld [vmem:[#allocation117_spill] sm:$0xff] }
0x1733   : > { %v5867_v13 = vpack.c.bf16 %v15083_v21, %v15080_v2  ;;  %v5869_v63 = vpack.c.bf16 %v15095_v34, %v15092_v22  ;;  %v5339_v18 = vadd.f32 %v15674_v42, %v14994_v11  ;;  %v5341_v61 = vadd.f32 %v15675_v39, %v14997_v44  ;;  %v15677_v11 = vld [vmem:[#allocation110_spill] sm:$0xff]  ;;  %v15681_v8 = vld [vmem:[#allocation119_spill] sm:$0xff]  ;;  %v10930_v2 = vld [vmem:[%s15390_s16 + $0x7e8] sm:$0xff]  }
0x1734   : > { %8578 = vmatprep.mubr.bf16.mxu1 %v5863_v41  ;;  %8627 = vmatprep.mubr.bf16.mxu0 %v5865_v15  ;;  %v5866_v23 = vpack.c.bf16 %v15103_v31, %v15100_v58  ;;  %v5388_v48 = vadd.f32 %v15676_v36, %v15008_v0  ;;  %v5390_v50 = vadd.f32 %v15677_v11, %v15011_v26  ;;  %v10917_v44 = vld [vmem:[%s15390_s16 + $0x750] sm:$0xff]   ;;  %v15682_v41 = vld [vmem:[#allocation121_spill] sm:$0xff] }
0x1735   : > { %8579 = vmatmul.mubr.bf16.vlgmr.msra.gmra.mrb[192].mxu1 %v5862_v54  ;;  %8628 = vmatmul.mubr.bf16.vlgmr.msra.gmra.mrb[188].mxu0 %v5864_v46  ;;  %v5868_v59 = vpack.c.bf16 %v15111_v56, %v15108_v10  ;;  %v5392_v7 = vadd.f32 %v15678_v28, %v15008_v0  ;;  %v5394_v57 = vadd.f32 %v15679_v9, %v15011_v26  ;;  %v15684_v54 = vld [vmem:[#allocation124_spill] sm:$0xff]  ;;  %v5590_v0 = vmax.f32 %v15055_v19, 0.0  ;;  %v15686_v19 = vld [vmem:[#allocation127_spill] sm:$0xff]  ;;  %v10933_v22 = vld [vmem:[%s15390_s16 + $0x770] sm:$0xff]  }
0x1736   : > { %10207 = vmatpush3.bf16.msra.mxu1 %v10911_v17  ;;  %10235 = vmatpush3.bf16.msra.mxu0 %v10912_v49  ;;  %v5441_v62 = vadd.f32 %v15680_v5, %v15014_v38  ;;  %v5443_v40 = vadd.f32 %v15681_v8, %v15017_v29  ;;  %v15147_v15 = vadd.f32 %v15682_v41, %v15014_v38  ;;  %v15683_v17 = vld [vmem:[#allocation123_spill] sm:$0xff]  ;;  %v5591_v26 = vmax.f32 %v15059_v47, 0.0  ;;  %v10919_v38 = vld [vmem:[%s15390_s16 + $0x710] sm:$0xff]   ;;  %v10932_v34 = vld [vmem:[%s15390_s16 + $0x7a8] sm:$0xff]  }
0x1737   : > { %10208 = vmatprep.subr.bf16.mxu1 %v10913_v3  ;;  %10236 = vmatprep.subr.bf16.mxu0 %v10914_v45  ;;  %v5447_v49 = vadd.f32 %v15683_v17, %v15017_v29  ;;  %v15153_v46 = vadd.f32 %v15684_v54, %v15020_v33  ;;  %v5622_v3 = vmax.f32 %v5339_v18, 0.0  ;;  %v15685_v45 = vld [vmem:[#allocation125_spill] sm:$0xff]  ;;  %v10920_v29 = vld [vmem:[%s15390_s16 + $0x790] sm:$0xff]   ;;  %v5623_v39 = vmax.f32 %v5341_v61, 0.0  ;;  %v10921_v18 = vld [vmem:[%s15390_s16 + $0x758] sm:$0xff]  }
0x1738   : > { %v5496_v42 = vadd.f32 %v15685_v45, %v15023_v27  ;;  %v5592_v36 = vmax.f32 %v5388_v48, 0.0  ;;  %v5593_v11 = vmax.f32 %v5390_v50, 0.0  ;;  %v5500_v47 = vadd.f32 %v15686_v19, %v15023_v27  ;;  %v15687_v27 = vld [vmem:[#allocation126_spill] sm:$0xff]  ;;  %v10926_v19 = vld [vmem:[%s15390_s16 + $0x7e0] sm:$0xff]  }
0x1739   : > { %v5625_v28 = vmax.f32 %v5394_v57, 0.0  ;;  %v5594_v9 = vmax.f32 %v5441_v62, 0.0  ;;  %v5595_v5 = vmax.f32 %v5443_v40, 0.0  ;;  %v5626_v61 = vmax.f32 %v15147_v15, 0.0  ;;  %v10923_v40 = vld [vmem:[%s15390_s16 + $0x718] sm:$0xff]  }
0x173a   : > { %10209 = vmatpush3.bf16.msra.mxu1 %v10915_v37  ;;  %10237 = vmatpush3.bf16.msra.mxu0 %v10916_v52  ;;  %v10922_v37 = vld [vmem:[%s15390_s16 + $0x7d8] sm:$0xff]   ;;  %v5624_v52 = vmax.f32 %v5392_v7, 0.0  ;;  %v5627_v48 = vmax.f32 %v5447_v49, 0.0  ;;  %v5596_v50 = vmax.f32 %v15153_v46, 0.0  ;;  %v5597_v41 = vmax.f32 %v5496_v42, 0.0 }
0x173b   : > { %10210 = vmatprep.subr.bf16.mxu1 %v10917_v44  ;;  %10238 = vmatprep.subr.bf16.mxu0 %v10918_v55  ;;  %v5498_v44 = vadd.f32 %v15687_v27, %v15020_v33  ;;  %v5629_v15 = vmax.f32 %v5500_v47, 0.0 }
0x173e   : > { %10211 = vmatpush3.bf16.msra.mxu1 %v10919_v38  ;;  %10239 = vmatpush3.bf16.msra.mxu0 %v10920_v29  ;;  %v10924_v29 = vld [vmem:[%s15390_s16 + $0x798] sm:$0xff]  }
0x173f   : > { %v15177_v55 = vpop.permute.xlu0 %5803  ;;  %v15179_v8 = vpop.permute.xlu1 %5798  ;;  %10212 = vmatprep.subr.bf16.mxu1 %v10921_v18  ;;  %10240 = vmatprep.subr.bf16.mxu0 %v10922_v37  ;;  %v10927_v37 = vld [vmem:[%s15390_s16 + $0x720] sm:$0xff]  }
0x1740   : > { %v5823_v7 = vmul.f32 %v15179_v8, %v5591_v26  ;;  %v5831_v57 = vmul.f32 %v15177_v55, %v5623_v39  ;;  %v5825_v62 = vmul.f32 %v15179_v8, %v5593_v11  ;;  %v5833_v33 = vmul.f32 %v15177_v55, %v5625_v28 }
0x1741   : > { %v5822_v17 = vmul.f32 %v15179_v8, %v5590_v0  ;;  %v5830_v49 = vmul.f32 %v15177_v55, %v5622_v3  ;;  %v5824_v46 = vmul.f32 %v15179_v8, %v5592_v36  ;;  %v5832_v26 = vmul.f32 %v15177_v55, %v5624_v52  ;;  %v10925_v36 = vld [vmem:[%s15390_s16 + $0x760] sm:$0xff]  }
0x1742   : > { %v5895_v54 = vpack.c.bf16 %v5831_v57, %v5823_v7  ;;  %v5827_v45 = vmul.f32 %v15179_v8, %v5595_v5  ;;  %v5897_v42 = vpack.c.bf16 %v5833_v33, %v5825_v62  ;;  %v5835_v39 = vmul.f32 %v15177_v55, %v5627_v48  ;;  %10213 = vmatpush3.bf16.msra.mxu1 %v10923_v40  ;;  %v10936_v7 = vld [vmem:[%s15390_s16 + $0x7b0] sm:$0xff]   ;;  %v10938_v57 = vld [vmem:[%s15390_s16 + $0x7f8] sm:$0xff]  }
0x1743   : > { %v5894_v38 = vpack.c.bf16 %v5830_v49, %v5822_v17  ;;  %v5829_v11 = vmul.f32 %v15179_v8, %v5597_v41  ;;  %v5628_v0 = vmax.f32 %v5498_v44, 0.0  ;;  %v5896_v3 = vpack.c.bf16 %v5832_v26, %v5824_v46  ;;  %10241 = vmatpush3.bf16.msra.mxu0 %v10924_v29  ;;  %10214 = vmatprep.subr.bf16.mxu1 %v10925_v36  ;;  %v10935_v44 = vld [vmem:[%s15390_s16 + $0x730] sm:$0xff]   ;;  %v10937_v41 = vld [vmem:[%s15390_s16 + $0x778] sm:$0xff]  }
0x1744   : > { %8586 = vmatprep.mubr.bf16.mxu1 %v5895_v54  ;;  %v5837_v47 = vmul.f32 %v15177_v55, %v5629_v15  ;;  %v5826_v18 = vmul.f32 %v15179_v8, %v5594_v9  ;;  %8635 = vmatprep.mubr.bf16.mxu0 %v5897_v42  ;;  %v5899_v52 = vpack.c.bf16 %v5835_v39, %v5827_v45  ;;  %v10929_v9 = vld [vmem:[%s15390_s16 + $0x768] sm:$0xff]   ;;  %v10939_v62 = vld [vmem:[%s15390_s16 + $0x738] sm:$0xff]  }
0x1745   : > { %8587 = vmatmul.mubr.bf16.gmra.mrb[196].mxu1 %v5894_v38  ;;  %v5834_v28 = vmul.f32 %v15177_v55, %v5626_v61  ;;  %v5828_v5 = vmul.f32 %v15179_v8, %v5596_v50  ;;  %8636 = vmatmul.mubr.bf16.gmra.mrb[192].mxu0 %v5896_v3  ;;  %v5836_v27 = vmul.f32 %v15177_v55, %v5628_v0  ;;  %v10928_v61 = vld [vmem:[%s15390_s16 + $0x7a0] sm:$0xff]   ;;  %v10940_v40 = vld [vmem:[%s15390_s16 + $0x7b8] sm:$0xff]  }
0x1746   : > { %8676 = vmatprep.mubr.bf16.mxu1 %v5867_v13  ;;  %v5901_v48 = vpack.c.bf16 %v5837_v47, %v5829_v11  ;;  %8725 = vmatprep.mubr.bf16.mxu0 %v5869_v63  ;;  %v10931_v13 = vld [vmem:[%s15390_s16 + $0x728] sm:$0xff]   ;;  %v10934_v63 = vld [vmem:[%s15390_s16 + $0x7f0] sm:$0xff]  }
0x1747   : > { %v5898_v50 = vpack.c.bf16 %v5834_v28, %v5826_v18  ;;  %10242 = vmatprep.subr.bf16.mxu0 %v10926_v19  ;;  %v5900_v21 = vpack.c.bf16 %v5836_v27, %v5828_v5  ;;  %10215 = vmatpush3.bf16.msra.mxu1 %v10927_v37 }
0x1748   : > { %10216 = vmatprep.subr.bf16.mxu1 %v10929_v9  ;;  %10243 = vmatpush3.bf16.msra.mxu0 %v10928_v61 }
0x1749   : > { %10244 = vmatprep.subr.bf16.mxu0 %v10930_v2 }
0x174b   : > { %10217 = vmatpush3.bf16.msra.mxu1 %v10931_v13 }
0x174c   : > { %10218 = vmatprep.subr.bf16.mxu1 %v10933_v22  ;;  %10245 = vmatpush3.bf16.msra.mxu0 %v10932_v34 }
0x174d   : > { %10246 = vmatprep.subr.bf16.mxu0 %v10934_v63 }
0x174f   : > { %10219 = vmatpush3.bf16.msra.mxu1 %v10935_v44 }
0x1750   : > { %10220 = vmatprep.subr.bf16.mxu1 %v10937_v41  ;;  %10247 = vmatpush3.bf16.msra.mxu0 %v10936_v7 }
0x1751   : > { %10248 = vmatprep.subr.bf16.mxu0 %v10938_v57 }
0x1753   : > { %10221 = vmatpush3.bf16.msra.mxu1 %v10939_v62 }
0x1754   : > { %10249 = vmatpush3.bf16.msra.mxu0 %v10940_v40 }
0x1756   : > { %8677 = vmatmul.mubr.bf16.vlgmr.msra.gmra.mrb[200].mxu1 %v5866_v23 }
0x1757   : > { %8684 = vmatprep.mubr.bf16.mxu1 %v5899_v52  ;;  %8726 = vmatmul.mubr.bf16.vlgmr.msra.gmra.mrb[196].mxu0 %v5868_v59 }
0x1758   : > { %8733 = vmatprep.mubr.bf16.mxu0 %v5901_v48 }
0x175e   : > { %8685 = vmatmul.mubr.bf16.gmra.mrb[204].mxu1 %v5898_v50 }
0x175f   : > { %8734 = vmatmul.mubr.bf16.gmra.mrb[200].mxu0 %v5900_v21 }
0x177d   : > { %v10054_v15 = vpop.f32.mrb[176].mxu1  ;;  %v10082_v33 = vpop.f32.mrb[172].mxu0 }
0x177e   : > { %v10055_v17 = vpop.f32.mrb[177].mxu1  ;;  %v10083_v49 = vpop.f32.mrb[173].mxu0 }
0x177f   : > { %v10056_v54 = vadd.f32 %v10055_v17, %v10054_v15  ;;  %v10084_v46 = vadd.f32 %v10083_v49, %v10082_v33  ;;  %v10057_v26 = vpop.f32.mrb[178].mxu1  ;;  %v10085_v45 = vpop.f32.mrb[174].mxu0 }
0x1780   : > { %v10058_v42 = vpop.f32.mrb[179].mxu1  ;;  %v10086_v38 = vpop.f32.mrb[175].mxu0 }
0x1781   : > { %v8385_v58 = vadd.f32 %v10056_v54, %v14986_v16  ;;  %v10059_v31 = vadd.f32 %v10058_v42, %v10057_v26  ;;  %v10087_v23 = vadd.f32 %v10086_v38, %v10085_v45 }
0x1783   : > { %v8434_v29 = vadd.f32 %v10084_v46, %v8385_v58  ;;  %v8388_v10 = vadd.f32 %v10059_v31, %v14988_v6 }
0x1785   : > { %v8437_v56 = vadd.f32 %v10087_v23, %v8388_v10 }
0x178f   : > { %v10088_v39 = vpop.f32.mrb[176].mxu0 }
0x1790   : > { %v10060_v59 = vpop.f32.mrb[180].mxu1  ;;  %v10089_v0 = vpop.f32.mrb[177].mxu0 }
0x1791   : > { %v10061_v11 = vpop.f32.mrb[181].mxu1  ;;  %v10090_v36 = vadd.f32 %v10089_v0, %v10088_v39  ;;  %v10091_v47 = vpop.f32.mrb[178].mxu0 }
0x1792   : > { %v10062_v3 = vadd.f32 %v10061_v11, %v10060_v59  ;;  %v10063_v19 = vpop.f32.mrb[182].mxu1  ;;  %v10092_v37 = vpop.f32.mrb[179].mxu0 }
0x1793   : > { %v10064_v18 = vpop.f32.mrb[183].mxu1  ;;  %v10093_v16 = vadd.f32 %v10092_v37, %v10091_v47 }
0x1794   : > { %v8393_v52 = vadd.f32 %v10062_v3, %v14999_v32  ;;  %v10065_v28 = vadd.f32 %v10064_v18, %v10063_v19 }
0x1796   : > { %v8442_v5 = vadd.f32 %v10090_v36, %v8393_v52  ;;  %v8396_v9 = vadd.f32 %v10065_v28, %v15001_v4 }
0x1798   : > { %v8445_v48 = vadd.f32 %v10093_v16, %v8396_v9 }
0x179f   : > { %v10110_v6 = vpop.f32.mrb[184].mxu1 }
0x17a0   : > { %v10138_v27 = vpop.f32.mrb[180].mxu0  ;;  %v10111_v61 = vpop.f32.mrb[185].mxu1 }
0x17a1   : > { %v10139_v50 = vpop.f32.mrb[181].mxu0  ;;  %v10112_v2 = vadd.f32 %v10111_v61, %v10110_v6  ;;  %v10113_v13 = vpop.f32.mrb[186].mxu1 }
0x17a2   : > { %v10140_v21 = vadd.f32 %v10139_v50, %v10138_v27  ;;  %v10141_v22 = vpop.f32.mrb[182].mxu0  ;;  %v10114_v34 = vpop.f32.mrb[187].mxu1 }
0x17a3   : > { %v10142_v63 = vpop.f32.mrb[183].mxu0  ;;  %v8483_v44 = vadd.f32 %v10112_v2, %v8434_v29  ;;  %v10115_v41 = vadd.f32 %v10114_v34, %v10113_v13 }
0x17a4   : > { %v10143_v7 = vadd.f32 %v10142_v63, %v10141_v22 }
0x17a5   : > { %v8532_v32 = vadd.f32 %v10140_v21, %v8483_v44  ;;  %v8486_v57 = vadd.f32 %v10115_v41, %v8437_v56 }
0x17a7   : > { %v8535_v62 = vadd.f32 %v10143_v7, %v8486_v57  ;;  %v10116_v40 = vpop.f32.mrb[188].mxu1  ;;  %v687_v57 = vld [vmem:[%s15381_s7 + $0x10] sm:$0xff] }
0x17a8   : > { %v10144_v15 = vpop.f32.mrb[184].mxu0  ;;  %v10117_v4 = vpop.f32.mrb[189].mxu1 }
0x17a9   : > { %v10145_v33 = vpop.f32.mrb[185].mxu0  ;;  %v10118_v17 = vadd.f32 %v10117_v4, %v10116_v40  ;;  %v10119_v54 = vpop.f32.mrb[190].mxu1 }
0x17aa   : > { %v10146_v49 = vadd.f32 %v10145_v33, %v10144_v15  ;;  %v10147_v46 = vpop.f32.mrb[186].mxu0  ;;  %v10120_v26 = vpop.f32.mrb[191].mxu1  ;;  %v8745_v33 = vrot.slane %v687_v57, %v11724_v24 }
0x17ab   : > { %v10148_v45 = vpop.f32.mrb[187].mxu0  ;;  %v8491_v42 = vadd.f32 %v10118_v17, %v8442_v5  ;;  %v10121_v38 = vadd.f32 %v10120_v26, %v10119_v54 }
0x17ac   : > { %v10149_v58 = vadd.f32 %v10148_v45, %v10147_v46  ;;  %v8757_v45 = vrot.slane %v687_v57, %v11752_v53 }
0x17ad   : > { %v8540_v31 = vadd.f32 %v10146_v49, %v8491_v42  ;;  %v8494_v23 = vadd.f32 %v10121_v38, %v8445_v48 }
0x17ae   : > { %v8758_v24 = vmul.f32 %v8757_v45, %v14646_v35 }
0x17af   : > { %v8543_v29 = vadd.f32 %v10149_v58, %v8494_v23  ;;  %v15688_v23 = vld [vmem:[#allocation34_spill] sm:$0xff] }
0x1808   : > { %v10166_v10 = vpop.f32.mrb[192].mxu1  ;;  %v10194_v59 = vpop.f32.mrb[188].mxu0 }
0x1809   : > { %v10167_v56 = vpop.f32.mrb[193].mxu1  ;;  %v10195_v39 = vpop.f32.mrb[189].mxu0 }
0x180a   : > { %v10168_v11 = vadd.f32 %v10167_v56, %v10166_v10  ;;  %v10196_v0 = vadd.f32 %v10195_v39, %v10194_v59  ;;  %v10169_v3 = vpop.f32.mrb[194].mxu1  ;;  %v10197_v36 = vpop.f32.mrb[190].mxu0  ;;  %v8769_v56 = vrot.slane %v687_v57, %v12136_v30 }
0x180b   : > { %v10170_v19 = vpop.f32.mrb[195].mxu1  ;;  %v10198_v47 = vpop.f32.mrb[191].mxu0 }
0x180c   : > { %v8581_v18 = vadd.f32 %v10168_v11, %v8532_v32  ;;  %v10171_v37 = vadd.f32 %v10170_v19, %v10169_v3  ;;  %v10199_v52 = vadd.f32 %v10198_v47, %v10197_v36  ;;  %v8771_v30 = vmul.f32 %v8769_v56, %v15063_v25 }
0x180d   : > { %v8760_v25 = vmul.f32 %v8757_v45, %v14766_v20  ;;  %v8773_v20 = vmul.f32 %v8769_v56, %v15177_v55  ;;  %v8850_v55 = vld [vmem:[%s15297_s17] sm:$0xff] }
0x180e   : > { %v8630_v28 = vadd.f32 %v10196_v0, %v8581_v18  ;;  %v8584_v16 = vadd.f32 %v10171_v37, %v8535_v62  ;;  %v15689_v0 = vld [vmem:[#allocation129_spill] sm:$0xff]  ;;  %v8759_v18 = vmul.f32 %v8757_v45, %v14644_v12  ;;  %vm8854_vm14 = vcmp.gt.f32.partialorder %v8850_v55, 0.5 }
0x180f   : > { %v8747_v3 = vmul.f32 %v8745_v33, %v15689_v0 }
0x1810   : > { %v8633_v5 = vadd.f32 %v10199_v52, %v8584_v16 }
0x1818   : > { %v10172_v9 = vpop.f32.mrb[196].mxu1  ;;  %v10200_v6 = vpop.f32.mrb[192].mxu0 }
0x1819   : > { %v10173_v48 = vpop.f32.mrb[197].mxu1  ;;  %v10201_v61 = vpop.f32.mrb[193].mxu0 }
0x181a   : > { %v10174_v27 = vadd.f32 %v10173_v48, %v10172_v9  ;;  %v10175_v50 = vpop.f32.mrb[198].mxu1  ;;  %v10202_v2 = vadd.f32 %v10201_v61, %v10200_v6  ;;  %v10203_v21 = vpop.f32.mrb[194].mxu0  ;;  %v8770_v9 = vmul.f32 %v8769_v56, %v15061_v60 }
0x181b   : > { %v10176_v13 = vpop.f32.mrb[199].mxu1  ;;  %v10204_v63 = vpop.f32.mrb[195].mxu0 }
0x181c   : > { %v8589_v22 = vadd.f32 %v10174_v27, %v8540_v31  ;;  %v10177_v34 = vadd.f32 %v10176_v13, %v10175_v50  ;;  %v10205_v44 = vadd.f32 %v10204_v63, %v10203_v21  ;;  %v8748_v50 = vmul.f32 %v8745_v33, %v14256_v51  ;;  %v15690_v63 = vld [vmem:[#allocation31_spill] sm:$0xff] }
0x181e   : > { %v8638_v41 = vadd.f32 %v10202_v2, %v8589_v22  ;;  %v8592_v7 = vadd.f32 %v10177_v34, %v8543_v29  ;;  %v8746_v29 = vmul.f32 %v8745_v33, %v15688_v23 }
0x1820   : > { %v8641_v32 = vadd.f32 %v10205_v44, %v8592_v7  ;;  %v8749_v44 = vmul.f32 %v8745_v33, %v15690_v63  ;;  %v15691_v7 = vld [vmem:[#allocation27_spill] sm:$0xff]  ;;  %v8772_v33 = vmul.f32 %v8769_v56, %v15179_v8  ;;  %v8851_v8 = vld [vmem:[%s15297_s17 + $0x8] sm:$0xff] }
0x1821   : > { %vm8855_vm13 = vcmp.gt.f32.partialorder %v8851_v8, 0.5 }
0x1829   : > { %v10222_v62 = vpop.f32.mrb[200].mxu1 }
0x182a   : > { %v10223_v40 = vpop.f32.mrb[201].mxu1  ;;  %v10250_v15 = vpop.f32.mrb[196].mxu0 }
0x182b   : > { %v10224_v4 = vadd.f32 %v10223_v40, %v10222_v62  ;;  %v10225_v17 = vpop.f32.mrb[202].mxu1  ;;  %v10251_v49 = vpop.f32.mrb[197].mxu0 }
0x182c   : > { %v10226_v54 = vpop.f32.mrb[203].mxu1  ;;  %v10252_v26 = vadd.f32 %v10251_v49, %v10250_v15  ;;  %v10253_v42 = vpop.f32.mrb[198].mxu0  ;;  %v8761_v15 = vmul.f32 %v8757_v45, %v14764_v43  ;;  %v15694_v45 = vld [vmem:[#allocation29_spill] sm:$0xff] }
0x182d   : > { %v8679_v46 = vadd.f32 %v10224_v4, %v8630_v28  ;;  %v10227_v38 = vadd.f32 %v10226_v54, %v10225_v17  ;;  %v10254_v58 = vpop.f32.mrb[199].mxu0 }
0x182e   : > { %v10255_v59 = vadd.f32 %v10254_v58, %v10253_v42 }
0x182f   : > { %v8728_v31 = vadd.f32 %v10252_v26, %v8679_v46  ;;  %v8682_v10 = vadd.f32 %v10227_v38, %v8633_v5  ;;  %v15693_v46 = vld [vmem:[#allocation30_spill] sm:$0xff] }
0x1831   : > { %v8750_v39 = vadd.f32 %v8746_v29, %v8728_v31  ;;  %v8731_v11 = vadd.f32 %v10255_v59, %v8682_v10  ;;  %v10228_v36 = vpop.f32.mrb[204].mxu1  ;;  %v15696_v31 = vmov 0  }
0x1832   : > { %v10229_v19 = vpop.f32.mrb[205].mxu1  ;;  %v10256_v37 = vpop.f32.mrb[200].mxu0  ;;  %v8859_v23 = vsel %vm8855_vm13, 1, %v15696_v31  ;;  %v8858_v29 = vsel %vm8854_vm14, 1, %v15696_v31 }
0x1833   : > { %v8762_v47 = vadd.f32 %v8758_v24, %v8750_v39  ;;  %v8751_v53 = vadd.f32 %v8747_v3, %v8731_v11  ;;  %v10230_v52 = vadd.f32 %v10229_v19, %v10228_v36  ;;  %v10231_v28 = vpop.f32.mrb[206].mxu1  ;;  %v10257_v16 = vpop.f32.mrb[201].mxu0 }
0x1834   : > { %v10232_v5 = vpop.f32.mrb[207].mxu1  ;;  %v10258_v48 = vadd.f32 %v10257_v16, %v10256_v37  ;;  %v10259_v27 = vpop.f32.mrb[202].mxu0 }
0x1835   : > { %v8763_v6 = vadd.f32 %v8759_v18, %v8751_v53  ;;  %v8687_v35 = vadd.f32 %v10230_v52, %v8638_v41  ;;  %v10233_v61 = vadd.f32 %v10232_v5, %v10231_v28  ;;  %v10260_v2 = vpop.f32.mrb[203].mxu0  ;;  %v8774_v21 = vadd.f32 %v8770_v9, %v8762_v47  ;;  %v15692_v41 = vld [vmem:[#allocation28_spill] sm:$0xff] }
0x1836   : > { %v10261_v22 = vadd.f32 %v10260_v2, %v10259_v27 }
0x1837   : > { %v8736_v13 = vadd.f32 %v10258_v48, %v8687_v35  ;;  %v8690_v12 = vadd.f32 %v10233_v61, %v8641_v32  ;;  %v8775_v34 = vadd.f32 %v8771_v30, %v8763_v6  ;;  %v8778_v57 = vadd.f32 %v8774_v21, %v15691_v7  ;;  %v8852_v6 = vld [vmem:[%s15297_s17 + $0x10] sm:$0xff]  ;;  %v8853_v35 = vld [vmem:[%s15297_s17 + $0x18] sm:$0xff]  ;;  %s11331_s17 = scalar_lea.vmem %s11330_s26, 1024 }
0x1838   : > { %vm8856_vm15 = vcmp.gt.f32.partialorder %v8852_v6, 0.5  ;;  %vm8857_vm1 = vcmp.gt.f32.partialorder %v8853_v35, 0.5  ;;  %p11333_p5 = scmp.lt.s32.totalorder %s11331_s17, %s11325_s27 }
0x1839   : > { %v8752_v60 = vadd.f32 %v8748_v50, %v8736_v13  ;;  %v8739_v62 = vadd.f32 %v10261_v22, %v8690_v12  ;;  %v8779_v40 = vadd.f32 %v8775_v34, %v15692_v41  ;;  %v8782_v51 = vsel %vm958_vm0, %v8778_v57, 0.0 }
0x183a   : > { %8783 = vadd.xlane.f32.xlu1 %v8782_v51  ;;  %v8860_v48 = vsel %vm8856_vm15, 1, %v15696_v31  ;;  %v8861_v27 = vsel %vm8857_vm1, 1, %v15696_v31  ;;  %p11334_p10 = por %p11333_p5, %p11332_p9 }
0x183b   : > { %v8764_v4 = vadd.f32 %v8760_v25, %v8752_v60  ;;  %v8753_v17 = vadd.f32 %v8749_v44, %v8739_v62  ;;  %v8785_v32 = vsel %vm958_vm0, %v8779_v40, 0.0  ;;  %v11152_v62 = vld [vmem:[%s15381_s7 + $0x8] sm:$0xff] }
0x183c   : > { %8786 = vadd.xlane.f32.xlu0 %v8785_v32  ;;  %v8837_v41 = vrot.slane %v11152_v62, %v12207_v14  ;;  %p11335_p0 = pnand %p11334_p10, %p11328_p6 }
0x183d   : > { %v8765_v49 = vadd.f32 %v8761_v15, %v8753_v17  ;;  %v8776_v54 = vadd.f32 %v8772_v33, %v8764_v4  ;;  %v8845_v4 = vrot.slane %v11152_v62, %v15580_v1 }
0x183f   : > { %v8780_v26 = vadd.f32 %v8776_v54, %v15693_v46  ;;  %v8777_v42 = vadd.f32 %v8773_v20, %v8765_v49 }
0x1841   : > { %v8788_v43 = vsel %vm958_vm0, %v8780_v26, 0.0  ;;  %v8781_v38 = vadd.f32 %v8777_v42, %v15694_v45 }
0x1842   : > { %8789 = vadd.xlane.f32.xlu0 %v8788_v43 }
0x1843   : > { %v8791_v58 = vsel %vm958_vm0, %v8781_v38, 0.0 }
0x1844   : > { %8792 = vadd.xlane.f32.xlu1 %v8791_v58 }
0x1855   : > { %8866 = vperm.xlu1 %10554, %v8859_v23  }
0x1858   : > { %8863 = vperm.xlu0 %10555, %v8858_v29  }
0x18c7   : > { %v8784_v10 = vpop.xlane.xlu1 %8783 }
0x18c8   : > { %v8794_v59 = vmul.f32 0.03125, %v8784_v10 }
0x18c9   : > { %v8787_v56 = vpop.xlane.xlu0 %8786 }
0x18ca   : > { %v8795_v39 = vmul.f32 0.03125, %v8787_v56  ;;  %v8798_v24 = vsub.f32 %v8778_v57, %v8794_v59 }
0x18cc   : > { %v8799_v11 = vsub.f32 %v8779_v40, %v8795_v39  ;;  %v8802_v0 = vmul.f32 %v8798_v24, %v8798_v24 }
0x18ce   : > { %v8803_v3 = vmul.f32 %v8799_v11, %v8799_v11  ;;  %v8806_v36 = vsel %vm958_vm0, %v8802_v0, 0.0 }
0x18cf   : > { %v8790_v19 = vpop.xlane.xlu0 %8789  ;;  %8807 = vadd.xlane.f32.xlu0 %v8806_v36 }
0x18d0   : > { %v8796_v47 = vmul.f32 0.03125, %v8790_v19  ;;  %v8809_v53 = vsel %vm958_vm0, %v8803_v3, 0.0 }
0x18d1   : > { %8810 = vadd.xlane.f32.xlu1 %v8809_v53  ;;  %v8793_v18 = vpop.xlane.xlu1 %8792 }
0x18d2   : > { %v8800_v37 = vsub.f32 %v8780_v26, %v8796_v47  ;;  %v8797_v52 = vmul.f32 0.03125, %v8793_v18 }
0x18d4   : > { %v8801_v28 = vsub.f32 %v8781_v38, %v8797_v52  ;;  %v8804_v16 = vmul.f32 %v8800_v37, %v8800_v37 }
0x18d5   : > { %v8867_v50 = vpop.permute.xlu1 %8866 }
0x18d6   : > { %v8812_v5 = vsel %vm958_vm0, %v8804_v16, 0.0  ;;  %v8805_v9 = vmul.f32 %v8801_v28, %v8801_v28  ;;  %vm8875_vm3 = vcmp.eq.s32.totalorder %v8867_v50, 1 }
0x18d7   : > { %8813 = vadd.xlane.f32.xlu0 %v8812_v5  ;;  %v8864_v61 = vpop.permute.xlu0 %8863 }
0x18d8   : > { %v8815_v30 = vsel %vm958_vm0, %v8805_v9, 0.0  ;;  %vm8874_vm2 = vcmp.eq.s32.totalorder %v8864_v61, 1 }
0x18d9   : > { %8816 = vadd.xlane.f32.xlu1 %v8815_v30 }
0x18ea   : > { %8869 = vperm.xlu1 %10554, %v8860_v48  }
0x18ed   : > { %8872 = vperm.xlu0 %10555, %v8861_v27  }
0x195c   : > { %v8808_v2 = vpop.xlane.xlu0 %8807 }
0x195d   : > { %v8818_v21 = vmul.f32 0.03125, %v8808_v2 }
0x195e   : > { %v8811_v13 = vpop.xlane.xlu1 %8810 }
0x195f   : > { %v8819_v12 = vmul.f32 0.03125, %v8811_v13  ;;  %v8822_v22 = vadd.f32 1e-05, %v8818_v21 }
0x1961   : > { %v8823_v34 = vadd.f32 1e-05, %v8819_v12  ;;  %11109 = vrsqrt.f32 %v8822_v22 }
0x1963   : > { %11111 = vrsqrt.f32 %v8823_v34 }
0x1964   : > { %v8814_v63 = vpop.xlane.xlu0 %8813 }
0x1965   : > { %v8820_v44 = vmul.f32 0.03125, %v8814_v63 }
0x1966   : > { %v8817_v7 = vpop.xlane.xlu1 %8816 }
0x1967   : > { %v8824_v57 = vadd.f32 1e-05, %v8820_v44  ;;  %v8821_v60 = vmul.f32 0.03125, %v8817_v7 }
0x1969   : > { %11113 = vrsqrt.f32 %v8824_v57  ;;  %v8825_v25 = vadd.f32 1e-05, %v8821_v60 }
0x196a   : > { %v8870_v1 = vpop.permute.xlu1 %8869 }
0x196b   : > { %11115 = vrsqrt.f32 %v8825_v25  ;;  %v11110_v40 = vpop.eup %11109  ;;  %vm8876_vm4 = vcmp.eq.s32.totalorder %v8870_v1, 1 }
0x196c   : > { %v8830_v51 = vmul.f32 %v11110_v40, %v8798_v24  ;;  %v8873_v8 = vpop.permute.xlu0 %8872 }
0x196d   : > { %v11112_v15 = vpop.eup %11111  ;;  %vm8877_vm5 = vcmp.eq.s32.totalorder %v8873_v8, 1 }
0x196e   : > { %v8831_v17 = vmul.f32 %v11112_v15, %v8799_v11  ;;  %v8838_v32 = vmul.f32 %v8837_v41, %v8830_v51 }
0x1970   : > { %v8839_v33 = vmul.f32 %v8837_v41, %v8831_v17  ;;  %v8846_v49 = vadd.f32 %v8845_v4, %v8838_v32 }
0x1972   : > { %v8847_v54 = vadd.f32 %v8845_v4, %v8839_v33  ;;  %v8878_v46 = vsel %vm8874_vm2, 0.0, %v8846_v49 }
0x1973   : > { %v11114_v20 = vpop.eup %11113  ;;  %8882 = vst.msk [vmem:[%s660_s24] sm:$0xff] %vm958_vm0, %v8878_v46 }
0x1974   : > { %v8879_v26 = vsel %vm8875_vm3, 0.0, %v8847_v54  ;;  %v8832_v42 = vmul.f32 %v11114_v20, %v8800_v37 }
0x1975   : > { %v11116_v14 = vpop.eup %11115  ;;  %8883 = vst.msk [vmem:[%s660_s24 + $0x8] sm:$0xff] %vm958_vm0, %v8879_v26 }
0x1976   : > { %v8840_v43 = vmul.f32 %v8837_v41, %v8832_v42  ;;  %v8833_v45 = vmul.f32 %v11116_v14, %v8801_v28 }
0x1978   : > { %v8848_v38 = vadd.f32 %v8845_v4, %v8840_v43  ;;  %v8841_v58 = vmul.f32 %v8837_v41, %v8833_v45 }
0x197a   : > { %v8880_v55 = vsel %vm8876_vm4, 0.0, %v8848_v38  ;;  %v8849_v31 = vadd.f32 %v8845_v4, %v8841_v58 }
0x197b   : > { %8884 = vst.msk [vmem:[%s660_s24 + $0x10] sm:$0xff] %vm958_vm0, %v8880_v55 }
0x197c   : > { %v8881_v23 = vsel %vm8877_vm5, 0.0, %v8849_v31 }
0x197d   : > { %8885 = vst.msk [vmem:[%s660_s24 + $0x18] sm:$0xff] %vm958_vm0, %v8881_v23 }
0x197e   : > { %11338 = shalt.err (!%p11335_p0)
}
0x197f   : > { %s11339_s21 = scalar_lea.hbm %s15328_s15, 512  ;;  %s11343_s2 = scalar_lea.hbm %s15699_s0, 1024 }
0x1980   : > { %p11340_p2 = scmp.ne.s32.totalorder %s15328_s15, %s11339_s21  ;;  %p11344_p12 = scmp.lt.u32.totalorder %s15328_s15, %s15699_s0 }
0x1981   : > { %p11345_p7 = scmp.lt.u32.totalorder %s11343_s2, %s11339_s21  ;;  %p11347_p11 = scmp.lt.u32.totalorder %s11339_s21, %s15328_s15 }
0x1982   : > { %p11341_p3 = pnand %p11340_p2, %p15700_p13 }
0x1983   : > { %p11346_p8 = por %p11345_p7, %p11344_p12 }
0x1984   : > { %p11342_p4 = pneg %p11341_p3 }
0x1985   : > { %p11348_p1 = por %p11347_p11, %p11346_p8 }
0x1987   : > { %p11349_p6 = pnand %p11348_p1, %p11342_p4 }
0x1989   : > { %11352 = shalt.err (!%p11349_p6)
}
0x198a   : > { %s11422_s23 = smov 128   ;;  %s11423_s1 = smov 8  }
0x198b   : > { %10420 = dma.vmem_to_hbm [thread:$0]  (%p15700_p13), %s15322_s19, 512, %s15328_s15, %s15333_s28, %s11422_s23, %s11422_s23, %s11423_s1  }
0x198c PF: > { %s15701_s18 = sld [smem:[#allocation19_spill]]  ;;  %s15702_s27 = sld [smem:[#allocation16_spill]] }
0x198d   : > { %s15703_s25 = sld [smem:[#allocation23_spill]] }
0x1992   : > { %p10452_p9 = scmp.ge.s32.totalorder %s15701_s18, 2  ;;  %s8915_s26 = sand.u32 1, %s15702_s27  }
0x1993   : > { %p15704_p5 = scmp.ne.s32.totalorder %s15703_s25, 0  ;;  %s8916_s17 = scalar_lea.sflag [#allocation4], %s8915_s26 }
0x1995   : > { %p10439_p10 = pnand %p10452_p9, %p15704_p5 }
0x1997   : > { %11382 = dma.done.wait (!%p10439_p10), %s8916_s17, 512  }
0x1998   : > { %11384 = vsyncadd (!%p10439_p10), %s8916_s17, 4294966784  ;;  %s15705_s27 = sld [smem:[#allocation20_spill]]  ;;  %s15706_s24 = sld [smem:[#allocation17_spill]] }
0x1999   : > { %s15707_s25 = sld [smem:[#allocation18_spill]]  ;;  %s15708_s26 = sld [smem:[#allocation21_spill]] }
0x199e   : > { %p30_p0 = scmp.ge.s32.totalorder %s15705_s27, 4  }
0x19a0   :  { %32 = sbr.rel (!%p30_p0) target bundleno = 13 (0xd), region = 155 }
0x19a7   :  { %8921 = vsyncpa [#allocation3], 1 }
0x19a8   :  { %8923 = vsyncpa [#allocation3 + $0x1], 1 }
0x19a9   :  { %8924 = vsyncpa [#allocation6], 1 }
0x19aa   :  { %8925 = vsyncpa [#allocation9], 1 }
0x19ab   :  { %8926 = vsyncpa [#allocation4], 1 }
0x19ac   :  { %8928 = vsyncpa [#allocation4 + $0x1], 1 }

</bundles_post_ra>
